<compile_context>
chip_gen: v7x
topology: tpu7x:2x2x1
jax: 0.10.0
libtpu: 0.0.40
codegen_flags: <defaults>
</compile_context>

<pallas_src>
import functools

import jax
import jax.numpy as jnp
from jax.experimental import pallas as pl
from jax.experimental.pallas import tpu as pltpu


_LANES = 128
_SUBLANES = 8
_FAST_PATH_ELEMS = 1 << 15      # below this, pallas_call launch overhead dominates
_CHUNK_ROWS = 1024              # rows per inner compute chunk (bounded code size)


def _hw_config():
    """(max_block_rows, num_tensorcores) per TPU generation."""
    kind = ""
    try:
        kind = jax.devices()[0].device_kind.lower()
    except Exception:
        pass
    if "v7" in kind or "tpu7" in kind:
        # 2 TensorCores / chip, 32 MiB scoped-VMEM default.
        return 8192, 2
    if "v6" in kind:
        # single TensorCore, 32 MiB scoped-VMEM default.
        return 8192, 1
    # v5e / unknown: 16 MiB scoped default -> keep 2 inputs x 2 bufs ~= 8 MiB.
    return 4096, 1


# --------------------------------------------------------------------------
# Pallas kernel: masked sum of binary_cross_entropy_with_logits elements
# --------------------------------------------------------------------------
def _bce_sum_kernel(pred_ref, targ_ref, out_ref, *,
                    n_valid, block_rows, chunk_rows, lanes,
                    blocks_per_core, needs_mask):
    p = pl.program_id(0)     # TensorCore slice ("parallel")
    j = pl.program_id(1)     # reduction step within the slice ("arbitrary")

    # Resident (8,128) per-core accumulator lives in the output block.
    @pl.when(j == 0)
    def _():
        out_ref[...] = jnp.zeros_like(out_ref)

    blk = p * blocks_per_core + j            # global (nominal) row-block index
    full_rows = n_valid // lanes             # rows that are entirely valid
    tail = n_valid % lanes                   # valid lanes in row `full_rows`
    # first global block index that can contain any invalid element
    first_partial_blk = n_valid // (block_rows * lanes)

    def chunk_sum(r0, csize, masked):
        x = pred_ref[pl.ds(r0, csize), :].astype(jnp.float32)
        t = targ_ref[pl.ds(r0, csize), :].astype(jnp.float32)
        # Numerically stable BCE-with-logits (same formulation PyTorch uses):
        #   loss = max(x, 0) - x*t + log1p(exp(-|x|))
        loss = jnp.maximum(x, 0.0) - x * t + jnp.log1p(jnp.exp(-jnp.abs(x)))
        if masked:
            row = (blk * block_rows + r0
                   + jax.lax.broadcasted_iota(jnp.int32, loss.shape, 0))
            valid = row < full_rows
            if tail:
                col = jax.lax.broadcasted_iota(jnp.int32, loss.shape, 1)
                valid = jnp.logical_or(
                    valid, jnp.logical_and(row == full_rows, col < tail))
            # select (not multiply): garbage NaN/Inf from padded / ragged block
            # reads must not leak into the sum.
            loss = jnp.where(valid, loss, 0.0)
        # Same-lane / same-sublane VPU reduction into one vreg-shaped partial
        # (tile-aligned reshape -> no relayout, no XLU work).
        return loss.reshape(csize // _SUBLANES, _SUBLANES, lanes).sum(axis=0)

    n_full_chunks = block_rows // chunk_rows
    rem_rows = block_rows % chunk_rows       # multiple of 8 by construction

    def run_block(masked):
        if n_full_chunks:
            @pl.loop(0, n_full_chunks)
            def _(c):
                r0 = pl.multiple_of(c * chunk_rows, _SUBLANES)
                out_ref[...] += chunk_sum(r0, chunk_rows, masked)
        if rem_rows:
            out_ref[...] += chunk_sum(n_full_chunks * chunk_rows, rem_rows, masked)

    if needs_mask:
        # Steady-state blocks never pay the iota/compare/select mask work.
        @pl.when(blk < first_partial_blk)
        def _():
            run_block(False)

        @pl.when(blk >= first_partial_blk)
        def _():
            run_block(True)
    else:
        run_block(False)


def _bce_with_logits_mean(prediction, target):
    """Mean BCE-with-logits over all elements, via a Pallas streaming reduce."""
    assert prediction.shape == target.shape
    n_elem = int(prediction.size)

    # Tiny-input fast path: pallas_call launch + pipeline warmup dominates.
    if n_elem < _FAST_PATH_ELEMS:
        x = prediction.astype(jnp.float32).reshape(-1)
        t = target.astype(jnp.float32).reshape(-1)
        loss = jnp.maximum(x, 0.0) - x * t + jnp.log1p(jnp.exp(-jnp.abs(x)))
        return jnp.sum(loss) / jnp.float32(n_elem)

    max_block_rows, hw_cores = _hw_config()

    # Keep native dtypes in HBM (cast to f32 happens inside the kernel).
    pred_flat = prediction.reshape(-1)
    targ_flat = target.reshape(-1)

    # Pad the flat length to a multiple of 8*128 so the 2-D slab is (8k, 128)
    # and every in-kernel chunk reshape is tile-aligned; padded elements are
    # masked inside the kernel.
    # TODO(synk): this rare path pays one XLA pad copy per input.
    pad = (-n_elem) % (_SUBLANES * _LANES)
    if pad:
        pred_flat = jnp.pad(pred_flat, (0, pad))
        targ_flat = jnp.pad(targ_flat, (0, pad))
    rows = (n_elem + pad) // _LANES          # multiple of 8

    pred2d = pred_flat.reshape(rows, _LANES)
    targ2d = targ_flat.reshape(rows, _LANES)

    block_rows = min(max_block_rows, rows)   # multiple of 8
    chunk_rows = min(_CHUNK_ROWS, block_rows)
    num_row_blocks = pl.cdiv(rows, block_rows)

    # Two TensorCores only where it buys bandwidth (v7x); cdiv split so it
    # never silently collapses to one core on odd block counts.
    num_cores = hw_cores if num_row_blocks >= 2 else 1
    blocks_per_core = pl.cdiv(num_row_blocks, num_cores)

    covered = num_cores * blocks_per_core * block_rows * _LANES
    needs_mask = covered != n_elem

    kernel = functools.partial(
        _bce_sum_kernel,
        n_valid=n_elem,
        block_rows=block_rows,
        chunk_rows=chunk_rows,
        lanes=_LANES,
        blocks_per_core=blocks_per_core,
        needs_mask=needs_mask,
    )

    last_blk = num_row_blocks - 1

    def in_map(p, j, bpc=blocks_per_core, last=last_blk):
        # Clamp so overflow steps from the cdiv core split never issue an
        # out-of-range block DMA; their contribution is zeroed in-kernel by
        # the nominal-index mask (needs_mask is True whenever they exist).
        return (jnp.minimum(p * bpc + j, last), 0)

    partials = pl.pallas_call(
        kernel,
        out_shape=jax.ShapeDtypeStruct((num_cores * _SUBLANES, _LANES), jnp.float32),
        grid_spec=pltpu.PrefetchScalarGridSpec(
            num_scalar_prefetch=0,
            grid=(num_cores, blocks_per_core),
            in_specs=[
                pl.BlockSpec((block_rows, _LANES), in_map),
                pl.BlockSpec((block_rows, _LANES), in_map),
            ],
            out_specs=pl.BlockSpec((_SUBLANES, _LANES), lambda p, j: (p, 0)),
        ),
        compiler_params=pltpu.CompilerParams(
            dimension_semantics=("parallel", "arbitrary"),
        ),
    )(pred2d, targ2d)

    return jnp.sum(partials) / jnp.float32(n_elem)


# --------------------------------------------------------------------------
# Module wrapper (mirrors BCELossWithQuant.forward)
# --------------------------------------------------------------------------
class BCELossWithQuant:
    def __init__(self, codebook_weight=1.0, nceloss_weight=0.1,
                 mskloss_weight=0.1, wrsloss_weight=0.1):
        self.codebook_weight = codebook_weight
        self.nceloss_weight = nceloss_weight
        self.mskloss_weight = mskloss_weight
        self.wrsloss_weight = wrsloss_weight

    def __call__(self, qloss, target, prediction, split,
                 nceloss=None, mskloss=None, wrsloss=None, isValid=False):
        bce_loss = _bce_with_logits_mean(prediction, target)
        loss = bce_loss + self.codebook_weight * qloss
        if not isValid:   # static Python flag, plain truthiness (review nit)
            loss = loss + (self.nceloss_weight * nceloss
                           + self.mskloss_weight * mskloss
                           + self.wrsloss_weight * wrsloss)
        log = {
            "{}/total_loss".format(split): jnp.mean(jax.lax.stop_gradient(loss)),
            "{}/rec_loss".format(split): jnp.mean(jax.lax.stop_gradient(bce_loss)),
            "{}/bce_loss".format(split): jnp.mean(jax.lax.stop_gradient(bce_loss)),
            "{}/quant_loss".format(split): jnp.mean(jax.lax.stop_gradient(qloss)),
        }
        return loss, log


# --------------------------------------------------------------------------
# Reference (pure JAX) for sanity checks
# --------------------------------------------------------------------------
def _ref_bce_with_logits_mean(prediction, target):
    x = prediction.astype(jnp.float32)
    t = target.astype(jnp.float32)
    loss = jnp.maximum(x, 0.0) - x * t + jnp.log1p(jnp.exp(-jnp.abs(x)))
    return jnp.mean(loss)


if __name__ == "__main__":
    key = jax.random.PRNGKey(0)
    k1, k2, k3, k4, k5, k6 = jax.random.split(key, 6)

    # ---- small module-shaped demo (NCHW, matches PyTorch conv convention) ----
    B, C, H, W = 2, 4, 16, 16
    prediction = jax.random.normal(k1, (B, C, H, W), dtype=jnp.float32)
    target = (jax.random.uniform(k2, (B, C, H, W)) > 0.5).astype(jnp.float32)

    qloss = jnp.abs(jax.random.normal(k3, (), dtype=jnp.float32))
    nceloss = jnp.abs(jax.random.normal(k4, (), dtype=jnp.float32))
    mskloss = jnp.abs(jax.random.normal(k5, (), dtype=jnp.float32))
    wrsloss = jnp.abs(jax.random.normal(k6, (), dtype=jnp.float32))

    loss_mod = BCELossWithQuant()
    loss, log = loss_mod(qloss, target, prediction, split="train",
                         nceloss=nceloss, mskloss=mskloss, wrsloss=wrsloss,
                         isValid=False)
    loss = jax.block_until_ready(loss)
    log = jax.tree_util.tree_map(jax.block_until_ready, log)

    ref_bce = _ref_bce_with_logits_mean(prediction, target)
    ref_loss = (ref_bce + 1.0 * qloss
                + 0.1 * nceloss + 0.1 * mskloss + 0.1 * wrsloss)
    assert jnp.allclose(loss, ref_loss, rtol=1e-5, atol=1e-5), (loss, ref_loss)
    assert jnp.allclose(log["train/bce_loss"], ref_bce, rtol=1e-5, atol=1e-5)

    # ---- Pallas path: aligned, multi-block f32 (exercises grid accumulation) ----
    pred_a = jax.random.normal(k1, (8, 8, 256, 256), dtype=jnp.float32)
    targ_a = (jax.random.uniform(k2, (8, 8, 256, 256)) > 0.5).astype(jnp.float32)
    got_a = jax.block_until_ready(_bce_with_logits_mean(pred_a, targ_a))
    ref_a = _ref_bce_with_logits_mean(pred_a, targ_a)
    assert jnp.allclose(got_a, ref_a, rtol=1e-4, atol=1e-5), (got_a, ref_a)

    # ---- Pallas path: ragged bf16 with a lane tail (pad + masked block) ----
    pred_b = jax.random.normal(k3, (5, 7, 31, 37), dtype=jnp.bfloat16)
    targ_b = (jax.random.uniform(k4, (5, 7, 31, 37)) > 0.5).astype(jnp.bfloat16)
    got_b = jax.block_until_ready(_bce_with_logits_mean(pred_b, targ_b))
    ref_b = _ref_bce_with_logits_mean(pred_b, targ_b)
    assert jnp.allclose(got_b, ref_b, rtol=1e-3, atol=1e-4), (got_b, ref_b)

    print("KERNEL_OK")
</pallas_src>

<mosaic_0001>
module attributes {stable_mosaic.version = 11 : i64} {
  func.func @_bce_sum_kernel(%arg0: i32, %arg1: i32, %arg2: memref<4096x128xf32, #tpu.memory_space<vmem>>, %arg3: memref<4096x128xf32, #tpu.memory_space<vmem>>, %arg4: memref<8x128xf32, #tpu.memory_space<vmem>>) attributes {dimension_semantics = [#tpu.dimension_semantics<parallel>, #tpu.dimension_semantics<arbitrary>], iteration_bounds = array<i64: 1, 8>, scalar_prefetch = 0 : i64, scratch_operands = 0 : i64, tpu.core_type = #tpu.core_type<tc>, window_params = [{transform_indices = @transform_0, window_bounds = array<i64: 4096, 128>}, {transform_indices = @transform_1, window_bounds = array<i64: 4096, 128>}, {transform_indices = @transform_2, window_bounds = array<i64: 8, 128>}]} {
    %c0_i32 = arith.constant 0 : i32
    %0 = arith.cmpi eq, %arg1, %c0_i32 : i32
    %1 = arith.extui %0 : i1 to i32
    %c0_i32_0 = arith.constant 0 : i32
    %2 = arith.cmpi ne, %1, %c0_i32_0 : i32
    scf.if %2 {
      %cst = arith.constant 0.000000e+00 : f32
      %4 = vector.broadcast %cst : f32 to vector<8x128xf32>
      %c0 = arith.constant 0 : index
      %c0_3 = arith.constant 0 : index
      %5 = vector.load %arg4[%c0, %c0_3] : memref<8x128xf32, #tpu.memory_space<vmem>>, vector<8x128xf32>
      tpu.vector_store %arg4[%c0, %c0_3], %4 {strides = array<i32>} : memref<8x128xf32, #tpu.memory_space<vmem>>, vector<8x128xf32>,
    } else {
    }
    %c0_i32_1 = arith.constant 0 : i32
    %c4_i32 = arith.constant 4 : i32
    %3 = arith.addi %c0_i32_1, %c4_i32 : i32
    %c1_i32 = arith.constant 1 : i32
    scf.for %arg5 = %c0_i32_1 to %3 step %c1_i32  : i32 {
      %c1_i32_3 = arith.constant 1 : i32
      %4 = arith.muli %arg5, %c1_i32_3 : i32
      %c0_i32_4 = arith.constant 0 : i32
      %5 = arith.addi %c0_i32_4, %4 : i32
      %c1024_i32 = arith.constant 1024 : i32
      %6 = arith.muli %5, %c1024_i32 : i32
      %7 = tpu.assume_multiple %6, 8 : i32
      %c0 = arith.constant 0 : index
      %c0_5 = arith.constant 0 : index
      %8 = vector.load %arg4[%c0, %c0_5] : memref<8x128xf32, #tpu.memory_space<vmem>>, vector<8x128xf32>
      %9 = arith.index_cast %7 : i32 to index
      %c0_6 = arith.constant 0 : index
      %10 = vector.load %arg2[%9, %c0_6] : memref<4096x128xf32, #tpu.memory_space<vmem>>, vector<1024x128xf32>
      %11 = arith.index_cast %7 : i32 to index
      %c0_7 = arith.constant 0 : index
      %12 = vector.load %arg3[%11, %c0_7] : memref<4096x128xf32, #tpu.memory_space<vmem>>, vector<1024x128xf32>
      %cst = arith.constant 0.000000e+00 : f32
      %13 = vector.broadcast %cst : f32 to vector<1024x128xf32>
      %14 = arith.maximumf %10, %13 : vector<1024x128xf32>
      %15 = arith.mulf %10, %12 : vector<1024x128xf32>
      %16 = arith.subf %14, %15 : vector<1024x128xf32>
      %17 = math.absf %10 : vector<1024x128xf32>
      %cst_8 = arith.constant 0.000000e+00 : f32
      %18 = vector.broadcast %cst_8 : f32 to vector<1024x128xf32>
      %19 = arith.subf %18, %17 : vector<1024x128xf32>
      %20 = math.exp %19 : vector<1024x128xf32>
      %21 = math.log1p %20 : vector<1024x128xf32>
      %22 = arith.addf %16, %21 : vector<1024x128xf32>
      %23 = vector.shape_cast %22 : vector<1024x128xf32> to vector<128x8x128xf32>
      %cst_9 = arith.constant dense<0.000000e+00> : vector<8x128xf32>
      %24 = vector.multi_reduction <add>, %23, %cst_9 [0] : vector<128x8x128xf32> to vector<8x128xf32>
      %25 = arith.addf %8, %24 : vector<8x128xf32>
      %c0_10 = arith.constant 0 : index
      %c0_11 = arith.constant 0 : index
      %26 = vector.load %arg4[%c0_10, %c0_11] : memref<8x128xf32, #tpu.memory_space<vmem>>, vector<8x128xf32>
      tpu.vector_store %arg4[%c0_10, %c0_11], %25 {strides = array<i32>} : memref<8x128xf32, #tpu.memory_space<vmem>>, vector<8x128xf32>,
    }
    %c4_i32_2 = arith.constant 4 : i32
    return
  }
  func.func @transform_0(%arg0: i32, %arg1: i32) -> (i32, i32) {
    %c8_i32 = arith.constant 8 : i32
    %0 = arith.muli %arg0, %c8_i32 : i32
    %1 = arith.addi %0, %arg1 : i32
    %c7_i32 = arith.constant 7 : i32
    %2 = arith.minsi %1, %c7_i32 : i32
    %c0_i32 = arith.constant 0 : i32
    %c0_i32_0 = arith.constant 0 : i32
    return %2, %c0_i32 : i32, i32
  }
  func.func @transform_1(%arg0: i32, %arg1: i32) -> (i32, i32) {
    %c8_i32 = arith.constant 8 : i32
    %0 = arith.muli %arg0, %c8_i32 : i32
    %1 = arith.addi %0, %arg1 : i32
    %c7_i32 = arith.constant 7 : i32
    %2 = arith.minsi %1, %c7_i32 : i32
    %c0_i32 = arith.constant 0 : i32
    %c0_i32_0 = arith.constant 0 : i32
    return %2, %c0_i32 : i32, i32
  }
  func.func @transform_2(%arg0: i32, %arg1: i32) -> (i32, i32) {
    %c0_i32 = arith.constant 0 : i32
    %c0_i32_0 = arith.constant 0 : i32
    return %arg0, %c0_i32 : i32, i32
  }
}

</mosaic_0001>

<bundles_post_ra>
// kernel: tpu_custom_call.1
= control target key start
LH: loop header
LB: loop body
LE: loop exit
PB: predicated region body
PF: predicated region fallthrough
CT: control target
= control target key end

     0   :  { %7 = vsyncpa [#allocation3], 0  ;;  %s10027_s0 = inlined_call_operand.hbm [shape: f32[32768,128], index: 0, kind: input, shape index: {}]   ;;  %s10028_s1 = inlined_call_operand.hbm [shape: f32[32768,128], index: 1, kind: input, shape index: {}]   ;;  %s10029_s2 = inlined_call_operand.hbm [shape: f32[8,128], index: 2, kind: output, shape index: {}]  }
   0x1   :  { %9 = vsyncpa [#allocation3 + $0x1], 0 }
   0x2   :  { %10 = vsyncpa [#allocation6], 0 }
   0x3   :  { %12 = vsyncpa [#allocation6 + $0x1], 0 }
   0x4   :  { %13 = vsyncpa [#allocation4], 0  ;;  %s3800_s9 = smov 0   ;;  %s3802_s10 = smov 0  }
   0x5   :  { %s3804_s11 = smov 0   ;;  %s3806_s12 = smov 0  }
   0x6   :  { %s3808_s13 = smov 0   ;;  %s3810_s14 = smov 0  }
   0x7 LB: > { %s2919_s15 = sadd.s32 4294967295, %s3773_s14   ;;  %s28_s16 = sadd.s32 1, %s3769_s13  ;;  %s3773_s14 = sphi %s3810_s14, %s19_s14   ;;  %s3769_s13 = sphi %s3808_s13, %s13120_s13   ;;  %s3765_s12 = sphi %s3806_s12, %s13119_s12   ;;  %s3761_s11 = sphi %s3804_s11, %s13118_s11   ;;  %s3757_s10 = sphi %s3802_s10, %s13117_s10   ;;  %s3753_s9 = sphi %s3800_s9, %s13116_s9  }
   0x8   : > { %p29_p0 = scmp.ge.s32.totalorder %s28_s16, 8  ;;  %p37_p1 = scmp.lt.s32.totalorder %s3769_s13, 7 }
   0x9   : > { %s46_s17 = sadd.s32 1, %s3761_s11  ;;  %p53_p2 = scmp.ne.s32.totalorder %s3761_s11, %s3757_s10 }
   0xa   : > { %s13122_s16 = smov (%p29_p0, %s28_s16), 0  ;;  %p54_p4 = scmp.eq.s32.totalorder %s3773_s14, 0 }
   0xb   : > { %s3837_s18 = scalar_select %p37_p1, %s3769_s13, 7 }
   0xc   : > { %p41_p3 = scmp.lt.s32.totalorder %s13122_s16, 7  ;;  %p59_p5 = scmp.ne.s32.totalorder %s3757_s10, %s3753_s9 }
   0xd   : > { %p60_p6 = scmp.eq.s32.totalorder %s2919_s15, 0  ;;  %p55_p7 = por %p54_p4, %p53_p2 }
   0xe   : > { %s42_s19 = scalar_select %p41_p3, %s13122_s16, 7 }
   0xf   : > { %p3845_p8 = por %p60_p6, %p59_p5  ;;  %p2954_p10 = scmp.lt.s32.totalorder %s3773_s14, 8 }
  0x10   : > { %s43_s21 = ssub.s32 %s3837_s18, %s42_s19  ;;  %s3852_s22 = sand.u32 1, %s3761_s11  }
  0x11   : > { %s10679_s20 = scalar_select %p3845_p8, 1, 0 }
  0x12   : > { %p44_p9 = scmp.eq.s32.totalorder %s43_s21, 0  ;;  %s2937_s23 = sshll.u32 %s3837_s18, 16 }
  0x13   : > { %s2922_s25 = sshll.u32 %s3852_s22, 12  ;;  %s3864_s28 = scalar_lea.hbm %s10027_s0, %s2937_s23 }
  0x14   : > { %s3856_s24 = scalar_select %p44_p9, %s3761_s11, %s46_s17  }
  0x15   : > { %s147_s29 = scalar_lea.vmem [#allocation2], %s2922_s25  ;;  %p3868_p11 = pnand %p2954_p10, %p55_p7 }
  0x16   : > { %s158_s30 = sshll.u32 %s147_s29, 4  ;;  %s144_s4 = scalar_lea.sflag [#allocation3], %s3852_s22  ;;  %s3872_s30 = int_to_ptr.vmem [resolvable:$true] %s158_s30 }
  0x17   : > { %s3625_s5 = scalar_lea.hbm %s3864_s28, 65536  ;;  %p3627_p13 = pneg %p3868_p11 }
  0x18   : > { %p3626_p12 = scmp.ne.s32.totalorder %s3864_s28, %s3625_s5  ;;  %s3630_s8 = scalar_lea.hbm %s10027_s0, 524288 }
  0x19   : > { %p3631_p2 = scmp.lt.u32.totalorder %s3864_s28, %s10027_s0  ;;  %p3632_p3 = scmp.lt.u32.totalorder %s3630_s8, %s3625_s5 }
  0x1a   : > { %p3628_p0 = pnand %p3627_p13, %p3626_p12  ;;  %p3634_p5 = scmp.lt.u32.totalorder %s3625_s5, %s3864_s28 }
  0x1b   : > { %p3633_p4 = por %p3632_p3, %p3631_p2 }
  0x1c   : > { %p3629_p1 = pneg %p3628_p0 }
  0x1d   : > { %p3635_p6 = por %p3634_p5, %p3633_p4 }
  0x1f   : > { %p3636_p7 = pnand %p3635_p6, %p3629_p1 }
  0x21   : > { %3639 = shalt.err (!%p3636_p7)
}
  0x22   : > { %s3640_s19 = scalar_lea.vmem %s3872_s30, 65536  ;;  %s3779_s21 = smov [#allocation2]  }
  0x23   : > { %p3641_p9 = scmp.ne.s32.totalorder %s3872_s30, %s3640_s19  ;;  %s3645_s26 = sshll.u32 %s3779_s21, 4  ;;  %s3646_s26 = int_to_ptr.vmem [resolvable:$false] %s3645_s26 }
  0x24   : > { %s3647_s27 = scalar_lea.vmem %s3646_s26, 131072  ;;  %p3648_p0 = scmp.lt.s32.totalorder %s3872_s30, %s3646_s26 }
  0x25   : > { %p3643_p10 = pnand %p3641_p9, %p3627_p13  ;;  %p3649_p2 = scmp.lt.s32.totalorder %s3647_s27, %s3640_s19 }
  0x27   : > { %p3644_p12 = pneg %p3643_p10  ;;  %p3650_p3 = por %p3649_p2, %p3648_p0 }
  0x29   : > { %p3651_p4 = pnand %p3650_p3, %p3644_p12 }
  0x2b   : > { %3654 = shalt.err (!%p3651_p4)
}
  0x2c   : > { %s3780_s29 = smov 128   ;;  %s3781_s5 = smov 8  }
  0x2d   : > { %2950 = dma.hbm_to_vmem [thread:$0]  (!%p3868_p11), %s3864_s28, 65536, %s3872_s30, %s144_s4, %s3780_s29, %s3780_s29, %s3781_s5  }
  0x2e   : > { %p2928_p1 = scmp.ge.s32.totalorder %s3773_s14, 1  ;;  %p191_p5 = scmp.lt.s32.totalorder %s3773_s14, 9 }
  0x2f   : > { %s3916_s9 = scalar_lea.hbm %s10028_s1, %s2937_s23  ;;  %s172_s17 = scalar_lea.vmem [#allocation5], %s2922_s25 }
  0x30   : > { %p3907_p6 = pnand %p2928_p1, %p191_p5  ;;  %s183_s19 = sshll.u32 %s172_s17, 4  ;;  %s3920_s19 = int_to_ptr.vmem [resolvable:$true] %s183_s19 }
  0x31   : > { %s169_s28 = scalar_lea.sflag [#allocation6], %s3852_s22  ;;  %s3655_s30 = scalar_lea.hbm %s3916_s9, 65536 }
  0x32   : > { %p3656_p7 = scmp.ne.s32.totalorder %s3916_s9, %s3655_s30  ;;  %s3660_s23 = scalar_lea.hbm %s10028_s1, 524288 }
  0x33   : > { %p3661_p12 = scmp.lt.u32.totalorder %s3916_s9, %s10028_s1  ;;  %p3662_p0 = scmp.lt.u32.totalorder %s3660_s23, %s3655_s30 }
  0x34   : > { %p3658_p9 = pnand %p3656_p7, %p3627_p13  ;;  %p3664_p3 = scmp.lt.u32.totalorder %s3655_s30, %s3916_s9 }
  0x35   : > { %p3663_p2 = por %p3662_p0, %p3661_p12 }
  0x36   : > { %p3659_p10 = pneg %p3658_p9 }
  0x37   : > { %p3665_p4 = por %p3664_p3, %p3663_p2 }
  0x39   : > { %p3666_p1 = pnand %p3665_p4, %p3659_p10 }
  0x3b   : > { %3669 = shalt.err (!%p3666_p1)
}
  0x3c   : > { %s3670_s25 = scalar_lea.vmem %s3920_s19, 65536  ;;  %s3782_s27 = smov [#allocation5]  }
  0x3d   : > { %p3671_p5 = scmp.ne.s32.totalorder %s3920_s19, %s3670_s25  ;;  %s3675_s7 = sshll.u32 %s3782_s27, 4  ;;  %s3676_s7 = int_to_ptr.vmem [resolvable:$false] %s3675_s7 }
  0x3e   : > { %s3677_s8 = scalar_lea.vmem %s3676_s7, 131072  ;;  %p3678_p8 = scmp.lt.s32.totalorder %s3920_s19, %s3676_s7 }
  0x3f   : > { %p3673_p7 = pnand %p3671_p5, %p3627_p13  ;;  %p3679_p12 = scmp.lt.s32.totalorder %s3677_s8, %s3670_s25 }
  0x41   : > { %p3674_p9 = pneg %p3673_p7  ;;  %p3680_p0 = por %p3679_p12, %p3678_p8 }
  0x43   : > { %p3681_p2 = pnand %p3680_p0, %p3674_p9 }
  0x45   : > { %3684 = shalt.err (!%p3681_p2)
}
  0x46   : > { %2953 = dma.hbm_to_vmem [thread:$0]  (!%p3868_p11), %s3916_s9, 65536, %s3920_s19, %s169_s28, %s3780_s29, %s3780_s29, %s3781_s5  }
  0x47   : > { %195 = sbr.rel (%p3907_p6) target bundleno = 1134 (0x46e), region = 28  ;;  %s197_s17 = sand.u32 (!%p3907_p6), 1, %s3757_s10  }
  0x48   : > { %s2929_s30 = sshll.u32 (!%p3907_p6), %s197_s17, 12  ;;  %s198_s18 = scalar_lea.sflag (!%p3907_p6), [#allocation3], %s197_s17 }
  0x49   : > { %s3954_s4 = scalar_lea.vmem (!%p3907_p6), [#allocation2], %s2929_s30  ;;  %p10682_p8 = scmp.ne.s32.totalorder (!%p3907_p6), %s10679_s20, 0 }
  0x4e   : > { %3740 = dma.done.wait (%p10682_p8), %s198_s18, 65536  }
  0x4f   : > { %3742 = vsyncadd (%p10682_p8), %s198_s18, 4294901760  ;;  %s207_s22 = scalar_lea.sflag [#allocation6], %s197_s17  ;;  %s3960_s3 = scalar_lea.vmem [#allocation5], %s2929_s30 }
  0x50   : > { %3744 = dma.done.wait (%p10682_p8), %s207_s22, 65536  }
  0x51   : > { %3746 = vsyncadd (%p10682_p8), %s207_s22, 4294901760  ;;  %p2931_p11 = scmp.ne.s32.totalorder %s3765_s12, 0 }
  0x52   : > { %v3783_v0 = vmov (!%p2931_p11), 0.0  }
  0x53   : > { %244 = sbr.rel (%p2931_p11) target bundleno = 90 (0x5a), region = 40  ;;  %245 = vst [vmem:[#allocation7] sm:$0xff] (!%p2931_p11), %v3783_v0 }
  0x5a PF: > { %s3967_s29 = smov 0  }
  0x5b LB: >> { %s2932_s5 = sshll.u32 %s3777_s29, 10  ;;  %s251_s29 = sadd.s32 1, %s3777_s29   ;;  %s3777_s29 = sphi %s3967_s29, %s251_s29  }
  0x5c   : >> { %s3976_s20 = scalar_lea.vmem %s3954_s4, %s2932_s5 [#allocation2]  ;;  %s4260_s12 = scalar_lea.vmem %s3960_s3, %s2932_s5 [#allocation5] }
  0x5d   : >> { %v3979_v1 = vld [vmem:[%s3976_s20 + $0x108] sm:$0xff]  ;;  %v3982_v2 = vld [vmem:[%s3976_s20 + $0x110] sm:$0xff]  ;;  %v3985_v3 = vld [vmem:[%s3976_s20 + $0x118] sm:$0xff]  ;;  %p248_p13 = scmp.ge.s32.totalorder %s251_s29, 4  }
  0x5e   : >> { %10683 = vst [vmem:[#allocation11_spill] sm:$0xff] %v3979_v1  ;;  %10684 = vst [vmem:[#allocation12_spill] sm:$0xff] %v3985_v3  ;;  %v3988_v4 = vld [vmem:[%s3976_s20 + $0x120] sm:$0xff]  ;;  %v3991_v5 = vld [vmem:[%s3976_s20 + $0x128] sm:$0xff]  ;;  %p9983_p6 = scmp.eq.s32.totalorder (%p248_p13), %s2919_s15, 7  ;;  %s3784_s9 = smov (%p248_p13), [#allocation7]  }
  0x5f   : >> { %10685 = vst [vmem:[#allocation13_spill] sm:$0xff] %v3988_v4  ;;  %v3994_v6 = vld [vmem:[%s3976_s20 + $0x130] sm:$0xff]  ;;  %v3997_v7 = vld [vmem:[%s3976_s20 + $0x138] sm:$0xff]  ;;  %v4000_v8 = vld [vmem:[%s3976_s20 + $0x140] sm:$0xff]  ;;  %s2826_s19 = sshll.u32 (%p248_p13), %s3784_s9, 4  ;;  %s2827_s19 = int_to_ptr.vmem [resolvable:$true] %s2826_s19 }
  0x60   : >> { %10686 = vst [vmem:[#allocation14_spill] sm:$0xff] %v3994_v6  ;;  %10687 = vst [vmem:[#allocation15_spill] sm:$0xff] %v3997_v7  ;;  %v4003_v9 = vld [vmem:[%s3976_s20 + $0x148] sm:$0xff]  ;;  %v4009_v13 = vld [vmem:[%s3976_s20 + $0x150] sm:$0xff]  ;;  %s3685_s28 = scalar_lea.vmem (%p248_p13), %s2827_s19, 128  ;;  %p3692_p1 = scmp.lt.s32.totalorder (%p248_p13), %s2827_s19, %s2827_s19 }
  0x61   : >> { %10688 = vst [vmem:[#allocation16_spill] sm:$0xff] %v4003_v9  ;;  %10689 = vst [vmem:[#allocation17_spill] sm:$0xff] %v4009_v13  ;;  %v4012_v14 = vld [vmem:[%s3976_s20 + $0x158] sm:$0xff]  ;;  %v4015_v15 = vld [vmem:[%s3976_s20 + $0x160] sm:$0xff]  ;;  %p3686_p10 = scmp.ne.s32.totalorder (%p248_p13), %s2827_s19, %s3685_s28  ;;  %p3693_p5 = scmp.lt.s32.totalorder (%p248_p13), %s3685_s28, %s3685_s28 }
  0x62   : >> { %10690 = vst [vmem:[#allocation18_spill] sm:$0xff] %v4015_v15  ;;  %v4021_v19 = vld [vmem:[%s3976_s20 + $0x168] sm:$0xff]  ;;  %v4024_v20 = vld [vmem:[%s3976_s20 + $0x170] sm:$0xff]  ;;  %v4027_v21 = vld [vmem:[%s3976_s20 + $0x178] sm:$0xff] }
  0x63   : >> { %10691 = vst [vmem:[#allocation19_spill] sm:$0xff] %v4021_v19  ;;  %10692 = vst [vmem:[#allocation20_spill] sm:$0xff] %v4027_v21  ;;  %v4033_v25 = vld [vmem:[%s3976_s20 + $0x180] sm:$0xff]  ;;  %v4036_v26 = vld [vmem:[%s3976_s20 + $0x188] sm:$0xff]  ;;  %p3687_p3 = pnand (%p248_p13), %p3686_p10, %p9983_p6  ;;  %p3694_p7 = por (%p248_p13), %p3693_p5, %p3692_p1 }
  0x64   : >> { %10693 = vst [vmem:[#allocation21_spill] sm:$0xff] %v4033_v25  ;;  %v4039_v27 = vld [vmem:[%s3976_s20 + $0x190] sm:$0xff]  ;;  %v4045_v31 = vld [vmem:[%s3976_s20 + $0x198] sm:$0xff]  ;;  %v4048_v32 = vld [vmem:[%s3976_s20 + $0x1a0] sm:$0xff] }
  0x65   : >> { %10694 = vst [vmem:[#allocation22_spill] sm:$0xff] %v4039_v27  ;;  %10695 = vst [vmem:[#allocation23_spill] sm:$0xff] %v4045_v31  ;;  %v4051_v33 = vld [vmem:[%s3976_s20 + $0x1a8] sm:$0xff]  ;;  %v4057_v37 = vld [vmem:[%s3976_s20 + $0x1b0] sm:$0xff]  ;;  %p3688_p4 = pneg (%p248_p13), %p3687_p3 }
  0x66   : >> { %10696 = vst [vmem:[#allocation24_spill] sm:$0xff] %v4051_v33  ;;  %10697 = vst [vmem:[#allocation25_spill] sm:$0xff] %v4057_v37  ;;  %v4060_v38 = vld [vmem:[%s3976_s20 + $0x1b8] sm:$0xff]  ;;  %v4063_v39 = vld [vmem:[%s3976_s20 + $0x1c0] sm:$0xff] }
  0x67   : >> { %10698 = vst [vmem:[#allocation26_spill] sm:$0xff] %v4063_v39  ;;  %v4069_v43 = vld [vmem:[%s3976_s20 + $0x1c8] sm:$0xff]  ;;  %v4072_v44 = vld [vmem:[%s3976_s20 + $0x1d0] sm:$0xff]  ;;  %v4075_v45 = vld [vmem:[%s3976_s20 + $0x1d8] sm:$0xff]  ;;  %p3695_p9 = pnand (%p248_p13), %p3694_p7, %p3688_p4 }
  0x68   : >> { %10699 = vst [vmem:[#allocation27_spill] sm:$0xff] %v4069_v43  ;;  %10700 = vst [vmem:[#allocation28_spill] sm:$0xff] %v4075_v45  ;;  %v4081_v49 = vld [vmem:[%s3976_s20 + $0x1e0] sm:$0xff]  ;;  %v4084_v50 = vld [vmem:[%s3976_s20 + $0x1e8] sm:$0xff] }
  0x69   : >> { %10701 = vst [vmem:[#allocation29_spill] sm:$0xff] %v4081_v49  ;;  %v4087_v51 = vld [vmem:[%s3976_s20 + $0x1f0] sm:$0xff]  ;;  %v4093_v55 = vld [vmem:[%s3976_s20 + $0x1f8] sm:$0xff]  ;;  %v4096_v56 = vld [vmem:[%s3976_s20 + $0x200] sm:$0xff] }
  0x6a   : >> { %10702 = vst [vmem:[#allocation30_spill] sm:$0xff] %v4087_v51  ;;  %10703 = vst [vmem:[#allocation31_spill] sm:$0xff] %v4093_v55  ;;  %v4099_v57 = vld [vmem:[%s3976_s20 + $0x208] sm:$0xff]  ;;  %v4105_v61 = vld [vmem:[%s3976_s20 + $0x210] sm:$0xff] }
  0x6b   : >> { %10704 = vst [vmem:[#allocation32_spill] sm:$0xff] %v4096_v56  ;;  %10705 = vst [vmem:[#allocation33_spill] sm:$0xff] %v4099_v57  ;;  %v4108_v62 = vld [vmem:[%s3976_s20 + $0x218] sm:$0xff]  ;;  %v4111_v63 = vld [vmem:[%s3976_s20 + $0x220] sm:$0xff] }
  0x6c   : >> { %10706 = vst [vmem:[#allocation34_spill] sm:$0xff] %v4105_v61  ;;  %10707 = vst [vmem:[#allocation35_spill] sm:$0xff] %v4108_v62  ;;  %v4117_v53 = vld [vmem:[%s3976_s20 + $0x228] sm:$0xff]  ;;  %v4120_v59 = vld [vmem:[%s3976_s20 + $0x230] sm:$0xff] }
  0x6d   : >> { %10708 = vst [vmem:[#allocation36_spill] sm:$0xff] %v4111_v63  ;;  %10709 = vst [vmem:[#allocation37_spill] sm:$0xff] %v4117_v53  ;;  %v4123_v60 = vld [vmem:[%s3976_s20 + $0x238] sm:$0xff]  ;;  %v4129_v47 = vld [vmem:[%s3976_s20 + $0x240] sm:$0xff] }
  0x6e   : >> { %10710 = vst [vmem:[#allocation38_spill] sm:$0xff] %v4120_v59  ;;  %10711 = vst [vmem:[#allocation39_spill] sm:$0xff] %v4123_v60  ;;  %v4132_v54 = vld [vmem:[%s3976_s20 + $0x248] sm:$0xff]  ;;  %v4135_v58 = vld [vmem:[%s3976_s20 + $0x250] sm:$0xff] }
  0x6f   : >> { %10712 = vst [vmem:[#allocation40_spill] sm:$0xff] %v4129_v47  ;;  %10713 = vst [vmem:[#allocation41_spill] sm:$0xff] %v4132_v54  ;;  %v4141_v41 = vld [vmem:[%s3976_s20 + $0x258] sm:$0xff]  ;;  %v4144_v48 = vld [vmem:[%s3976_s20 + $0x260] sm:$0xff] }
  0x70   : >> { %10714 = vst [vmem:[#allocation42_spill] sm:$0xff] %v4135_v58  ;;  %10715 = vst [vmem:[#allocation43_spill] sm:$0xff] %v4141_v41  ;;  %v4147_v0 = vld [vmem:[%s3976_s20 + $0x268] sm:$0xff]  ;;  %v4153_v35 = vld [vmem:[%s3976_s20 + $0x270] sm:$0xff] }
  0x71   : >> { %10716 = vst [vmem:[#allocation44_spill] sm:$0xff] %v4144_v48  ;;  %10717 = vst [vmem:[#allocation45_spill] sm:$0xff] %v4147_v0  ;;  %v4156_v42 = vld [vmem:[%s3976_s20 + $0x278] sm:$0xff]  ;;  %v4159_v52 = vld [vmem:[%s3976_s20 + $0x280] sm:$0xff] }
  0x72   : >> { %10718 = vst [vmem:[#allocation46_spill] sm:$0xff] %v4153_v35  ;;  %10719 = vst [vmem:[#allocation47_spill] sm:$0xff] %v4156_v42  ;;  %v4165_v29 = vld [vmem:[%s3976_s20 + $0x288] sm:$0xff]  ;;  %v4168_v36 = vld [vmem:[%s3976_s20 + $0x290] sm:$0xff] }
  0x73   : >> { %10720 = vst [vmem:[#allocation48_spill] sm:$0xff] %v4159_v52  ;;  %10721 = vst [vmem:[#allocation49_spill] sm:$0xff] %v4165_v29  ;;  %v4171_v46 = vld [vmem:[%s3976_s20 + $0x298] sm:$0xff]  ;;  %v4177_v23 = vld [vmem:[%s3976_s20 + $0x2a0] sm:$0xff] }
  0x74   : >> { %10722 = vst [vmem:[#allocation50_spill] sm:$0xff] %v4168_v36  ;;  %10723 = vst [vmem:[#allocation51_spill] sm:$0xff] %v4171_v46  ;;  %v4180_v30 = vld [vmem:[%s3976_s20 + $0x2a8] sm:$0xff]  ;;  %v4183_v40 = vld [vmem:[%s3976_s20 + $0x2b0] sm:$0xff] }
  0x75   : >> { %10724 = vst [vmem:[#allocation52_spill] sm:$0xff] %v4177_v23  ;;  %10725 = vst [vmem:[#allocation53_spill] sm:$0xff] %v4180_v30  ;;  %v4189_v17 = vld [vmem:[%s3976_s20 + $0x2b8] sm:$0xff]  ;;  %v4192_v24 = vld [vmem:[%s3976_s20 + $0x2c0] sm:$0xff] }
  0x76   : >> { %10726 = vst [vmem:[#allocation54_spill] sm:$0xff] %v4183_v40  ;;  %10727 = vst [vmem:[#allocation55_spill] sm:$0xff] %v4189_v17  ;;  %v4195_v34 = vld [vmem:[%s3976_s20 + $0x2c8] sm:$0xff]  ;;  %v4201_v11 = vld [vmem:[%s3976_s20 + $0x2d0] sm:$0xff] }
  0x77   : >> { %10728 = vst [vmem:[#allocation56_spill] sm:$0xff] %v4192_v24  ;;  %10729 = vst [vmem:[#allocation57_spill] sm:$0xff] %v4195_v34  ;;  %v4204_v18 = vld [vmem:[%s3976_s20 + $0x2d8] sm:$0xff]  ;;  %v4207_v28 = vld [vmem:[%s3976_s20 + $0x2e0] sm:$0xff] }
  0x78   : >> { %10730 = vst [vmem:[#allocation58_spill] sm:$0xff] %v4201_v11  ;;  %10731 = vst [vmem:[#allocation59_spill] sm:$0xff] %v4204_v18  ;;  %v4213_v29 = vld [vmem:[%s3976_s20 + $0x2e8] sm:$0xff]  ;;  %v4216_v12 = vld [vmem:[%s3976_s20 + $0x2f0] sm:$0xff] }
  0x79   : >> { %10732 = vst [vmem:[#allocation60_spill] sm:$0xff] %v4207_v28  ;;  %10733 = vst [vmem:[#allocation61_spill] sm:$0xff] %v4213_v29  ;;  %v4219_v22 = vld [vmem:[%s3976_s20 + $0x2f8] sm:$0xff]  ;;  %v4225_v52 = vld [vmem:[%s3976_s20 + $0x300] sm:$0xff] }
  0x7a   : >> { %10734 = vst [vmem:[#allocation62_spill] sm:$0xff] %v4216_v12  ;;  %10735 = vst [vmem:[#allocation63_spill] sm:$0xff] %v4219_v22  ;;  %v4228_v16 = vld [vmem:[%s3976_s20 + $0x308] sm:$0xff]  ;;  %v4231_v40 = vld [vmem:[%s3976_s20 + $0x310] sm:$0xff] }
  0x7b   : >> { %10736 = vst [vmem:[#allocation64_spill] sm:$0xff] %v4225_v52  ;;  %10737 = vst [vmem:[#allocation65_spill] sm:$0xff] %v4228_v16  ;;  %v4237_v36 = vld [vmem:[%s3976_s20 + $0x318] sm:$0xff]  ;;  %v4240_v24 = vld [vmem:[%s3976_s20 + $0x320] sm:$0xff] }
  0x7c   : >> { %10738 = vst [vmem:[#allocation66_spill] sm:$0xff] %v4231_v40  ;;  %10739 = vst [vmem:[#allocation67_spill] sm:$0xff] %v4237_v36  ;;  %v4243_v10 = vld [vmem:[%s3976_s20 + $0x328] sm:$0xff]  ;;  %v4249_v30 = vld [vmem:[%s3976_s20 + $0x330] sm:$0xff] }
  0x7d   : >> { %10740 = vst [vmem:[#allocation68_spill] sm:$0xff] %v4240_v24  ;;  %10741 = vst [vmem:[#allocation69_spill] sm:$0xff] %v4243_v10  ;;  %v4252_v11 = vld [vmem:[%s3976_s20 + $0x338] sm:$0xff]  ;;  %v4255_v23 = vld [vmem:[%s3976_s20 + $0x340] sm:$0xff] }
  0x7e   : >> { %10742 = vst [vmem:[#allocation70_spill] sm:$0xff] %v4249_v30  ;;  %10743 = vst [vmem:[#allocation71_spill] sm:$0xff] %v4255_v23  ;;  %v4266_v17 = vld [vmem:[%s3976_s20 + $0x348] sm:$0xff]  ;;  %v4269_v22 = vld [vmem:[%s3976_s20 + $0x350] sm:$0xff] }
  0x7f   : >> { %10744 = vst [vmem:[#allocation72_spill] sm:$0xff] %v4266_v17  ;;  %v417_v12 = vld [vmem:[%s4260_s12 + $0x108] sm:$0xff]  ;;  %v4276_v34 = vld [vmem:[%s3976_s20 + $0x358] sm:$0xff]  ;;  %v418_v46 = vld [vmem:[%s4260_s12 + $0x110] sm:$0xff] }
  0x80   : >> { %10745 = vst [vmem:[#allocation73_spill] sm:$0xff] %v4276_v34  ;;  %v419_v42 = vld [vmem:[%s4260_s12 + $0x118] sm:$0xff]  ;;  %v420_v40 = vld [vmem:[%s4260_s12 + $0x120] sm:$0xff]  ;;  %v4285_v29 = vmul.f32 %v417_v12, %v3979_v1  ;;  %v421_v18 = vld [vmem:[%s4260_s12 + $0x128] sm:$0xff]  ;;  %v4295_v16 = vmul.f32 %v418_v46, %v3982_v2 }
  0x81   : >> { %v4288_v28 = vld [vmem:[%s3976_s20 + $0x360] sm:$0xff]  ;;  %v422_v10 = vld [vmem:[%s4260_s12 + $0x130] sm:$0xff]  ;;  %v423_v24 = vld [vmem:[%s4260_s12 + $0x138] sm:$0xff]  ;;  %v4298_v52 = vmul.f32 %v419_v42, %v3985_v3  ;;  %v4301_v12 = vmul.f32 %v420_v40, %v3988_v4  ;;  %v4311_v46 = vmul.f32 %v421_v18, %v3991_v5 }
  0x82   : >> { %10746 = vst [vmem:[#allocation74_spill] sm:$0xff] %v4285_v29  ;;  %10747 = vst [vmem:[#allocation75_spill] sm:$0xff] %v4288_v28  ;;  %v4304_v35 = vld [vmem:[%s3976_s20 + $0x368] sm:$0xff]  ;;  %v424_v1 = vld [vmem:[%s4260_s12 + $0x140] sm:$0xff]  ;;  %v4314_v42 = vmul.f32 %v422_v10, %v3994_v6  ;;  %v4317_v40 = vmul.f32 %v423_v24, %v3997_v7 }
  0x83   : >> { %10748 = vst [vmem:[#allocation76_spill] sm:$0xff] %v4298_v52  ;;  %10749 = vst [vmem:[#allocation77_spill] sm:$0xff] %v4301_v12  ;;  %v425_v29 = vld [vmem:[%s4260_s12 + $0x148] sm:$0xff]  ;;  %v426_v23 = vld [vmem:[%s4260_s12 + $0x150] sm:$0xff]  ;;  %v4327_v18 = vmul.f32 %v424_v1, %v4000_v8 }
  0x84   : >> { %10750 = vst [vmem:[#allocation78_spill] sm:$0xff] %v4314_v42  ;;  %10751 = vst [vmem:[#allocation79_spill] sm:$0xff] %v4317_v40  ;;  %v4320_v4 = vld [vmem:[%s3976_s20 + $0x370] sm:$0xff]  ;;  %v427_v12 = vld [vmem:[%s4260_s12 + $0x158] sm:$0xff]  ;;  %v4330_v10 = vmul.f32 %v425_v29, %v4003_v9  ;;  %v4333_v24 = vmul.f32 %v426_v23, %v4009_v13 }
  0x85   : >> { %10752 = vst [vmem:[#allocation80_spill] sm:$0xff] %v4320_v4  ;;  %v428_v3 = vld [vmem:[%s4260_s12 + $0x160] sm:$0xff]  ;;  %v429_v52 = vld [vmem:[%s4260_s12 + $0x168] sm:$0xff]  ;;  %v4336_v7 = vld [vmem:[%s3976_s20 + $0x378] sm:$0xff]  ;;  %v4343_v1 = vmul.f32 %v427_v12, %v4012_v14 }
  0x86   : >> { %10753 = vst [vmem:[#allocation81_spill] sm:$0xff] %v4330_v10  ;;  %10754 = vst [vmem:[#allocation82_spill] sm:$0xff] %v4333_v24  ;;  %v430_v40 = vld [vmem:[%s4260_s12 + $0x170] sm:$0xff]  ;;  %v431_v6 = vld [vmem:[%s4260_s12 + $0x178] sm:$0xff]  ;;  %v4346_v29 = vmul.f32 %v428_v3, %v4015_v15  ;;  %v4349_v23 = vmul.f32 %v429_v52, %v4021_v19 }
  0x87   : >> { %10755 = vst [vmem:[#allocation83_spill] sm:$0xff] %v4336_v7  ;;  %v432_v42 = vld [vmem:[%s4260_s12 + $0x180] sm:$0xff]  ;;  %v433_v24 = vld [vmem:[%s4260_s12 + $0x188] sm:$0xff]  ;;  %v434_v9 = vld [vmem:[%s4260_s12 + $0x190] sm:$0xff]  ;;  %v4359_v12 = vmul.f32 %v430_v40, %v4024_v20  ;;  %v4362_v3 = vmul.f32 %v431_v6, %v4027_v21 }
  0x88   : >> { %10756 = vst [vmem:[#allocation84_spill] sm:$0xff] %v4346_v29  ;;  %10757 = vst [vmem:[#allocation85_spill] sm:$0xff] %v4349_v23  ;;  %v4352_v13 = vld [vmem:[%s3976_s20 + $0x380] sm:$0xff]  ;;  %v435_v10 = vld [vmem:[%s4260_s12 + $0x198] sm:$0xff]  ;;  %v4365_v52 = vmul.f32 %v432_v42, %v4033_v25  ;;  %v4375_v40 = vmul.f32 %v433_v24, %v4036_v26  ;;  %v4378_v6 = vmul.f32 %v434_v9, %v4039_v27 }
  0x89   : >> { %10758 = vst [vmem:[#allocation86_spill] sm:$0xff] %v4362_v3  ;;  %v4368_v19 = vld [vmem:[%s3976_s20 + $0x388] sm:$0xff]  ;;  %v436_v23 = vld [vmem:[%s4260_s12 + $0x1a0] sm:$0xff]  ;;  %v438_v29 = vld [vmem:[%s4260_s12 + $0x1b0] sm:$0xff]  ;;  %v4381_v42 = vmul.f32 %v435_v10, %v4045_v31 }
  0x8a   : >> { %10759 = vst [vmem:[#allocation87_spill] sm:$0xff] %v4365_v52  ;;  %v437_v15 = vld [vmem:[%s4260_s12 + $0x1a8] sm:$0xff]  ;;  %10760 = vst [vmem:[#allocation88_spill] sm:$0xff] %v4378_v6  ;;  %v4384_v25 = vld [vmem:[%s3976_s20 + $0x390] sm:$0xff]  ;;  %v4391_v24 = vmul.f32 %v436_v23, %v4048_v32  ;;  %v4397_v10 = vmul.f32 %v438_v29, %v4057_v37 }
  0x8b   : >> { %10761 = vst [vmem:[#allocation89_spill] sm:$0xff] %v4381_v42  ;;  %10762 = vst [vmem:[#allocation90_spill] sm:$0xff] %v4384_v25  ;;  %v439_v52 = vld [vmem:[%s4260_s12 + $0x1b8] sm:$0xff]  ;;  %v440_v21 = vld [vmem:[%s4260_s12 + $0x1c0] sm:$0xff]  ;;  %v4394_v9 = vmul.f32 %v437_v15, %v4051_v33 }
  0x8c   : >> { %v441_v3 = vld [vmem:[%s4260_s12 + $0x1c8] sm:$0xff]  ;;  %10764 = vst [vmem:[#allocation92_spill] sm:$0xff] %v4397_v10  ;;  %v4400_v31 = vld [vmem:[%s3976_s20 + $0x398] sm:$0xff]  ;;  %v442_v42 = vld [vmem:[%s4260_s12 + $0x1d0] sm:$0xff]  ;;  %v4407_v23 = vmul.f32 %v439_v52, %v4060_v38  ;;  %v4410_v15 = vmul.f32 %v440_v21, %v4063_v39 }
  0x8d   : >> { %10763 = vst [vmem:[#allocation91_spill] sm:$0xff] %v4394_v9  ;;  %v443_v27 = vld [vmem:[%s4260_s12 + $0x1d8] sm:$0xff]  ;;  %v444_v6 = vld [vmem:[%s4260_s12 + $0x1e0] sm:$0xff]  ;;  %v4413_v29 = vmul.f32 %v441_v3, %v4069_v43  ;;  %v445_v10 = vld [vmem:[%s4260_s12 + $0x1e8] sm:$0xff]  ;;  %v4423_v52 = vmul.f32 %v442_v42, %v4072_v44 }
  0x8e   : >> { %10765 = vst [vmem:[#allocation93_spill] sm:$0xff] %v4410_v15  ;;  %v4416_v37 = vld [vmem:[%s3976_s20 + $0x3a0] sm:$0xff]  ;;  %v446_v33 = vld [vmem:[%s4260_s12 + $0x1f0] sm:$0xff]  ;;  %v447_v9 = vld [vmem:[%s4260_s12 + $0x1f8] sm:$0xff]  ;;  %v4426_v21 = vmul.f32 %v443_v27, %v4075_v45  ;;  %v4429_v3 = vmul.f32 %v444_v6, %v4081_v49  ;;  %v4439_v42 = vmul.f32 %v445_v10, %v4084_v50 }
  0x8f   : >> { %10766 = vst [vmem:[#allocation94_spill] sm:$0xff] %v4413_v29  ;;  %10767 = vst [vmem:[#allocation95_spill] sm:$0xff] %v4416_v37  ;;  %v4432_v43 = vld [vmem:[%s3976_s20 + $0x3a8] sm:$0xff]  ;;  %v448_v29 = vld [vmem:[%s4260_s12 + $0x200] sm:$0xff]  ;;  %v4442_v27 = vmul.f32 %v446_v33, %v4087_v51  ;;  %v4445_v6 = vmul.f32 %v447_v9, %v4093_v55 }
  0x90   : >> { %10768 = vst [vmem:[#allocation96_spill] sm:$0xff] %v4426_v21  ;;  %10769 = vst [vmem:[#allocation97_spill] sm:$0xff] %v4429_v3  ;;  %v449_v39 = vld [vmem:[%s4260_s12 + $0x208] sm:$0xff]  ;;  %v450_v15 = vld [vmem:[%s4260_s12 + $0x210] sm:$0xff]  ;;  %v4455_v10 = vmul.f32 %v448_v29, %v4096_v56 }
  0x91   : >> { %10770 = vst [vmem:[#allocation98_spill] sm:$0xff] %v4432_v43  ;;  %10771 = vst [vmem:[#allocation99_spill] sm:$0xff] %v4442_v27  ;;  %v4448_v49 = vld [vmem:[%s3976_s20 + $0x3b0] sm:$0xff]  ;;  %v451_v3 = vld [vmem:[%s4260_s12 + $0x218] sm:$0xff]  ;;  %v4458_v33 = vmul.f32 %v449_v39, %v4099_v57  ;;  %v4461_v9 = vmul.f32 %v450_v15, %v4105_v61 }
  0x92   : >> { %10772 = vst [vmem:[#allocation100_spill] sm:$0xff] %v4445_v6  ;;  %v452_v45 = vld [vmem:[%s4260_s12 + $0x220] sm:$0xff]  ;;  %v453_v21 = vld [vmem:[%s4260_s12 + $0x228] sm:$0xff]  ;;  %10773 = vst [vmem:[#allocation101_spill] sm:$0xff] %v4455_v10  ;;  %v4471_v29 = vmul.f32 %v451_v3, %v4108_v62 }
  0x93   : >> { %10774 = vst [vmem:[#allocation102_spill] sm:$0xff] %v4458_v33  ;;  %10775 = vst [vmem:[#allocation103_spill] sm:$0xff] %v4461_v9  ;;  %v4464_v55 = vld [vmem:[%s3976_s20 + $0x3b8] sm:$0xff]  ;;  %v454_v6 = vld [vmem:[%s4260_s12 + $0x230] sm:$0xff]  ;;  %v4474_v39 = vmul.f32 %v452_v45, %v4111_v63  ;;  %v4477_v15 = vmul.f32 %v453_v21, %v4117_v53 }
  0x94   : >> { %10776 = vst [vmem:[#allocation104_spill] sm:$0xff] %v4464_v55  ;;  %v455_v51 = vld [vmem:[%s4260_s12 + $0x238] sm:$0xff]  ;;  %v456_v27 = vld [vmem:[%s4260_s12 + $0x240] sm:$0xff]  ;;  %10777 = vst [vmem:[#allocation105_spill] sm:$0xff] %v4471_v29  ;;  %v4487_v3 = vmul.f32 %v454_v6, %v4120_v59 }
  0x95   : >> { %10778 = vst [vmem:[#allocation106_spill] sm:$0xff] %v4474_v39  ;;  %10779 = vst [vmem:[#allocation107_spill] sm:$0xff] %v4477_v15  ;;  %v4480_v61 = vld [vmem:[%s3976_s20 + $0x3c0] sm:$0xff]  ;;  %v457_v9 = vld [vmem:[%s4260_s12 + $0x248] sm:$0xff]  ;;  %v4490_v45 = vmul.f32 %v455_v51, %v4123_v60  ;;  %v4493_v21 = vmul.f32 %v456_v27, %v4129_v47 }
  0x96   : >> { %10780 = vst [vmem:[#allocation108_spill] sm:$0xff] %v4480_v61  ;;  %v458_v57 = vld [vmem:[%s4260_s12 + $0x250] sm:$0xff]  ;;  %v459_v33 = vld [vmem:[%s4260_s12 + $0x258] sm:$0xff]  ;;  %10781 = vst [vmem:[#allocation109_spill] sm:$0xff] %v4487_v3  ;;  %v4503_v6 = vmul.f32 %v457_v9, %v4132_v54 }
  0x97   : >> { %10782 = vst [vmem:[#allocation110_spill] sm:$0xff] %v4490_v45  ;;  %10783 = vst [vmem:[#allocation111_spill] sm:$0xff] %v4493_v21  ;;  %v4496_v53 = vld [vmem:[%s3976_s20 + $0x3c8] sm:$0xff]  ;;  %v460_v15 = vld [vmem:[%s4260_s12 + $0x260] sm:$0xff]  ;;  %v4506_v51 = vmul.f32 %v458_v57, %v4135_v58  ;;  %v4509_v27 = vmul.f32 %v459_v33, %v4141_v41 }
  0x98   : >> { %v461_v63 = vld [vmem:[%s4260_s12 + $0x268] sm:$0xff]  ;;  %v462_v39 = vld [vmem:[%s4260_s12 + $0x270] sm:$0xff]  ;;  %10784 = vst [vmem:[#allocation112_spill] sm:$0xff] %v4503_v6  ;;  %v463_v21 = vld [vmem:[%s4260_s12 + $0x278] sm:$0xff]  ;;  %v4519_v9 = vmul.f32 %v460_v15, %v4144_v48 }
  0x99   : >> { %10785 = vst [vmem:[#allocation113_spill] sm:$0xff] %v4506_v51  ;;  %10786 = vst [vmem:[#allocation114_spill] sm:$0xff] %v4509_v27  ;;  %v4512_v47 = vld [vmem:[%s3976_s20 + $0x3d0] sm:$0xff]  ;;  %v464_v60 = vld [vmem:[%s4260_s12 + $0x280] sm:$0xff]  ;;  %v4522_v57 = vmul.f32 %v461_v63, %v4147_v0 }
  0x9a   : >> { %v465_v45 = vld [vmem:[%s4260_s12 + $0x288] sm:$0xff]  ;;  %10787 = vst [vmem:[#allocation115_spill] sm:$0xff] %v4519_v9  ;;  %v10789_v58 = vld [vmem:[#allocation46_spill] sm:$0xff]  ;;  %v4528_v41 = vld [vmem:[%s3976_s20 + $0x3d8] sm:$0xff] }
  0x9b   : >> { %10788 = vst [vmem:[#allocation116_spill] sm:$0xff] %v4522_v57  ;;  %v4525_v33 = vmul.f32 %v462_v39, %v10789_v58  ;;  %v466_v27 = vld [vmem:[%s4260_s12 + $0x290] sm:$0xff]  ;;  %v467_v51 = vld [vmem:[%s4260_s12 + $0x298] sm:$0xff]  ;;  %v468_v54 = vld [vmem:[%s4260_s12 + $0x2a0] sm:$0xff] }
  0x9c   : >> { %v10791_v6 = vld [vmem:[#allocation47_spill] sm:$0xff]  ;;  %v10793_v48 = vld [vmem:[#allocation48_spill] sm:$0xff]  ;;  %v10795_v0 = vld [vmem:[#allocation49_spill] sm:$0xff] }
  0x9d   : >> { %10790 = vst [vmem:[#allocation117_spill] sm:$0xff] %v4525_v33  ;;  %v4535_v15 = vmul.f32 %v463_v21, %v10791_v6  ;;  %v4538_v63 = vmul.f32 %v464_v60, %v10793_v48  ;;  %v4541_v39 = vmul.f32 %v465_v45, %v10795_v0  ;;  %v4544_v58 = vld [vmem:[%s3976_s20 + $0x3e0] sm:$0xff]  ;;  %v469_v33 = vld [vmem:[%s4260_s12 + $0x2a8] sm:$0xff]  ;;  %v470_v57 = vld [vmem:[%s4260_s12 + $0x2b0] sm:$0xff] }
  0x9e   : >> { %10797 = vst [vmem:[#allocation121_spill] sm:$0xff] %v4544_v58  ;;  %v471_v9 = vld [vmem:[%s4260_s12 + $0x2b8] sm:$0xff]  ;;  %v10798_v59 = vld [vmem:[#allocation50_spill] sm:$0xff]  ;;  %v10800_v6 = vld [vmem:[#allocation51_spill] sm:$0xff] }
  0x9f   : >> { %10792 = vst [vmem:[#allocation118_spill] sm:$0xff] %v4535_v15  ;;  %10794 = vst [vmem:[#allocation119_spill] sm:$0xff] %v4538_v63  ;;  %v4551_v21 = vmul.f32 %v466_v27, %v10798_v59  ;;  %v4554_v60 = vmul.f32 %v467_v51, %v10800_v6  ;;  %v10802_v48 = vld [vmem:[#allocation52_spill] sm:$0xff]  ;;  %v4560_v0 = vld [vmem:[%s3976_s20 + $0x3e8] sm:$0xff] }
  0xa0   : >> { %10796 = vst [vmem:[#allocation120_spill] sm:$0xff] %v4541_v39  ;;  %v4557_v45 = vmul.f32 %v468_v54, %v10802_v48  ;;  %10804 = vst [vmem:[#allocation125_spill] sm:$0xff] %v4560_v0  ;;  %v472_v39 = vld [vmem:[%s4260_s12 + $0x2c0] sm:$0xff]  ;;  %v473_v63 = vld [vmem:[%s4260_s12 + $0x2c8] sm:$0xff] }
  0xa1   : >> { %10799 = vst [vmem:[#allocation122_spill] sm:$0xff] %v4551_v21  ;;  %10801 = vst [vmem:[#allocation123_spill] sm:$0xff] %v4554_v60  ;;  %v474_v15 = vld [vmem:[%s4260_s12 + $0x2d0] sm:$0xff]  ;;  %v10805_v3 = vld [vmem:[#allocation53_spill] sm:$0xff] }
  0xa2   : >> { %10803 = vst [vmem:[#allocation124_spill] sm:$0xff] %v4557_v45  ;;  %v4567_v27 = vmul.f32 %v469_v33, %v10805_v3  ;;  %v10807_v59 = vld [vmem:[#allocation54_spill] sm:$0xff]  ;;  %v10809_v6 = vld [vmem:[#allocation55_spill] sm:$0xff]  ;;  %v4576_v48 = vld [vmem:[%s3976_s20 + $0x3f0] sm:$0xff] }
  0xa3   : >> { %v4570_v51 = vmul.f32 %v470_v57, %v10807_v59  ;;  %v4573_v54 = vmul.f32 %v471_v9, %v10809_v6  ;;  %10811 = vst [vmem:[#allocation129_spill] sm:$0xff] %v4576_v48  ;;  %v475_v45 = vld [vmem:[%s4260_s12 + $0x2d8] sm:$0xff]  ;;  %v476_v60 = vld [vmem:[%s4260_s12 + $0x2e0] sm:$0xff]  ;;  %v477_v21 = vld [vmem:[%s4260_s12 + $0x2e8] sm:$0xff] }
  0xa4   : >> { %10806 = vst [vmem:[#allocation126_spill] sm:$0xff] %v4567_v27  ;;  %v10812_v36 = vld [vmem:[#allocation56_spill] sm:$0xff]  ;;  %v10814_v33 = vld [vmem:[#allocation57_spill] sm:$0xff]  ;;  %v10816_v57 = vld [vmem:[#allocation58_spill] sm:$0xff] }
  0xa5   : >> { %10808 = vst [vmem:[#allocation127_spill] sm:$0xff] %v4570_v51  ;;  %10810 = vst [vmem:[#allocation128_spill] sm:$0xff] %v4573_v54  ;;  %v4583_v29 = vmul.f32 %v472_v39, %v10812_v36  ;;  %v4586_v3 = vmul.f32 %v473_v63, %v10814_v33  ;;  %v4589_v59 = vmul.f32 %v474_v15, %v10816_v57  ;;  %v4592_v9 = vld [vmem:[%s3976_s20 + $0x3f8] sm:$0xff]  ;;  %v478_v6 = vld [vmem:[%s4260_s12 + $0x2f0] sm:$0xff] }
  0xa6   : >> { %10818 = vst [vmem:[#allocation133_spill] sm:$0xff] %v4592_v9  ;;  %v479_v54 = vld [vmem:[%s4260_s12 + $0x2f8] sm:$0xff]  ;;  %v480_v51 = vld [vmem:[%s4260_s12 + $0x300] sm:$0xff]  ;;  %v10819_v62 = vld [vmem:[#allocation59_spill] sm:$0xff] }
  0xa7   : >> { %10813 = vst [vmem:[#allocation130_spill] sm:$0xff] %v4583_v29  ;;  %10815 = vst [vmem:[#allocation131_spill] sm:$0xff] %v4586_v3  ;;  %v4599_v56 = vmul.f32 %v475_v45, %v10819_v62  ;;  %v10821_v39 = vld [vmem:[#allocation60_spill] sm:$0xff]  ;;  %v10823_v63 = vld [vmem:[#allocation61_spill] sm:$0xff] }
  0xa8   : >> { %10817 = vst [vmem:[#allocation132_spill] sm:$0xff] %v4589_v59  ;;  %v4602_v36 = vmul.f32 %v476_v60, %v10821_v39  ;;  %v4605_v15 = vmul.f32 %v477_v21, %v10823_v63  ;;  %v481_v57 = vld [vmem:[%s4260_s12 + $0x308] sm:$0xff]  ;;  %v482_v59 = vld [vmem:[%s4260_s12 + $0x310] sm:$0xff]  ;;  %v483_v33 = vld [vmem:[%s4260_s12 + $0x318] sm:$0xff] }
  0xa9   : >> { %10820 = vst [vmem:[#allocation134_spill] sm:$0xff] %v4599_v56  ;;  %v10825_v29 = vld [vmem:[#allocation62_spill] sm:$0xff]  ;;  %v10827_v27 = vld [vmem:[#allocation63_spill] sm:$0xff]  ;;  %v10829_v62 = vld [vmem:[#allocation64_spill] sm:$0xff] }
  0xaa   : >> { %10822 = vst [vmem:[#allocation135_spill] sm:$0xff] %v4602_v36  ;;  %10824 = vst [vmem:[#allocation136_spill] sm:$0xff] %v4605_v15  ;;  %v4612_v10 = vmul.f32 %v478_v6, %v10825_v29  ;;  %v4615_v45 = vmul.f32 %v479_v54, %v10827_v27  ;;  %v4618_v60 = vmul.f32 %v480_v51, %v10829_v62  ;;  %v484_v21 = vld [vmem:[%s4260_s12 + $0x320] sm:$0xff]  ;;  %v485_v63 = vld [vmem:[%s4260_s12 + $0x328] sm:$0xff] }
  0xab   : >> { %v486_v15 = vld [vmem:[%s4260_s12 + $0x330] sm:$0xff]  ;;  %v10831_v36 = vld [vmem:[#allocation65_spill] sm:$0xff]  ;;  %v10832_v3 = vld [vmem:[#allocation66_spill] sm:$0xff] }
  0xac   : >> { %10826 = vst [vmem:[#allocation137_spill] sm:$0xff] %v4612_v10  ;;  %10828 = vst [vmem:[#allocation138_spill] sm:$0xff] %v4615_v45  ;;  %v4625_v56 = vmul.f32 %v481_v57, %v10831_v36  ;;  %v4628_v6 = vmul.f32 %v482_v59, %v10832_v3  ;;  %v10834_v29 = vld [vmem:[#allocation67_spill] sm:$0xff]  ;;  %v487_v51 = vld [vmem:[%s4260_s12 + $0x338] sm:$0xff]  ;;  %v4644_v59 = vmul.f32 %v486_v15, %v4249_v30 }
  0xad   : >> { %10830 = vst [vmem:[#allocation139_spill] sm:$0xff] %v4618_v60  ;;  %v4631_v54 = vmul.f32 %v483_v33, %v10834_v29  ;;  %v488_v62 = vld [vmem:[%s4260_s12 + $0x340] sm:$0xff]  ;;  %v489_v60 = vld [vmem:[%s4260_s12 + $0x348] sm:$0xff]  ;;  %v10836_v45 = vld [vmem:[#allocation68_spill] sm:$0xff]  ;;  %v4650_v3 = vmul.f32 %v487_v51, %v4252_v11 }
  0xae   : >> { %10833 = vst [vmem:[#allocation65_spill] sm:$0xff] %v4628_v6  ;;  %v4638_v10 = vmul.f32 %v484_v21, %v10836_v45  ;;  %v10837_v39 = vld [vmem:[#allocation69_spill] sm:$0xff]  ;;  %10839 = vst [vmem:[#allocation142_spill] sm:$0xff] %v4644_v59  ;;  %v490_v33 = vld [vmem:[%s4260_s12 + $0x350] sm:$0xff]  ;;  %v4656_v21 = vmul.f32 %v489_v60, %v4266_v17 }
  0xaf   : >> { %10835 = vst [vmem:[#allocation140_spill] sm:$0xff] %v4631_v54  ;;  %v4641_v57 = vmul.f32 %v485_v63, %v10837_v39  ;;  %v491_v29 = vld [vmem:[%s4260_s12 + $0x358] sm:$0xff]  ;;  %v492_v54 = vld [vmem:[%s4260_s12 + $0x360] sm:$0xff]  ;;  %v10840_v6 = vld [vmem:[#allocation71_spill] sm:$0xff]  ;;  %v4667_v51 = vmul.f32 %v490_v33, %v4269_v22 }
  0xb0   : >> { %v4653_v27 = vmul.f32 %v488_v62, %v10840_v6  ;;  %v10841_v63 = vld [vmem:[#allocation74_spill] sm:$0xff]  ;;  %v10842_v39 = vld [vmem:[#allocation11_spill] sm:$0xff]  ;;  %v494_v59 = vld [vmem:[%s4260_s12 + $0x370] sm:$0xff]  ;;  %v4670_v62 = vmul.f32 %v491_v29, %v4276_v34  ;;  %v4673_v60 = vmul.f32 %v492_v54, %v4288_v28 }
  0xb1   : >> { %10838 = vst [vmem:[#allocation141_spill] sm:$0xff] %v4641_v57  ;;  %v10843_v57 = vmax.f32 %v10842_v39, 0.0  ;;  %v493_v30 = vld [vmem:[%s4260_s12 + $0x368] sm:$0xff]  ;;  %v495_v45 = vld [vmem:[%s4260_s12 + $0x378] sm:$0xff]  ;;  %v10846_v39 = vmax.f32 %v3982_v2, 0.0  ;;  %v498_v17 = vld [vmem:[%s4260_s12 + $0x390] sm:$0xff]  ;;  %v4687_v29 = vmul.f32 %v494_v59, %v4320_v4 }
  0xb2   : >> { %10845 = vst [vmem:[#allocation74_spill] sm:$0xff] %v4673_v60  ;;  %v4684_v33 = vmul.f32 %v493_v30, %v4304_v35  ;;  %v4690_v54 = vmul.f32 %v495_v45, %v4336_v7  ;;  %v10849_v28 = vld [vmem:[#allocation76_spill] sm:$0xff]  ;;  %v501_v34 = vld [vmem:[%s4260_s12 + $0x3a8] sm:$0xff]  ;;  %v4707_v45 = vmul.f32 %v498_v17, %v4384_v25  ;;  %v10854_v7 = vld [vmem:[#allocation77_spill] sm:$0xff] }
  0xb3   : >> { %v4661_v15 = vsub.f32 %v10843_v57, %v10841_v63  ;;  %v4678_v57 = vsub.f32 %v10846_v39, %v4295_v16  ;;  %v496_v63 = vld [vmem:[%s4260_s12 + $0x380] sm:$0xff]  ;;  %v10850_v60 = vld [vmem:[#allocation12_spill] sm:$0xff]  ;;  %v499_v39 = vld [vmem:[%s4260_s12 + $0x398] sm:$0xff]  ;;  %v4724_v17 = vmul.f32 %v501_v34, %v4432_v43 }
  0xb4   : >> { %10848 = vst [vmem:[#allocation143_spill] sm:$0xff] %v4690_v54  ;;  %v10851_v2 = vmax.f32 %v10850_v60, 0.0  ;;  %v4701_v30 = vmul.f32 %v496_v63, %v4352_v13  ;;  %10853 = vst [vmem:[#allocation12_spill] sm:$0xff] %v4707_v45  ;;  %v10855_v54 = vld [vmem:[#allocation13_spill] sm:$0xff]  ;;  %v504_v4 = vld [vmem:[%s4260_s12 + $0x3c0] sm:$0xff]  ;;  %v4718_v63 = vmul.f32 %v499_v39, %v4400_v31 }
  0xb5   : >> { %10844 = vst [vmem:[#allocation71_spill] sm:$0xff] %v4661_v15  ;;  %10847 = vst [vmem:[#allocation11_spill] sm:$0xff] %v4678_v57  ;;  %v497_v15 = vld [vmem:[%s4260_s12 + $0x388] sm:$0xff]  ;;  %v500_v57 = vld [vmem:[%s4260_s12 + $0x3a0] sm:$0xff]  ;;  %v10856_v60 = vmax.f32 %v10855_v54, 0.0  ;;  %v10859_v54 = vmax.f32 %v3991_v5, 0.0 }
  0xb6   : >> { %v4695_v16 = vsub.f32 %v10851_v2, %v10849_v28  ;;  %v4704_v59 = vmul.f32 %v497_v15, %v4368_v19  ;;  %v502_v2 = vld [vmem:[%s4260_s12 + $0x3b0] sm:$0xff]  ;;  %v4721_v15 = vmul.f32 %v500_v57, %v4416_v37  ;;  %10858 = vst [vmem:[#allocation13_spill] sm:$0xff] %v4724_v17  ;;  %v507_v25 = vld [vmem:[%s4260_s12 + $0x3d8] sm:$0xff]  ;;  %v4741_v57 = vmul.f32 %v504_v4, %v4480_v61  ;;  %v10862_v34 = vld [vmem:[#allocation78_spill] sm:$0xff] }
  0xb7   : >> { %v4712_v28 = vsub.f32 %v10856_v60, %v10854_v7  ;;  %v4729_v7 = vsub.f32 %v10859_v54, %v4311_v46  ;;  %v505_v60 = vld [vmem:[%s4260_s12 + $0x3c8] sm:$0xff]  ;;  %v4735_v45 = vmul.f32 %v502_v2, %v4448_v49  ;;  %v10863_v43 = vld [vmem:[#allocation14_spill] sm:$0xff]  ;;  %v510_v54 = vld [vmem:[%s4260_s12 + $0x3f0] sm:$0xff] }
  0xb8   : >> { %10852 = vst [vmem:[#allocation76_spill] sm:$0xff] %v4695_v16  ;;  %v503_v16 = vld [vmem:[%s4260_s12 + $0x3b8] sm:$0xff]  ;;  %10861 = vst [vmem:[#allocation145_spill] sm:$0xff] %v4741_v57  ;;  %v10864_v17 = vmax.f32 %v10863_v43, 0.0  ;;  %v508_v5 = vld [vmem:[%s4260_s12 + $0x3e0] sm:$0xff] }
  0xb9   : >> { %10857 = vst [vmem:[#allocation77_spill] sm:$0xff] %v4712_v28  ;;  %10860 = vst [vmem:[#allocation144_spill] sm:$0xff] %v4729_v7  ;;  %v506_v28 = vld [vmem:[%s4260_s12 + $0x3d0] sm:$0xff]  ;;  %v4738_v39 = vmul.f32 %v503_v16, %v4464_v55  ;;  %v509_v46 = vld [vmem:[%s4260_s12 + $0x3e8] sm:$0xff]  ;;  %v4752_v7 = vmul.f32 %v505_v60, %v4496_v53  ;;  %v4758_v16 = vmul.f32 %v507_v25, %v4528_v41 }
  0xba   : >> { %v4746_v37 = vsub.f32 %v10864_v17, %v10862_v34  ;;  %v4755_v2 = vmul.f32 %v506_v28, %v4512_v47  ;;  %v10866_v55 = vld [vmem:[#allocation79_spill] sm:$0xff]  ;;  %v511_v43 = vld [vmem:[%s4260_s12 + $0x3f8] sm:$0xff]  ;;  %v4767_v17 = vmul.f32 %v508_v5, %v4544_v58  ;;  %v4770_v34 = vmul.f32 %v509_v46, %v4560_v0  ;;  %v10876_v5 = vld [vmem:[#allocation82_spill] sm:$0xff] }
  0xbb   : >> { %v10867_v4 = vld [vmem:[#allocation15_spill] sm:$0xff]  ;;  %v4773_v60 = vmul.f32 %v510_v54, %v4576_v48  ;;  %v10870_v28 = vmax.f32 %v4000_v8, 0.0  ;;  %v10877_v58 = vld [vmem:[#allocation17_spill] sm:$0xff]  ;;  %v10880_v54 = vmax.f32 %v4012_v14, 0.0  ;;  %v10882_v8 = vld [vmem:[#allocation84_spill] sm:$0xff] }
  0xbc   : >> { %10865 = vst [vmem:[#allocation78_spill] sm:$0xff] %v4746_v37  ;;  %v10868_v61 = vmax.f32 %v10867_v4, 0.0  ;;  %v4781_v37 = vmul.f32 %v511_v43, %v4592_v9  ;;  %v10878_v46 = vmax.f32 %v10877_v58, 0.0  ;;  %v10887_v9 = vld [vmem:[#allocation19_spill] sm:$0xff]  ;;  %v10890_v58 = vmax.f32 %v4024_v20, 0.0 }
  0xbd   : >> { %v4778_v25 = vsub.f32 %v10870_v28, %v4327_v18  ;;  %v4796_v48 = vsub.f32 %v10880_v54, %v4343_v1  ;;  %v10883_v18 = vld [vmem:[#allocation18_spill] sm:$0xff]  ;;  %v10896_v54 = vld [vmem:[#allocation87_spill] sm:$0xff] }
  0xbe   : >> { %v4763_v57 = vsub.f32 %v10868_v61, %v10866_v55  ;;  %v10872_v55 = vld [vmem:[#allocation81_spill] sm:$0xff]  ;;  %v10873_v61 = vld [vmem:[#allocation16_spill] sm:$0xff]  ;;  %v4791_v0 = vsub.f32 %v10878_v46, %v10876_v5  ;;  %v10884_v28 = vmax.f32 %v10883_v18, 0.0  ;;  %v10892_v5 = vld [vmem:[#allocation86_spill] sm:$0xff] }
  0xbf   : >> { %10871 = vst [vmem:[#allocation79_spill] sm:$0xff] %v4778_v25  ;;  %v10874_v4 = vmax.f32 %v10873_v61, 0.0  ;;  %10881 = vst [vmem:[#allocation16_spill] sm:$0xff] %v4796_v48  ;;  %v10886_v25 = vld [vmem:[#allocation85_spill] sm:$0xff]  ;;  %v10888_v61 = vmax.f32 %v10887_v9, 0.0  ;;  %v10893_v46 = vld [vmem:[#allocation20_spill] sm:$0xff] }
  0xc0   : >> { %10869 = vst [vmem:[#allocation14_spill] sm:$0xff] %v4763_v57  ;;  %10879 = vst [vmem:[#allocation81_spill] sm:$0xff] %v4791_v0  ;;  %v4801_v43 = vsub.f32 %v10884_v28, %v10882_v8  ;;  %v10894_v14 = vmax.f32 %v10893_v46, 0.0  ;;  %v10897_v48 = vld [vmem:[#allocation21_spill] sm:$0xff]  ;;  %v10900_v9 = vmax.f32 %v4036_v26, 0.0  ;;  %v10902_v28 = vld [vmem:[#allocation88_spill] sm:$0xff] }
  0xc1   : >> { %v4786_v57 = vsub.f32 %v10874_v4, %v10872_v55  ;;  %v4806_v55 = vsub.f32 %v10888_v61, %v10886_v25  ;;  %v4811_v4 = vsub.f32 %v10890_v58, %v4359_v12  ;;  %v10898_v18 = vmax.f32 %v10897_v48, 0.0  ;;  %v10903_v61 = vld [vmem:[#allocation22_spill] sm:$0xff]  ;;  %v10906_v58 = vld [vmem:[#allocation89_spill] sm:$0xff]  ;;  %v406_v0 = vld [vmem:[%s4260_s12 + $0xb0] sm:$0xff] }
  0xc2   : >> { %10885 = vst [vmem:[#allocation82_spill] sm:$0xff] %v4801_v43  ;;  %v4816_v1 = vsub.f32 %v10894_v14, %v10892_v5  ;;  %v4826_v25 = vsub.f32 %v10900_v9, %v4375_v40  ;;  %v10904_v20 = vmax.f32 %v10903_v61, 0.0  ;;  %v10910_v48 = vmax.f32 %v4048_v32, 0.0  ;;  %v10916_v9 = vld [vmem:[#allocation92_spill] sm:$0xff]  ;;  %v405_v43 = vld [vmem:[%s4260_s12 + $0xa8] sm:$0xff] }
  0xc3   : >> { %10875 = vst [vmem:[#allocation15_spill] sm:$0xff] %v4786_v57  ;;  %10889 = vst [vmem:[#allocation17_spill] sm:$0xff] %v4806_v55  ;;  %v4821_v8 = vsub.f32 %v10898_v18, %v10896_v54  ;;  %v10912_v54 = vld [vmem:[#allocation91_spill] sm:$0xff]  ;;  %v10913_v18 = vld [vmem:[#allocation24_spill] sm:$0xff] }
  0xc4   : >> { %10891 = vst [vmem:[#allocation84_spill] sm:$0xff] %v4811_v4  ;;  %10895 = vst [vmem:[#allocation18_spill] sm:$0xff] %v4816_v1  ;;  %v4831_v12 = vsub.f32 %v10904_v20, %v10902_v28  ;;  %v10907_v4 = vld [vmem:[#allocation23_spill] sm:$0xff]  ;;  %v4841_v14 = vsub.f32 %v10910_v48, %v4391_v24  ;;  %v10914_v26 = vmax.f32 %v10913_v18, 0.0  ;;  %v10926_v48 = vld [vmem:[#allocation94_spill] sm:$0xff] }
  0xc5   : >> { %10899 = vst [vmem:[#allocation85_spill] sm:$0xff] %v4821_v8  ;;  %10901 = vst [vmem:[#allocation19_spill] sm:$0xff] %v4826_v25  ;;  %v10908_v46 = vmax.f32 %v10907_v4, 0.0  ;;  %v10917_v25 = vld [vmem:[#allocation25_spill] sm:$0xff]  ;;  %v10920_v4 = vmax.f32 %v4060_v38, 0.0 }
  0xc6   : >> { %10905 = vst [vmem:[#allocation86_spill] sm:$0xff] %v4831_v12  ;;  %10911 = vst [vmem:[#allocation87_spill] sm:$0xff] %v4841_v14  ;;  %v4846_v40 = vsub.f32 %v10914_v26, %v10912_v54  ;;  %v10918_v61 = vmax.f32 %v10917_v25, 0.0  ;;  %v10927_v14 = vld [vmem:[#allocation27_spill] sm:$0xff]  ;;  %v10930_v25 = vmax.f32 %v4072_v44, 0.0 }
  0xc7   : >> { %v4836_v5 = vsub.f32 %v10908_v46, %v10906_v58  ;;  %v4856_v20 = vsub.f32 %v10920_v4, %v4407_v23  ;;  %v10922_v58 = vld [vmem:[#allocation93_spill] sm:$0xff]  ;;  %v10923_v46 = vld [vmem:[#allocation26_spill] sm:$0xff]  ;;  %v10928_v18 = vmax.f32 %v10927_v14, 0.0  ;;  %v10940_v14 = vmax.f32 %v4084_v50, 0.0 }
  0xc8   : >> { %10915 = vst [vmem:[#allocation21_spill] sm:$0xff] %v4846_v40  ;;  %v4851_v28 = vsub.f32 %v10918_v61, %v10916_v9  ;;  %v10924_v32 = vmax.f32 %v10923_v46, 0.0  ;;  %v4871_v26 = vsub.f32 %v10930_v25, %v4423_v52  ;;  %v10932_v9 = vld [vmem:[#allocation96_spill] sm:$0xff]  ;;  %v10936_v4 = vld [vmem:[#allocation97_spill] sm:$0xff] }
  0xc9   : >> { %10909 = vst [vmem:[#allocation20_spill] sm:$0xff] %v4836_v5  ;;  %10921 = vst [vmem:[#allocation22_spill] sm:$0xff] %v4856_v20  ;;  %v4866_v54 = vsub.f32 %v10928_v18, %v10926_v48  ;;  %v10933_v61 = vld [vmem:[#allocation28_spill] sm:$0xff]  ;;  %v10937_v20 = vld [vmem:[#allocation29_spill] sm:$0xff] }
  0xca   : >> { %10919 = vst [vmem:[#allocation88_spill] sm:$0xff] %v4851_v28  ;;  %v4861_v24 = vsub.f32 %v10924_v32, %v10922_v58  ;;  %10931 = vst [vmem:[#allocation91_spill] sm:$0xff] %v4871_v26  ;;  %v10934_v38 = vmax.f32 %v10933_v61, 0.0  ;;  %v10938_v46 = vmax.f32 %v10937_v20, 0.0  ;;  %v4886_v32 = vsub.f32 %v10940_v14, %v4439_v42  ;;  %v10942_v48 = vld [vmem:[#allocation99_spill] sm:$0xff]  ;;  %v10943_v18 = vld [vmem:[#allocation30_spill] sm:$0xff] }
  0xcb   : >> { %10929 = vst [vmem:[#allocation23_spill] sm:$0xff] %v4866_v54  ;;  %v10944_v44 = vmax.f32 %v10943_v18, 0.0  ;;  %v10946_v25 = vld [vmem:[#allocation100_spill] sm:$0xff]  ;;  %v10947_v26 = vld [vmem:[#allocation31_spill] sm:$0xff]  ;;  %v399_v28 = vld [vmem:[%s4260_s12 + $0x78] sm:$0xff] }
  0xcc   : >> { %10925 = vst [vmem:[#allocation89_spill] sm:$0xff] %v4861_v24  ;;  %v4876_v23 = vsub.f32 %v10934_v38, %v10932_v9  ;;  %v4881_v58 = vsub.f32 %v10938_v46, %v10936_v4  ;;  %10941 = vst [vmem:[#allocation25_spill] sm:$0xff] %v4886_v32  ;;  %v10948_v61 = vmax.f32 %v10947_v26, 0.0  ;;  %v10950_v38 = vld [vmem:[#allocation101_spill] sm:$0xff]  ;;  %v10954_v46 = vld [vmem:[#allocation102_spill] sm:$0xff] }
  0xcd   : >> { %v4891_v52 = vsub.f32 %v10944_v44, %v10942_v48  ;;  %v10958_v14 = vld [vmem:[#allocation103_spill] sm:$0xff]  ;;  %v10959_v32 = vld [vmem:[#allocation34_spill] sm:$0xff]  ;;  %v10962_v44 = vld [vmem:[#allocation105_spill] sm:$0xff] }
  0xce   : >> { %10935 = vst [vmem:[#allocation24_spill] sm:$0xff] %v4876_v23  ;;  %10939 = vst [vmem:[#allocation92_spill] sm:$0xff] %v4881_v58  ;;  %v4896_v9 = vsub.f32 %v10948_v61, %v10946_v25  ;;  %v10951_v23 = vld [vmem:[#allocation32_spill] sm:$0xff]  ;;  %v10955_v58 = vld [vmem:[#allocation33_spill] sm:$0xff]  ;;  %v10960_v18 = vmax.f32 %v10959_v32, 0.0 }
  0xcf   : >> { %10945 = vst [vmem:[#allocation93_spill] sm:$0xff] %v4891_v52  ;;  %v10952_v20 = vmax.f32 %v10951_v23, 0.0  ;;  %v10956_v50 = vmax.f32 %v10955_v58, 0.0  ;;  %v10963_v52 = vld [vmem:[#allocation35_spill] sm:$0xff]  ;;  %v10966_v61 = vld [vmem:[#allocation106_spill] sm:$0xff] }
  0xd0   : >> { %10949 = vst [vmem:[#allocation26_spill] sm:$0xff] %v4896_v9  ;;  %v4911_v48 = vsub.f32 %v10960_v18, %v10958_v14  ;;  %v10964_v26 = vmax.f32 %v10963_v52, 0.0  ;;  %v10967_v9 = vld [vmem:[#allocation36_spill] sm:$0xff]  ;;  %v10978_v18 = vld [vmem:[#allocation110_spill] sm:$0xff]  ;;  %v397_v24 = vld [vmem:[%s4260_s12 + $0x68] sm:$0xff] }
  0xd1   : >> { %v4901_v4 = vsub.f32 %v10952_v20, %v10950_v38  ;;  %v4906_v42 = vsub.f32 %v10956_v50, %v10954_v46  ;;  %v10968_v23 = vmax.f32 %v10967_v9, 0.0  ;;  %v10970_v20 = vld [vmem:[#allocation107_spill] sm:$0xff]  ;;  %v10974_v50 = vld [vmem:[#allocation109_spill] sm:$0xff] }
  0xd2   : >> { %10961 = vst [vmem:[#allocation96_spill] sm:$0xff] %v4911_v48  ;;  %v4916_v25 = vsub.f32 %v10964_v26, %v10962_v44  ;;  %v10979_v48 = vld [vmem:[#allocation39_spill] sm:$0xff] }
  0xd3   : >> { %10953 = vst [vmem:[#allocation94_spill] sm:$0xff] %v4901_v4  ;;  %10957 = vst [vmem:[#allocation27_spill] sm:$0xff] %v4906_v42  ;;  %v4921_v38 = vsub.f32 %v10968_v23, %v10966_v61  ;;  %v10971_v4 = vld [vmem:[#allocation37_spill] sm:$0xff]  ;;  %v10975_v42 = vld [vmem:[#allocation38_spill] sm:$0xff]  ;;  %v10980_v52 = vmax.f32 %v10979_v48, 0.0 }
  0xd4   : >> { %10965 = vst [vmem:[#allocation28_spill] sm:$0xff] %v4916_v25  ;;  %v10972_v58 = vmax.f32 %v10971_v4, 0.0  ;;  %v10976_v32 = vmax.f32 %v10975_v42, 0.0  ;;  %v10982_v26 = vld [vmem:[#allocation111_spill] sm:$0xff]  ;;  %v10983_v25 = vld [vmem:[#allocation40_spill] sm:$0xff] }
  0xd5   : >> { %10969 = vst [vmem:[#allocation97_spill] sm:$0xff] %v4921_v38  ;;  %v4936_v44 = vsub.f32 %v10980_v52, %v10978_v18  ;;  %v10984_v9 = vmax.f32 %v10983_v25, 0.0  ;;  %v10986_v23 = vld [vmem:[#allocation112_spill] sm:$0xff]  ;;  %v10987_v38 = vld [vmem:[#allocation41_spill] sm:$0xff]  ;;  %v10998_v52 = vld [vmem:[#allocation115_spill] sm:$0xff] }
  0xd6   : >> { %v4926_v46 = vsub.f32 %v10972_v58, %v10970_v20  ;;  %v4931_v14 = vsub.f32 %v10976_v32, %v10974_v50  ;;  %v10988_v4 = vmax.f32 %v10987_v38, 0.0  ;;  %v10990_v58 = vld [vmem:[#allocation113_spill] sm:$0xff]  ;;  %v10994_v32 = vld [vmem:[#allocation114_spill] sm:$0xff] }
  0xd7   : >> { %10981 = vst [vmem:[#allocation30_spill] sm:$0xff] %v4936_v44  ;;  %v4941_v61 = vsub.f32 %v10984_v9, %v10982_v26  ;;  %v10999_v44 = vld [vmem:[#allocation44_spill] sm:$0xff] }
  0xd8   : >> { %10973 = vst [vmem:[#allocation29_spill] sm:$0xff] %v4926_v46  ;;  %10977 = vst [vmem:[#allocation99_spill] sm:$0xff] %v4931_v14  ;;  %v4946_v20 = vsub.f32 %v10988_v4, %v10986_v23  ;;  %v10991_v46 = vld [vmem:[#allocation42_spill] sm:$0xff]  ;;  %v10995_v14 = vld [vmem:[#allocation43_spill] sm:$0xff]  ;;  %v11000_v25 = vmax.f32 %v10999_v44, 0.0 }
  0xd9   : >> { %10985 = vst [vmem:[#allocation100_spill] sm:$0xff] %v4941_v61  ;;  %v10992_v42 = vmax.f32 %v10991_v46, 0.0  ;;  %v10996_v48 = vmax.f32 %v10995_v14, 0.0  ;;  %v11002_v9 = vld [vmem:[#allocation116_spill] sm:$0xff]  ;;  %v11003_v61 = vld [vmem:[#allocation45_spill] sm:$0xff] }
  0xda   : >> { %10989 = vst [vmem:[#allocation31_spill] sm:$0xff] %v4946_v20  ;;  %v4961_v26 = vsub.f32 %v11000_v25, %v10998_v52  ;;  %v11004_v38 = vmax.f32 %v11003_v61, 0.0  ;;  %v11006_v4 = vld [vmem:[#allocation117_spill] sm:$0xff]  ;;  %v11007_v20 = vld [vmem:[#allocation46_spill] sm:$0xff]  ;;  %v11018_v25 = vld [vmem:[#allocation120_spill] sm:$0xff] }
  0xdb   : >> { %v4951_v50 = vsub.f32 %v10992_v42, %v10990_v58  ;;  %v4956_v18 = vsub.f32 %v10996_v48, %v10994_v32  ;;  %v11008_v46 = vmax.f32 %v11007_v20, 0.0  ;;  %v11010_v42 = vld [vmem:[#allocation118_spill] sm:$0xff]  ;;  %v11014_v48 = vld [vmem:[#allocation119_spill] sm:$0xff] }
  0xdc   : >> { %11001 = vst [vmem:[#allocation102_spill] sm:$0xff] %v4961_v26  ;;  %v4966_v23 = vsub.f32 %v11004_v38, %v11002_v9  ;;  %v11019_v26 = vld [vmem:[#allocation49_spill] sm:$0xff]  ;;  %v11022_v38 = vld [vmem:[#allocation122_spill] sm:$0xff] }
  0xdd   : >> { %10993 = vst [vmem:[#allocation101_spill] sm:$0xff] %v4951_v50  ;;  %10997 = vst [vmem:[#allocation32_spill] sm:$0xff] %v4956_v18  ;;  %v4971_v58 = vsub.f32 %v11008_v46, %v11006_v4  ;;  %v11011_v50 = vld [vmem:[#allocation47_spill] sm:$0xff]  ;;  %v11015_v18 = vld [vmem:[#allocation48_spill] sm:$0xff]  ;;  %v11020_v61 = vmax.f32 %v11019_v26, 0.0 }
  0xde   : >> { %11005 = vst [vmem:[#allocation33_spill] sm:$0xff] %v4966_v23  ;;  %v11012_v14 = vmax.f32 %v11011_v50, 0.0  ;;  %v11016_v44 = vmax.f32 %v11015_v18, 0.0  ;;  %v11023_v23 = vld [vmem:[#allocation50_spill] sm:$0xff]  ;;  %v11026_v46 = vld [vmem:[#allocation123_spill] sm:$0xff] }
  0xdf   : >> { %11009 = vst [vmem:[#allocation103_spill] sm:$0xff] %v4971_v58  ;;  %v4986_v9 = vsub.f32 %v11020_v61, %v11018_v25  ;;  %v11024_v20 = vmax.f32 %v11023_v23, 0.0  ;;  %v11027_v58 = vld [vmem:[#allocation51_spill] sm:$0xff] }
  0xe0   : >> { %v4976_v32 = vsub.f32 %v11012_v14, %v11010_v42  ;;  %v4981_v52 = vsub.f32 %v11016_v44, %v11014_v48  ;;  %v11028_v50 = vmax.f32 %v11027_v58, 0.0  ;;  %v11030_v14 = vld [vmem:[#allocation124_spill] sm:$0xff]  ;;  %v11034_v44 = vld [vmem:[#allocation126_spill] sm:$0xff]  ;;  %v11038_v61 = vld [vmem:[#allocation127_spill] sm:$0xff] }
  0xe1   : >> { %11021 = vst [vmem:[#allocation35_spill] sm:$0xff] %v4986_v9  ;;  %v4991_v4 = vsub.f32 %v11024_v20, %v11022_v38  ;;  %v11039_v9 = vld [vmem:[#allocation54_spill] sm:$0xff]  ;;  %v11042_v20 = vld [vmem:[#allocation128_spill] sm:$0xff] }
  0xe2   : >> { %11013 = vst [vmem:[#allocation34_spill] sm:$0xff] %v4976_v32  ;;  %11017 = vst [vmem:[#allocation105_spill] sm:$0xff] %v4981_v52  ;;  %v4996_v42 = vsub.f32 %v11028_v50, %v11026_v46  ;;  %v11031_v32 = vld [vmem:[#allocation52_spill] sm:$0xff]  ;;  %v11035_v52 = vld [vmem:[#allocation53_spill] sm:$0xff]  ;;  %v11040_v23 = vmax.f32 %v11039_v9, 0.0 }
  0xe3   : >> { %11025 = vst [vmem:[#allocation106_spill] sm:$0xff] %v4991_v4  ;;  %v11032_v18 = vmax.f32 %v11031_v32, 0.0  ;;  %v11036_v26 = vmax.f32 %v11035_v52, 0.0  ;;  %v11043_v4 = vld [vmem:[#allocation55_spill] sm:$0xff]  ;;  %v11046_v50 = vld [vmem:[#allocation130_spill] sm:$0xff] }
  0xe4   : >> { %11029 = vst [vmem:[#allocation36_spill] sm:$0xff] %v4996_v42  ;;  %v5011_v38 = vsub.f32 %v11040_v23, %v11038_v61  ;;  %v11044_v58 = vmax.f32 %v11043_v4, 0.0  ;;  %v11047_v42 = vld [vmem:[#allocation56_spill] sm:$0xff]  ;;  %v11058_v23 = vld [vmem:[#allocation134_spill] sm:$0xff] }
  0xe5   : >> { %v5001_v48 = vsub.f32 %v11032_v18, %v11030_v14  ;;  %v5006_v25 = vsub.f32 %v11036_v26, %v11034_v44  ;;  %v11048_v32 = vmax.f32 %v11047_v42, 0.0  ;;  %v11050_v18 = vld [vmem:[#allocation131_spill] sm:$0xff]  ;;  %v11054_v26 = vld [vmem:[#allocation132_spill] sm:$0xff] }
  0xe6   : >> { %11041 = vst [vmem:[#allocation109_spill] sm:$0xff] %v5011_v38  ;;  %v5016_v46 = vsub.f32 %v11044_v58, %v11042_v20  ;;  %v11059_v38 = vld [vmem:[#allocation59_spill] sm:$0xff] }
  0xe7   : >> { %11033 = vst [vmem:[#allocation107_spill] sm:$0xff] %v5001_v48  ;;  %11037 = vst [vmem:[#allocation37_spill] sm:$0xff] %v5006_v25  ;;  %v5021_v14 = vsub.f32 %v11048_v32, %v11046_v50  ;;  %v11051_v48 = vld [vmem:[#allocation57_spill] sm:$0xff]  ;;  %v11055_v25 = vld [vmem:[#allocation58_spill] sm:$0xff]  ;;  %v11060_v4 = vmax.f32 %v11059_v38, 0.0 }
  0xe8   : >> { %11045 = vst [vmem:[#allocation38_spill] sm:$0xff] %v5016_v46  ;;  %v11052_v52 = vmax.f32 %v11051_v48, 0.0  ;;  %v11056_v9 = vmax.f32 %v11055_v25, 0.0  ;;  %v11062_v58 = vld [vmem:[#allocation135_spill] sm:$0xff]  ;;  %v11063_v46 = vld [vmem:[#allocation60_spill] sm:$0xff] }
  0xe9   : >> { %11049 = vst [vmem:[#allocation110_spill] sm:$0xff] %v5021_v14  ;;  %v5036_v20 = vsub.f32 %v11060_v4, %v11058_v23  ;;  %v11064_v42 = vmax.f32 %v11063_v46, 0.0  ;;  %v11066_v32 = vld [vmem:[#allocation136_spill] sm:$0xff]  ;;  %v11067_v14 = vld [vmem:[#allocation61_spill] sm:$0xff]  ;;  %v11078_v4 = vld [vmem:[#allocation139_spill] sm:$0xff] }
  0xea   : >> { %v5026_v44 = vsub.f32 %v11052_v52, %v11050_v18  ;;  %v5031_v61 = vsub.f32 %v11056_v9, %v11054_v26  ;;  %v11068_v48 = vmax.f32 %v11067_v14, 0.0  ;;  %v11070_v52 = vld [vmem:[#allocation137_spill] sm:$0xff]  ;;  %v11074_v9 = vld [vmem:[#allocation138_spill] sm:$0xff]  ;;  %v11082_v14 = vmax.f32 %v10831_v36, 0.0 }
  0xeb   : >> { %11061 = vst [vmem:[#allocation40_spill] sm:$0xff] %v5036_v20  ;;  %v5041_v50 = vsub.f32 %v11064_v42, %v11062_v58  ;;  %v11079_v20 = vld [vmem:[#allocation64_spill] sm:$0xff] }
  0xec   : >> { %11053 = vst [vmem:[#allocation39_spill] sm:$0xff] %v5026_v44  ;;  %11057 = vst [vmem:[#allocation111_spill] sm:$0xff] %v5031_v61  ;;  %v5046_v18 = vsub.f32 %v11068_v48, %v11066_v32  ;;  %v11071_v44 = vld [vmem:[#allocation62_spill] sm:$0xff]  ;;  %v11075_v61 = vld [vmem:[#allocation63_spill] sm:$0xff]  ;;  %v11080_v46 = vmax.f32 %v11079_v20, 0.0  ;;  %v5066_v42 = vsub.f32 %v11082_v14, %v4625_v56 }
  0xed   : >> { %11065 = vst [vmem:[#allocation112_spill] sm:$0xff] %v5041_v50  ;;  %v11072_v25 = vmax.f32 %v11071_v44, 0.0  ;;  %v11076_v38 = vmax.f32 %v11075_v61, 0.0  ;;  %v11084_v32 = vld [vmem:[#allocation65_spill] sm:$0xff]  ;;  %v11085_v48 = vld [vmem:[#allocation66_spill] sm:$0xff]  ;;  %v401_v50 = vld [vmem:[%s4260_s12 + $0x88] sm:$0xff] }
  0xee   : >> { %11069 = vst [vmem:[#allocation41_spill] sm:$0xff] %v5046_v18  ;;  %v5061_v58 = vsub.f32 %v11080_v46, %v11078_v4  ;;  %11083 = vst [vmem:[#allocation43_spill] sm:$0xff] %v5066_v42  ;;  %v11086_v44 = vmax.f32 %v11085_v48, 0.0  ;;  %v11095_v46 = vld [vmem:[#allocation141_spill] sm:$0xff]  ;;  %v11099_v14 = vld [vmem:[#allocation142_spill] sm:$0xff] }
  0xef   : >> { %v5051_v26 = vsub.f32 %v11072_v25, %v11070_v52  ;;  %v5056_v23 = vsub.f32 %v11076_v38, %v11074_v9  ;;  %v11088_v25 = vld [vmem:[#allocation140_spill] sm:$0xff]  ;;  %v11100_v42 = vld [vmem:[#allocation70_spill] sm:$0xff] }
  0xf0   : >> { %11081 = vst [vmem:[#allocation114_spill] sm:$0xff] %v5061_v58  ;;  %v5071_v52 = vsub.f32 %v11086_v44, %v11084_v32  ;;  %v11092_v38 = vld [vmem:[#allocation68_spill] sm:$0xff]  ;;  %v11096_v58 = vld [vmem:[#allocation69_spill] sm:$0xff]  ;;  %v11101_v48 = vmax.f32 %v11100_v42, 0.0  ;;  %v11110_v42 = vmax.f32 %v4269_v22, 0.0  ;;  %v396_v18 = vld [vmem:[%s4260_s12 + $0x60] sm:$0xff] }
  0xf1   : >> { %11073 = vst [vmem:[#allocation113_spill] sm:$0xff] %v5051_v26  ;;  %11077 = vst [vmem:[#allocation42_spill] sm:$0xff] %v5056_v23  ;;  %v11089_v26 = vld [vmem:[#allocation67_spill] sm:$0xff]  ;;  %v11093_v20 = vmax.f32 %v11092_v38, 0.0  ;;  %v11097_v36 = vmax.f32 %v11096_v58, 0.0 }
  0xf2   : >> { %11087 = vst [vmem:[#allocation115_spill] sm:$0xff] %v5071_v52  ;;  %v11090_v61 = vmax.f32 %v11089_v26, 0.0  ;;  %v5091_v32 = vsub.f32 %v11101_v48, %v11099_v14  ;;  %v11103_v26 = vmax.f32 %v4252_v11, 0.0  ;;  %v11116_v14 = vld [vmem:[#allocation75_spill] sm:$0xff]  ;;  %v11119_v48 = vmax.f32 %v4304_v35, 0.0  ;;  %v398_v52 = vld [vmem:[%s4260_s12 + $0x70] sm:$0xff] }
  0xf3   : >> { %v5081_v4 = vsub.f32 %v11093_v20, %v4638_v10  ;;  %v5086_v56 = vsub.f32 %v11097_v36, %v11095_v46  ;;  %v5111_v20 = vsub.f32 %v11110_v42, %v4667_v51  ;;  %v11112_v46 = vld [vmem:[#allocation73_spill] sm:$0xff]  ;;  %v11115_v36 = vld [vmem:[#allocation74_spill] sm:$0xff]  ;;  %v11128_v42 = vmax.f32 %v4352_v13, 0.0  ;;  %v11138_v13 = vld [vmem:[#allocation95_spill] sm:$0xff] }
  0xf4   : >> { %v5076_v9 = vsub.f32 %v11090_v61, %v11088_v25  ;;  %11102 = vst [vmem:[#allocation117_spill] sm:$0xff] %v5091_v32  ;;  %v5096_v44 = vsub.f32 %v11103_v26, %v4650_v3  ;;  %v11105_v25 = vmax.f32 %v10840_v6, 0.0  ;;  %v11107_v61 = vld [vmem:[#allocation72_spill] sm:$0xff]  ;;  %v11113_v11 = vmax.f32 %v11112_v46, 0.0 }
  0xf5   : >> { %11094 = vst [vmem:[#allocation116_spill] sm:$0xff] %v5081_v4  ;;  %11098 = vst [vmem:[#allocation45_spill] sm:$0xff] %v5086_v56  ;;  %v11108_v58 = vmax.f32 %v11107_v61, 0.0  ;;  %v11117_v6 = vmax.f32 %v11116_v14, 0.0  ;;  %v11121_v26 = vld [vmem:[#allocation80_spill] sm:$0xff]  ;;  %v11125_v61 = vld [vmem:[#allocation83_spill] sm:$0xff]  ;;  %v5141_v46 = vsub.f32 %v11128_v42, %v4701_v30 }
  0xf6   : >> { %11091 = vst [vmem:[#allocation44_spill] sm:$0xff] %v5076_v9  ;;  %11104 = vst [vmem:[#allocation46_spill] sm:$0xff] %v5096_v44  ;;  %v5101_v10 = vsub.f32 %v11105_v25, %v4653_v27  ;;  %v5116_v3 = vsub.f32 %v11113_v11, %v4670_v62  ;;  %v11122_v22 = vmax.f32 %v11121_v26, 0.0  ;;  %v11124_v25 = vld [vmem:[#allocation143_spill] sm:$0xff]  ;;  %v11130_v35 = vmax.f32 %v4368_v19, 0.0  ;;  %v11132_v11 = vld [vmem:[#allocation12_spill] sm:$0xff] }
  0xf7   : >> { %v5106_v38 = vsub.f32 %v11108_v58, %v4656_v21  ;;  %11111 = vst [vmem:[#allocation119_spill] sm:$0xff] %v5111_v20  ;;  %v5121_v27 = vsub.f32 %v11117_v6, %v11115_v36  ;;  %v5126_v21 = vsub.f32 %v11119_v48, %v4684_v33  ;;  %v11126_v58 = vmax.f32 %v11125_v61, 0.0  ;;  %11129 = vst [vmem:[#allocation123_spill] sm:$0xff] %v5141_v46  ;;  %v11133_v36 = vld [vmem:[#allocation90_spill] sm:$0xff]  ;;  %v5329_v46 = vld [vmem:[%s3976_s20 + $0xf0] sm:$0xff] }
  0xf8   : >> { %11106 = vst [vmem:[#allocation118_spill] sm:$0xff] %v5101_v10  ;;  %11114 = vst [vmem:[#allocation48_spill] sm:$0xff] %v5116_v3  ;;  %v5131_v51 = vsub.f32 %v11122_v22, %v4687_v29  ;;  %v5146_v33 = vsub.f32 %v11130_v35, %v4704_v59  ;;  %v11134_v29 = vmax.f32 %v11133_v36, 0.0  ;;  %v11136_v6 = vmax.f32 %v4400_v31, 0.0  ;;  %v11141_v59 = vld [vmem:[#allocation13_spill] sm:$0xff]  ;;  %v11142_v26 = vld [vmem:[#allocation98_spill] sm:$0xff] }
  0xf9   : >> { %11109 = vst [vmem:[#allocation47_spill] sm:$0xff] %v5106_v38  ;;  %11118 = vst [vmem:[#allocation120_spill] sm:$0xff] %v5121_v27  ;;  %v5136_v62 = vsub.f32 %v11126_v58, %v11124_v25  ;;  %v11139_v30 = vmax.f32 %v11138_v13, 0.0  ;;  %v11143_v22 = vmax.f32 %v11142_v26, 0.0  ;;  %v11145_v61 = vmax.f32 %v4448_v49, 0.0  ;;  %v11151_v35 = vld [vmem:[#allocation108_spill] sm:$0xff] }
  0xfa   : >> { %11120 = vst [vmem:[#allocation49_spill] sm:$0xff] %v5126_v21  ;;  %11123 = vst [vmem:[#allocation122_spill] sm:$0xff] %v5131_v51  ;;  %v5151_v14 = vsub.f32 %v11134_v29, %v11132_v11  ;;  %v5156_v48 = vsub.f32 %v11136_v6, %v4718_v63  ;;  %v11147_v63 = vld [vmem:[#allocation104_spill] sm:$0xff]  ;;  %v11152_v11 = vmax.f32 %v11151_v35, 0.0  ;;  %v11154_v29 = vmax.f32 %v4496_v53, 0.0  ;;  %v11163_v53 = vld [vmem:[#allocation125_spill] sm:$0xff] }
  0xfb   : >> { %11127 = vst [vmem:[#allocation50_spill] sm:$0xff] %v5136_v62  ;;  %11131 = vst [vmem:[#allocation51_spill] sm:$0xff] %v5146_v33  ;;  %v5161_v19 = vsub.f32 %v11139_v30, %v4721_v15  ;;  %v5166_v25 = vsub.f32 %v11143_v22, %v11141_v59  ;;  %v5171_v31 = vsub.f32 %v11145_v61, %v4735_v45  ;;  %v11148_v58 = vmax.f32 %v11147_v63, 0.0  ;;  %v11150_v15 = vld [vmem:[#allocation145_spill] sm:$0xff]  ;;  %v5231_v35 = vld [vmem:[%s3976_s20 + $0x20] sm:$0xff] }
  0xfc   : >> { %11135 = vst [vmem:[#allocation124_spill] sm:$0xff] %v5151_v14  ;;  %11137 = vst [vmem:[#allocation52_spill] sm:$0xff] %v5156_v48  ;;  %v5181_v36 = vsub.f32 %v11152_v11, %v11150_v15  ;;  %v5186_v49 = vsub.f32 %v11154_v29, %v4752_v7  ;;  %v11156_v45 = vmax.f32 %v4512_v47, 0.0  ;;  %v11160_v30 = vld [vmem:[#allocation121_spill] sm:$0xff]  ;;  %v11164_v7 = vmax.f32 %v11163_v53, 0.0  ;;  %v5225_v15 = vld [vmem:[%s3976_s20 + $0x10] sm:$0xff] }
  0xfd   : >> { %11140 = vst [vmem:[#allocation126_spill] sm:$0xff] %v5161_v19  ;;  %11144 = vst [vmem:[#allocation53_spill] sm:$0xff] %v5166_v25  ;;  %v5176_v42 = vsub.f32 %v11148_v58, %v4738_v39  ;;  %v11158_v39 = vmax.f32 %v4528_v41, 0.0  ;;  %v11161_v59 = vmax.f32 %v11160_v30, 0.0  ;;  %v11166_v47 = vld [vmem:[#allocation129_spill] sm:$0xff]  ;;  %v5219_v58 = vld [vmem:[%s3976_s20] sm:$0xff] }
  0xfe   : >> { %11146 = vst [vmem:[#allocation127_spill] sm:$0xff] %v5171_v31  ;;  %11153 = vst [vmem:[#allocation128_spill] sm:$0xff] %v5181_v36  ;;  %v5191_v6 = vsub.f32 %v11156_v45, %v4755_v2  ;;  %v5206_v22 = vsub.f32 %v11164_v7, %v4770_v34  ;;  %v11167_v2 = vmax.f32 %v11166_v47, 0.0  ;;  %v11169_v41 = vld [vmem:[#allocation133_spill] sm:$0xff]  ;;  %v5237_v11 = vld [vmem:[%s3976_s20 + $0x30] sm:$0xff] }
  0xff   : >> { %11149 = vst [vmem:[#allocation54_spill] sm:$0xff] %v5176_v42  ;;  %11155 = vst [vmem:[#allocation55_spill] sm:$0xff] %v5186_v49  ;;  %v5196_v13 = vsub.f32 %v11158_v39, %v4758_v16  ;;  %v5201_v26 = vsub.f32 %v11161_v59, %v4767_v17  ;;  %v11170_v16 = vmax.f32 %v11169_v41, 0.0  ;;  %v5222_v17 = vld [vmem:[%s3976_s20 + $0x8] sm:$0xff]  ;;  %v5228_v34 = vld [vmem:[%s3976_s20 + $0x18] sm:$0xff] }
 0x100   : >> { %11157 = vst [vmem:[#allocation130_spill] sm:$0xff] %v5191_v6  ;;  %11165 = vst [vmem:[#allocation57_spill] sm:$0xff] %v5206_v22  ;;  %v5211_v61 = vsub.f32 %v11167_v2, %v4773_v60  ;;  %v5234_v60 = vld [vmem:[%s3976_s20 + $0x28] sm:$0xff]  ;;  %v5240_v29 = vld [vmem:[%s3976_s20 + $0x38] sm:$0xff] }
 0x101   : >> { %11159 = vst [vmem:[#allocation56_spill] sm:$0xff] %v5196_v13  ;;  %11162 = vst [vmem:[#allocation131_spill] sm:$0xff] %v5201_v26  ;;  %v5216_v63 = vsub.f32 %v11170_v16, %v4781_v37  ;;  %v5243_v37 = vld [vmem:[%s3976_s20 + $0x40] sm:$0xff]  ;;  %v5246_v45 = vld [vmem:[%s3976_s20 + $0x48] sm:$0xff] }
 0x102   : >> { %11168 = vst [vmem:[#allocation132_spill] sm:$0xff] %v5211_v61  ;;  %11172 = vst [vmem:[#allocation134_spill] sm:$0xff] %v5234_v60  ;;  %v5250_v30 = vld [vmem:[%s3976_s20 + $0x50] sm:$0xff]  ;;  %v5253_v59 = vld [vmem:[%s3976_s20 + $0x58] sm:$0xff] }
 0x103   : >> { %11171 = vst [vmem:[#allocation58_spill] sm:$0xff] %v5216_v63  ;;  %11173 = vst [vmem:[#allocation59_spill] sm:$0xff] %v5237_v11  ;;  %v5256_v53 = vld [vmem:[%s3976_s20 + $0x60] sm:$0xff]  ;;  %v5262_v41 = vld [vmem:[%s3976_s20 + $0x68] sm:$0xff] }
 0x104   : >> { %v5265_v16 = vld [vmem:[%s3976_s20 + $0x70] sm:$0xff]  ;;  %v5268_v39 = vld [vmem:[%s3976_s20 + $0x78] sm:$0xff]  ;;  %v5274_v22 = vld [vmem:[%s3976_s20 + $0x80] sm:$0xff]  ;;  %11174 = vst [vmem:[#allocation135_spill] sm:$0xff] %v5329_v46  ;;  %v5407_v55 = vmul.f32 %v397_v24, %v5262_v41 }
 0x105   : >> { %v5277_v47 = vld [vmem:[%s3976_s20 + $0x88] sm:$0xff]  ;;  %v5280_v2 = vld [vmem:[%s3976_s20 + $0x90] sm:$0xff]  ;;  %v5286_v61 = vld [vmem:[%s3976_s20 + $0x98] sm:$0xff] }
 0x106   : >> { %v5289_v6 = vld [vmem:[%s3976_s20 + $0xa0] sm:$0xff]  ;;  %v5292_v7 = vld [vmem:[%s3976_s20 + $0xa8] sm:$0xff]  ;;  %v5298_v13 = vld [vmem:[%s3976_s20 + $0xb0] sm:$0xff] }
 0x107   : >> { %v5301_v63 = vld [vmem:[%s3976_s20 + $0xb8] sm:$0xff]  ;;  %v5304_v42 = vld [vmem:[%s3976_s20 + $0xc0] sm:$0xff]  ;;  %v5310_v36 = vld [vmem:[%s3976_s20 + $0xc8] sm:$0xff] }
 0x108   : >> { %v5313_v26 = vld [vmem:[%s3976_s20 + $0xd0] sm:$0xff]  ;;  %v5316_v19 = vld [vmem:[%s3976_s20 + $0xd8] sm:$0xff]  ;;  %v384_v48 = vld [vmem:[%s4260_s12] sm:$0xff] }
 0x109   : >> { %v5323_v31 = vld [vmem:[%s3976_s20 + $0xe0] sm:$0xff]  ;;  %v5326_v49 = vld [vmem:[%s3976_s20 + $0xe8] sm:$0xff]  ;;  %v5336_v33 = vld [vmem:[%s3976_s20 + $0xf8] sm:$0xff]  ;;  %v640_v4 = vmul.f32 %v384_v48, %v5219_v58 }
 0x10a   : >> { %v385_v62 = vld [vmem:[%s4260_s12 + $0x8] sm:$0xff]  ;;  %11175 = vst [vmem:[#allocation60_spill] sm:$0xff] %v5336_v33  ;;  %v5339_v25 = vld [vmem:[%s3976_s20 + $0x100] sm:$0xff]  ;;  %v386_v27 = vld [vmem:[%s4260_s12 + $0x10] sm:$0xff] }
 0x10b   : >> { %11176 = vst [vmem:[#allocation136_spill] sm:$0xff] %v5339_v25  ;;  %v387_v3 = vld [vmem:[%s4260_s12 + $0x18] sm:$0xff]  ;;  %v388_v21 = vld [vmem:[%s4260_s12 + $0x20] sm:$0xff]  ;;  %v389_v10 = vld [vmem:[%s4260_s12 + $0x28] sm:$0xff]  ;;  %v641_v44 = vmul.f32 %v385_v62, %v5222_v17  ;;  %v642_v54 = vmul.f32 %v386_v27, %v5225_v15 }
 0x10c   : >> { %v390_v14 = vld [vmem:[%s4260_s12 + $0x30] sm:$0xff]  ;;  %v391_v20 = vld [vmem:[%s4260_s12 + $0x38] sm:$0xff]  ;;  %v392_v38 = vld [vmem:[%s4260_s12 + $0x40] sm:$0xff]  ;;  %v643_v51 = vmul.f32 %v387_v3, %v5228_v34  ;;  %v644_v23 = vmul.f32 %v388_v21, %v5231_v35  ;;  %v645_v62 = vmul.f32 %v389_v10, %v5234_v60  ;;  %v11177_v10 = vmax.f32 %v5219_v58, 0.0 }
 0x10d   : >> { %v393_v9 = vld [vmem:[%s4260_s12 + $0x48] sm:$0xff]  ;;  %v394_v32 = vld [vmem:[%s4260_s12 + $0x50] sm:$0xff]  ;;  %v395_v56 = vld [vmem:[%s4260_s12 + $0x58] sm:$0xff]  ;;  %v5373_v40 = vmul.f32 %v390_v14, %v5237_v11  ;;  %v5380_v3 = vmul.f32 %v391_v20, %v5240_v29  ;;  %v5383_v12 = vmul.f32 %v392_v38, %v5243_v37  ;;  %v5399_v20 = vmul.f32 %v396_v18, %v5256_v53 }
 0x10e   : >> { %v400_v48 = vld [vmem:[%s4260_s12 + $0x80] sm:$0xff]  ;;  %v402_v27 = vld [vmem:[%s4260_s12 + $0x90] sm:$0xff]  ;;  %v5386_v21 = vmul.f32 %v393_v9, %v5246_v45  ;;  %v5390_v14 = vsub.f32 %v11177_v10, %v640_v4  ;;  %v5393_v5 = vmul.f32 %v394_v32, %v5250_v30  ;;  %v5396_v8 = vmul.f32 %v395_v56, %v5253_v59  ;;  %v403_v9 = vld [vmem:[%s4260_s12 + $0x98] sm:$0xff] }
 0x10f   : >> { %v11179_v38 = vmax.f32 %v5222_v17, 0.0  ;;  %v5410_v4 = vmul.f32 %v398_v52, %v5265_v16  ;;  %v5413_v32 = vmul.f32 %v399_v28, %v5268_v39  ;;  %v11181_v56 = vmax.f32 %v5225_v15, 0.0  ;;  %v404_v18 = vld [vmem:[%s4260_s12 + $0xa0] sm:$0xff] }
 0x110   : >> { %11178 = vst [vmem:[#allocation61_spill] sm:$0xff] %v5390_v14  ;;  %v5428_v24 = vmul.f32 %v402_v27, %v5280_v2  ;;  %v11183_v52 = vmax.f32 %v5228_v34, 0.0  ;;  %v5444_v27 = vmul.f32 %v403_v9, %v5286_v61  ;;  %v5457_v9 = vmul.f32 %v405_v43, %v5292_v7  ;;  %v410_v43 = vld [vmem:[%s4260_s12 + $0xd0] sm:$0xff] }
 0x111   : >> { %v5403_v1 = vsub.f32 %v11179_v38, %v641_v44  ;;  %v5417_v10 = vsub.f32 %v11181_v56, %v642_v54  ;;  %v5422_v44 = vmul.f32 %v400_v48, %v5274_v22  ;;  %v5425_v38 = vmul.f32 %v401_v50, %v5277_v47  ;;  %v5528_v50 = vld [vmem:[%s3976_s20 + $0x120] sm:$0xff] }
 0x112   : >> { %v5432_v28 = vsub.f32 %v11183_v52, %v643_v51  ;;  %v11185_v54 = vmax.f32 %v5231_v35, 0.0  ;;  %v5472_v14 = vmul.f32 %v406_v0, %v5298_v13  ;;  %v413_v51 = vld [vmem:[%s4260_s12 + $0xe8] sm:$0xff]  ;;  %v5508_v48 = vmul.f32 %v410_v43, %v5313_v26  ;;  %v5524_v43 = vld [vmem:[%s3976_s20 + $0x118] sm:$0xff]  ;;  %11194 = vst [vmem:[#allocation67_spill] sm:$0xff] %v5528_v50 }
 0x113   : >> { %11180 = vst [vmem:[#allocation137_spill] sm:$0xff] %v5403_v1  ;;  %11182 = vst [vmem:[#allocation62_spill] sm:$0xff] %v5417_v10  ;;  %v407_v10 = vld [vmem:[%s4260_s12 + $0xb8] sm:$0xff]  ;;  %v5565_v25 = vmul.f32 %v413_v51, %v5326_v49  ;;  %v5583_v51 = vld [vmem:[%s3976_s20 + $0x170] sm:$0xff] }
 0x114   : >> { %11184 = vst [vmem:[#allocation138_spill] sm:$0xff] %v5432_v28  ;;  %v5437_v56 = vsub.f32 %v11185_v54, %v644_v23  ;;  %v408_v23 = vld [vmem:[%s4260_s12 + $0xc0] sm:$0xff]  ;;  %v5451_v54 = vmul.f32 %v404_v18, %v5289_v6  ;;  %v11187_v18 = vmax.f32 %v5234_v60, 0.0  ;;  %11193 = vst [vmem:[#allocation140_spill] sm:$0xff] %v5524_v43  ;;  %v415_v60 = vld [vmem:[%s4260_s12 + $0xf8] sm:$0xff] }
 0x115   : >> { %v5485_v0 = vmul.f32 %v408_v23, %v5304_v42  ;;  %v5546_v43 = vld [vmem:[%s3976_s20 + $0x138] sm:$0xff]  ;;  %11205 = vst [vmem:[#allocation80_spill] sm:$0xff] %v5583_v51  ;;  %v5604_v51 = vld [vmem:[%s3976_s20 + $0x190] sm:$0xff] }
 0x116   : >> { %11186 = vst [vmem:[#allocation63_spill] sm:$0xff] %v5437_v56  ;;  %v409_v56 = vld [vmem:[%s4260_s12 + $0xc8] sm:$0xff]  ;;  %v5465_v28 = vsub.f32 %v11187_v18, %v645_v62  ;;  %v411_v62 = vld [vmem:[%s4260_s12 + $0xd8] sm:$0xff]  ;;  %v5479_v18 = vmul.f32 %v407_v10, %v5301_v63  ;;  %v11189_v10 = vmax.f32 %v5237_v11, 0.0  ;;  %11199 = vst [vmem:[#allocation142_spill] sm:$0xff] %v5546_v43  ;;  %v11208_v11 = vmax.f32 %v5243_v37, 0.0 }
 0x117   : >> { %v5501_v52 = vmul.f32 %v409_v56, %v5310_v36  ;;  %v5513_v56 = vld [vmem:[%s3976_s20 + $0x108] sm:$0xff]  ;;  %v11268_v43 = vmax.f32 %v5298_v13, 0.0 }
 0x118   : >> { %11188 = vst [vmem:[#allocation139_spill] sm:$0xff] %v5465_v28  ;;  %v412_v28 = vld [vmem:[%s4260_s12 + $0xe0] sm:$0xff]  ;;  %v5494_v57 = vsub.f32 %v11189_v10, %v5373_v40  ;;  %v414_v10 = vld [vmem:[%s4260_s12 + $0xf0] sm:$0xff]  ;;  %11191 = vst [vmem:[#allocation65_spill] sm:$0xff] %v5513_v56 }
 0x119   : >> { %v5520_v40 = vld [vmem:[%s3976_s20 + $0x110] sm:$0xff]  ;;  %v5538_v56 = vld [vmem:[%s3976_s20 + $0x128] sm:$0xff]  ;;  %v5550_v50 = vmul.f32 %v412_v28, %v5323_v31  ;;  %v5568_v28 = vld [vmem:[%s3976_s20 + $0x158] sm:$0xff]  ;;  %v5580_v23 = vmul.f32 %v414_v10, %v5329_v46  ;;  %v5597_v10 = vsub.f32 %v11208_v11, %v5383_v12 }
 0x11a   : >> { %11190 = vst [vmem:[#allocation64_spill] sm:$0xff] %v5494_v57  ;;  %v5517_v57 = vmul.f32 %v411_v62, %v5316_v19  ;;  %11192 = vst [vmem:[#allocation66_spill] sm:$0xff] %v5520_v40  ;;  %v11195_v62 = vmax.f32 %v5240_v29, 0.0  ;;  %v5542_v40 = vld [vmem:[%s3976_s20 + $0x130] sm:$0xff]  ;;  %v5615_v12 = vld [vmem:[%s3976_s20 + $0x1a0] sm:$0xff] }
 0x11b   : >> { %11197 = vst [vmem:[#allocation141_spill] sm:$0xff] %v5538_v56  ;;  %11198 = vst [vmem:[#allocation69_spill] sm:$0xff] %v5542_v40  ;;  %v5561_v56 = vld [vmem:[%s3976_s20 + $0x150] sm:$0xff]  ;;  %v5572_v40 = vld [vmem:[%s3976_s20 + $0x160] sm:$0xff] }
 0x11c   : >> { %v5535_v1 = vsub.f32 %v11195_v62, %v5380_v3  ;;  %v5553_v3 = vld [vmem:[%s3976_s20 + $0x140] sm:$0xff]  ;;  %11202 = vst [vmem:[#allocation73_spill] sm:$0xff] %v5561_v56  ;;  %11203 = vst [vmem:[#allocation74_spill] sm:$0xff] %v5568_v28  ;;  %v11215_v62 = vmax.f32 %v5246_v45, 0.0  ;;  %v5827_v56 = vld [vmem:[%s3976_s20 + $0x2d0] sm:$0xff] }
 0x11d   : >> { %11200 = vst [vmem:[#allocation70_spill] sm:$0xff] %v5553_v3  ;;  %v5576_v3 = vld [vmem:[%s3976_s20 + $0x168] sm:$0xff]  ;;  %11204 = vst [vmem:[#allocation75_spill] sm:$0xff] %v5580_v23  ;;  %v5591_v28 = vld [vmem:[%s3976_s20 + $0x180] sm:$0xff] }
 0x11e   : >> { %11196 = vst [vmem:[#allocation68_spill] sm:$0xff] %v5535_v1  ;;  %v5557_v1 = vld [vmem:[%s3976_s20 + $0x148] sm:$0xff]  ;;  %11207 = vst [vmem:[#allocation83_spill] sm:$0xff] %v5591_v28  ;;  %v5612_v28 = vmul.f32 %v415_v60, %v5336_v33  ;;  %v5629_v60 = vsub.f32 %v11215_v62, %v5386_v21  ;;  %v5649_v62 = vld [vmem:[%s3976_s20 + $0x1d0] sm:$0xff] }
 0x11f   : >> { %11201 = vst [vmem:[#allocation72_spill] sm:$0xff] %v5557_v1  ;;  %v5587_v1 = vld [vmem:[%s3976_s20 + $0x178] sm:$0xff]  ;;  %11209 = vst [vmem:[#allocation12_spill] sm:$0xff] %v5597_v10  ;;  %v5600_v23 = vld [vmem:[%s3976_s20 + $0x188] sm:$0xff] }
 0x120   : >> { %11206 = vst [vmem:[#allocation143_spill] sm:$0xff] %v5587_v1  ;;  %11210 = vst [vmem:[#allocation90_spill] sm:$0xff] %v5600_v23  ;;  %v5608_v1 = vld [vmem:[%s3976_s20 + $0x198] sm:$0xff]  ;;  %v5619_v10 = vld [vmem:[%s3976_s20 + $0x1a8] sm:$0xff] }
 0x121   : >> { %11211 = vst [vmem:[#allocation95_spill] sm:$0xff] %v5612_v28  ;;  %11212 = vst [vmem:[#allocation13_spill] sm:$0xff] %v5615_v12  ;;  %v5623_v23 = vld [vmem:[%s3976_s20 + $0x1b0] sm:$0xff]  ;;  %v5632_v28 = vld [vmem:[%s3976_s20 + $0x1b8] sm:$0xff] }
 0x122   : >> { %11213 = vst [vmem:[#allocation98_spill] sm:$0xff] %v5619_v10  ;;  %11214 = vst [vmem:[#allocation104_spill] sm:$0xff] %v5623_v23  ;;  %v5636_v12 = vld [vmem:[%s3976_s20 + $0x1c0] sm:$0xff]  ;;  %v5640_v10 = vld [vmem:[%s3976_s20 + $0x1c8] sm:$0xff]  ;;  %v11219_v23 = vmax.f32 %v5250_v30, 0.0 }
 0x123   : >> { %11216 = vst [vmem:[#allocation145_spill] sm:$0xff] %v5629_v60  ;;  %11217 = vst [vmem:[#allocation108_spill] sm:$0xff] %v5636_v12  ;;  %v5653_v60 = vld [vmem:[%s3976_s20 + $0x1d8] sm:$0xff]  ;;  %v5657_v12 = vld [vmem:[%s3976_s20 + $0x1e0] sm:$0xff] }
 0x124   : >> { %11218 = vst [vmem:[#allocation121_spill] sm:$0xff] %v5640_v10  ;;  %v5646_v21 = vsub.f32 %v11219_v23, %v5393_v5  ;;  %11221 = vst [vmem:[#allocation129_spill] sm:$0xff] %v5653_v60  ;;  %v11223_v10 = vmax.f32 %v5253_v59, 0.0  ;;  %v5666_v23 = vld [vmem:[%s3976_s20 + $0x1e8] sm:$0xff]  ;;  %v5674_v60 = vld [vmem:[%s3976_s20 + $0x1f8] sm:$0xff] }
 0x125   : >> { %11222 = vst [vmem:[#allocation133_spill] sm:$0xff] %v5657_v12  ;;  %11226 = vst [vmem:[#allocation148_spill] sm:$0xff] %v5674_v60  ;;  %v11227_v12 = vmax.f32 %v5256_v53, 0.0  ;;  %v11231_v60 = vmax.f32 %v5262_v41, 0.0  ;;  %v5840_v11 = vld [vmem:[%s3976_s20 + $0x2e0] sm:$0xff] }
 0x126   : >> { %11220 = vst [vmem:[#allocation125_spill] sm:$0xff] %v5646_v21  ;;  %v5663_v5 = vsub.f32 %v11223_v10, %v5396_v8  ;;  %v5670_v21 = vld [vmem:[%s3976_s20 + $0x1f0] sm:$0xff]  ;;  %v5683_v10 = vld [vmem:[%s3976_s20 + $0x200] sm:$0xff]  ;;  %11266 = vst [vmem:[#allocation178_spill] sm:$0xff] %v5840_v11  ;;  %v11272_v11 = vand.u32 2147483647, %v5219_v58 }
 0x127   : >> { %11225 = vst [vmem:[#allocation147_spill] sm:$0xff] %v5670_v21  ;;  %v5680_v8 = vsub.f32 %v11227_v12, %v5399_v20  ;;  %v5691_v21 = vld [vmem:[%s3976_s20 + $0x210] sm:$0xff]  ;;  %v5697_v20 = vsub.f32 %v11231_v60, %v5407_v55  ;;  %v5700_v12 = vld [vmem:[%s3976_s20 + $0x218] sm:$0xff]  ;;  %v11277_v58 = vmax.f32 %v5304_v42, 0.0 }
 0x128   : >> { %11224 = vst [vmem:[#allocation146_spill] sm:$0xff] %v5663_v5  ;;  %v5687_v5 = vld [vmem:[%s3976_s20 + $0x208] sm:$0xff]  ;;  %11230 = vst [vmem:[#allocation151_spill] sm:$0xff] %v5691_v21  ;;  %v11235_v21 = vmax.f32 %v5265_v16, 0.0  ;;  %v5717_v60 = vld [vmem:[%s3976_s20 + $0x230] sm:$0xff] }
 0x129   : >> { %11228 = vst [vmem:[#allocation149_spill] sm:$0xff] %v5680_v8  ;;  %11229 = vst [vmem:[#allocation150_spill] sm:$0xff] %v5687_v5  ;;  %v5704_v8 = vld [vmem:[%s3976_s20 + $0x220] sm:$0xff]  ;;  %v5708_v5 = vld [vmem:[%s3976_s20 + $0x228] sm:$0xff] }
 0x12a   : >> { %11232 = vst [vmem:[#allocation152_spill] sm:$0xff] %v5697_v20  ;;  %11233 = vst [vmem:[#allocation153_spill] sm:$0xff] %v5704_v8  ;;  %v5714_v55 = vsub.f32 %v11235_v21, %v5410_v4  ;;  %v5721_v20 = vld [vmem:[%s3976_s20 + $0x238] sm:$0xff]  ;;  %v5725_v8 = vld [vmem:[%s3976_s20 + $0x240] sm:$0xff] }
 0x12b   : >> { %11234 = vst [vmem:[#allocation154_spill] sm:$0xff] %v5708_v5  ;;  %11237 = vst [vmem:[#allocation156_spill] sm:$0xff] %v5721_v20  ;;  %v11239_v5 = vmax.f32 %v5268_v39, 0.0  ;;  %v5734_v21 = vld [vmem:[%s3976_s20 + $0x248] sm:$0xff]  ;;  %v5742_v20 = vld [vmem:[%s3976_s20 + $0x258] sm:$0xff] }
 0x12c   : >> { %11236 = vst [vmem:[#allocation155_spill] sm:$0xff] %v5714_v55  ;;  %11238 = vst [vmem:[#allocation157_spill] sm:$0xff] %v5725_v8  ;;  %v5738_v55 = vld [vmem:[%s3976_s20 + $0x250] sm:$0xff]  ;;  %v11243_v8 = vmax.f32 %v5274_v22, 0.0 }
 0x12d   : >> { %v5731_v4 = vsub.f32 %v11239_v5, %v5413_v32  ;;  %11241 = vst [vmem:[#allocation159_spill] sm:$0xff] %v5738_v55  ;;  %11242 = vst [vmem:[#allocation160_spill] sm:$0xff] %v5742_v20  ;;  %v5751_v5 = vld [vmem:[%s3976_s20 + $0x260] sm:$0xff]  ;;  %v5759_v55 = vld [vmem:[%s3976_s20 + $0x270] sm:$0xff]  ;;  %v11247_v20 = vmax.f32 %v5277_v47, 0.0 }
 0x12e   : >> { %v5748_v32 = vsub.f32 %v11243_v8, %v5422_v44  ;;  %11246 = vst [vmem:[#allocation163_spill] sm:$0xff] %v5759_v55  ;;  %v5768_v8 = vld [vmem:[%s3976_s20 + $0x278] sm:$0xff]  ;;  %v11251_v55 = vmax.f32 %v5280_v2, 0.0 }
 0x12f   : >> { %11240 = vst [vmem:[#allocation158_spill] sm:$0xff] %v5731_v4  ;;  %v5755_v4 = vld [vmem:[%s3976_s20 + $0x268] sm:$0xff]  ;;  %v5765_v44 = vsub.f32 %v11247_v20, %v5425_v38  ;;  %v5785_v20 = vld [vmem:[%s3976_s20 + $0x290] sm:$0xff] }
 0x130   : >> { %11244 = vst [vmem:[#allocation161_spill] sm:$0xff] %v5748_v32  ;;  %11245 = vst [vmem:[#allocation162_spill] sm:$0xff] %v5755_v4  ;;  %v5772_v32 = vld [vmem:[%s3976_s20 + $0x280] sm:$0xff]  ;;  %v5776_v4 = vld [vmem:[%s3976_s20 + $0x288] sm:$0xff]  ;;  %v5782_v38 = vsub.f32 %v11251_v55, %v5428_v24 }
 0x131   : >> { %11248 = vst [vmem:[#allocation164_spill] sm:$0xff] %v5765_v44  ;;  %11249 = vst [vmem:[#allocation165_spill] sm:$0xff] %v5772_v32  ;;  %v5789_v44 = vld [vmem:[%s3976_s20 + $0x298] sm:$0xff]  ;;  %v5793_v32 = vld [vmem:[%s3976_s20 + $0x2a0] sm:$0xff] }
 0x132   : >> { %11250 = vst [vmem:[#allocation166_spill] sm:$0xff] %v5776_v4  ;;  %11252 = vst [vmem:[#allocation167_spill] sm:$0xff] %v5782_v38  ;;  %v11255_v4 = vmax.f32 %v5286_v61, 0.0  ;;  %v5802_v55 = vld [vmem:[%s3976_s20 + $0x2a8] sm:$0xff]  ;;  %v5806_v38 = vld [vmem:[%s3976_s20 + $0x2b0] sm:$0xff] }
 0x133   : >> { %11253 = vst [vmem:[#allocation168_spill] sm:$0xff] %v5789_v44  ;;  %11254 = vst [vmem:[#allocation169_spill] sm:$0xff] %v5793_v32  ;;  %v5810_v44 = vld [vmem:[%s3976_s20 + $0x2b8] sm:$0xff]  ;;  %v11260_v32 = vmax.f32 %v5289_v6, 0.0 }
 0x134   : >> { %v5799_v24 = vsub.f32 %v11255_v4, %v5444_v27  ;;  %11257 = vst [vmem:[#allocation171_spill] sm:$0xff] %v5802_v55  ;;  %11258 = vst [vmem:[#allocation172_spill] sm:$0xff] %v5806_v38  ;;  %v5819_v4 = vld [vmem:[%s3976_s20 + $0x2c0] sm:$0xff]  ;;  %v5844_v55 = vld [vmem:[%s3976_s20 + $0x2e8] sm:$0xff] }
 0x135   : >> { %11259 = vst [vmem:[#allocation173_spill] sm:$0xff] %v5810_v44  ;;  %v5816_v27 = vsub.f32 %v11260_v32, %v5451_v54  ;;  %v11263_v44 = vmax.f32 %v5292_v7, 0.0  ;;  %v5836_v54 = vld [vmem:[%s3976_s20 + $0x2d8] sm:$0xff]  ;;  %11267 = vst [vmem:[#allocation179_spill] sm:$0xff] %v5844_v55 }
 0x136   : >> { %11256 = vst [vmem:[#allocation170_spill] sm:$0xff] %v5799_v24  ;;  %v5823_v24 = vld [vmem:[%s3976_s20 + $0x2c8] sm:$0xff]  ;;  %11265 = vst [vmem:[#allocation177_spill] sm:$0xff] %v5836_v54  ;;  %v5857_v32 = vld [vmem:[%s3976_s20 + $0x2f8] sm:$0xff]  ;;  %v1024_v54 = vsub.f32 0.0, %v11272_v11  ;;  %v5880_v11 = vsub.f32 %v11277_v58, %v5485_v0 }
 0x137   : >> { %11261 = vst [vmem:[#allocation174_spill] sm:$0xff] %v5816_v27  ;;  %11262 = vst [vmem:[#allocation175_spill] sm:$0xff] %v5823_v24  ;;  %v5833_v38 = vsub.f32 %v11263_v44, %v5457_v9  ;;  %v5850_v9 = vsub.f32 %v11268_v43, %v5472_v14  ;;  %v5853_v44 = vld [vmem:[%s3976_s20 + $0x2f0] sm:$0xff]  ;;  %v11273_v24 = vmax.f32 %v5301_v63, 0.0  ;;  %v5868_v14 = vld [vmem:[%s3976_s20 + $0x300] sm:$0xff] }
 0x138   : >> { %11270 = vst [vmem:[#allocation181_spill] sm:$0xff] %v5853_v44  ;;  %11271 = vst [vmem:[#allocation182_spill] sm:$0xff] %v5857_v32  ;;  %v11276_v27 = vand.u32 2147483647, %v5222_v17  ;;  %v5883_v44 = vld [vmem:[%s3976_s20 + $0x310] sm:$0xff]  ;;  %v11281_v17 = vmax.f32 %v5310_v36, 0.0 }
 0x139   : >> { %11264 = vst [vmem:[#allocation176_spill] sm:$0xff] %v5833_v38  ;;  %11269 = vst [vmem:[#allocation180_spill] sm:$0xff] %v5850_v9  ;;  %v5865_v55 = vsub.f32 %v11273_v24, %v5479_v18  ;;  %v5872_v9 = vld [vmem:[%s3976_s20 + $0x308] sm:$0xff]  ;;  %v5887_v24 = vld [vmem:[%s3976_s20 + $0x318] sm:$0xff]  ;;  %v11290_v18 = vmax.f32 %v5316_v19, 0.0 }
 0x13a   : >> { %11275 = vst [vmem:[#allocation184_spill] sm:$0xff] %v5872_v9  ;;  %v1025_v32 = vsub.f32 0.0, %v11276_v27  ;;  %11278 = vst [vmem:[#allocation185_spill] sm:$0xff] %v5880_v11  ;;  %v5895_v27 = vsub.f32 %v11281_v17, %v5501_v52  ;;  %v5898_v9 = vld [vmem:[%s3976_s20 + $0x320] sm:$0xff]  ;;  %v5902_v58 = vld [vmem:[%s3976_s20 + $0x328] sm:$0xff]  ;;  %v11294_v17 = vmax.f32 %v5323_v31, 0.0 }
 0x13b   : >> { %11274 = vst [vmem:[#allocation183_spill] sm:$0xff] %v5865_v55  ;;  %11279 = vst [vmem:[#allocation186_spill] sm:$0xff] %v5887_v24  ;;  %v11280_v55 = vand.u32 2147483647, %v5225_v15  ;;  %v11285_v11 = vand.u32 2147483647, %v5228_v34  ;;  %v5921_v34 = vsub.f32 %v11290_v18, %v5517_v57 }
 0x13c   : >> { %11282 = vst [vmem:[#allocation187_spill] sm:$0xff] %v5895_v27  ;;  %11283 = vst [vmem:[#allocation188_spill] sm:$0xff] %v5898_v9  ;;  %v11286_v15 = vmax.f32 %v5313_v26, 0.0  ;;  %v5913_v52 = vld [vmem:[%s3976_s20 + $0x330] sm:$0xff]  ;;  %v11289_v27 = vand.u32 2147483647, %v5231_v35  ;;  %v5932_v35 = vsub.f32 %v11294_v17, %v5550_v50 }
 0x13d   : >> { %v1026_v38 = vsub.f32 0.0, %v11280_v55  ;;  %11284 = vst [vmem:[#allocation189_spill] sm:$0xff] %v5902_v58  ;;  %v1027_v43 = vsub.f32 0.0, %v11285_v11  ;;  %11288 = vst [vmem:[#allocation191_spill] sm:$0xff] %v5913_v52  ;;  %v1152_v9 = vmul.f32 1.442695, %v1024_v54 }
 0x13e   : >> { %v5910_v55 = vsub.f32 %v11286_v15, %v5508_v48  ;;  %v1028_v0 = vsub.f32 0.0, %v11289_v27  ;;  %11291 = vst [vmem:[#allocation192_spill] sm:$0xff] %v5921_v34  ;;  %v5924_v11 = vld [vmem:[%s3976_s20 + $0x338] sm:$0xff]  ;;  %v11292_v15 = vld [vmem:[#allocation134_spill] sm:$0xff]  ;;  %v1154_v24 = vmul.f32 1.442695, %v1025_v32 }
 0x13f   : >> { %11295 = vst [vmem:[#allocation134_spill] sm:$0xff] %v5932_v35  ;;  %v5935_v54 = vld [vmem:[%s3976_s20 + $0x340] sm:$0xff]  ;;  %v11297_v57 = vld [vmem:[#allocation59_spill] sm:$0xff]  ;;  %v1156_v52 = vmul.f32 1.442695, %v1026_v38  ;;  %v11299_v48 = vmax.f32 %v5326_v49, 0.0  ;;  %3017 = vpow2.f32 %v1152_v9 }
 0x140   : >> { %11287 = vst [vmem:[#allocation190_spill] sm:$0xff] %v5910_v55  ;;  %v11293_v55 = vand.u32 2147483647, %v11292_v15  ;;  %11296 = vst [vmem:[#allocation193_spill] sm:$0xff] %v5935_v54  ;;  %v11298_v18 = vand.u32 2147483647, %v11297_v57  ;;  %3019 = vpow2.f32 %v1154_v24 }
 0x141   : >> { %v5946_v32 = vld [vmem:[%s3976_s20 + $0x348] sm:$0xff]  ;;  %v11301_v50 = vand.u32 2147483647, %v5240_v29  ;;  %v1158_v35 = vmul.f32 1.442695, %v1027_v43  ;;  %v5952_v27 = vld [vmem:[%s3976_s20 + $0x350] sm:$0xff]  ;;  %3021 = vpow2.f32 %v1156_v52 }
 0x142   : >> { %v1029_v58 = vsub.f32 0.0, %v11293_v55  ;;  %v1030_v34 = vsub.f32 0.0, %v11298_v18  ;;  %v5943_v55 = vsub.f32 %v11299_v48, %v5565_v25  ;;  %v11302_v38 = vand.u32 2147483647, %v5243_v37  ;;  %v5958_v25 = vld [vmem:[%s3976_s20 + $0x358] sm:$0xff] }
 0x143   : >> { %v1031_v17 = vsub.f32 0.0, %v11301_v50  ;;  %v1160_v54 = vmul.f32 1.442695, %v1028_v0  ;;  %v11303_v15 = vand.u32 2147483647, %v5246_v45  ;;  %v5964_v50 = vld [vmem:[%s3976_s20 + $0x360] sm:$0xff]  ;;  %3023 = vpow2.f32 %v1158_v35 }
 0x144   : >> { %11300 = vst [vmem:[#allocation59_spill] sm:$0xff] %v5943_v55  ;;  %v1032_v18 = vsub.f32 0.0, %v11302_v38  ;;  %v1162_v43 = vmul.f32 1.442695, %v1029_v58  ;;  %v11304_v37 = vand.u32 2147483647, %v5250_v30 }
 0x145   : >> { %v1033_v29 = vsub.f32 0.0, %v11303_v15  ;;  %v1164_v9 = vmul.f32 1.442695, %v1030_v34  ;;  %v5970_v0 = vld [vmem:[%s3976_s20 + $0x368] sm:$0xff]  ;;  %v11305_v45 = vand.u32 2147483647, %v5253_v59  ;;  %3025 = vpow2.f32 %v1160_v54 }
 0x146   : >> { %v1034_v38 = vsub.f32 0.0, %v11304_v37  ;;  %v1166_v24 = vmul.f32 1.442695, %v1031_v17  ;;  %v5976_v58 = vld [vmem:[%s3976_s20 + $0x370] sm:$0xff]  ;;  %v11306_v30 = vand.u32 2147483647, %v5256_v53  ;;  %3027 = vpow2.f32 %v1162_v43 }
 0x147   : >> { %v1035_v15 = vsub.f32 0.0, %v11305_v45  ;;  %v1168_v52 = vmul.f32 1.442695, %v1032_v18  ;;  %v5982_v34 = vld [vmem:[%s3976_s20 + $0x378] sm:$0xff]  ;;  %v11307_v59 = vand.u32 2147483647, %v5262_v41  ;;  %3029 = vpow2.f32 %v1164_v9 }
 0x148   : >> { %v1036_v37 = vsub.f32 0.0, %v11306_v30  ;;  %v1170_v35 = vmul.f32 1.442695, %v1033_v29  ;;  %v5988_v17 = vld [vmem:[%s3976_s20 + $0x380] sm:$0xff]  ;;  %v11308_v53 = vand.u32 2147483647, %v5265_v16  ;;  %3031 = vpow2.f32 %v1166_v24 }
 0x149   : >> { %v1037_v45 = vsub.f32 0.0, %v11307_v59  ;;  %v1172_v54 = vmul.f32 1.442695, %v1034_v38  ;;  %v5994_v18 = vld [vmem:[%s3976_s20 + $0x388] sm:$0xff]  ;;  %v11309_v41 = vand.u32 2147483647, %v5268_v39  ;;  %3033 = vpow2.f32 %v1168_v52  ;;  %v6011_v24 = vpop.eup %3017 }
 0x14a   : >> { %v1038_v30 = vsub.f32 0.0, %v11308_v53  ;;  %v1174_v29 = vmul.f32 1.442695, %v1035_v15  ;;  %v6000_v43 = vld [vmem:[%s3976_s20 + $0x390] sm:$0xff]  ;;  %v11310_v57 = vand.u32 2147483647, %v5274_v22  ;;  %3035 = vpow2.f32 %v1170_v35  ;;  %v6019_v55 = vpop.eup %3019 }
 0x14b   : >> { %v1039_v59 = vsub.f32 0.0, %v11309_v41  ;;  %v1176_v38 = vmul.f32 1.442695, %v1036_v37  ;;  %v6006_v9 = vld [vmem:[%s3976_s20 + $0x398] sm:$0xff]  ;;  %v11311_v48 = vand.u32 2147483647, %v5277_v47  ;;  %3037 = vpow2.f32 %v1172_v54 }
 0x14c   : >> { %v1040_v16 = vsub.f32 0.0, %v11310_v57  ;;  %v1178_v15 = vmul.f32 1.442695, %v1037_v45  ;;  %11312 = vst [vmem:[#allocation194_spill] sm:$0xff] %v6011_v24  ;;  %v6014_v41 = vld [vmem:[%s3976_s20 + $0x3a0] sm:$0xff]  ;;  %11314 = vst [vmem:[#allocation195_spill] sm:$0xff] %v6019_v55  ;;  %3039 = vpow2.f32 %v1174_v29  ;;  %v6027_v24 = vpop.eup %3021 }
 0x14d   : >> { %v1041_v39 = vsub.f32 0.0, %v11311_v48  ;;  %v11313_v57 = vand.u32 2147483647, %v5280_v2  ;;  %v1180_v37 = vmul.f32 1.442695, %v1038_v30  ;;  %v6022_v53 = vld [vmem:[%s3976_s20 + $0x3a8] sm:$0xff]  ;;  %3041 = vpow2.f32 %v1176_v38  ;;  %v6035_v55 = vpop.eup %3023 }
 0x14e   : >> { %v11315_v48 = vand.u32 2147483647, %v5286_v61  ;;  %v1182_v35 = vmul.f32 1.442695, %v1039_v59  ;;  %11316 = vst [vmem:[#allocation196_spill] sm:$0xff] %v6027_v24  ;;  %v6030_v22 = vld [vmem:[%s3976_s20 + $0x3b0] sm:$0xff]  ;;  %3043 = vpow2.f32 %v1178_v15 }
 0x14f   : >> { %v1042_v52 = vsub.f32 0.0, %v11313_v57  ;;  %11317 = vst [vmem:[#allocation197_spill] sm:$0xff] %v6030_v22  ;;  %v11318_v30 = vand.u32 2147483647, %v5289_v6  ;;  %v1184_v57 = vmul.f32 1.442695, %v1040_v16  ;;  %v6043_v24 = vpop.eup %3025  ;;  %3045 = vpow2.f32 %v1180_v37 }
 0x150   : >> { %v1043_v45 = vsub.f32 0.0, %v11315_v48  ;;  %11319 = vst [vmem:[#allocation198_spill] sm:$0xff] %v6035_v55  ;;  %v6038_v47 = vld [vmem:[%s3976_s20 + $0x3b8] sm:$0xff]  ;;  %v11321_v59 = vand.u32 2147483647, %v5292_v7  ;;  %11322 = vst [vmem:[#allocation200_spill] sm:$0xff] %v6043_v24  ;;  %v6051_v55 = vpop.eup %3027  ;;  %3047 = vpow2.f32 %v1182_v35 }
 0x151   : >> { %v1044_v54 = vsub.f32 0.0, %v11318_v30  ;;  %11320 = vst [vmem:[#allocation199_spill] sm:$0xff] %v6038_v47  ;;  %v1186_v48 = vmul.f32 1.442695, %v1041_v39  ;;  %v6046_v2 = vld [vmem:[%s3976_s20 + $0x3c0] sm:$0xff]  ;;  %11325 = vst [vmem:[#allocation202_spill] sm:$0xff] %v6051_v55  ;;  %v6059_v24 = vpop.eup %3029  ;;  %3049 = vpow2.f32 %v1184_v57 }
 0x152   : >> { %v1045_v29 = vsub.f32 0.0, %v11321_v59  ;;  %11323 = vst [vmem:[#allocation201_spill] sm:$0xff] %v6046_v2  ;;  %v11324_v16 = vand.u32 2147483647, %v5298_v13  ;;  %v1188_v30 = vmul.f32 1.442695, %v1042_v52  ;;  %v6067_v55 = vpop.eup %3031 }
 0x153   : >> { %v6054_v61 = vld [vmem:[%s3976_s20 + $0x3c8] sm:$0xff]  ;;  %v11327_v39 = vand.u32 2147483647, %v5301_v63  ;;  %v1190_v59 = vmul.f32 1.442695, %v1043_v45  ;;  %11328 = vst [vmem:[#allocation204_spill] sm:$0xff] %v6059_v24  ;;  %3051 = vpow2.f32 %v1186_v48  ;;  %v6075_v24 = vpop.eup %3033 }
 0x154   : >> { %v1046_v38 = vsub.f32 0.0, %v11324_v16  ;;  %11326 = vst [vmem:[#allocation203_spill] sm:$0xff] %v6054_v61  ;;  %v6062_v6 = vld [vmem:[%s3976_s20 + $0x3d0] sm:$0xff]  ;;  %v11330_v52 = vand.u32 2147483647, %v5304_v42  ;;  %11331 = vst [vmem:[#allocation206_spill] sm:$0xff] %v6067_v55  ;;  %3053 = vpow2.f32 %v1188_v30  ;;  %v6083_v55 = vpop.eup %3035 }
 0x155   : >> { %v1047_v15 = vsub.f32 0.0, %v11327_v39  ;;  %11329 = vst [vmem:[#allocation205_spill] sm:$0xff] %v6062_v6  ;;  %v1192_v16 = vmul.f32 1.442695, %v1044_v54  ;;  %v6070_v7 = vld [vmem:[%s3976_s20 + $0x3d8] sm:$0xff]  ;;  %11334 = vst [vmem:[#allocation208_spill] sm:$0xff] %v6075_v24  ;;  %3055 = vpow2.f32 %v1190_v59  ;;  %v6091_v24 = vpop.eup %3037 }
 0x156   : >> { %v1048_v37 = vsub.f32 0.0, %v11330_v52  ;;  %11332 = vst [vmem:[#allocation207_spill] sm:$0xff] %v6070_v7  ;;  %v11333_v45 = vand.u32 2147483647, %v5310_v36  ;;  %v1194_v39 = vmul.f32 1.442695, %v1045_v29 }
 0x157   : >> { %v6078_v13 = vld [vmem:[%s3976_s20 + $0x3e0] sm:$0xff]  ;;  %v11336_v54 = vand.u32 2147483647, %v5313_v26  ;;  %v1196_v52 = vmul.f32 1.442695, %v1046_v38  ;;  %11337 = vst [vmem:[#allocation210_spill] sm:$0xff] %v6083_v55  ;;  %3057 = vpow2.f32 %v1192_v16  ;;  %v6099_v55 = vpop.eup %3039 }
 0x158   : >> { %v1049_v35 = vsub.f32 0.0, %v11333_v45  ;;  %11335 = vst [vmem:[#allocation209_spill] sm:$0xff] %v6078_v13  ;;  %v6086_v63 = vld [vmem:[%s3976_s20 + $0x3e8] sm:$0xff]  ;;  %v11339_v29 = vand.u32 2147483647, %v5316_v19  ;;  %11340 = vst [vmem:[#allocation212_spill] sm:$0xff] %v6091_v24  ;;  %3059 = vpow2.f32 %v1194_v39  ;;  %v6107_v36 = vpop.eup %3041 }
 0x159   : >> { %v1050_v57 = vsub.f32 0.0, %v11336_v54  ;;  %11338 = vst [vmem:[#allocation211_spill] sm:$0xff] %v6086_v63  ;;  %v1198_v45 = vmul.f32 1.442695, %v1047_v15  ;;  %v6094_v42 = vld [vmem:[%s3976_s20 + $0x3f0] sm:$0xff]  ;;  %11343 = vst [vmem:[#allocation214_spill] sm:$0xff] %v6099_v55  ;;  %3061 = vpow2.f32 %v1196_v52 }
 0x15a   : >> { %v1051_v48 = vsub.f32 0.0, %v11339_v29  ;;  %11341 = vst [vmem:[#allocation213_spill] sm:$0xff] %v6094_v42  ;;  %v11342_v30 = vand.u32 2147483647, %v5323_v31  ;;  %v1200_v54 = vmul.f32 1.442695, %v1048_v37 }
 0x15b   : >> { %v6102_v13 = vld [vmem:[%s3976_s20 + $0x3f8] sm:$0xff]  ;;  %v11345_v59 = vand.u32 2147483647, %v5326_v49  ;;  %v1202_v29 = vmul.f32 1.442695, %v1049_v35  ;;  %11346 = vst [vmem:[#allocation216_spill] sm:$0xff] %v6107_v36  ;;  %3063 = vpow2.f32 %v1198_v45 }
 0x15c   : >> { %v1052_v38 = vsub.f32 0.0, %v11342_v30  ;;  %11344 = vst [vmem:[#allocation215_spill] sm:$0xff] %v6102_v13  ;;  %v11347_v26 = vand.u32 2147483647, %v5329_v46  ;;  %v11348_v31 = vand.u32 2147483647, %v5336_v33  ;;  %v6113_v30 = vpop.eup %3043  ;;  %3065 = vpow2.f32 %v1200_v54 }
 0x15d   : >> { %v1053_v15 = vsub.f32 0.0, %v11345_v59  ;;  %v1204_v37 = vmul.f32 1.442695, %v1050_v57  ;;  %11349 = vst [vmem:[#allocation217_spill] sm:$0xff] %v6113_v30  ;;  %v11350_v55 = vld [vmem:[#allocation136_spill] sm:$0xff]  ;;  %v11352_v13 = vld [vmem:[#allocation65_spill] sm:$0xff]  ;;  %v6119_v39 = vpop.eup %3045  ;;  %3067 = vpow2.f32 %v1202_v29 }
 0x15e   : >> { %v1054_v24 = vsub.f32 0.0, %v11347_v26  ;;  %v1055_v16 = vsub.f32 0.0, %v11348_v31  ;;  %v11351_v42 = vand.u32 2147483647, %v11350_v55  ;;  %v11353_v49 = vand.u32 2147483647, %v11352_v13  ;;  %v6125_v52 = vpop.eup %3047 }
 0x15f   : >> { %v1206_v35 = vmul.f32 1.442695, %v1051_v48  ;;  %11354 = vst [vmem:[#allocation65_spill] sm:$0xff] %v6119_v39  ;;  %v11355_v36 = vld [vmem:[#allocation66_spill] sm:$0xff]  ;;  %v11357_v63 = vld [vmem:[#allocation140_spill] sm:$0xff]  ;;  %v11360_v30 = vld [vmem:[#allocation67_spill] sm:$0xff]  ;;  %v6131_v45 = vpop.eup %3049  ;;  %3069 = vpow2.f32 %v1204_v37 }
 0x160   : >> { %v1056_v19 = vsub.f32 0.0, %v11351_v42  ;;  %v1057_v59 = vsub.f32 0.0, %v11353_v49  ;;  %v11356_v46 = vand.u32 2147483647, %v11355_v36  ;;  %v11358_v33 = vand.u32 2147483647, %v11357_v63  ;;  %v6137_v54 = vpop.eup %3051 }
 0x161   : >> { %v1208_v57 = vmul.f32 1.442695, %v1052_v38  ;;  %11359 = vst [vmem:[#allocation66_spill] sm:$0xff] %v6125_v52  ;;  %v11361_v55 = vand.u32 2147483647, %v11360_v30  ;;  %v11362_v7 = vld [vmem:[#allocation141_spill] sm:$0xff]  ;;  %3071 = vpow2.f32 %v1206_v35  ;;  %v6143_v29 = vpop.eup %3053 }
 0x162   : >> { %v1058_v26 = vsub.f32 0.0, %v11356_v46  ;;  %v1059_v31 = vsub.f32 0.0, %v11358_v33  ;;  %v11363_v13 = vand.u32 2147483647, %v11362_v7  ;;  %v1210_v48 = vmul.f32 1.442695, %v1053_v15  ;;  %v6149_v37 = vpop.eup %3055 }
 0x163   : >> { %v1060_v42 = vsub.f32 0.0, %v11361_v55  ;;  %11364 = vst [vmem:[#allocation140_spill] sm:$0xff] %v6131_v45  ;;  %v11365_v39 = vld [vmem:[#allocation69_spill] sm:$0xff]  ;;  %v11367_v6 = vld [vmem:[#allocation142_spill] sm:$0xff]  ;;  %v1212_v38 = vmul.f32 1.442695, %v1054_v24  ;;  %3073 = vpow2.f32 %v1208_v57  ;;  %v6155_v35 = vpop.eup %3057 }
 0x164   : >> { %v1061_v49 = vsub.f32 0.0, %v11363_v13  ;;  %v11366_v36 = vand.u32 2147483647, %v11365_v39  ;;  %v11368_v63 = vand.u32 2147483647, %v11367_v6  ;;  %11369 = vst [vmem:[#allocation67_spill] sm:$0xff] %v6137_v54  ;;  %3075 = vpow2.f32 %v1210_v48  ;;  %v6163_v57 = vpop.eup %3059 }
 0x165   : >> { %v11370_v52 = vld [vmem:[#allocation70_spill] sm:$0xff]  ;;  %v11372_v61 = vld [vmem:[#allocation72_spill] sm:$0xff]  ;;  %v1214_v15 = vmul.f32 1.442695, %v1055_v16  ;;  %11374 = vst [vmem:[#allocation141_spill] sm:$0xff] %v6143_v29  ;;  %v11375_v45 = vld [vmem:[#allocation73_spill] sm:$0xff]  ;;  %3077 = vpow2.f32 %v1212_v38 }
 0x166   : >> { %v1062_v46 = vsub.f32 0.0, %v11366_v36  ;;  %v1063_v33 = vsub.f32 0.0, %v11368_v63  ;;  %v11371_v30 = vand.u32 2147483647, %v11370_v52  ;;  %v11373_v7 = vand.u32 2147483647, %v11372_v61 }
 0x167   : >> { %v11376_v39 = vand.u32 2147483647, %v11375_v45  ;;  %v11377_v2 = vld [vmem:[#allocation74_spill] sm:$0xff]  ;;  %v1216_v24 = vmul.f32 1.442695, %v1056_v19  ;;  %11379 = vst [vmem:[#allocation69_spill] sm:$0xff] %v6149_v37  ;;  %3079 = vpow2.f32 %v1214_v15 }
 0x168   : >> { %v1064_v55 = vsub.f32 0.0, %v11371_v30  ;;  %v1065_v13 = vsub.f32 0.0, %v11373_v7  ;;  %v11378_v6 = vand.u32 2147483647, %v11377_v2  ;;  %v11380_v52 = vand.u32 2147483647, %v5572_v40 }
 0x169   : >> { %v1066_v36 = vsub.f32 0.0, %v11376_v39  ;;  %v11381_v61 = vand.u32 2147483647, %v5576_v3  ;;  %v1218_v16 = vmul.f32 1.442695, %v1057_v59  ;;  %11382 = vst [vmem:[#allocation142_spill] sm:$0xff] %v6155_v35  ;;  %3081 = vpow2.f32 %v1216_v24 }
 0x16a   : >> { %v1067_v63 = vsub.f32 0.0, %v11378_v6  ;;  %v1068_v30 = vsub.f32 0.0, %v11380_v52  ;;  %v11383_v29 = vld [vmem:[#allocation80_spill] sm:$0xff]  ;;  %v11385_v54 = vld [vmem:[#allocation143_spill] sm:$0xff]  ;;  %v1220_v19 = vmul.f32 1.442695, %v1058_v26 }
 0x16b   : >> { %v1069_v7 = vsub.f32 0.0, %v11381_v61  ;;  %v11384_v45 = vand.u32 2147483647, %v11383_v29  ;;  %v11386_v2 = vand.u32 2147483647, %v11385_v54  ;;  %11387 = vst [vmem:[#allocation70_spill] sm:$0xff] %v6163_v57  ;;  %v6173_v29 = vpop.eup %3061  ;;  %3083 = vpow2.f32 %v1218_v16 }
 0x16c   : >> { %v11388_v40 = vld [vmem:[#allocation83_spill] sm:$0xff]  ;;  %v11390_v3 = vld [vmem:[#allocation90_spill] sm:$0xff]  ;;  %v1222_v61 = vmul.f32 1.442695, %v1059_v31  ;;  %11392 = vst [vmem:[#allocation72_spill] sm:$0xff] %v6173_v29  ;;  %v11401_v29 = vld [vmem:[#allocation104_spill] sm:$0xff]  ;;  %3085 = vpow2.f32 %v1220_v19 }
 0x16d   : >> { %v1070_v39 = vsub.f32 0.0, %v11384_v45  ;;  %v6161_v6 = vsub.f32 0.0, %v11386_v2  ;;  %v11389_v52 = vand.u32 2147483647, %v11388_v40  ;;  %v11391_v48 = vand.u32 2147483647, %v11390_v3  ;;  %v6183_v40 = vpop.eup %3063 }
 0x16e   : >> { %v11393_v54 = vand.u32 2147483647, %v5604_v51  ;;  %v11394_v26 = vand.u32 2147483647, %v5608_v1  ;;  %v1224_v2 = vmul.f32 1.442695, %v1060_v42  ;;  %3087 = vpow2.f32 %v1222_v61 }
 0x16f   : >> { %v6167_v37 = vsub.f32 0.0, %v11389_v52  ;;  %v6171_v59 = vsub.f32 0.0, %v11391_v48  ;;  %11395 = vst [vmem:[#allocation73_spill] sm:$0xff] %v6183_v40  ;;  %v11396_v52 = vld [vmem:[#allocation13_spill] sm:$0xff]  ;;  %v11398_v15 = vld [vmem:[#allocation98_spill] sm:$0xff]  ;;  %v11405_v40 = vld [vmem:[#allocation108_spill] sm:$0xff] }
 0x170   : >> { %v6177_v45 = vsub.f32 0.0, %v11393_v54  ;;  %v6181_v38 = vsub.f32 0.0, %v11394_v26  ;;  %v11397_v3 = vand.u32 2147483647, %v11396_v52  ;;  %v11399_v31 = vand.u32 2147483647, %v11398_v15  ;;  %v6193_v54 = vpop.eup %3065 }
 0x171   : >> { %v1226_v51 = vmul.f32 1.442695, %v1061_v49  ;;  %11400 = vst [vmem:[#allocation74_spill] sm:$0xff] %v6193_v54  ;;  %v11402_v1 = vand.u32 2147483647, %v11401_v29  ;;  %v11407_v16 = vld [vmem:[#allocation121_spill] sm:$0xff]  ;;  %3089 = vpow2.f32 %v1224_v2 }
 0x172   : >> { %v6187_v48 = vsub.f32 0.0, %v11397_v3  ;;  %v6191_v57 = vsub.f32 0.0, %v11399_v31  ;;  %v11403_v42 = vand.u32 2147483647, %v5632_v28  ;;  %v1228_v52 = vmul.f32 1.442695, %v1062_v46  ;;  %v6203_v3 = vpop.eup %3067 }
 0x173   : >> { %v6197_v26 = vsub.f32 0.0, %v11402_v1  ;;  %11404 = vst [vmem:[#allocation80_spill] sm:$0xff] %v6203_v3  ;;  %v11406_v15 = vand.u32 2147483647, %v11405_v40  ;;  %v11408_v49 = vand.u32 2147483647, %v11407_v16  ;;  %v6213_v1 = vpop.eup %3069  ;;  %3091 = vpow2.f32 %v1226_v51 }
 0x174   : >> { %v6201_v24 = vsub.f32 0.0, %v11403_v42  ;;  %v1230_v29 = vmul.f32 1.442695, %v1063_v33  ;;  %11409 = vst [vmem:[#allocation143_spill] sm:$0xff] %v6213_v1  ;;  %v11410_v28 = vand.u32 2147483647, %v5649_v62  ;;  %3093 = vpow2.f32 %v1228_v52 }
 0x175   : >> { %v6207_v31 = vsub.f32 0.0, %v11406_v15  ;;  %v6211_v35 = vsub.f32 0.0, %v11408_v49  ;;  %v11411_v19 = vld [vmem:[#allocation129_spill] sm:$0xff]  ;;  %v1232_v40 = vmul.f32 1.442695, %v1064_v55  ;;  %v6223_v15 = vpop.eup %3071  ;;  %v11418_v1 = vld [vmem:[#allocation147_spill] sm:$0xff] }
 0x176   : >> { %v6217_v42 = vsub.f32 0.0, %v11410_v28  ;;  %v11412_v46 = vand.u32 2147483647, %v11411_v19  ;;  %11413 = vst [vmem:[#allocation83_spill] sm:$0xff] %v6223_v15  ;;  %v11414_v3 = vld [vmem:[#allocation133_spill] sm:$0xff]  ;;  %v6233_v28 = vpop.eup %3073  ;;  %v11420_v2 = vld [vmem:[#allocation148_spill] sm:$0xff]  ;;  %3095 = vpow2.f32 %v1230_v29 }
 0x177   : >> { %v11415_v16 = vand.u32 2147483647, %v11414_v3  ;;  %v11416_v33 = vand.u32 2147483647, %v5666_v23  ;;  %v1234_v62 = vmul.f32 1.442695, %v1065_v13  ;;  %3097 = vpow2.f32 %v1232_v40 }
 0x178   : >> { %v6221_v54 = vsub.f32 0.0, %v11412_v46  ;;  %11417 = vst [vmem:[#allocation90_spill] sm:$0xff] %v6233_v28  ;;  %v11419_v19 = vand.u32 2147483647, %v11418_v1  ;;  %v11421_v55 = vand.u32 2147483647, %v11420_v2 }
 0x179   : >> { %v6227_v49 = vsub.f32 0.0, %v11415_v16  ;;  %v6231_v61 = vsub.f32 0.0, %v11416_v33  ;;  %v1236_v3 = vmul.f32 1.442695, %v1066_v36  ;;  %v6243_v16 = vpop.eup %3075  ;;  %v11423_v23 = vand.u32 2147483647, %v5683_v10 }
 0x17a   : >> { %v6237_v46 = vsub.f32 0.0, %v11419_v19  ;;  %v6241_v47 = vsub.f32 0.0, %v11421_v55  ;;  %11422 = vst [vmem:[#allocation13_spill] sm:$0xff] %v6243_v16  ;;  %v11424_v51 = vld [vmem:[#allocation150_spill] sm:$0xff]  ;;  %v1238_v1 = vmul.f32 1.442695, %v1067_v63  ;;  %v6253_v19 = vpop.eup %3077  ;;  %3099 = vpow2.f32 %v1234_v62 }
 0x17b   : >> { %v6247_v33 = vsub.f32 0.0, %v11423_v23  ;;  %v11425_v13 = vand.u32 2147483647, %v11424_v51  ;;  %11426 = vst [vmem:[#allocation98_spill] sm:$0xff] %v6253_v19  ;;  %v11427_v28 = vld [vmem:[#allocation151_spill] sm:$0xff]  ;;  %v6263_v23 = vpop.eup %3079  ;;  %v11431_v16 = vld [vmem:[#allocation153_spill] sm:$0xff]  ;;  %3101 = vpow2.f32 %v1236_v3 }
 0x17c   : >> { %v11428_v2 = vand.u32 2147483647, %v11427_v28  ;;  %v11429_v36 = vand.u32 2147483647, %v5700_v12  ;;  %v1240_v10 = vmul.f32 1.442695, %v1068_v30  ;;  %3103 = vpow2.f32 %v1238_v1 }
 0x17d   : >> { %v6251_v15 = vsub.f32 0.0, %v11425_v13  ;;  %11430 = vst [vmem:[#allocation104_spill] sm:$0xff] %v6263_v23  ;;  %v11432_v51 = vand.u32 2147483647, %v11431_v16  ;;  %v11433_v29 = vld [vmem:[#allocation154_spill] sm:$0xff]  ;;  %v11437_v40 = vld [vmem:[#allocation156_spill] sm:$0xff] }
 0x17e   : >> { %v6257_v55 = vsub.f32 0.0, %v11428_v2  ;;  %v6261_v52 = vsub.f32 0.0, %v11429_v36  ;;  %v11434_v63 = vand.u32 2147483647, %v11433_v29  ;;  %v1242_v28 = vmul.f32 1.442695, %v1069_v7  ;;  %v6273_v2 = vpop.eup %3081 }
 0x17f   : >> { %v6267_v13 = vsub.f32 0.0, %v11432_v51  ;;  %11435 = vst [vmem:[#allocation108_spill] sm:$0xff] %v6273_v2  ;;  %v11436_v12 = vand.u32 2147483647, %v5717_v60  ;;  %v11438_v30 = vand.u32 2147483647, %v11437_v40  ;;  %v6283_v51 = vpop.eup %3083  ;;  %3105 = vpow2.f32 %v1240_v10 }
 0x180   : >> { %v6271_v22 = vsub.f32 0.0, %v11434_v63  ;;  %v1244_v16 = vmul.f32 1.442695, %v1070_v39  ;;  %11439 = vst [vmem:[#allocation121_spill] sm:$0xff] %v6283_v51  ;;  %v11440_v23 = vld [vmem:[#allocation157_spill] sm:$0xff]  ;;  %v11444_v40 = vld [vmem:[#allocation159_spill] sm:$0xff]  ;;  %3107 = vpow2.f32 %v1242_v28 }
 0x181   : >> { %v6277_v36 = vsub.f32 0.0, %v11436_v12  ;;  %v6281_v19 = vsub.f32 0.0, %v11438_v30  ;;  %v11441_v29 = vand.u32 2147483647, %v11440_v23  ;;  %v11442_v7 = vand.u32 2147483647, %v5734_v21  ;;  %v6294_v12 = vpop.eup %3085 }
 0x182   : >> { %v1246_v60 = vmul.f32 1.442695, %v6161_v6  ;;  %11443 = vst [vmem:[#allocation129_spill] sm:$0xff] %v6294_v12  ;;  %v11445_v30 = vand.u32 2147483647, %v11444_v40  ;;  %v11446_v39 = vld [vmem:[#allocation160_spill] sm:$0xff]  ;;  %3109 = vpow2.f32 %v1244_v16 }
 0x183   : >> { %v6287_v63 = vsub.f32 0.0, %v11441_v29  ;;  %v6291_v62 = vsub.f32 0.0, %v11442_v7  ;;  %v11447_v3 = vand.u32 2147483647, %v11446_v39  ;;  %v1248_v23 = vmul.f32 1.442695, %v6167_v37  ;;  %v6305_v29 = vpop.eup %3087 }
 0x184   : >> { %v6298_v2 = vsub.f32 0.0, %v11445_v30  ;;  %11448 = vst [vmem:[#allocation133_spill] sm:$0xff] %v6305_v29  ;;  %v11449_v21 = vand.u32 2147483647, %v5751_v5  ;;  %v11450_v6 = vld [vmem:[#allocation162_spill] sm:$0xff]  ;;  %v6316_v30 = vpop.eup %3089  ;;  %v11454_v39 = vld [vmem:[#allocation163_spill] sm:$0xff]  ;;  %3111 = vpow2.f32 %v1246_v60 }
 0x185   : >> { %v6302_v51 = vsub.f32 0.0, %v11447_v3  ;;  %v11451_v7 = vand.u32 2147483647, %v11450_v6  ;;  %v1250_v40 = vmul.f32 1.442695, %v6171_v59  ;;  %11453 = vst [vmem:[#allocation148_spill] sm:$0xff] %v6316_v30  ;;  %3113 = vpow2.f32 %v1248_v23 }
 0x186   : >> { %v6309_v1 = vsub.f32 0.0, %v11449_v21  ;;  %v11455_v3 = vand.u32 2147483647, %v11454_v39  ;;  %v11456_v37 = vand.u32 2147483647, %v5768_v8  ;;  %v6327_v21 = vpop.eup %3091  ;;  %v11458_v6 = vld [vmem:[#allocation165_spill] sm:$0xff] }
 0x187   : >> { %v6313_v12 = vsub.f32 0.0, %v11451_v7  ;;  %v1252_v5 = vmul.f32 1.442695, %v6177_v45  ;;  %11457 = vst [vmem:[#allocation150_spill] sm:$0xff] %v6327_v21  ;;  %v11459_v7 = vand.u32 2147483647, %v11458_v6  ;;  %3115 = vpow2.f32 %v1250_v40 }
 0x188   : >> { %v6320_v10 = vsub.f32 0.0, %v11455_v3  ;;  %v6324_v29 = vsub.f32 0.0, %v11456_v37  ;;  %v11460_v59 = vld [vmem:[#allocation166_spill] sm:$0xff]  ;;  %v1254_v39 = vmul.f32 1.442695, %v6181_v38  ;;  %v6338_v3 = vpop.eup %3093  ;;  %v11465_v45 = vld [vmem:[#allocation168_spill] sm:$0xff] }
 0x189   : >> { %11452 = vst [vmem:[#allocation147_spill] sm:$0xff] %v6313_v12  ;;  %v6331_v28 = vsub.f32 0.0, %v11459_v7  ;;  %v11461_v12 = vand.u32 2147483647, %v11460_v59  ;;  %11463 = vst [vmem:[#allocation153_spill] sm:$0xff] %v6338_v3  ;;  %v6349_v7 = vpop.eup %3095  ;;  %v11471_v38 = vld [vmem:[#allocation171_spill] sm:$0xff]  ;;  %3117 = vpow2.f32 %v1252_v5 }
 0x18a   : >> { %v11464_v8 = vand.u32 2147483647, %v5785_v20  ;;  %v11466_v37 = vand.u32 2147483647, %v11465_v45  ;;  %v1256_v6 = vmul.f32 1.442695, %v6187_v48  ;;  %3119 = vpow2.f32 %v1254_v39 }
 0x18b   : >> { %v6335_v30 = vsub.f32 0.0, %v11461_v12  ;;  %11468 = vst [vmem:[#allocation156_spill] sm:$0xff] %v6349_v7  ;;  %v11469_v12 = vld [vmem:[#allocation169_spill] sm:$0xff]  ;;  %v1258_v20 = vmul.f32 1.442695, %v6191_v57  ;;  %v11474_v45 = vld [vmem:[#allocation172_spill] sm:$0xff] }
 0x18c   : >> { %v6342_v16 = vsub.f32 0.0, %v11464_v8  ;;  %v6346_v21 = vsub.f32 0.0, %v11466_v37  ;;  %v11470_v59 = vand.u32 2147483647, %v11469_v12  ;;  %v6360_v8 = vpop.eup %3097  ;;  %v11475_v37 = vand.u32 2147483647, %v11474_v45 }
 0x18d   : >> { %11462 = vst [vmem:[#allocation151_spill] sm:$0xff] %v6335_v30  ;;  %v11472_v30 = vand.u32 2147483647, %v11471_v38  ;;  %11473 = vst [vmem:[#allocation157_spill] sm:$0xff] %v6360_v8  ;;  %v11476_v48 = vld [vmem:[#allocation173_spill] sm:$0xff]  ;;  %v11480_v57 = vld [vmem:[#allocation175_spill] sm:$0xff]  ;;  %3121 = vpow2.f32 %v1256_v6 }
 0x18e   : >> { %11467 = vst [vmem:[#allocation154_spill] sm:$0xff] %v6346_v21  ;;  %v6353_v60 = vsub.f32 0.0, %v11470_v59  ;;  %v6364_v23 = vsub.f32 0.0, %v11475_v37  ;;  %v11477_v21 = vand.u32 2147483647, %v11476_v48  ;;  %v6371_v59 = vpop.eup %3099  ;;  %3123 = vpow2.f32 %v1258_v20 }
 0x18f   : >> { %v6357_v3 = vsub.f32 0.0, %v11472_v30  ;;  %v1260_v12 = vmul.f32 1.442695, %v6197_v26  ;;  %11478 = vst [vmem:[#allocation159_spill] sm:$0xff] %v6371_v59  ;;  %v11479_v30 = vand.u32 2147483647, %v5819_v4  ;;  %v6382_v37 = vpop.eup %3101 }
 0x190   : >> { %v6368_v7 = vsub.f32 0.0, %v11477_v21  ;;  %v11481_v38 = vand.u32 2147483647, %v11480_v57  ;;  %v1262_v45 = vmul.f32 1.442695, %v6201_v24  ;;  %11483 = vst [vmem:[#allocation162_spill] sm:$0xff] %v6382_v37 }
 0x191   : >> { %v6375_v40 = vsub.f32 0.0, %v11479_v30  ;;  %v11484_v21 = vand.u32 2147483647, %v5827_v56  ;;  %v11485_v26 = vld [vmem:[#allocation177_spill] sm:$0xff]  ;;  %v1264_v4 = vmul.f32 1.442695, %v6207_v31  ;;  %v6393_v30 = vpop.eup %3103  ;;  %3125 = vpow2.f32 %v1260_v12 }
 0x192   : >> { %v6379_v8 = vsub.f32 0.0, %v11481_v38  ;;  %v11486_v48 = vand.u32 2147483647, %v11485_v26  ;;  %11488 = vst [vmem:[#allocation165_spill] sm:$0xff] %v6393_v30  ;;  %v11489_v57 = vld [vmem:[#allocation178_spill] sm:$0xff]  ;;  %v11491_v24 = vld [vmem:[#allocation179_spill] sm:$0xff]  ;;  %3127 = vpow2.f32 %v1262_v45 }
 0x193   : >> { %v6386_v5 = vsub.f32 0.0, %v11484_v21  ;;  %v11490_v38 = vand.u32 2147483647, %v11489_v57  ;;  %v1266_v56 = vmul.f32 1.442695, %v6211_v35  ;;  %v6404_v21 = vpop.eup %3105  ;;  %v11494_v26 = vld [vmem:[#allocation181_spill] sm:$0xff]  ;;  %3129 = vpow2.f32 %v1264_v4 }
 0x194   : >> { %11482 = vst [vmem:[#allocation160_spill] sm:$0xff] %v6379_v8  ;;  %v6390_v59 = vsub.f32 0.0, %v11486_v48  ;;  %v11492_v8 = vand.u32 2147483647, %v11491_v24  ;;  %11493 = vst [vmem:[#allocation166_spill] sm:$0xff] %v6404_v21  ;;  %v11496_v31 = vld [vmem:[#allocation182_spill] sm:$0xff] }
 0x195   : >> { %v6397_v39 = vsub.f32 0.0, %v11490_v38  ;;  %v11495_v48 = vand.u32 2147483647, %v11494_v26  ;;  %v1268_v57 = vmul.f32 1.442695, %v6217_v42  ;;  %v6415_v38 = vpop.eup %3107  ;;  %v11500_v35 = vld [vmem:[#allocation184_spill] sm:$0xff]  ;;  %3131 = vpow2.f32 %v1266_v56 }
 0x196   : >> { %11487 = vst [vmem:[#allocation163_spill] sm:$0xff] %v6390_v59  ;;  %v6401_v37 = vsub.f32 0.0, %v11492_v8  ;;  %v11497_v59 = vand.u32 2147483647, %v11496_v31  ;;  %11498 = vst [vmem:[#allocation168_spill] sm:$0xff] %v6415_v38  ;;  %v11505_v42 = vld [vmem:[#allocation186_spill] sm:$0xff] }
 0x197   : >> { %v6408_v6 = vsub.f32 0.0, %v11495_v48  ;;  %v11499_v8 = vand.u32 2147483647, %v5868_v14  ;;  %v11501_v24 = vand.u32 2147483647, %v11500_v35  ;;  %v6426_v48 = vpop.eup %3109  ;;  %v11508_v35 = vld [vmem:[#allocation188_spill] sm:$0xff]  ;;  %3133 = vpow2.f32 %v1268_v57 }
 0x198   : >> { %v6412_v30 = vsub.f32 0.0, %v11497_v59  ;;  %v1270_v26 = vmul.f32 1.442695, %v6221_v54  ;;  %11503 = vst [vmem:[#allocation171_spill] sm:$0xff] %v6426_v48  ;;  %v11504_v59 = vand.u32 2147483647, %v5883_v44 }
 0x199   : >> { %v6419_v20 = vsub.f32 0.0, %v11499_v8  ;;  %v6423_v21 = vsub.f32 0.0, %v11501_v24  ;;  %v11506_v31 = vand.u32 2147483647, %v11505_v42  ;;  %v1272_v14 = vmul.f32 1.442695, %v6227_v49  ;;  %v6437_v8 = vpop.eup %3111 }
 0x19a   : >> { %v6430_v12 = vsub.f32 0.0, %v11504_v59  ;;  %11507 = vst [vmem:[#allocation172_spill] sm:$0xff] %v6437_v8  ;;  %v11509_v24 = vand.u32 2147483647, %v11508_v35  ;;  %v11510_v54 = vld [vmem:[#allocation189_spill] sm:$0xff]  ;;  %v6448_v59 = vpop.eup %3113  ;;  %v11513_v42 = vld [vmem:[#allocation191_spill] sm:$0xff]  ;;  %3135 = vpow2.f32 %v1270_v26 }
 0x19b   : >> { %11502 = vst [vmem:[#allocation169_spill] sm:$0xff] %v6423_v21  ;;  %v6434_v38 = vsub.f32 0.0, %v11506_v31  ;;  %v11511_v21 = vand.u32 2147483647, %v11510_v54  ;;  %v1274_v44 = vmul.f32 1.442695, %v6231_v61  ;;  %3137 = vpow2.f32 %v1272_v14 }
 0x19c   : >> { %v6441_v45 = vsub.f32 0.0, %v11509_v24  ;;  %11512 = vst [vmem:[#allocation173_spill] sm:$0xff] %v6448_v59  ;;  %v11514_v31 = vand.u32 2147483647, %v11513_v42  ;;  %v11515_v49 = vand.u32 2147483647, %v5924_v11  ;;  %v6459_v24 = vpop.eup %3115 }
 0x19d   : >> { %v6445_v48 = vsub.f32 0.0, %v11511_v21  ;;  %v1276_v35 = vmul.f32 1.442695, %v6237_v46  ;;  %v11516_v21 = vld [vmem:[#allocation193_spill] sm:$0xff]  ;;  %v11518_v61 = vand.u32 2147483647, %v5946_v32  ;;  %3139 = vpow2.f32 %v1274_v44 }
 0x19e   : >> { %v6452_v4 = vsub.f32 0.0, %v11514_v31  ;;  %v6456_v8 = vsub.f32 0.0, %v11515_v49  ;;  %v11517_v54 = vand.u32 2147483647, %v11516_v21  ;;  %v1278_v42 = vmul.f32 1.442695, %v6241_v47  ;;  %v6470_v31 = vpop.eup %3117 }
 0x19f   : >> { %v6467_v59 = vsub.f32 0.0, %v11518_v61  ;;  %11519 = vst [vmem:[#allocation175_spill] sm:$0xff] %v6470_v31  ;;  %v11520_v11 = vand.u32 2147483647, %v5952_v27  ;;  %v11521_v46 = vand.u32 2147483647, %v5958_v25  ;;  %3141 = vpow2.f32 %v1276_v35 }
 0x1a0   : >> { %v6463_v56 = vsub.f32 0.0, %v11517_v54  ;;  %v1280_v21 = vmul.f32 1.442695, %v6247_v33  ;;  %v6481_v54 = vpop.eup %3119  ;;  %v11523_v32 = vand.u32 2147483647, %v5964_v50  ;;  %3143 = vpow2.f32 %v1278_v42 }
 0x1a1   : >> { %v6474_v57 = vsub.f32 0.0, %v11520_v11  ;;  %v6478_v49 = vsub.f32 0.0, %v11521_v46  ;;  %11522 = vst [vmem:[#allocation177_spill] sm:$0xff] %v6481_v54  ;;  %v11524_v47 = vand.u32 2147483647, %v5970_v0  ;;  %v6492_v11 = vpop.eup %3121 }
 0x1a2   : >> { %v6485_v26 = vsub.f32 0.0, %v11523_v32  ;;  %v1282_v27 = vmul.f32 1.442695, %v6251_v15  ;;  %11525 = vst [vmem:[#allocation178_spill] sm:$0xff] %v6492_v11  ;;  %v11526_v25 = vand.u32 2147483647, %v5976_v58  ;;  %v6503_v32 = vpop.eup %3123  ;;  %3145 = vpow2.f32 %v1280_v21 }
 0x1a3   : >> { %v6489_v61 = vsub.f32 0.0, %v11524_v47  ;;  %v11527_v33 = vand.u32 2147483647, %v5982_v34  ;;  %v1284_v50 = vmul.f32 1.442695, %v6257_v55  ;;  %11528 = vst [vmem:[#allocation179_spill] sm:$0xff] %v6503_v32 }
 0x1a4   : >> { %v6496_v14 = vsub.f32 0.0, %v11526_v25  ;;  %v11529_v0 = vand.u32 2147483647, %v5988_v17  ;;  %v11530_v15 = vand.u32 2147483647, %v5994_v18  ;;  %v6514_v25 = vpop.eup %3125  ;;  %3147 = vpow2.f32 %v1282_v27 }
 0x1a5   : >> { %v6500_v46 = vsub.f32 0.0, %v11527_v33  ;;  %v1286_v58 = vmul.f32 1.442695, %v6261_v52  ;;  %11531 = vst [vmem:[#allocation181_spill] sm:$0xff] %v6514_v25  ;;  %v11532_v34 = vand.u32 2147483647, %v6000_v43  ;;  %3149 = vpow2.f32 %v1284_v50 }
 0x1a6   : >> { %v6507_v44 = vsub.f32 0.0, %v11529_v0  ;;  %v6511_v47 = vsub.f32 0.0, %v11530_v15  ;;  %v11533_v55 = vand.u32 2147483647, %v6006_v9  ;;  %v1288_v17 = vmul.f32 1.442695, %v6267_v13  ;;  %v6525_v0 = vpop.eup %3127 }
 0x1a7   : >> { %v6518_v35 = vsub.f32 0.0, %v11532_v34  ;;  %11534 = vst [vmem:[#allocation182_spill] sm:$0xff] %v6525_v0  ;;  %v11535_v18 = vand.u32 2147483647, %v6014_v41  ;;  %v11536_v52 = vand.u32 2147483647, %v6022_v53  ;;  %v6536_v34 = vpop.eup %3129  ;;  %3151 = vpow2.f32 %v1286_v58 }
 0x1a8   : >> { %v6522_v33 = vsub.f32 0.0, %v11533_v55  ;;  %v1290_v43 = vmul.f32 1.442695, %v6271_v22  ;;  %11537 = vst [vmem:[#allocation184_spill] sm:$0xff] %v6536_v34  ;;  %v11538_v9 = vld [vmem:[#allocation197_spill] sm:$0xff]  ;;  %v11540_v13 = vld [vmem:[#allocation199_spill] sm:$0xff]  ;;  %3153 = vpow2.f32 %v1288_v17 }
 0x1a9   : >> { %v6529_v42 = vsub.f32 0.0, %v11535_v18  ;;  %v6533_v15 = vsub.f32 0.0, %v11536_v52  ;;  %v11539_v55 = vand.u32 2147483647, %v11538_v9  ;;  %v11541_v25 = vand.u32 2147483647, %v11540_v13  ;;  %v6547_v18 = vpop.eup %3131 }
 0x1aa   : >> { %v1292_v41 = vmul.f32 1.442695, %v6277_v36  ;;  %11542 = vst [vmem:[#allocation186_spill] sm:$0xff] %v6547_v18  ;;  %v11543_v53 = vld [vmem:[#allocation201_spill] sm:$0xff]  ;;  %v11545_v22 = vld [vmem:[#allocation203_spill] sm:$0xff]  ;;  %3155 = vpow2.f32 %v1290_v43 }
 0x1ab   : >> { %v6540_v21 = vsub.f32 0.0, %v11539_v55  ;;  %v6544_v0 = vsub.f32 0.0, %v11541_v25  ;;  %v11544_v52 = vand.u32 2147483647, %v11543_v53  ;;  %v11546_v32 = vand.u32 2147483647, %v11545_v22  ;;  %v6558_v55 = vpop.eup %3133 }
 0x1ac   : >> { %v1294_v9 = vmul.f32 1.442695, %v6281_v19  ;;  %11547 = vst [vmem:[#allocation188_spill] sm:$0xff] %v6558_v55  ;;  %v11548_v25 = vld [vmem:[#allocation205_spill] sm:$0xff]  ;;  %v11550_v36 = vld [vmem:[#allocation207_spill] sm:$0xff]  ;;  %3157 = vpow2.f32 %v1292_v41 }
 0x1ad   : >> { %v6551_v27 = vsub.f32 0.0, %v11544_v52  ;;  %v6555_v34 = vsub.f32 0.0, %v11546_v32  ;;  %v11549_v13 = vand.u32 2147483647, %v11548_v25  ;;  %v11551_v11 = vand.u32 2147483647, %v11550_v36  ;;  %v6569_v52 = vpop.eup %3135 }
 0x1ae   : >> { %v1296_v53 = vmul.f32 1.442695, %v6287_v63  ;;  %11552 = vst [vmem:[#allocation189_spill] sm:$0xff] %v6569_v52  ;;  %v11553_v32 = vld [vmem:[#allocation209_spill] sm:$0xff]  ;;  %v11555_v19 = vld [vmem:[#allocation211_spill] sm:$0xff]  ;;  %3159 = vpow2.f32 %v1294_v9 }
 0x1af   : >> { %v6562_v50 = vsub.f32 0.0, %v11549_v13  ;;  %v6566_v18 = vsub.f32 0.0, %v11551_v11  ;;  %v11554_v22 = vand.u32 2147483647, %v11553_v32  ;;  %v11556_v54 = vand.u32 2147483647, %v11555_v19  ;;  %v6580_v13 = vpop.eup %3137 }
 0x1b0   : >> { %v1298_v25 = vmul.f32 1.442695, %v6291_v62  ;;  %11557 = vst [vmem:[#allocation191_spill] sm:$0xff] %v6580_v13  ;;  %v11558_v11 = vld [vmem:[#allocation213_spill] sm:$0xff]  ;;  %v11560_v63 = vld [vmem:[#allocation215_spill] sm:$0xff]  ;;  %3161 = vpow2.f32 %v1296_v53 }
 0x1b1   : >> { %v6573_v58 = vsub.f32 0.0, %v11554_v22  ;;  %v6577_v55 = vsub.f32 0.0, %v11556_v54  ;;  %v11559_v36 = vand.u32 2147483647, %v11558_v11  ;;  %v11561_v31 = vand.u32 2147483647, %v11560_v63  ;;  %v6591_v22 = vpop.eup %3139 }
 0x1b2   : >> { %v1300_v32 = vmul.f32 1.442695, %v6298_v2  ;;  %11562 = vst [vmem:[#allocation193_spill] sm:$0xff] %v6591_v22  ;;  %v1302_v54 = vmul.f32 1.442695, %v6302_v51  ;;  %v11563_v43 = vld [vmem:[#allocation147_spill] sm:$0xff]  ;;  %v6596_v13 = vpop.eup %3141  ;;  %3163 = vpow2.f32 %v1298_v25 }
 0x1b3   : >> { %v6584_v17 = vsub.f32 0.0, %v11559_v36  ;;  %v6588_v52 = vsub.f32 0.0, %v11561_v31  ;;  %v1304_v62 = vmul.f32 1.442695, %v6309_v1  ;;  %v1306_v19 = vmul.f32 1.442695, %v11563_v43  ;;  %v6601_v36 = vpop.eup %3143 }
 0x1b4   : >> { %11564 = vst [vmem:[#allocation197_spill] sm:$0xff] %v6596_v13  ;;  %v1308_v11 = vmul.f32 1.442695, %v6320_v10  ;;  %v1310_v31 = vmul.f32 1.442695, %v6324_v29  ;;  %11565 = vst [vmem:[#allocation199_spill] sm:$0xff] %v6601_v36  ;;  %v6606_v22 = vpop.eup %3145  ;;  %3165 = vpow2.f32 %v1300_v32 }
 0x1b5   : >> { %v1312_v41 = vmul.f32 1.442695, %v6331_v28  ;;  %v11566_v2 = vld [vmem:[#allocation151_spill] sm:$0xff]  ;;  %v1316_v51 = vmul.f32 1.442695, %v6342_v16  ;;  %v11567_v63 = vld [vmem:[#allocation154_spill] sm:$0xff]  ;;  %v6611_v43 = vpop.eup %3147  ;;  %3167 = vpow2.f32 %v1302_v54 }
 0x1b6   : >> { %v1314_v9 = vmul.f32 1.442695, %v11566_v2  ;;  %v1318_v1 = vmul.f32 1.442695, %v11567_v63  ;;  %11568 = vst [vmem:[#allocation201_spill] sm:$0xff] %v6606_v22  ;;  %11569 = vst [vmem:[#allocation203_spill] sm:$0xff] %v6611_v43  ;;  %v6618_v63 = vpop.eup %3149  ;;  %3169 = vpow2.f32 %v1304_v62 }
 0x1b7   : >> { %v1320_v53 = vmul.f32 1.442695, %v6353_v60  ;;  %v1322_v10 = vmul.f32 1.442695, %v6357_v3  ;;  %v1324_v29 = vmul.f32 1.442695, %v6364_v23  ;;  %v6629_v54 = vpop.eup %3151  ;;  %3171 = vpow2.f32 %v1306_v19 }
 0x1b8   : >> { %v1326_v28 = vmul.f32 1.442695, %v6368_v7  ;;  %v1328_v25 = vmul.f32 1.442695, %v6375_v40  ;;  %v11570_v2 = vld [vmem:[#allocation160_spill] sm:$0xff]  ;;  %11571 = vst [vmem:[#allocation205_spill] sm:$0xff] %v6618_v63  ;;  %3173 = vpow2.f32 %v1308_v11 }
 0x1b9   : >> { %v6616_v16 = vmul.f32 1.442695, %v11570_v2  ;;  %v6621_v32 = vmul.f32 1.442695, %v6386_v5  ;;  %v11572_v60 = vld [vmem:[#allocation163_spill] sm:$0xff]  ;;  %11573 = vst [vmem:[#allocation207_spill] sm:$0xff] %v6629_v54  ;;  %v6640_v5 = vpop.eup %3153  ;;  %3175 = vpow2.f32 %v1310_v31 }
 0x1ba   : >> { %v6624_v3 = vmul.f32 1.442695, %v11572_v60  ;;  %v6627_v23 = vmul.f32 1.442695, %v6397_v39  ;;  %v6632_v7 = vmul.f32 1.442695, %v6401_v37  ;;  %v6651_v37 = vpop.eup %3155  ;;  %3177 = vpow2.f32 %v1312_v41 }
 0x1bb   : >> { %v6635_v40 = vmul.f32 1.442695, %v6408_v6  ;;  %v6638_v62 = vmul.f32 1.442695, %v6412_v30  ;;  %11574 = vst [vmem:[#allocation209_spill] sm:$0xff] %v6640_v5  ;;  %v11575_v39 = vld [vmem:[#allocation169_spill] sm:$0xff]  ;;  %3179 = vpow2.f32 %v1314_v9 }
 0x1bc   : >> { %v6643_v2 = vmul.f32 1.442695, %v6419_v20  ;;  %v6646_v60 = vmul.f32 1.442695, %v11575_v39  ;;  %v6649_v19 = vmul.f32 1.442695, %v6430_v12  ;;  %v6662_v20 = vpop.eup %3157  ;;  %3181 = vpow2.f32 %v1316_v51 }
 0x1bd   : >> { %11576 = vst [vmem:[#allocation211_spill] sm:$0xff] %v6651_v37  ;;  %v6654_v6 = vmul.f32 1.442695, %v6434_v38  ;;  %v6657_v30 = vmul.f32 1.442695, %v6441_v45  ;;  %11577 = vst [vmem:[#allocation213_spill] sm:$0xff] %v6662_v20  ;;  %v6673_v38 = vpop.eup %3159  ;;  %3183 = vpow2.f32 %v1318_v1 }
 0x1be   : >> { %v6660_v11 = vmul.f32 1.442695, %v6445_v48  ;;  %v6665_v39 = vmul.f32 1.442695, %v6452_v4  ;;  %v6668_v12 = vmul.f32 1.442695, %v6456_v8  ;;  %v6684_v4 = vpop.eup %3161  ;;  %3185 = vpow2.f32 %v1320_v53 }
 0x1bf   : >> { %v6671_v31 = vmul.f32 1.442695, %v6463_v56  ;;  %11578 = vst [vmem:[#allocation215_spill] sm:$0xff] %v6673_v38  ;;  %v6676_v45 = vmul.f32 1.442695, %v6467_v59  ;;  %11579 = vst [vmem:[#allocation147_spill] sm:$0xff] %v6684_v4  ;;  %v6695_v59 = vpop.eup %3163  ;;  %3187 = vpow2.f32 %v1322_v10 }
 0x1c0   : >> { %v6679_v48 = vmul.f32 1.442695, %v6474_v57  ;;  %v6682_v41 = vmul.f32 1.442695, %v6478_v49  ;;  %v6687_v8 = vmul.f32 1.442695, %v6485_v26  ;;  %v6706_v26 = vpop.eup %3165  ;;  %3189 = vpow2.f32 %v1324_v29 }
 0x1c1   : >> { %v6690_v56 = vmul.f32 1.442695, %v6489_v61  ;;  %v6693_v9 = vmul.f32 1.442695, %v6496_v14  ;;  %11580 = vst [vmem:[#allocation151_spill] sm:$0xff] %v6695_v59  ;;  %11581 = vst [vmem:[#allocation154_spill] sm:$0xff] %v6706_v26  ;;  %3191 = vpow2.f32 %v1326_v28 }
 0x1c2   : >> { %v6698_v57 = vmul.f32 1.442695, %v6500_v46  ;;  %v6701_v49 = vmul.f32 1.442695, %v6507_v44  ;;  %v6704_v51 = vmul.f32 1.442695, %v6511_v47  ;;  %v6717_v46 = vpop.eup %3167  ;;  %3193 = vpow2.f32 %v1328_v25 }
 0x1c3   : >> { %v6709_v61 = vmul.f32 1.442695, %v6518_v35  ;;  %v6712_v14 = vmul.f32 1.442695, %v6522_v33  ;;  %v6715_v1 = vmul.f32 1.442695, %v6529_v42  ;;  %v6726_v59 = vpop.eup %3169  ;;  %3195 = vpow2.f32 %v6616_v16 }
 0x1c4   : >> { %11582 = vst [vmem:[#allocation160_spill] sm:$0xff] %v6717_v46  ;;  %v6720_v44 = vmul.f32 1.442695, %v6533_v15  ;;  %v6723_v47 = vmul.f32 1.442695, %v6540_v21  ;;  %v11583_v26 = vld [vmem:[#allocation194_spill] sm:$0xff]  ;;  %v6735_v10 = vpop.eup %3171  ;;  %3197 = vpow2.f32 %v6621_v32 }
 0x1c5   : >> { %v1411_v53 = vmul.f32 -0.5, %v11583_v26  ;;  %11584 = vst [vmem:[#allocation163_spill] sm:$0xff] %v6726_v59  ;;  %v6729_v35 = vmul.f32 1.442695, %v6544_v0  ;;  %v6732_v33 = vmul.f32 1.442695, %v6551_v27  ;;  %v6746_v29 = vpop.eup %3173  ;;  %3199 = vpow2.f32 %v6624_v3 }
 0x1c6   : >> { %v11585_v42 = vld [vmem:[#allocation195_spill] sm:$0xff]  ;;  %11586 = vst [vmem:[#allocation169_spill] sm:$0xff] %v6735_v10  ;;  %v6738_v15 = vmul.f32 1.442695, %v6555_v34  ;;  %v6741_v21 = vmul.f32 1.442695, %v6562_v50  ;;  %v6755_v4 = vpop.eup %3175  ;;  %3201 = vpow2.f32 %v6627_v23 }
 0x1c7   : >> { %v1420_v46 = vmul.f32 -0.5, %v11585_v42  ;;  %v6744_v59 = vmul.f32 1.442695, %v6566_v18  ;;  %11587 = vst [vmem:[#allocation194_spill] sm:$0xff] %v6746_v29  ;;  %v6749_v0 = vmul.f32 1.442695, %v6573_v58  ;;  %v6764_v25 = vpop.eup %3177  ;;  %3203 = vpow2.f32 %v6632_v7 }
 0x1c8   : >> { %v6752_v27 = vmul.f32 1.442695, %v6577_v55  ;;  %v11588_v10 = vld [vmem:[#allocation196_spill] sm:$0xff]  ;;  %11589 = vst [vmem:[#allocation195_spill] sm:$0xff] %v6755_v4  ;;  %v6759_v34 = vmul.f32 1.442695, %v6584_v17  ;;  %v6771_v4 = vpop.eup %3179  ;;  %3205 = vpow2.f32 %v6635_v40 }
 0x1c9   : >> { %v1429_v28 = vmul.f32 -0.5, %v11588_v10  ;;  %v6762_v18 = vmul.f32 1.442695, %v6588_v52  ;;  %v1412_v50 = vadd.f32 1.0, %v1411_v53  ;;  %11590 = vst [vmem:[#allocation196_spill] sm:$0xff] %v6764_v25  ;;  %v6768_v55 = vadd.f32 1.0, %v11583_v26  ;;  %v6779_v25 = vpop.eup %3181 }
 0x1ca   : >> { %v1421_v58 = vadd.f32 1.0, %v1420_v46  ;;  %v11591_v29 = vld [vmem:[#allocation198_spill] sm:$0xff]  ;;  %v6776_v52 = vadd.f32 1.0, %v11585_v42  ;;  %v11593_v16 = vld [vmem:[#allocation200_spill] sm:$0xff]  ;;  %v6784_v46 = vadd.f32 1.0, %v11588_v10  ;;  %3207 = vpow2.f32 %v6638_v62 }
 0x1cb   : >> { %v1438_v38 = vmul.f32 -0.5, %v11591_v29  ;;  %11592 = vst [vmem:[#allocation198_spill] sm:$0xff] %v6771_v4  ;;  %v1447_v53 = vmul.f32 -0.5, %v11593_v16  ;;  %11594 = vst [vmem:[#allocation200_spill] sm:$0xff] %v6779_v25  ;;  %v1430_v20 = vadd.f32 1.0, %v1429_v28  ;;  %v6786_v4 = vpop.eup %3183  ;;  %v6790_v3 = vmul.f32 %v11583_v26, %v1412_v50  ;;  %v11596_v37 = vld [vmem:[#allocation202_spill] sm:$0xff] }
 0x1cc   : >> { %11595 = vst [vmem:[#allocation218_spill] sm:$0xff] %v6786_v4  ;;  %v1456_v5 = vmul.f32 -0.5, %v11596_v37  ;;  %v6794_v25 = vpop.eup %3185  ;;  %v6798_v23 = vmul.f32 %v11585_v42, %v1421_v58  ;;  %v6801_v28 = vadd.f32 1.0, %v11591_v29  ;;  %v11599_v17 = vld [vmem:[#allocation204_spill] sm:$0xff]  ;;  %3209 = vpow2.f32 %v6643_v2 }
 0x1cd   : >> { %11597 = vst [vmem:[#allocation219_spill] sm:$0xff] %v6794_v25  ;;  %v1439_v32 = vadd.f32 1.0, %v1438_v38  ;;  %v6803_v4 = vpop.eup %3187  ;;  %v1448_v50 = vadd.f32 1.0, %v1447_v53  ;;  %v1465_v54 = vmul.f32 -0.5, %v11599_v17  ;;  %v6812_v40 = vmul.f32 %v11588_v10, %v1430_v20  ;;  %v11602_v38 = vld [vmem:[#allocation206_spill] sm:$0xff]  ;;  %v11606_v43 = vld [vmem:[#allocation208_spill] sm:$0xff] }
 0x1ce   : >> { %11598 = vst [vmem:[#allocation220_spill] sm:$0xff] %v6803_v4  ;;  %v6808_v63 = vpop.eup %3189  ;;  %v6815_v58 = vadd.f32 1.0, %v11593_v16  ;;  %v1474_v25 = vmul.f32 -0.5, %v11602_v38  ;;  %3211 = vpow2.f32 %v6646_v60  ;;  %v6823_v53 = vadd.f32 1.0, %v11596_v37  ;;  %v11610_v20 = vld [vmem:[#allocation210_spill] sm:$0xff] }
 0x1cf   : >> { %11600 = vst [vmem:[#allocation221_spill] sm:$0xff] %v6808_v63  ;;  %11601 = vst [vmem:[#allocation222_spill] sm:$0xff] %v6812_v40  ;;  %v6818_v4 = vpop.eup %3191  ;;  %v1457_v7 = vadd.f32 1.0, %v1456_v5  ;;  %3213 = vpow2.f32 %v6649_v19  ;;  %v6829_v2 = vmul.f32 %v11591_v29, %v1439_v32  ;;  %v1483_v22 = vmul.f32 -0.5, %v11606_v43  ;;  %v11614_v19 = vld [vmem:[#allocation212_spill] sm:$0xff] }
 0x1d0   : >> { %11603 = vst [vmem:[#allocation223_spill] sm:$0xff] %v6818_v4  ;;  %v6825_v63 = vpop.eup %3193  ;;  %3215 = vpow2.f32 %v6654_v6  ;;  %v6837_v60 = vmul.f32 %v11593_v16, %v1448_v50  ;;  %v6840_v5 = vadd.f32 1.0, %v11599_v17  ;;  %v1466_v62 = vadd.f32 1.0, %v1465_v54  ;;  %v11617_v54 = vld [vmem:[#allocation214_spill] sm:$0xff] }
 0x1d1   : >> { %11604 = vst [vmem:[#allocation224_spill] sm:$0xff] %v6825_v63  ;;  %11605 = vst [vmem:[#allocation225_spill] sm:$0xff] %v6829_v2  ;;  %v6833_v4 = vpop.eup %3195  ;;  %3217 = vpow2.f32 %v6657_v30  ;;  %v1475_v32 = vadd.f32 1.0, %v1474_v25  ;;  %v1492_v36 = vmul.f32 -0.5, %v11610_v20  ;;  %v6851_v6 = vmul.f32 %v11596_v37, %v1457_v7  ;;  %v11621_v7 = vld [vmem:[#allocation216_spill] sm:$0xff] }
 0x1d2   : >> { %11607 = vst [vmem:[#allocation226_spill] sm:$0xff] %v6833_v4  ;;  %11608 = vst [vmem:[#allocation227_spill] sm:$0xff] %v6837_v60  ;;  %v6842_v63 = vpop.eup %3197  ;;  %3219 = vpow2.f32 %v6660_v11  ;;  %v6854_v50 = vadd.f32 1.0, %v11602_v38  ;;  %v6861_v30 = vadd.f32 1.0, %v11606_v43  ;;  %v1484_v25 = vadd.f32 1.0, %v1483_v22 }
 0x1d3   : >> { %11609 = vst [vmem:[#allocation228_spill] sm:$0xff] %v6842_v63  ;;  %v6847_v13 = vpop.eup %3199  ;;  %11612 = vst [vmem:[#allocation230_spill] sm:$0xff] %v6851_v6  ;;  %3221 = vpow2.f32 %v6665_v39  ;;  %v6868_v11 = vmul.f32 %v11599_v17, %v1466_v62  ;;  %v1510_v6 = vmul.f32 -0.5, %v11617_v54  ;;  %v6876_v39 = vmul.f32 %v11602_v38, %v1475_v32 }
 0x1d4   : >> { %11611 = vst [vmem:[#allocation229_spill] sm:$0xff] %v6847_v13  ;;  %v6857_v63 = vpop.eup %3201  ;;  %v1501_v13 = vmul.f32 -0.5, %v11614_v19  ;;  %3223 = vpow2.f32 %v6668_v12  ;;  %v6879_v22 = vadd.f32 1.0, %v11610_v20  ;;  %v6886_v62 = vadd.f32 1.0, %v11614_v19 }
 0x1d5   : >> { %11613 = vst [vmem:[#allocation231_spill] sm:$0xff] %v6857_v63  ;;  %v6864_v4 = vpop.eup %3203  ;;  %11616 = vst [vmem:[#allocation233_spill] sm:$0xff] %v6868_v11  ;;  %3225 = vpow2.f32 %v6671_v31  ;;  %v1519_v11 = vmul.f32 -0.5, %v11621_v7  ;;  %v6893_v31 = vmul.f32 %v11606_v43, %v1484_v25  ;;  %v6901_v12 = vadd.f32 1.0, %v11617_v54  ;;  %v11628_v25 = vld [vmem:[#allocation65_spill] sm:$0xff] }
 0x1d6   : >> { %11615 = vst [vmem:[#allocation232_spill] sm:$0xff] %v6864_v4  ;;  %v6872_v37 = vpop.eup %3205  ;;  %11619 = vst [vmem:[#allocation235_spill] sm:$0xff] %v6876_v39  ;;  %v1493_v4 = vadd.f32 1.0, %v1492_v36  ;;  %3227 = vpow2.f32 %v6676_v45  ;;  %v1502_v32 = vadd.f32 1.0, %v1501_v13  ;;  %v11624_v36 = vld [vmem:[#allocation217_spill] sm:$0xff]  ;;  %v11753_v2 = vmov 0 }
 0x1d7   : >> { %11618 = vst [vmem:[#allocation234_spill] sm:$0xff] %v6872_v37  ;;  %v6881_v63 = vpop.eup %3207  ;;  %3229 = vpow2.f32 %v6679_v48  ;;  %11623 = vst [vmem:[#allocation238_spill] sm:$0xff] %v6893_v31  ;;  %v1528_v39 = vmul.f32 -0.5, %v11624_v36  ;;  %v1537_v31 = vmul.f32 -0.5, %v11628_v25  ;;  %v1520_v45 = vadd.f32 1.0, %v1519_v11 }
 0x1d8   : >> { %11620 = vst [vmem:[#allocation236_spill] sm:$0xff] %v6881_v63  ;;  %v6889_v17 = vpop.eup %3209  ;;  %3231 = vpow2.f32 %v6682_v41  ;;  %v1511_v63 = vadd.f32 1.0, %v1510_v6  ;;  %v6907_v48 = vmul.f32 %v11610_v20, %v1493_v4  ;;  %v6915_v41 = vadd.f32 1.0, %v11621_v7  ;;  %v11630_v6 = vld [vmem:[#allocation66_spill] sm:$0xff]  ;;  %v11635_v20 = vld [vmem:[#allocation140_spill] sm:$0xff] }
 0x1d9   : >> { %11622 = vst [vmem:[#allocation237_spill] sm:$0xff] %v6889_v17  ;;  %v6896_v38 = vpop.eup %3211  ;;  %3233 = vpow2.f32 %v6687_v8  ;;  %v6922_v4 = vmul.f32 %v11614_v19, %v1502_v32  ;;  %v1529_v13 = vadd.f32 1.0, %v1528_v39  ;;  %v6932_v11 = vadd.f32 1.0, %v11624_v36 }
 0x1da   : >> { %11625 = vst [vmem:[#allocation239_spill] sm:$0xff] %v6896_v38  ;;  %v6903_v37 = vpop.eup %3213  ;;  %11627 = vst [vmem:[#allocation241_spill] sm:$0xff] %v6907_v48  ;;  %3235 = vpow2.f32 %v6690_v56  ;;  %v1546_v38 = vmul.f32 -0.5, %v11630_v6  ;;  %v6929_v56 = vmul.f32 %v11617_v54, %v1511_v63  ;;  %v6940_v39 = vadd.f32 1.0, %v11628_v25 }
 0x1db   : >> { %11626 = vst [vmem:[#allocation240_spill] sm:$0xff] %v6903_v37  ;;  %v6911_v43 = vpop.eup %3215  ;;  %3237 = vpow2.f32 %v6693_v9  ;;  %11632 = vst [vmem:[#allocation244_spill] sm:$0xff] %v6922_v4  ;;  %v1538_v32 = vadd.f32 1.0, %v1537_v31  ;;  %v6946_v63 = vmul.f32 %v11621_v7, %v1520_v45  ;;  %v6956_v9 = vadd.f32 1.0, %v11630_v6  ;;  %v11644_v45 = vld [vmem:[#allocation67_spill] sm:$0xff] }
 0x1dc   : >> { %11629 = vst [vmem:[#allocation242_spill] sm:$0xff] %v6911_v43  ;;  %v6918_v37 = vpop.eup %3217  ;;  %3239 = vpow2.f32 %v6698_v57  ;;  %11634 = vst [vmem:[#allocation246_spill] sm:$0xff] %v6929_v56  ;;  %v1547_v56 = vadd.f32 1.0, %v1546_v38  ;;  %v1564_v57 = vmul.f32 -0.5, %v11644_v45  ;;  %v11645_v38 = vld [vmem:[#allocation121_spill] sm:$0xff] }
 0x1dd   : >> { %11631 = vst [vmem:[#allocation243_spill] sm:$0xff] %v6918_v37  ;;  %v6925_v48 = vpop.eup %3219  ;;  %v1555_v37 = vmul.f32 -0.5, %v11635_v20  ;;  %3241 = vpow2.f32 %v6701_v49  ;;  %11637 = vst [vmem:[#allocation248_spill] sm:$0xff] %v6940_v39  ;;  %v6953_v49 = vmul.f32 %v11624_v36, %v1529_v13  ;;  %v6971_v13 = vadd.f32 1.0, %v11635_v20  ;;  %v11652_v36 = vld [vmem:[#allocation129_spill] sm:$0xff] }
 0x1de   : >> { %11633 = vst [vmem:[#allocation245_spill] sm:$0xff] %v6925_v48  ;;  %v6935_v43 = vpop.eup %3221  ;;  %3243 = vpow2.f32 %v6704_v51  ;;  %11639 = vst [vmem:[#allocation250_spill] sm:$0xff] %v6946_v63  ;;  %v1708_v63 = vmul.f32 -0.5, %v11645_v38 }
 0x1df   : >> { %11636 = vst [vmem:[#allocation247_spill] sm:$0xff] %v6935_v43  ;;  %v6942_v8 = vpop.eup %3223  ;;  %3245 = vpow2.f32 %v6709_v61  ;;  %11641 = vst [vmem:[#allocation252_spill] sm:$0xff] %v6953_v49  ;;  %v1556_v51 = vadd.f32 1.0, %v1555_v37  ;;  %v6968_v61 = vmul.f32 %v11628_v25, %v1538_v32  ;;  %v6978_v37 = vmul.f32 %v11630_v6, %v1547_v56  ;;  %v11656_v25 = vld [vmem:[#allocation133_spill] sm:$0xff] }
 0x1e0   : >> { %11638 = vst [vmem:[#allocation249_spill] sm:$0xff] %v6942_v8  ;;  %v6949_v4 = vpop.eup %3225  ;;  %11642 = vst [vmem:[#allocation253_spill] sm:$0xff] %v6956_v9  ;;  %3247 = vpow2.f32 %v6712_v14  ;;  %v6981_v14 = vadd.f32 1.0, %v11644_v45  ;;  %v1709_v6 = vadd.f32 1.0, %v1708_v63  ;;  %v7007_v32 = vadd.f32 1.0, %v11645_v38 }
 0x1e1   : >> { %11640 = vst [vmem:[#allocation251_spill] sm:$0xff] %v6949_v4  ;;  %v6959_v39 = vpop.eup %3227  ;;  %3249 = vpow2.f32 %v6715_v1  ;;  %11647 = vst [vmem:[#allocation255_spill] sm:$0xff] %v6968_v61  ;;  %v1717_v1 = vmul.f32 -0.5, %v11652_v36  ;;  %v11654_v61 = vld [vmem:[#allocation141_spill] sm:$0xff]  ;;  %v6996_v56 = vmul.f32 %v11635_v20, %v1556_v51  ;;  %v7015_v63 = vadd.f32 1.0, %v11652_v36  ;;  %v11665_v20 = vld [vmem:[#allocation150_spill] sm:$0xff] }
 0x1e2   : >> { %11643 = vst [vmem:[#allocation254_spill] sm:$0xff] %v6959_v39  ;;  %v6964_v7 = vpop.eup %3229  ;;  %11648 = vst [vmem:[#allocation256_spill] sm:$0xff] %v6971_v13  ;;  %3251 = vpow2.f32 %v6720_v44  ;;  %v6989_v31 = vadd.f32 1.0, %v11654_v61  ;;  %v1726_v13 = vmul.f32 -0.5, %v11656_v25 }
 0x1e3   : >> { %11646 = vst [vmem:[#allocation121_spill] sm:$0xff] %v6964_v7  ;;  %v6974_v49 = vpop.eup %3231  ;;  %11650 = vst [vmem:[#allocation258_spill] sm:$0xff] %v6978_v37  ;;  %3253 = vpow2.f32 %v6723_v47  ;;  %v6998_v37 = vadd.f32 1.0, %v1564_v57  ;;  %v7004_v47 = vmul.f32 -0.5, %v11654_v61  ;;  %v1718_v57 = vadd.f32 1.0, %v1717_v1  ;;  %v11668_v1 = vld [vmem:[#allocation153_spill] sm:$0xff] }
 0x1e4   : >> { %11649 = vst [vmem:[#allocation257_spill] sm:$0xff] %v6974_v49  ;;  %11651 = vst [vmem:[#allocation259_spill] sm:$0xff] %v6981_v14  ;;  %v6984_v9 = vpop.eup %3233  ;;  %3255 = vpow2.f32 %v6729_v35  ;;  %v7029_v35 = vadd.f32 1.0, %v11656_v25  ;;  %v1753_v61 = vmul.f32 -0.5, %v11668_v1 }
 0x1e5   : >> { %11653 = vst [vmem:[#allocation129_spill] sm:$0xff] %v6984_v9  ;;  %11655 = vst [vmem:[#allocation260_spill] sm:$0xff] %v6989_v31  ;;  %v6992_v44 = vpop.eup %3235  ;;  %3257 = vpow2.f32 %v6732_v33  ;;  %v11662_v31 = vld [vmem:[#allocation148_spill] sm:$0xff] }
 0x1e6   : >> { %11657 = vst [vmem:[#allocation133_spill] sm:$0xff] %v6992_v44  ;;  %11658 = vst [vmem:[#allocation261_spill] sm:$0xff] %v6996_v56  ;;  %v7000_v14 = vpop.eup %3237  ;;  %v1735_v45 = vmul.f32 -0.5, %v11662_v31  ;;  %3259 = vpow2.f32 %v6738_v15  ;;  %v1727_v56 = vadd.f32 1.0, %v1726_v13  ;;  %v7026_v15 = vmul.f32 %v11645_v38, %v1709_v6  ;;  %v11676_v6 = vld [vmem:[#allocation157_spill] sm:$0xff] }
 0x1e7   : >> { %11659 = vst [vmem:[#allocation262_spill] sm:$0xff] %v6998_v37  ;;  %11660 = vst [vmem:[#allocation263_spill] sm:$0xff] %v7000_v14  ;;  %v7010_v54 = vpop.eup %3239  ;;  %3261 = vpow2.f32 %v6741_v21  ;;  %v7037_v13 = vadd.f32 1.0, %v11662_v31  ;;  %v1771_v14 = vmul.f32 -0.5, %v11676_v6 }
 0x1e8   : >> { %11661 = vst [vmem:[#allocation264_spill] sm:$0xff] %v7004_v47  ;;  %11663 = vst [vmem:[#allocation148_spill] sm:$0xff] %v7010_v54  ;;  %v7017_v51 = vpop.eup %3241  ;;  %v1744_v47 = vmul.f32 -0.5, %v11665_v20  ;;  %3263 = vpow2.f32 %v6744_v59  ;;  %v1736_v33 = vadd.f32 1.0, %v1735_v45  ;;  %v7043_v59 = vmul.f32 %v11652_v36, %v1718_v57 }
 0x1e9   : >> { %11664 = vst [vmem:[#allocation265_spill] sm:$0xff] %v7017_v51  ;;  %v7022_v37 = vpop.eup %3243  ;;  %11667 = vst [vmem:[#allocation266_spill] sm:$0xff] %v7026_v15  ;;  %3265 = vpow2.f32 %v6749_v0  ;;  %v11672_v51 = vld [vmem:[#allocation156_spill] sm:$0xff]  ;;  %v7051_v0 = vmul.f32 %v11656_v25, %v1727_v56  ;;  %v7054_v45 = vadd.f32 1.0, %v11665_v20  ;;  %v1754_v57 = vadd.f32 1.0, %v1753_v61 }
 0x1ea   : >> { %11666 = vst [vmem:[#allocation150_spill] sm:$0xff] %v7022_v37  ;;  %v7032_v19 = vpop.eup %3245  ;;  %3267 = vpow2.f32 %v6752_v27  ;;  %11671 = vst [vmem:[#allocation268_spill] sm:$0xff] %v7043_v59  ;;  %v1762_v54 = vmul.f32 -0.5, %v11672_v51  ;;  %v1745_v21 = vadd.f32 1.0, %v1744_v47  ;;  %v7068_v56 = vadd.f32 1.0, %v11668_v1  ;;  %v11680_v27 = vld [vmem:[#allocation159_spill] sm:$0xff] }
 0x1eb   : >> { %11669 = vst [vmem:[#allocation153_spill] sm:$0xff] %v7032_v19  ;;  %v7039_v37 = vpop.eup %3247  ;;  %3269 = vpow2.f32 %v6759_v34  ;;  %11674 = vst [vmem:[#allocation269_spill] sm:$0xff] %v7051_v0  ;;  %v7065_v34 = vmul.f32 %v11662_v31, %v1736_v33  ;;  %v11683_v47 = vld [vmem:[#allocation162_spill] sm:$0xff]  ;;  %v11687_v33 = vld [vmem:[#allocation165_spill] sm:$0xff] }
 0x1ec   : >> { %11670 = vst [vmem:[#allocation267_spill] sm:$0xff] %v7039_v37  ;;  %v7047_v19 = vpop.eup %3249  ;;  %3271 = vpow2.f32 %v6762_v18  ;;  %v7075_v18 = vadd.f32 1.0, %v11672_v51  ;;  %v1763_v61 = vadd.f32 1.0, %v1762_v54  ;;  %v1789_v9 = vmul.f32 -0.5, %v11683_v47 }
 0x1ed   : >> { %11673 = vst [vmem:[#allocation156_spill] sm:$0xff] %v7047_v19  ;;  %v7056_v37 = vpop.eup %3251  ;;  %3273 = vlog2.f32 %v6768_v55  ;;  %11678 = vst [vmem:[#allocation271_spill] sm:$0xff] %v7065_v34  ;;  %v7082_v55 = vmul.f32 %v11665_v20, %v1745_v21  ;;  %v7093_v54 = vadd.f32 1.0, %v11676_v6  ;;  %v7100_v21 = vadd.f32 1.0, %v11680_v27 }
 0x1ee   : >> { %11675 = vst [vmem:[#allocation270_spill] sm:$0xff] %v7056_v37  ;;  %v7061_v44 = vpop.eup %3253  ;;  %3275 = vlog2.f32 %v6776_v52  ;;  %v7090_v52 = vmul.f32 %v11668_v1, %v1754_v57  ;;  %v1790_v4 = vadd.f32 1.0, %v1789_v9  ;;  %v11696_v9 = vld [vmem:[#allocation171_spill] sm:$0xff]  ;;  %v11782_v60 = vand.u32 2147483647, %v11683_v47 }
 0x1ef   : >> { %11677 = vst [vmem:[#allocation157_spill] sm:$0xff] %v7061_v44  ;;  %v7071_v37 = vpop.eup %3255  ;;  %v1780_v44 = vmul.f32 -0.5, %v11680_v27  ;;  %3277 = vlog2.f32 %v6784_v46  ;;  %11682 = vst [vmem:[#allocation273_spill] sm:$0xff] %v7082_v55  ;;  %v7115_v46 = vadd.f32 1.0, %v11683_v47  ;;  %v1825_v43 = vmul.f32 -0.5, %v11696_v9 }
 0x1f0   : >> { %11679 = vst [vmem:[#allocation272_spill] sm:$0xff] %v7071_v37  ;;  %v7078_v19 = vpop.eup %3257  ;;  %3279 = vlog2.f32 %v6801_v28  ;;  %11685 = vst [vmem:[#allocation274_spill] sm:$0xff] %v7090_v52  ;;  %v7107_v28 = vmul.f32 %v11672_v51, %v1763_v61  ;;  %v11694_v61 = vld [vmem:[#allocation168_spill] sm:$0xff]  ;;  %vm7376_vm14 = vcmp.lt.f32.partialorder %v11782_v60, 0.0004427343  ;;  %v11798_v60 = vmov 0 }
 0x1f1   : >> { %11681 = vst [vmem:[#allocation159_spill] sm:$0xff] %v7078_v19  ;;  %v7086_v37 = vpop.eup %3259  ;;  %v1772_v19 = vadd.f32 1.0, %v1771_v14  ;;  %3281 = vlog2.f32 %v6815_v58  ;;  %v1781_v57 = vadd.f32 1.0, %v1780_v44  ;;  %v11690_v14 = vld [vmem:[#allocation166_spill] sm:$0xff] }
 0x1f2   : >> { %11684 = vst [vmem:[#allocation162_spill] sm:$0xff] %v7086_v37  ;;  %v7095_v49 = vpop.eup %3261  ;;  %v1798_v37 = vmul.f32 -0.5, %v11687_v33  ;;  %3283 = vlog2.f32 %v6823_v53  ;;  %11689 = vst [vmem:[#allocation276_spill] sm:$0xff] %v7107_v28  ;;  %v1807_v39 = vmul.f32 -0.5, %v11690_v14  ;;  %v11714_v28 = vmov 0 }
 0x1f3   : >> { %11686 = vst [vmem:[#allocation275_spill] sm:$0xff] %v7095_v49  ;;  %v7103_v7 = vpop.eup %3263  ;;  %3285 = vlog2.f32 %v6840_v5  ;;  %v7121_v53 = vmul.f32 %v11676_v6, %v1772_v19  ;;  %v7129_v5 = vadd.f32 1.0, %v11687_v33  ;;  %v7136_v19 = vmul.f32 %v11680_v27, %v1781_v57 }
 0x1f4   : >> { %11688 = vst [vmem:[#allocation165_spill] sm:$0xff] %v7103_v7  ;;  %v7110_v49 = vpop.eup %3265  ;;  %3287 = vlog2.f32 %v6854_v50  ;;  %v1816_v7 = vmul.f32 -0.5, %v11694_v61  ;;  %v1799_v58 = vadd.f32 1.0, %v1798_v37  ;;  %v1808_v44 = vadd.f32 1.0, %v1807_v39 }
 0x1f5   : >> { %11691 = vst [vmem:[#allocation166_spill] sm:$0xff] %v7110_v49  ;;  %v7117_v8 = vpop.eup %3267  ;;  %11693 = vst [vmem:[#allocation278_spill] sm:$0xff] %v7121_v53  ;;  %3289 = vlog2.f32 %v6861_v30  ;;  %v7147_v37 = vmul.f32 %v11683_v47, %v1790_v4  ;;  %v11703_v39 = vand.u32 2147483647, %v11585_v42  ;;  %v11704_v50 = vmov 0  ;;  %v11706_v4 = vld [vmem:[#allocation172_spill] sm:$0xff] }
 0x1f6   : >> { %11692 = vst [vmem:[#allocation277_spill] sm:$0xff] %v7117_v8  ;;  %v7125_v49 = vpop.eup %3269  ;;  %3291 = vlog2.f32 %v6879_v22  ;;  %11698 = vst [vmem:[#allocation279_spill] sm:$0xff] %v7136_v19  ;;  %v7150_v22 = vadd.f32 1.0, %v11690_v14  ;;  %v11708_v57 = vmov 0  ;;  %v7172_v42 = vmul.f32 %v11687_v33, %v1799_v58 }
 0x1f7   : >> { %11695 = vst [vmem:[#allocation168_spill] sm:$0xff] %v7125_v49  ;;  %v7132_v8 = vpop.eup %3271  ;;  %v11699_v49 = vand.u32 2147483647, %v11583_v26  ;;  %3293 = vlog2.f32 %v6886_v62  ;;  %11702 = vst [vmem:[#allocation280_spill] sm:$0xff] %v7147_v37  ;;  %vm7155_vm1 = vcmp.lt.f32.partialorder %v11703_v39, 0.0004427343 }
 0x1f8   : >> { %11697 = vst [vmem:[#allocation171_spill] sm:$0xff] %v7132_v8  ;;  %v3274_v48 = vpop.eup %3273  ;;  %v11705_v50 = vsel %vm7155_vm1, 4294967295, %v11704_v50  ;;  %3295 = vlog2.f32 %v6901_v12  ;;  %v7161_v26 = vadd.f32 1.0, %v11694_v61  ;;  %v1817_v62 = vadd.f32 1.0, %v1816_v7  ;;  %11711 = vst [vmem:[#allocation281_spill] sm:$0xff] %v7172_v42  ;;  %v11712_v12 = vld [vmem:[#allocation173_spill] sm:$0xff] }
 0x1f9   : >> { %vm7141_vm0 = vcmp.lt.f32.partialorder %v11699_v49, 0.0004427343  ;;  %v3276_v8 = vpop.eup %3275  ;;  %v1834_v49 = vmul.f32 -0.5, %v11706_v4  ;;  %v11707_v37 = vand.u32 2147483647, %v11588_v10  ;;  %3297 = vlog2.f32 %v6915_v41  ;;  %v11820_v15 = vld [vmem:[#allocation274_spill] sm:$0xff] }
 0x1fa   : >> { %v3278_v17 = vpop.eup %3277  ;;  %v1826_v39 = vadd.f32 1.0, %v1825_v43  ;;  %v1843_v19 = vmul.f32 -0.5, %v11712_v12  ;;  %v11713_v7 = vand.u32 2147483647, %v11591_v29  ;;  %3299 = vlog2.f32 %v6932_v11 }
 0x1fb   : >> { %vm7166_vm2 = vcmp.lt.f32.partialorder %v11707_v37, 0.0004427343  ;;  %v3280_v53 = vpop.eup %3279  ;;  %v7183_v10 = vmul.f32 %v11690_v14, %v1808_v44  ;;  %v7187_v58 = vadd.f32 1.0, %v11696_v9  ;;  %v11718_v37 = vand.u32 2147483647, %v11593_v16 }
 0x1fc   : >> { %v11709_v57 = vsel %vm7166_vm2, 4294967295, %v11708_v57  ;;  %vm7177_vm3 = vcmp.lt.f32.partialorder %v11713_v7, 0.0004427343  ;;  %v3282_v43 = vpop.eup %3281  ;;  %v11719_v42 = vmov 0  ;;  %3301 = vlog2.f32 %v7007_v32 }
 0x1fd   : >> { %11710 = vst [vmem:[#allocation172_spill] sm:$0xff] %v11709_v57  ;;  %v11715_v28 = vsel %vm7177_vm3, 4294967295, %v11714_v28  ;;  %11717 = vst [vmem:[#allocation282_spill] sm:$0xff] %v7183_v10  ;;  %vm7191_vm4 = vcmp.lt.f32.partialorder %v11718_v37, 0.0004427343  ;;  %v7198_v11 = vadd.f32 1.0, %v11706_v4  ;;  %v3284_v7 = vpop.eup %3283  ;;  %3303 = vlog2.f32 %v7015_v63 }
 0x1fe   : >> { %11716 = vst [vmem:[#allocation173_spill] sm:$0xff] %v11715_v28  ;;  %v11720_v42 = vsel %vm7191_vm4, 4294967295, %v11719_v42  ;;  %v1852_v44 = vmul.f32 -0.5, %v6459_v24  ;;  %v7203_v41 = vmul.f32 %v11694_v61, %v1817_v62  ;;  %v1835_v16 = vadd.f32 1.0, %v1834_v49  ;;  %v3286_v10 = vpop.eup %3285  ;;  %v11727_v37 = vld [vmem:[#allocation175_spill] sm:$0xff] }
 0x1ff   : >> { %11721 = vst [vmem:[#allocation283_spill] sm:$0xff] %v11720_v42  ;;  %3305 = vlog2.f32 %v7029_v35  ;;  %v7208_v32 = vmul.f32 %v11696_v9, %v1826_v39  ;;  %v7211_v29 = vadd.f32 1.0, %v11712_v12  ;;  %v1844_v52 = vadd.f32 1.0, %v1843_v19  ;;  %v7213_v55 = vpop.eup %3287 }
 0x200   : >> { %11722 = vst [vmem:[#allocation284_spill] sm:$0xff] %v7203_v41  ;;  %11724 = vst [vmem:[#allocation286_spill] sm:$0xff] %v7213_v55  ;;  %v7215_v34 = vmul.f32 0.6931472, %v3274_v48  ;;  %3307 = vlog2.f32 %v7037_v13  ;;  %v7220_v62 = vadd.f32 1.0, %v6459_v24  ;;  %v7222_v49 = vpop.eup %3289  ;;  %v1853_v39 = vadd.f32 1.0, %v1852_v44 }
 0x201   : >> { %11723 = vst [vmem:[#allocation285_spill] sm:$0xff] %v7208_v32  ;;  %11725 = vst [vmem:[#allocation287_spill] sm:$0xff] %v7222_v49  ;;  %v7224_v35 = vmul.f32 0.6931472, %v3276_v8  ;;  %3309 = vlog2.f32 %v7054_v45  ;;  %v1861_v19 = vmul.f32 -0.5, %v11727_v37  ;;  %v7228_v32 = vpop.eup %3291  ;;  %v7234_v13 = vmul.f32 %v11706_v4, %v1835_v16  ;;  %v11732_v44 = vld [vmem:[#allocation177_spill] sm:$0xff] }
 0x202   : >> { %11728 = vst [vmem:[#allocation175_spill] sm:$0xff] %v7228_v32  ;;  %v7230_v48 = vmul.f32 0.6931472, %v3278_v17  ;;  %3311 = vlog2.f32 %v7068_v56  ;;  %v7237_v55 = vpop.eup %3293  ;;  %v7239_v8 = vmul.f32 0.6931472, %v3280_v53  ;;  %v7243_v45 = vmul.f32 %v11712_v12, %v1844_v52  ;;  %v11735_v53 = vld [vmem:[#allocation178_spill] sm:$0xff] }
 0x203   : >> { %11726 = vst [vmem:[#allocation288_spill] sm:$0xff] %v7224_v35  ;;  %11730 = vst [vmem:[#allocation290_spill] sm:$0xff] %v7237_v55  ;;  %3313 = vlog2.f32 %v7075_v18  ;;  %v1870_v32 = vmul.f32 -0.5, %v11732_v44  ;;  %v7246_v17 = vpop.eup %3295  ;;  %v7252_v16 = vmul.f32 0.6931472, %v3282_v43  ;;  %v1879_v63 = vmul.f32 -0.5, %v11735_v53 }
 0x204   : >> { %11729 = vst [vmem:[#allocation289_spill] sm:$0xff] %v7230_v48  ;;  %11731 = vst [vmem:[#allocation291_spill] sm:$0xff] %v7239_v8  ;;  %3315 = vlog2.f32 %v7093_v54  ;;  %v7256_v55 = vpop.eup %3297  ;;  %v11737_v52 = vand.u32 2147483647, %v11645_v38  ;;  %v7270_v43 = vmul.f32 %v6459_v24, %v1853_v39  ;;  %v1862_v54 = vadd.f32 1.0, %v1861_v19 }
 0x205   : >> { %11733 = vst [vmem:[#allocation177_spill] sm:$0xff] %v7246_v17  ;;  %11734 = vst [vmem:[#allocation292_spill] sm:$0xff] %v7252_v16  ;;  %v11738_v17 = vmov 0  ;;  %3317 = vlog2.f32 %v7100_v21  ;;  %v7272_v56 = vpop.eup %3299  ;;  %v1858_v38 = vadd.f32 1.0, %v11727_v37  ;;  %v11742_v39 = vand.u32 2147483647, %v11652_v36 }
 0x206   : >> { %11736 = vst [vmem:[#allocation178_spill] sm:$0xff] %v7256_v55  ;;  %vm7264_vm5 = vcmp.lt.f32.partialorder %v11737_v52, 0.0004427343  ;;  %11740 = vst [vmem:[#allocation293_spill] sm:$0xff] %v7272_v56  ;;  %3319 = vlog2.f32 %v7115_v46  ;;  %v11741_v52 = vld [vmem:[#allocation179_spill] sm:$0xff]  ;;  %v3302_v49 = vpop.eup %3301  ;;  %v11743_v19 = vmov 0 }
 0x207   : >> { %v11739_v17 = vsel %vm7264_vm5, 4294967295, %v11738_v17  ;;  %v1888_v18 = vmul.f32 -0.5, %v11741_v52  ;;  %vm7287_vm6 = vcmp.lt.f32.partialorder %v11742_v39, 0.0004427343  ;;  %3321 = vlog2.f32 %v7129_v5  ;;  %v11746_v46 = vld [vmem:[#allocation181_spill] sm:$0xff]  ;;  %v3304_v48 = vpop.eup %3303 }
 0x208   : >> { %v11744_v19 = vsel %vm7287_vm6, 4294967295, %v11743_v19  ;;  %v1871_v55 = vadd.f32 1.0, %v1870_v32  ;;  %v1897_v56 = vmul.f32 -0.5, %v11746_v46  ;;  %v7297_v57 = vmul.f32 0.6931472, %v3284_v7 }
 0x209   : >> { %11745 = vst [vmem:[#allocation179_spill] sm:$0xff] %v11744_v19  ;;  %3323 = vlog2.f32 %v7150_v22  ;;  %v1880_v36 = vadd.f32 1.0, %v1879_v63  ;;  %v3306_v39 = vpop.eup %3305  ;;  %v7300_v21 = vmul.f32 0.6931472, %v3286_v10  ;;  %v11749_v8 = vand.u32 2147483647, %v11656_v25 }
 0x20a   : >> { %11747 = vst [vmem:[#allocation181_spill] sm:$0xff] %v7297_v57  ;;  %v11752_v32 = vand.u32 2147483647, %v11662_v31  ;;  %3325 = vlog2.f32 %v7161_v26  ;;  %v7316_v22 = vmul.f32 %v11727_v37, %v1862_v54  ;;  %v3308_v7 = vpop.eup %3307  ;;  %v11756_v25 = vand.u32 2147483647, %v11665_v20  ;;  %v11819_v19 = vld [vmem:[#allocation273_spill] sm:$0xff] }
 0x20b   : >> { %11748 = vst [vmem:[#allocation294_spill] sm:$0xff] %v7300_v21  ;;  %vm7304_vm7 = vcmp.lt.f32.partialorder %v11749_v8, 0.0004427343  ;;  %v11757_v63 = vmov 0  ;;  %v11760_v31 = vand.u32 2147483647, %v11668_v1  ;;  %3327 = vlog2.f32 %v7187_v58  ;;  %v3310_v40 = vpop.eup %3309 }
 0x20c   : >> { %vm7310_vm8 = vcmp.lt.f32.partialorder %v11752_v32, 0.0004427343  ;;  %vm7321_vm9 = vcmp.lt.f32.partialorder %v11756_v25, 0.0004427343  ;;  %v11761_v8 = vmov 0  ;;  %v1867_v26 = vadd.f32 1.0, %v11732_v44  ;;  %v3312_v10 = vpop.eup %3311 }
 0x20d   : >> { %v11754_v2 = vsel %vm7310_vm8, 4294967295, %v11753_v2  ;;  %v11758_v63 = vsel %vm7321_vm9, 4294967295, %v11757_v63  ;;  %vm7327_vm10 = vcmp.lt.f32.partialorder %v11760_v31, 0.0004427343  ;;  %v1889_v32 = vadd.f32 1.0, %v1888_v18 }
 0x20e   : >> { %11755 = vst [vmem:[#allocation295_spill] sm:$0xff] %v11754_v2  ;;  %11759 = vst [vmem:[#allocation296_spill] sm:$0xff] %v11758_v63  ;;  %v11762_v8 = vsel %vm7327_vm10, 4294967295, %v11761_v8  ;;  %v11764_v20 = vand.u32 2147483647, %v11672_v51  ;;  %v11765_v25 = vmov 0  ;;  %3329 = vlog2.f32 %v7198_v11  ;;  %v3314_v11 = vpop.eup %3313 }
 0x20f   : >> { %11763 = vst [vmem:[#allocation297_spill] sm:$0xff] %v11762_v8  ;;  %v7342_v1 = vmul.f32 %v11732_v44, %v1871_v55  ;;  %v1876_v31 = vadd.f32 1.0, %v11735_v53  ;;  %v1898_v58 = vadd.f32 1.0, %v1897_v56  ;;  %v7345_v21 = vmul.f32 0.6931472, %v3302_v49  ;;  %v3316_v16 = vpop.eup %3315  ;;  %v11822_v2 = vld [vmem:[#allocation188_spill] sm:$0xff] }
 0x210   : >> { %vm7336_vm11 = vcmp.lt.f32.partialorder %v11764_v20, 0.0004427343  ;;  %v11770_v18 = vand.u32 2147483647, %v11676_v6  ;;  %v11771_v54 = vmov 0  ;;  %3331 = vlog2.f32 %v7211_v29 }
 0x211   : >> { %v11766_v25 = vsel %vm7336_vm11, 4294967295, %v11765_v25  ;;  %11768 = vst [vmem:[#allocation299_spill] sm:$0xff] %v7342_v1  ;;  %11769 = vst [vmem:[#allocation300_spill] sm:$0xff] %v7345_v21  ;;  %v7355_v51 = vmul.f32 %v11735_v53, %v1880_v36  ;;  %v11775_v20 = vand.u32 2147483647, %v11680_v27  ;;  %v11776_v56 = vmov 0 }
 0x212   : >> { %11767 = vst [vmem:[#allocation298_spill] sm:$0xff] %v11766_v25  ;;  %vm7349_vm12 = vcmp.lt.f32.partialorder %v11770_v18, 0.0004427343  ;;  %3333 = vlog2.f32 %v7220_v62  ;;  %v1885_v6 = vadd.f32 1.0, %v11741_v52  ;;  %v11779_v18 = vld [vmem:[#allocation182_spill] sm:$0xff]  ;;  %v7371_v55 = vmul.f32 %v11741_v52, %v1889_v32 }
 0x213   : >> { %v11772_v54 = vsel %vm7349_vm12, 4294967295, %v11771_v54  ;;  %11774 = vst [vmem:[#allocation302_spill] sm:$0xff] %v7355_v51  ;;  %vm7360_vm13 = vcmp.lt.f32.partialorder %v11775_v20, 0.0004427343  ;;  %v1906_v29 = vmul.f32 -0.5, %v11779_v18  ;;  %3335 = vlog2.f32 %v1858_v38  ;;  %v3318_v20 = vpop.eup %3317 }
 0x214   : >> { %11773 = vst [vmem:[#allocation301_spill] sm:$0xff] %v11772_v54  ;;  %v11777_v56 = vsel %vm7360_vm13, 4294967295, %v11776_v56  ;;  %v7368_v36 = vmul.f32 0.6931472, %v3304_v48  ;;  %11781 = vst [vmem:[#allocation304_spill] sm:$0xff] %v7371_v55  ;;  %v1894_v27 = vadd.f32 1.0, %v11746_v46  ;;  %3337 = vlog2.f32 %v1867_v26  ;;  %v3320_v57 = vpop.eup %3319 }
 0x215   : >> { %11778 = vst [vmem:[#allocation303_spill] sm:$0xff] %v11777_v56  ;;  %v11783_v62 = vmov 0  ;;  %v11786_v49 = vand.u32 2147483647, %v11687_v33  ;;  %v11787_v42 = vmov 0  ;;  %v7387_v48 = vmul.f32 %v11746_v46, %v1898_v58 }
 0x216   : >> { %11780 = vst [vmem:[#allocation182_spill] sm:$0xff] %v7368_v36  ;;  %v11784_v62 = vsel %vm7376_vm14, 4294967295, %v11783_v62  ;;  %v1900_v38 = vand.u32 2147483647, %v11746_v46  ;;  %v1903_v32 = vadd.f32 1.0, %v11779_v18  ;;  %3339 = vlog2.f32 %v1876_v31  ;;  %v11818_v36 = vld [vmem:[#allocation186_spill] sm:$0xff] }
 0x217   : >> { %11785 = vst [vmem:[#allocation305_spill] sm:$0xff] %v11784_v62  ;;  %vm7382_vm15 = vcmp.lt.f32.partialorder %v11786_v49, 0.0004427343  ;;  %11790 = vst [vmem:[#allocation307_spill] sm:$0xff] %v7387_v48  ;;  %v7395_v47 = vmul.f32 0.6931472, %v3306_v39  ;;  %v3322_v49 = vpop.eup %3321  ;;  %3341 = vlog2.f32 %v1885_v6 }
 0x218   : >> { %v11788_v42 = vsel %vm7382_vm15, 4294967295, %v11787_v42  ;;  %v7397_v33 = vmul.f32 0.6931472, %v3308_v7  ;;  %v7399_v26 = vmul.f32 0.6931472, %v3310_v40  ;;  %v1907_v39 = vadd.f32 1.0, %v1906_v29  ;;  %v3324_v7 = vpop.eup %3323 }
 0x219   : >> { %11789 = vst [vmem:[#allocation306_spill] sm:$0xff] %v11788_v42  ;;  %11791 = vst [vmem:[#allocation308_spill] sm:$0xff] %v7395_v47  ;;  %v7401_v58 = vmul.f32 0.6931472, %v3312_v10  ;;  %v11794_v46 = vand.u32 2147483647, %v11690_v14  ;;  %3343 = vlog2.f32 %v1894_v27 }
 0x21a   : >> { %11792 = vst [vmem:[#allocation309_spill] sm:$0xff] %v7397_v33  ;;  %v11797_v35 = vand.u32 2147483647, %v11694_v61  ;;  %v7419_v10 = vmul.f32 0.6931472, %v3314_v11  ;;  %v11808_v29 = vmov 0  ;;  %3345 = vlog2.f32 %v1903_v32 }
 0x21b   : >> { %11793 = vst [vmem:[#allocation310_spill] sm:$0xff] %v7401_v58  ;;  %vm7405_vm4 = vcmp.lt.f32.partialorder %v11794_v46, 0.0004427343  ;;  %v11801_v14 = vand.u32 2147483647, %v11696_v9  ;;  %v3326_v9 = vpop.eup %3325  ;;  %v1921_v59 = vadd.f32 1.0, %v11818_v36  ;;  %v7470_v47 = vmul.f32 %v11779_v18, %v1907_v39 }
 0x21c   : >> { %vm7411_vm3 = vcmp.lt.f32.partialorder %v11797_v35, 0.0004427343  ;;  %11800 = vst [vmem:[#allocation311_spill] sm:$0xff] %v7419_v10  ;;  %v11804_v61 = vand.u32 2147483647, %v11706_v4  ;;  %v11813_v4 = vmov 0 }
 0x21d   : >> { %v11799_v60 = vsel %vm7411_vm3, 4294967295, %v11798_v60  ;;  %vm7423_vm5 = vcmp.lt.f32.partialorder %v11801_v14, 0.0004427343  ;;  %v11807_v6 = vand.u32 2147483647, %v11712_v12  ;;  %11821 = vst [vmem:[#allocation186_spill] sm:$0xff] %v7470_v47 }
 0x21e   : >> { %vm7429_vm2 = vcmp.lt.f32.partialorder %v11804_v61, 0.0004427343  ;;  %v1909_v11 = vand.u32 2147483647, %v11779_v18  ;;  %v7440_v46 = vmul.f32 0.6931472, %v3316_v16 }
 0x21f   : >> { %vm7435_vm1 = vcmp.lt.f32.partialorder %v11807_v6, 0.0004427343  ;;  %v11812_v14 = vand.u32 2147483647, %v6459_v24  ;;  %v11815_v61 = vld [vmem:[#allocation184_spill] sm:$0xff]  ;;  %v3328_v6 = vpop.eup %3327  ;;  %v1930_v24 = vadd.f32 1.0, %v11822_v2 }
 0x220   : >> { %v11809_v29 = vsel %vm7435_vm1, 4294967295, %v11808_v29  ;;  %11811 = vst [vmem:[#allocation313_spill] sm:$0xff] %v7440_v46  ;;  %v1912_v40 = vadd.f32 1.0, %v11815_v61  ;;  %v1915_v12 = vmul.f32 -0.5, %v11815_v61  ;;  %v3330_v32 = vpop.eup %3329  ;;  %v7477_v0 = vmul.f32 0.6931472, %v3320_v57 }
 0x221   : >> { %11810 = vst [vmem:[#allocation312_spill] sm:$0xff] %v11809_v29  ;;  %vm7444_vm6 = vcmp.lt.f32.partialorder %v11812_v14, 0.0004427343  ;;  %v7458_v14 = vmul.f32 0.6931472, %v3318_v20  ;;  %v3332_v20 = vpop.eup %3331  ;;  %v1924_v18 = vmul.f32 -0.5, %v11818_v36 }
 0x222   : >> { %v11814_v4 = vsel %vm7444_vm6, 4294967295, %v11813_v4  ;;  %v7479_v63 = vmul.f32 0.6931472, %v3322_v49  ;;  %v11825_v21 = vand.u32 2147483647, %v11727_v37  ;;  %v3334_v39 = vpop.eup %3333  ;;  %v11828_v27 = vld [vmem:[#allocation278_spill] sm:$0xff]  ;;  %3347 = vlog2.f32 %v1912_v40 }
 0x223   : >> { %11817 = vst [vmem:[#allocation184_spill] sm:$0xff] %v7458_v14  ;;  %v11829_v16 = vand.u32 2147483647, %v11732_v44  ;;  %v11830_v57 = vmov 0  ;;  %v1916_v37 = vadd.f32 1.0, %v1915_v12  ;;  %v3336_v49 = vpop.eup %3335  ;;  %v11840_v12 = vmov 0 }
 0x224   : >> { %11824 = vst [vmem:[#allocation273_spill] sm:$0xff] %v7479_v63  ;;  %vm7483_vm9 = vcmp.lt.f32.partialorder %v11825_v21, 0.0004427343  ;;  %v1918_v21 = vand.u32 2147483647, %v11815_v61  ;;  %3349 = vlog2.f32 %v1921_v59  ;;  %v3338_v58 = vpop.eup %3337  ;;  %v1933_v14 = vmul.f32 -0.5, %v11822_v2 }
 0x225   : >> { %vm7494_vm11 = vcmp.lt.f32.partialorder %v11829_v16, 0.0004427343  ;;  %v7503_v25 = vmul.f32 0.6931472, %v3324_v7  ;;  %v7505_v54 = vmul.f32 0.6931472, %v3326_v9  ;;  %3351 = vlog2.f32 %v1930_v24 }
 0x226   : >> { %v11831_v57 = vsel %vm7494_vm11, 4294967295, %v11830_v57  ;;  %v11835_v44 = vand.u32 2147483647, %v11735_v53  ;;  %v11836_v16 = vmov 0  ;;  %v11839_v40 = vand.u32 2147483647, %v11741_v52  ;;  %v3340_v52 = vpop.eup %3339 }
 0x227   : >> { %11832 = vst [vmem:[#allocation274_spill] sm:$0xff] %v11831_v57  ;;  %11834 = vst [vmem:[#allocation188_spill] sm:$0xff] %v7505_v54  ;;  %v7519_v56 = vmul.f32 0.6931472, %v3328_v6  ;;  %v7521_v7 = vmul.f32 0.6931472, %v3330_v32  ;;  %v3342_v33 = vpop.eup %3341 }
 0x228   : >> { %vm7509_vm12 = vcmp.lt.f32.partialorder %v11835_v44, 0.0004427343  ;;  %vm7515_vm10 = vcmp.lt.f32.partialorder %v11839_v40, 0.0004427343  ;;  %v7523_v9 = vmul.f32 0.6931472, %v3332_v20  ;;  %v3344_v62 = vpop.eup %3343 }
 0x229   : >> { %v11837_v16 = vsel %vm7509_vm12, 4294967295, %v11836_v16  ;;  %v11841_v12 = vsel %vm7515_vm10, 4294967295, %v11840_v12  ;;  %11843 = vst [vmem:[#allocation315_spill] sm:$0xff] %v7519_v56  ;;  %11844 = vst [vmem:[#allocation316_spill] sm:$0xff] %v7521_v7  ;;  %vm7525_vm13 = vcmp.lt.f32.partialorder %v1900_v38, 0.0004427343  ;;  %v3346_v32 = vpop.eup %3345 }
 0x22a   : >> { %11838 = vst [vmem:[#allocation278_spill] sm:$0xff] %v11837_v16  ;;  %11842 = vst [vmem:[#allocation314_spill] sm:$0xff] %v11841_v12  ;;  %v11846_v53 = vmov 0  ;;  %vm7529_vm8 = vcmp.lt.f32.partialorder %v1909_v11, 0.0004427343  ;;  %v11849_v44 = vmov 0  ;;  %v7544_v11 = vmul.f32 %v11815_v61, %v1916_v37 }
 0x22b   : >> { %11845 = vst [vmem:[#allocation317_spill] sm:$0xff] %v7523_v9  ;;  %v11847_v53 = vsel %vm7525_vm13, 4294967295, %v11846_v53  ;;  %v11850_v44 = vsel %vm7529_vm8, 4294967295, %v11849_v44  ;;  %v11852_v40 = vld [vmem:[#allocation280_spill] sm:$0xff]  ;;  %v7541_v38 = vmul.f32 0.6931472, %v3334_v39 }
 0x22c   : >> { %11848 = vst [vmem:[#allocation318_spill] sm:$0xff] %v11847_v53  ;;  %11851 = vst [vmem:[#allocation319_spill] sm:$0xff] %v11850_v44  ;;  %v1925_v20 = vadd.f32 1.0, %v1924_v18  ;;  %v1927_v24 = vand.u32 2147483647, %v11818_v36  ;;  %v11856_v10 = vld [vmem:[#allocation189_spill] sm:$0xff] }
 0x22d   : >> { %11854 = vst [vmem:[#allocation280_spill] sm:$0xff] %v7541_v38  ;;  %11855 = vst [vmem:[#allocation320_spill] sm:$0xff] %v7544_v11  ;;  %v1939_v46 = vadd.f32 1.0, %v11856_v10  ;;  %v11857_v59 = vld [vmem:[#allocation282_spill] sm:$0xff]  ;;  %v1942_v61 = vmul.f32 -0.5, %v11856_v10  ;;  %v11858_v39 = vld [vmem:[#allocation191_spill] sm:$0xff] }
 0x22e   : >> { %v1948_v37 = vadd.f32 1.0, %v11858_v39  ;;  %v11859_v63 = vld [vmem:[#allocation285_spill] sm:$0xff]  ;;  %v7571_v54 = vmul.f32 0.6931472, %v3336_v49  ;;  %vm7573_vm3 = vcmp.lt.f32.partialorder %v1918_v21, 0.0004427343  ;;  %v7584_v42 = vmul.f32 %v11818_v36, %v1925_v20  ;;  %v3348_v36 = vpop.eup %3347 }
 0x22f   : >> { %v11861_v41 = vmov 0  ;;  %v7581_v56 = vmul.f32 0.6931472, %v3338_v58  ;;  %v1936_v7 = vand.u32 2147483647, %v11822_v2  ;;  %v11868_v21 = vmov 0 }
 0x230   : >> { %11860 = vst [vmem:[#allocation189_spill] sm:$0xff] %v7571_v54  ;;  %v11862_v41 = vsel %vm7573_vm3, 4294967295, %v11861_v41  ;;  %11865 = vst [vmem:[#allocation285_spill] sm:$0xff] %v7584_v42  ;;  %v7587_v29 = vmul.f32 0.6931472, %v3340_v52  ;;  %v1934_v18 = vadd.f32 1.0, %v1933_v14  ;;  %3353 = vlog2.f32 %v1939_v46  ;;  %v3350_v14 = vpop.eup %3349 }
 0x231   : >> { %11863 = vst [vmem:[#allocation282_spill] sm:$0xff] %v11862_v41  ;;  %11864 = vst [vmem:[#allocation191_spill] sm:$0xff] %v7581_v56  ;;  %v7589_v49 = vmul.f32 0.6931472, %v3342_v33  ;;  %vm7591_vm1 = vcmp.lt.f32.partialorder %v1927_v24, 0.0004427343  ;;  %3355 = vlog2.f32 %v1948_v37  ;;  %v3352_v52 = vpop.eup %3351 }
 0x232   : >> { %11866 = vst [vmem:[#allocation321_spill] sm:$0xff] %v7587_v29  ;;  %v11869_v21 = vsel %vm7591_vm1, 4294967295, %v11868_v21  ;;  %v7595_v9 = vmul.f32 0.6931472, %v3344_v62  ;;  %v7597_v6 = vmul.f32 0.6931472, %v3346_v32 }
 0x233   : >> { %11867 = vst [vmem:[#allocation322_spill] sm:$0xff] %v7589_v49  ;;  %11870 = vst [vmem:[#allocation323_spill] sm:$0xff] %v11869_v21  ;;  %v1943_v58 = vadd.f32 1.0, %v1942_v61  ;;  %v1945_v33 = vand.u32 2147483647, %v11856_v10  ;;  %v1951_v20 = vmul.f32 -0.5, %v11858_v39 }
 0x234   : >> { %11871 = vst [vmem:[#allocation324_spill] sm:$0xff] %v7595_v9  ;;  %11872 = vst [vmem:[#allocation325_spill] sm:$0xff] %v7597_v6  ;;  %v11873_v24 = vld [vmem:[#allocation193_spill] sm:$0xff]  ;;  %vm7610_vm6 = vcmp.lt.f32.partialorder %v1936_v7, 0.0004427343  ;;  %v11874_v46 = vmov 0  ;;  %v7625_v7 = vmul.f32 %v11822_v2, %v1934_v18 }
 0x235   : >> { %v1957_v38 = vadd.f32 1.0, %v11873_v24  ;;  %v11875_v46 = vsel %vm7610_vm6, 4294967295, %v11874_v46  ;;  %v1960_v32 = vmul.f32 -0.5, %v11873_v24  ;;  %v11877_v61 = vld [vmem:[#allocation197_spill] sm:$0xff]  ;;  %v11879_v62 = vld [vmem:[#allocation199_spill] sm:$0xff]  ;;  %v7639_v12 = vmul.f32 %v11856_v10, %v1943_v58 }
 0x236   : >> { %11876 = vst [vmem:[#allocation193_spill] sm:$0xff] %v11875_v46  ;;  %v1966_v37 = vadd.f32 1.0, %v11877_v61  ;;  %11878 = vst [vmem:[#allocation197_spill] sm:$0xff] %v7625_v7  ;;  %v1975_v56 = vadd.f32 1.0, %v11879_v62  ;;  %v7636_v29 = vmul.f32 0.6931472, %v3348_v36 }
 0x237   : >> { %11881 = vst [vmem:[#allocation326_spill] sm:$0xff] %v7639_v12  ;;  %vm7641_vm10 = vcmp.lt.f32.partialorder %v1945_v33, 0.0004427343  ;;  %v11882_v2 = vmov 0  ;;  %v1952_v18 = vadd.f32 1.0, %v1951_v20  ;;  %3357 = vlog2.f32 %v1957_v38  ;;  %v11887_v10 = vld [vmem:[#allocation201_spill] sm:$0xff] }
 0x238   : >> { %11880 = vst [vmem:[#allocation199_spill] sm:$0xff] %v7636_v29  ;;  %v11883_v2 = vsel %vm7641_vm10, 4294967295, %v11882_v2  ;;  %v1954_v57 = vand.u32 2147483647, %v11858_v39  ;;  %v7646_v53 = vmul.f32 0.6931472, %v3350_v14  ;;  %3359 = vlog2.f32 %v1966_v37 }
 0x239   : >> { %11884 = vst [vmem:[#allocation327_spill] sm:$0xff] %v11883_v2  ;;  %v7648_v1 = vmul.f32 0.6931472, %v3352_v52  ;;  %v1961_v9 = vadd.f32 1.0, %v1960_v32  ;;  %v1963_v36 = vand.u32 2147483647, %v11873_v24  ;;  %3361 = vlog2.f32 %v1975_v56 }
 0x23a   : >> { %11885 = vst [vmem:[#allocation328_spill] sm:$0xff] %v7646_v53  ;;  %v1969_v54 = vmul.f32 -0.5, %v11877_v61  ;;  %v1984_v58 = vadd.f32 1.0, %v11887_v10  ;;  %v1978_v38 = vmul.f32 -0.5, %v11879_v62  ;;  %v1987_v20 = vmul.f32 -0.5, %v11887_v10  ;;  %v11888_v52 = vld [vmem:[#allocation203_spill] sm:$0xff]  ;;  %v3354_v32 = vpop.eup %3353 }
 0x23b   : >> { %11886 = vst [vmem:[#allocation329_spill] sm:$0xff] %v7648_v1  ;;  %v1993_v14 = vadd.f32 1.0, %v11888_v52  ;;  %v7661_v37 = vmul.f32 %v11858_v39, %v1952_v18  ;;  %vm7663_vm8 = vcmp.lt.f32.partialorder %v1954_v57, 0.0004427343  ;;  %v11890_v6 = vmov 0  ;;  %v11893_v56 = vld [vmem:[#allocation205_spill] sm:$0xff]  ;;  %v3356_v11 = vpop.eup %3355 }
 0x23c   : >> { %v11891_v6 = vsel %vm7663_vm8, 4294967295, %v11890_v6  ;;  %v2002_v47 = vadd.f32 1.0, %v11893_v56  ;;  %v11894_v44 = vld [vmem:[#allocation61_spill] sm:$0xff]  ;;  %v11895_v33 = vsel %vm7141_vm0, %v6790_v3, %v7215_v34  ;;  %v7685_v18 = vmul.f32 %v11873_v24, %v1961_v9  ;;  %v11903_v24 = vld [vmem:[#allocation207_spill] sm:$0xff] }
 0x23d   : >> { %11889 = vst [vmem:[#allocation201_spill] sm:$0xff] %v7661_v37  ;;  %11892 = vst [vmem:[#allocation203_spill] sm:$0xff] %v11891_v6  ;;  %v7674_v29 = vadd.f32 %v11895_v33, %v11894_v44  ;;  %v1996_v30 = vmul.f32 -0.5, %v11888_v52  ;;  %vm7688_vm3 = vcmp.lt.f32.partialorder %v1963_v36, 0.0004427343  ;;  %v11898_v3 = vmov 0 }
 0x23e   : >> { %11897 = vst [vmem:[#allocation61_spill] sm:$0xff] %v7685_v18  ;;  %v11899_v3 = vsel %vm7688_vm3, 4294967295, %v11898_v3  ;;  %v1970_v34 = vadd.f32 1.0, %v1969_v54  ;;  %v1972_v44 = vand.u32 2147483647, %v11877_v61  ;;  %3363 = vlog2.f32 %v1984_v58  ;;  %v11904_v53 = vld [vmem:[#allocation209_spill] sm:$0xff] }
 0x23f   : >> { %11896 = vst [vmem:[#allocation205_spill] sm:$0xff] %v7674_v29  ;;  %11900 = vst [vmem:[#allocation330_spill] sm:$0xff] %v11899_v3  ;;  %v1981_v33 = vand.u32 2147483647, %v11879_v62  ;;  %v7694_v39 = vmul.f32 0.6931472, %v3354_v32  ;;  %3365 = vlog2.f32 %v1993_v14 }
 0x240   : >> { %v1979_v29 = vadd.f32 1.0, %v1978_v38  ;;  %v1988_v46 = vadd.f32 1.0, %v1987_v20  ;;  %v7696_v57 = vmul.f32 0.6931472, %v3356_v11  ;;  %v1990_v9 = vand.u32 2147483647, %v11887_v10 }
 0x241   : >> { %11901 = vst [vmem:[#allocation331_spill] sm:$0xff] %v7694_v39  ;;  %3367 = vlog2.f32 %v2002_v47  ;;  %v2011_v36 = vadd.f32 1.0, %v11903_v24  ;;  %v1997_v1 = vadd.f32 1.0, %v1996_v30  ;;  %v1999_v54 = vand.u32 2147483647, %v11888_v52  ;;  %v3358_v58 = vpop.eup %3357  ;;  %v11909_v47 = vld [vmem:[#allocation211_spill] sm:$0xff] }
 0x242   : >> { %11902 = vst [vmem:[#allocation332_spill] sm:$0xff] %v7696_v57  ;;  %v2005_v7 = vmul.f32 -0.5, %v11893_v56  ;;  %v2020_v42 = vadd.f32 1.0, %v11904_v53  ;;  %v7704_v32 = vmul.f32 %v11877_v61, %v1970_v34  ;;  %vm7706_vm0 = vcmp.lt.f32.partialorder %v1972_v44, 0.0004427343  ;;  %v3360_v14 = vpop.eup %3359 }
 0x243   : >> { %v11906_v38 = vmov 0  ;;  %v2014_v11 = vmul.f32 -0.5, %v11903_v24  ;;  %v2029_v20 = vadd.f32 1.0, %v11909_v47  ;;  %v7717_v21 = vmul.f32 %v11879_v62, %v1979_v29  ;;  %v3362_v44 = vpop.eup %3361 }
 0x244   : >> { %11905 = vst [vmem:[#allocation207_spill] sm:$0xff] %v7704_v32  ;;  %v11907_v38 = vsel %vm7706_vm0, 4294967295, %v11906_v38  ;;  %vm7719_vm6 = vcmp.lt.f32.partialorder %v1981_v33, 0.0004427343  ;;  %v11911_v61 = vmov 0  ;;  %v7724_v34 = vmul.f32 %v11887_v10, %v1988_v46  ;;  %v11950_v32 = vld [vmem:[#allocation163_spill] sm:$0xff] }
 0x245   : >> { %11908 = vst [vmem:[#allocation209_spill] sm:$0xff] %v11907_v38  ;;  %11910 = vst [vmem:[#allocation211_spill] sm:$0xff] %v7717_v21  ;;  %v11912_v61 = vsel %vm7719_vm6, 4294967295, %v11911_v61  ;;  %vm7730_vm1 = vcmp.lt.f32.partialorder %v1990_v9, 0.0004427343  ;;  %v11915_v48 = vmov 0  ;;  %3369 = vlog2.f32 %v2011_v36 }
 0x246   : >> { %11913 = vst [vmem:[#allocation333_spill] sm:$0xff] %v11912_v61  ;;  %11914 = vst [vmem:[#allocation334_spill] sm:$0xff] %v7724_v34  ;;  %v11916_v48 = vsel %vm7730_vm1, 4294967295, %v11915_v48  ;;  %v2008_v29 = vand.u32 2147483647, %v11893_v56  ;;  %v2023_v62 = vmul.f32 -0.5, %v11904_v53  ;;  %v7739_v46 = vmul.f32 %v11888_v52, %v1997_v1 }
 0x247   : >> { %11917 = vst [vmem:[#allocation335_spill] sm:$0xff] %v11916_v48  ;;  %v7736_v33 = vmul.f32 0.6931472, %v3358_v58  ;;  %vm7741_vm10 = vcmp.lt.f32.partialorder %v1999_v54, 0.0004427343  ;;  %v11920_v10 = vmov 0  ;;  %3371 = vlog2.f32 %v2020_v42 }
 0x248   : >> { %11919 = vst [vmem:[#allocation337_spill] sm:$0xff] %v7739_v46  ;;  %v11921_v10 = vsel %vm7741_vm10, 4294967295, %v11920_v10  ;;  %v2006_v30 = vadd.f32 1.0, %v2005_v7  ;;  %v7745_v9 = vmul.f32 0.6931472, %v3360_v14  ;;  %v2015_v41 = vadd.f32 1.0, %v2014_v11  ;;  %v3364_v54 = vpop.eup %3363 }
 0x249   : >> { %11918 = vst [vmem:[#allocation336_spill] sm:$0xff] %v7736_v33  ;;  %11922 = vst [vmem:[#allocation338_spill] sm:$0xff] %v11921_v10  ;;  %v2017_v57 = vand.u32 2147483647, %v11903_v24  ;;  %3373 = vlog2.f32 %v2029_v20  ;;  %v7748_v36 = vmul.f32 0.6931472, %v3362_v44  ;;  %v3366_v39 = vpop.eup %3365 }
 0x24a   : >> { %11923 = vst [vmem:[#allocation339_spill] sm:$0xff] %v7745_v9  ;;  %v2026_v58 = vand.u32 2147483647, %v11904_v53  ;;  %v2032_v37 = vmul.f32 -0.5, %v11909_v47  ;;  %v11925_v1 = vld [vmem:[#allocation213_spill] sm:$0xff]  ;;  %v11926_v6 = vmov 0  ;;  %v7764_v44 = vmul.f32 %v11893_v56, %v2006_v30 }
 0x24b   : >> { %11924 = vst [vmem:[#allocation340_spill] sm:$0xff] %v7748_v36  ;;  %v2038_v52 = vadd.f32 1.0, %v11925_v1  ;;  %vm7753_vm8 = vcmp.lt.f32.partialorder %v2008_v29, 0.0004427343  ;;  %v2024_v42 = vadd.f32 1.0, %v2023_v62  ;;  %v11929_v11 = vld [vmem:[#allocation215_spill] sm:$0xff]  ;;  %v3368_v49 = vpop.eup %3367  ;;  %v7773_v55 = vmul.f32 %v11903_v24, %v2015_v41 }
 0x24c   : >> { %v11927_v6 = vsel %vm7753_vm8, 4294967295, %v11926_v6  ;;  %v2035_v7 = vand.u32 2147483647, %v11909_v47  ;;  %v2047_v14 = vadd.f32 1.0, %v11929_v11  ;;  %11930 = vst [vmem:[#allocation215_spill] sm:$0xff] %v7764_v44  ;;  %v2041_v12 = vmul.f32 -0.5, %v11925_v1 }
 0x24d   : >> { %11928 = vst [vmem:[#allocation213_spill] sm:$0xff] %v11927_v6  ;;  %v11931_v29 = vld [vmem:[#allocation147_spill] sm:$0xff]  ;;  %vm7775_vm13 = vcmp.lt.f32.partialorder %v2017_v57, 0.0004427343  ;;  %v11933_v51 = vmov 0  ;;  %v2050_v56 = vmul.f32 -0.5, %v11929_v11  ;;  %3375 = vlog2.f32 %v2038_v52 }
 0x24e   : >> { %v2056_v2 = vadd.f32 1.0, %v11931_v29  ;;  %11932 = vst [vmem:[#allocation147_spill] sm:$0xff] %v7773_v55  ;;  %v11934_v51 = vsel %vm7775_vm13, 4294967295, %v11933_v51  ;;  %v11936_v30 = vld [vmem:[#allocation151_spill] sm:$0xff]  ;;  %v7785_v18 = vmul.f32 0.6931472, %v3364_v54  ;;  %v7794_v24 = vmul.f32 %v11904_v53, %v2024_v42 }
 0x24f   : >> { %11935 = vst [vmem:[#allocation341_spill] sm:$0xff] %v11934_v51  ;;  %v2065_v20 = vadd.f32 1.0, %v11936_v30  ;;  %vm7787_vm3 = vcmp.lt.f32.partialorder %v2026_v58, 0.0004427343  ;;  %v11938_v62 = vmov 0  ;;  %v2033_v41 = vadd.f32 1.0, %v2032_v37  ;;  %v3370_v33 = vpop.eup %3369 }
 0x250   : >> { %11937 = vst [vmem:[#allocation151_spill] sm:$0xff] %v7785_v18  ;;  %v11939_v62 = vsel %vm7787_vm3, 4294967295, %v11938_v62  ;;  %v7791_v57 = vmul.f32 0.6931472, %v3366_v39  ;;  %11942 = vst [vmem:[#allocation344_spill] sm:$0xff] %v7794_v24  ;;  %v11943_v9 = vmov 0  ;;  %3377 = vlog2.f32 %v2047_v14 }
 0x251   : >> { %11940 = vst [vmem:[#allocation342_spill] sm:$0xff] %v11939_v62  ;;  %vm7796_vm0 = vcmp.lt.f32.partialorder %v2035_v7, 0.0004427343  ;;  %v7800_v61 = vmul.f32 0.6931472, %v3368_v49  ;;  %v2042_v54 = vadd.f32 1.0, %v2041_v12  ;;  %3379 = vlog2.f32 %v2056_v2  ;;  %v3372_v53 = vpop.eup %3371 }
 0x252   : >> { %11941 = vst [vmem:[#allocation343_spill] sm:$0xff] %v7791_v57  ;;  %v11944_v9 = vsel %vm7796_vm0, 4294967295, %v11943_v9  ;;  %v2044_v58 = vand.u32 2147483647, %v11925_v1  ;;  %v2051_v36 = vadd.f32 1.0, %v2050_v56  ;;  %3381 = vlog2.f32 %v2065_v20  ;;  %v11947_v39 = vld [vmem:[#allocation154_spill] sm:$0xff] }
 0x253   : >> { %11945 = vst [vmem:[#allocation345_spill] sm:$0xff] %v11944_v9  ;;  %11946 = vst [vmem:[#allocation346_spill] sm:$0xff] %v7800_v61  ;;  %v2053_v37 = vand.u32 2147483647, %v11929_v11  ;;  %v2074_v52 = vadd.f32 1.0, %v11947_v39  ;;  %v7810_v49 = vmul.f32 %v11909_v47, %v2033_v41  ;;  %v2059_v12 = vmul.f32 -0.5, %v11931_v29  ;;  %v3374_v14 = vpop.eup %3373 }
 0x254   : >> { %v11949_v7 = vld [vmem:[#allocation160_spill] sm:$0xff]  ;;  %v2068_v56 = vmul.f32 -0.5, %v11936_v30  ;;  %v2077_v21 = vmul.f32 -0.5, %v11947_v39  ;;  %v2092_v48 = vadd.f32 1.0, %v11950_v32  ;;  %v7825_v41 = vmul.f32 0.6931472, %v3370_v33 }
 0x255   : >> { %11948 = vst [vmem:[#allocation154_spill] sm:$0xff] %v7810_v49  ;;  %v2083_v2 = vadd.f32 1.0, %v11949_v7  ;;  %v7828_v42 = vmul.f32 %v11925_v1, %v2042_v54  ;;  %vm7830_vm1 = vcmp.lt.f32.partialorder %v2044_v58, 0.0004427343  ;;  %v11953_v18 = vmov 0 }
 0x256   : >> { %11951 = vst [vmem:[#allocation160_spill] sm:$0xff] %v7825_v41  ;;  %v11954_v18 = vsel %vm7830_vm1, 4294967295, %v11953_v18  ;;  %v2062_v20 = vand.u32 2147483647, %v11931_v29  ;;  %v7835_v57 = vmul.f32 0.6931472, %v3372_v53  ;;  %v7838_v46 = vmul.f32 %v11929_v11, %v2051_v36 }
 0x257   : >> { %11952 = vst [vmem:[#allocation163_spill] sm:$0xff] %v7828_v42  ;;  %11955 = vst [vmem:[#allocation347_spill] sm:$0xff] %v11954_v18  ;;  %vm7840_vm10 = vcmp.lt.f32.partialorder %v2053_v37, 0.0004427343  ;;  %v11958_v10 = vmov 0  ;;  %3383 = vlog2.f32 %v2074_v52  ;;  %v2060_v1 = vadd.f32 1.0, %v2059_v12  ;;  %v3376_v53 = vpop.eup %3375 }
 0x258   : >> { %11956 = vst [vmem:[#allocation348_spill] sm:$0xff] %v7835_v57  ;;  %11957 = vst [vmem:[#allocation349_spill] sm:$0xff] %v7838_v46  ;;  %v11959_v10 = vsel %vm7840_vm10, 4294967295, %v11958_v10  ;;  %v7844_v33 = vmul.f32 0.6931472, %v3374_v14  ;;  %3385 = vlog2.f32 %v2083_v2  ;;  %v2069_v58 = vadd.f32 1.0, %v2068_v56 }
 0x259   : >> { %11960 = vst [vmem:[#allocation350_spill] sm:$0xff] %v11959_v10  ;;  %v2071_v54 = vand.u32 2147483647, %v11936_v30  ;;  %v2078_v47 = vadd.f32 1.0, %v2077_v21  ;;  %v2086_v61 = vmul.f32 -0.5, %v11949_v7  ;;  %3387 = vlog2.f32 %v2092_v48  ;;  %v11962_v52 = vld [vmem:[#allocation169_spill] sm:$0xff] }
 0x25a   : >> { %11961 = vst [vmem:[#allocation351_spill] sm:$0xff] %v7844_v33  ;;  %v2080_v11 = vand.u32 2147483647, %v11947_v39  ;;  %v2095_v37 = vmul.f32 -0.5, %v11950_v32  ;;  %v2101_v12 = vadd.f32 1.0, %v11962_v52  ;;  %v3378_v14 = vpop.eup %3377  ;;  %v11963_v48 = vmov 0 }
 0x25b   : >> { %vm7859_vm8 = vcmp.lt.f32.partialorder %v2062_v20, 0.0004427343  ;;  %v2089_v2 = vand.u32 2147483647, %v11949_v7  ;;  %v11966_v56 = vld [vmem:[#allocation194_spill] sm:$0xff]  ;;  %v3380_v41 = vpop.eup %3379  ;;  %v7870_v51 = vmul.f32 %v11931_v29, %v2060_v1  ;;  %v11968_v62 = vmov 0 }
 0x25c   : >> { %v11964_v48 = vsel %vm7859_vm8, 4294967295, %v11963_v48  ;;  %v2110_v36 = vadd.f32 1.0, %v11966_v56  ;;  %vm7872_vm13 = vcmp.lt.f32.partialorder %v2071_v54, 0.0004427343  ;;  %v2104_v20 = vmul.f32 -0.5, %v11962_v52  ;;  %v3382_v21 = vpop.eup %3381 }
 0x25d   : >> { %11965 = vst [vmem:[#allocation169_spill] sm:$0xff] %v11964_v48  ;;  %11967 = vst [vmem:[#allocation194_spill] sm:$0xff] %v7870_v51  ;;  %v11969_v62 = vsel %vm7872_vm13, 4294967295, %v11968_v62  ;;  %v7877_v57 = vmul.f32 0.6931472, %v3376_v53  ;;  %v7880_v24 = vmul.f32 %v11936_v30, %v2069_v58  ;;  %v7883_v44 = vmul.f32 %v11947_v39, %v2078_v47 }
 0x25e   : >> { %11970 = vst [vmem:[#allocation352_spill] sm:$0xff] %v11969_v62  ;;  %v2087_v9 = vadd.f32 1.0, %v2086_v61  ;;  %v7885_v55 = vmul.f32 0.6931472, %v3378_v14  ;;  %vm7887_vm0 = vcmp.lt.f32.partialorder %v2080_v11, 0.0004427343  ;;  %3389 = vlog2.f32 %v2101_v12 }
 0x25f   : >> { %11971 = vst [vmem:[#allocation353_spill] sm:$0xff] %v7877_v57  ;;  %11972 = vst [vmem:[#allocation354_spill] sm:$0xff] %v7880_v24  ;;  %v11975_v29 = vmov 0  ;;  %v2096_v1 = vadd.f32 1.0, %v2095_v37  ;;  %v2098_v54 = vand.u32 2147483647, %v11950_v32  ;;  %3391 = vlog2.f32 %v2110_v36 }
 0x260   : >> { %11973 = vst [vmem:[#allocation355_spill] sm:$0xff] %v7883_v44  ;;  %11974 = vst [vmem:[#allocation356_spill] sm:$0xff] %v7885_v55  ;;  %v11976_v29 = vsel %vm7887_vm0, 4294967295, %v11975_v29  ;;  %v7892_v33 = vmul.f32 0.6931472, %v3380_v41  ;;  %v11979_v53 = vmov 0  ;;  %v7909_v12 = vmul.f32 %v11949_v7, %v2087_v9 }
 0x261   : >> { %11977 = vst [vmem:[#allocation357_spill] sm:$0xff] %v11976_v29  ;;  %vm7894_vm3 = vcmp.lt.f32.partialorder %v2089_v2, 0.0004427343  ;;  %v2107_v30 = vand.u32 2147483647, %v11962_v52  ;;  %v11982_v61 = vld [vmem:[#allocation195_spill] sm:$0xff]  ;;  %v3384_v49 = vpop.eup %3383  ;;  %v7918_v34 = vmul.f32 %v11950_v32, %v2096_v1 }
 0x262   : >> { %11978 = vst [vmem:[#allocation358_spill] sm:$0xff] %v7892_v33  ;;  %v11980_v53 = vsel %vm7894_vm3, 4294967295, %v11979_v53  ;;  %v2119_v39 = vadd.f32 1.0, %v11982_v61  ;;  %v7900_v47 = vmul.f32 0.6931472, %v3382_v21  ;;  %v2105_v58 = vadd.f32 1.0, %v2104_v20  ;;  %v3386_v21 = vpop.eup %3385 }
 0x263   : >> { %11981 = vst [vmem:[#allocation359_spill] sm:$0xff] %v11980_v53  ;;  %v2113_v11 = vmul.f32 -0.5, %v11966_v56  ;;  %v11984_v37 = vld [vmem:[#allocation196_spill] sm:$0xff]  ;;  %v2122_v36 = vmul.f32 -0.5, %v11982_v61  ;;  %v11986_v2 = vld [vmem:[#allocation198_spill] sm:$0xff]  ;;  %v11988_v38 = vmov 0  ;;  %v3388_v7 = vpop.eup %3387 }
 0x264   : >> { %11983 = vst [vmem:[#allocation195_spill] sm:$0xff] %v7900_v47  ;;  %v2128_v14 = vadd.f32 1.0, %v11984_v37  ;;  %11985 = vst [vmem:[#allocation196_spill] sm:$0xff] %v7909_v12  ;;  %v2137_v6 = vadd.f32 1.0, %v11986_v2  ;;  %vm7920_vm6 = vcmp.lt.f32.partialorder %v2098_v54, 0.0004427343  ;;  %3393 = vlog2.f32 %v2119_v39 }
 0x265   : >> { %11987 = vst [vmem:[#allocation198_spill] sm:$0xff] %v7918_v34  ;;  %v11989_v38 = vsel %vm7920_vm6, 4294967295, %v11988_v38  ;;  %v11991_v41 = vld [vmem:[#allocation200_spill] sm:$0xff]  ;;  %v2116_v42 = vand.u32 2147483647, %v11966_v56  ;;  %v2131_v20 = vmul.f32 -0.5, %v11984_v37  ;;  %v7936_v1 = vmul.f32 %v11962_v52, %v2105_v58 }
 0x266   : >> { %11990 = vst [vmem:[#allocation360_spill] sm:$0xff] %v11989_v38  ;;  %v2146_v9 = vadd.f32 1.0, %v11991_v41  ;;  %vm7938_vm10 = vcmp.lt.f32.partialorder %v2107_v30, 0.0004427343  ;;  %v11993_v54 = vmov 0  ;;  %v2114_v55 = vadd.f32 1.0, %v2113_v11 }
 0x267   : >> { %11992 = vst [vmem:[#allocation200_spill] sm:$0xff] %v7936_v1  ;;  %v11994_v54 = vsel %vm7938_vm10, 4294967295, %v11993_v54  ;;  %3395 = vlog2.f32 %v2128_v14  ;;  %v7942_v57 = vmul.f32 0.6931472, %v3384_v49  ;;  %v2123_v33 = vadd.f32 1.0, %v2122_v36  ;;  %v12002_v49 = vld [vmem:[#allocation218_spill] sm:$0xff] }
 0x268   : >> { %11995 = vst [vmem:[#allocation361_spill] sm:$0xff] %v11994_v54  ;;  %v2125_v39 = vand.u32 2147483647, %v11982_v61  ;;  %3397 = vlog2.f32 %v2137_v6  ;;  %v7945_v51 = vmul.f32 0.6931472, %v3386_v21  ;;  %v2140_v32 = vmul.f32 -0.5, %v11986_v2  ;;  %v3390_v14 = vpop.eup %3389 }
 0x269   : >> { %11996 = vst [vmem:[#allocation362_spill] sm:$0xff] %v7942_v57  ;;  %v7947_v48 = vmul.f32 0.6931472, %v3388_v7  ;;  %3399 = vlog2.f32 %v2146_v9  ;;  %vm7950_vm13 = vcmp.lt.f32.partialorder %v2116_v42, 0.0004427343  ;;  %v11999_v52 = vmov 0  ;;  %v3392_v9 = vpop.eup %3391 }
 0x26a   : >> { %11997 = vst [vmem:[#allocation363_spill] sm:$0xff] %v7945_v51  ;;  %v12000_v52 = vsel %vm7950_vm13, 4294967295, %v11999_v52  ;;  %v2132_v30 = vadd.f32 1.0, %v2131_v20  ;;  %v2134_v58 = vand.u32 2147483647, %v11984_v37  ;;  %v2155_v11 = vadd.f32 1.0, %v12002_v49 }
 0x26b   : >> { %11998 = vst [vmem:[#allocation364_spill] sm:$0xff] %v7947_v48  ;;  %12001 = vst [vmem:[#allocation365_spill] sm:$0xff] %v12000_v52  ;;  %v7957_v36 = vmul.f32 %v11966_v56, %v2114_v55  ;;  %v2143_v6 = vand.u32 2147483647, %v11986_v2  ;;  %v2149_v21 = vmul.f32 -0.5, %v11991_v41  ;;  %v12004_v7 = vld [vmem:[#allocation219_spill] sm:$0xff]  ;;  %v7981_v42 = vmul.f32 %v11982_v61, %v2123_v33 }
 0x26c   : >> { %v2164_v47 = vadd.f32 1.0, %v12004_v7  ;;  %vm7966_vm8 = vcmp.lt.f32.partialorder %v2125_v39, 0.0004427343  ;;  %v12005_v20 = vmov 0  ;;  %v2158_v24 = vmul.f32 -0.5, %v12002_v49  ;;  %v12008_v55 = vld [vmem:[#allocation220_spill] sm:$0xff] }
 0x26d   : >> { %12003 = vst [vmem:[#allocation218_spill] sm:$0xff] %v7957_v36  ;;  %v12006_v20 = vsel %vm7966_vm8, 4294967295, %v12005_v20  ;;  %v2173_v56 = vadd.f32 1.0, %v12008_v55  ;;  %12009 = vst [vmem:[#allocation220_spill] sm:$0xff] %v7981_v42  ;;  %v2141_v39 = vadd.f32 1.0, %v2140_v32  ;;  %v7986_v44 = vmul.f32 %v11984_v37, %v2132_v30 }
 0x26e   : >> { %12007 = vst [vmem:[#allocation219_spill] sm:$0xff] %v12006_v20  ;;  %v7983_v57 = vmul.f32 0.6931472, %v3390_v14  ;;  %vm7988_vm0 = vcmp.lt.f32.partialorder %v2134_v58, 0.0004427343  ;;  %v12012_v29 = vmov 0  ;;  %3401 = vlog2.f32 %v2155_v11  ;;  %v3394_v61 = vpop.eup %3393 }
 0x26f   : >> { %12011 = vst [vmem:[#allocation367_spill] sm:$0xff] %v7986_v44  ;;  %v12013_v29 = vsel %vm7988_vm0, 4294967295, %v12012_v29  ;;  %v2152_v62 = vand.u32 2147483647, %v11991_v41  ;;  %v7993_v51 = vmul.f32 0.6931472, %v3392_v9  ;;  %3403 = vlog2.f32 %v2164_v47 }
 0x270   : >> { %12010 = vst [vmem:[#allocation366_spill] sm:$0xff] %v7983_v57  ;;  %12014 = vst [vmem:[#allocation368_spill] sm:$0xff] %v12013_v29  ;;  %vm7995_vm3 = vcmp.lt.f32.partialorder %v2143_v6, 0.0004427343  ;;  %v12016_v46 = vmov 0  ;;  %v2150_v33 = vadd.f32 1.0, %v2149_v21  ;;  %3405 = vlog2.f32 %v2173_v56 }
 0x271   : >> { %12015 = vst [vmem:[#allocation369_spill] sm:$0xff] %v7993_v51  ;;  %v12017_v46 = vsel %vm7995_vm3, 4294967295, %v12016_v46  ;;  %v2159_v32 = vadd.f32 1.0, %v2158_v24  ;;  %v2161_v37 = vand.u32 2147483647, %v12002_v49  ;;  %v2167_v30 = vmul.f32 -0.5, %v12004_v7  ;;  %v3396_v58 = vpop.eup %3395 }
 0x272   : >> { %12018 = vst [vmem:[#allocation370_spill] sm:$0xff] %v12017_v46  ;;  %v8002_v14 = vmul.f32 %v11986_v2, %v2141_v39  ;;  %v2170_v11 = vand.u32 2147483647, %v12004_v7  ;;  %v2176_v6 = vmul.f32 -0.5, %v12008_v55  ;;  %v12020_v9 = vld [vmem:[#allocation221_spill] sm:$0xff]  ;;  %v3398_v34 = vpop.eup %3397  ;;  %v12021_v47 = vmov 0 }
 0x273   : >> { %v2182_v48 = vadd.f32 1.0, %v12020_v9  ;;  %vm8011_vm6 = vcmp.lt.f32.partialorder %v2152_v62, 0.0004427343  ;;  %v2185_v21 = vmul.f32 -0.5, %v12020_v9  ;;  %v12024_v2 = vld [vmem:[#allocation223_spill] sm:$0xff]  ;;  %v3400_v39 = vpop.eup %3399  ;;  %v8024_v53 = vmul.f32 %v11991_v41, %v2150_v33  ;;  %v12027_v24 = vld [vmem:[#allocation224_spill] sm:$0xff] }
 0x274   : >> { %12019 = vst [vmem:[#allocation371_spill] sm:$0xff] %v8002_v14  ;;  %v12022_v47 = vsel %vm8011_vm6, 4294967295, %v12021_v47  ;;  %v2191_v56 = vadd.f32 1.0, %v12024_v2  ;;  %v8021_v12 = vmul.f32 0.6931472, %v3394_v61  ;;  %v2200_v62 = vadd.f32 1.0, %v12027_v24 }
 0x275   : >> { %12023 = vst [vmem:[#allocation221_spill] sm:$0xff] %v12022_v47  ;;  %12026 = vst [vmem:[#allocation372_spill] sm:$0xff] %v8024_v53  ;;  %v8028_v57 = vmul.f32 %v12002_v49, %v2159_v32  ;;  %vm8030_vm10 = vcmp.lt.f32.partialorder %v2161_v37, 0.0004427343  ;;  %v12029_v1 = vmov 0  ;;  %v2168_v54 = vadd.f32 1.0, %v2167_v30 }
 0x276   : >> { %12025 = vst [vmem:[#allocation223_spill] sm:$0xff] %v8021_v12  ;;  %v12030_v1 = vsel %vm8030_vm10, 4294967295, %v12029_v1  ;;  %v2179_v10 = vand.u32 2147483647, %v12008_v55  ;;  %v8035_v18 = vmul.f32 0.6931472, %v3396_v58  ;;  %3407 = vlog2.f32 %v2182_v48 }
 0x277   : >> { %12028 = vst [vmem:[#allocation224_spill] sm:$0xff] %v8028_v57  ;;  %12031 = vst [vmem:[#allocation373_spill] sm:$0xff] %v12030_v1  ;;  %v8037_v38 = vmul.f32 0.6931472, %v3398_v34  ;;  %vm8039_vm13 = vcmp.lt.f32.partialorder %v2170_v11, 0.0004427343  ;;  %3409 = vlog2.f32 %v2191_v56 }
 0x278   : >> { %12032 = vst [vmem:[#allocation374_spill] sm:$0xff] %v8035_v18  ;;  %v12034_v61 = vmov 0  ;;  %v2177_v41 = vadd.f32 1.0, %v2176_v6  ;;  %v8043_v33 = vmul.f32 0.6931472, %v3400_v39  ;;  %v2186_v49 = vadd.f32 1.0, %v2185_v21  ;;  %v3402_v11 = vpop.eup %3401 }
 0x279   : >> { %12033 = vst [vmem:[#allocation375_spill] sm:$0xff] %v8037_v38  ;;  %v12035_v61 = vsel %vm8039_vm13, 4294967295, %v12034_v61  ;;  %v2194_v32 = vmul.f32 -0.5, %v12024_v2  ;;  %v2188_v34 = vand.u32 2147483647, %v12020_v9  ;;  %3411 = vlog2.f32 %v2200_v62  ;;  %v12038_v30 = vld [vmem:[#allocation226_spill] sm:$0xff]  ;;  %v3404_v51 = vpop.eup %3403 }
 0x27a   : >> { %12036 = vst [vmem:[#allocation376_spill] sm:$0xff] %v12035_v61  ;;  %12037 = vst [vmem:[#allocation377_spill] sm:$0xff] %v8043_v33  ;;  %v2209_v58 = vadd.f32 1.0, %v12038_v30  ;;  %v8053_v6 = vmul.f32 %v12004_v7, %v2168_v54  ;;  %vm8055_vm1 = vcmp.lt.f32.partialorder %v2179_v10, 0.0004427343  ;;  %v12040_v48 = vmov 0  ;;  %v3406_v37 = vpop.eup %3405 }
 0x27b   : >> { %v12041_v48 = vsel %vm8055_vm1, 4294967295, %v12040_v48  ;;  %v2203_v21 = vmul.f32 -0.5, %v12027_v24  ;;  %v12043_v56 = vld [vmem:[#allocation228_spill] sm:$0xff]  ;;  %v8070_v10 = vmul.f32 %v12008_v55, %v2177_v41  ;;  %v2212_v7 = vmul.f32 -0.5, %v12038_v30  ;;  %v12050_v41 = vld [vmem:[#allocation229_spill] sm:$0xff]  ;;  %v12063_v1 = vld [vmem:[#allocation234_spill] sm:$0xff] }
 0x27c   : >> { %12039 = vst [vmem:[#allocation226_spill] sm:$0xff] %v8053_v6  ;;  %12042 = vst [vmem:[#allocation378_spill] sm:$0xff] %v12041_v48  ;;  %v2218_v39 = vadd.f32 1.0, %v12043_v56  ;;  %v8078_v42 = vmul.f32 %v12020_v9, %v2186_v49  ;;  %v2195_v62 = vadd.f32 1.0, %v2194_v32  ;;  %v2197_v18 = vand.u32 2147483647, %v12024_v2 }
 0x27d   : >> { %12044 = vst [vmem:[#allocation228_spill] sm:$0xff] %v8070_v10  ;;  %v8081_v44 = vmul.f32 0.6931472, %v3402_v11  ;;  %vm8083_vm3 = vcmp.lt.f32.partialorder %v2188_v34, 0.0004427343  ;;  %v12047_v54 = vmov 0  ;;  %3413 = vlog2.f32 %v2209_v58 }
 0x27e   : >> { %12045 = vst [vmem:[#allocation379_spill] sm:$0xff] %v8078_v42  ;;  %v12048_v54 = vsel %vm8083_vm3, 4294967295, %v12047_v54  ;;  %v2206_v55 = vand.u32 2147483647, %v12027_v24  ;;  %v2227_v38 = vadd.f32 1.0, %v12050_v41  ;;  %v2204_v12 = vadd.f32 1.0, %v2203_v21 }
 0x27f   : >> { %12046 = vst [vmem:[#allocation380_spill] sm:$0xff] %v8081_v44  ;;  %12049 = vst [vmem:[#allocation381_spill] sm:$0xff] %v12048_v54  ;;  %v8089_v14 = vmul.f32 0.6931472, %v3404_v51  ;;  %v2215_v9 = vand.u32 2147483647, %v12038_v30  ;;  %3415 = vlog2.f32 %v2218_v39  ;;  %v8097_v53 = vmul.f32 %v12024_v2, %v2195_v62 }
 0x280   : >> { %v8092_v49 = vmul.f32 0.6931472, %v3406_v37  ;;  %v2213_v32 = vadd.f32 1.0, %v2212_v7  ;;  %v2221_v11 = vmul.f32 -0.5, %v12043_v56  ;;  %v12053_v34 = vld [vmem:[#allocation231_spill] sm:$0xff]  ;;  %v12055_v58 = vmov 0  ;;  %v3408_v46 = vpop.eup %3407 }
 0x281   : >> { %12051 = vst [vmem:[#allocation229_spill] sm:$0xff] %v8089_v14  ;;  %v2236_v33 = vadd.f32 1.0, %v12053_v34  ;;  %12054 = vst [vmem:[#allocation231_spill] sm:$0xff] %v8097_v53  ;;  %vm8099_vm6 = vcmp.lt.f32.partialorder %v2197_v18, 0.0004427343  ;;  %v2230_v51 = vmul.f32 -0.5, %v12050_v41  ;;  %3417 = vlog2.f32 %v2227_v38  ;;  %v3410_v2 = vpop.eup %3409 }
 0x282   : >> { %12052 = vst [vmem:[#allocation382_spill] sm:$0xff] %v8092_v49  ;;  %v12056_v58 = vsel %vm8099_vm6, 4294967295, %v12055_v58  ;;  %v12058_v21 = vld [vmem:[#allocation232_spill] sm:$0xff]  ;;  %vm8109_vm0 = vcmp.lt.f32.partialorder %v2206_v55, 0.0004427343  ;;  %v12059_v39 = vmov 0  ;;  %v8119_v7 = vmul.f32 %v12027_v24, %v2204_v12 }
 0x283   : >> { %12057 = vst [vmem:[#allocation383_spill] sm:$0xff] %v12056_v58  ;;  %v2245_v47 = vadd.f32 1.0, %v12058_v21  ;;  %v12060_v39 = vsel %vm8109_vm0, 4294967295, %v12059_v39  ;;  %v2239_v18 = vmul.f32 -0.5, %v12053_v34  ;;  %v2224_v29 = vand.u32 2147483647, %v12043_v56  ;;  %v3412_v55 = vpop.eup %3411 }
 0x284   : >> { %12061 = vst [vmem:[#allocation232_spill] sm:$0xff] %v12060_v39  ;;  %12062 = vst [vmem:[#allocation384_spill] sm:$0xff] %v8119_v7  ;;  %v2254_v37 = vadd.f32 1.0, %v12063_v1  ;;  %v8128_v44 = vmul.f32 %v12038_v30, %v2213_v32  ;;  %vm8130_vm10 = vcmp.lt.f32.partialorder %v2215_v9, 0.0004427343  ;;  %v12065_v57 = vmov 0 }
 0x285   : >> { %v12066_v57 = vsel %vm8130_vm10, 4294967295, %v12065_v57  ;;  %v2222_v62 = vadd.f32 1.0, %v2221_v11  ;;  %3419 = vlog2.f32 %v2236_v33  ;;  %v8134_v12 = vmul.f32 0.6931472, %v3408_v46  ;;  %v12071_v11 = vld [vmem:[#allocation236_spill] sm:$0xff]  ;;  %v12095_v53 = vld [vmem:[#allocation243_spill] sm:$0xff] }
 0x286   : >> { %12064 = vst [vmem:[#allocation234_spill] sm:$0xff] %v8128_v44  ;;  %12067 = vst [vmem:[#allocation385_spill] sm:$0xff] %v12066_v57  ;;  %v2231_v24 = vadd.f32 1.0, %v2230_v51  ;;  %v2233_v14 = vand.u32 2147483647, %v12050_v41  ;;  %3421 = vlog2.f32 %v2245_v47  ;;  %v2240_v61 = vadd.f32 1.0, %v2239_v18 }
 0x287   : >> { %12068 = vst [vmem:[#allocation386_spill] sm:$0xff] %v8134_v12  ;;  %v8137_v6 = vmul.f32 0.6931472, %v3410_v2  ;;  %v2242_v38 = vand.u32 2147483647, %v12053_v34  ;;  %v2248_v30 = vmul.f32 -0.5, %v12058_v21  ;;  %3423 = vlog2.f32 %v2254_v37  ;;  %v3414_v46 = vpop.eup %3413 }
 0x288   : >> { %v8141_v32 = vmul.f32 0.6931472, %v3412_v55  ;;  %v2251_v9 = vand.u32 2147483647, %v12058_v21  ;;  %v2263_v33 = vadd.f32 1.0, %v12071_v11  ;;  %v8146_v51 = vmul.f32 %v12043_v56, %v2222_v62  ;;  %v12076_v2 = vld [vmem:[#allocation237_spill] sm:$0xff] }
 0x289   : >> { %12069 = vst [vmem:[#allocation387_spill] sm:$0xff] %v8137_v6  ;;  %vm8148_vm1 = vcmp.lt.f32.partialorder %v2224_v29, 0.0004427343  ;;  %v12073_v47 = vmov 0  ;;  %v2257_v18 = vmul.f32 -0.5, %v12063_v1  ;;  %v2272_v49 = vadd.f32 1.0, %v12076_v2  ;;  %v3416_v10 = vpop.eup %3415 }
 0x28a   : >> { %12070 = vst [vmem:[#allocation388_spill] sm:$0xff] %v8141_v32  ;;  %12072 = vst [vmem:[#allocation236_spill] sm:$0xff] %v8146_v51  ;;  %v12074_v47 = vsel %vm8148_vm1, 4294967295, %v12073_v47  ;;  %vm8158_vm13 = vcmp.lt.f32.partialorder %v2233_v14, 0.0004427343  ;;  %v12077_v55 = vmov 0  ;;  %v8169_v20 = vmul.f32 %v12050_v41, %v2231_v24 }
 0x28b   : >> { %12075 = vst [vmem:[#allocation389_spill] sm:$0xff] %v12074_v47  ;;  %v12078_v55 = vsel %vm8158_vm13, 4294967295, %v12077_v55  ;;  %v2266_v56 = vmul.f32 -0.5, %v12071_v11  ;;  %v12080_v29 = vld [vmem:[#allocation239_spill] sm:$0xff]  ;;  %v8172_v36 = vmul.f32 %v12053_v34, %v2240_v61  ;;  %v2249_v37 = vadd.f32 1.0, %v2248_v30  ;;  %v3418_v61 = vpop.eup %3417  ;;  %v12091_v14 = vld [vmem:[#allocation240_spill] sm:$0xff] }
 0x28c   : >> { %12079 = vst [vmem:[#allocation237_spill] sm:$0xff] %v12078_v55  ;;  %v2281_v62 = vadd.f32 1.0, %v12080_v29  ;;  %12081 = vst [vmem:[#allocation239_spill] sm:$0xff] %v8169_v20  ;;  %v8178_v12 = vmul.f32 0.6931472, %v3414_v46  ;;  %v12084_v42 = vmov 0  ;;  %3425 = vlog2.f32 %v2263_v33 }
 0x28d   : >> { %12082 = vst [vmem:[#allocation390_spill] sm:$0xff] %v8172_v36  ;;  %vm8180_vm3 = vcmp.lt.f32.partialorder %v2242_v38, 0.0004427343  ;;  %vm8184_vm8 = vcmp.lt.f32.partialorder %v2251_v9, 0.0004427343  ;;  %v12087_v48 = vmov 0  ;;  %3427 = vlog2.f32 %v2272_v49 }
 0x28e   : >> { %12083 = vst [vmem:[#allocation391_spill] sm:$0xff] %v8178_v12  ;;  %v12085_v42 = vsel %vm8180_vm3, 4294967295, %v12084_v42  ;;  %v12088_v48 = vsel %vm8184_vm8, 4294967295, %v12087_v48  ;;  %v2260_v41 = vand.u32 2147483647, %v12063_v1  ;;  %v2258_v24 = vadd.f32 1.0, %v2257_v18 }
 0x28f   : >> { %12086 = vst [vmem:[#allocation392_spill] sm:$0xff] %v12085_v42  ;;  %12089 = vst [vmem:[#allocation393_spill] sm:$0xff] %v12088_v48  ;;  %v8189_v34 = vmul.f32 0.6931472, %v3416_v10  ;;  %v2275_v30 = vmul.f32 -0.5, %v12076_v2  ;;  %v2267_v46 = vadd.f32 1.0, %v2266_v56  ;;  %3429 = vlog2.f32 %v2281_v62  ;;  %v3420_v9 = vpop.eup %3419 }
 0x290   : >> { %v2269_v38 = vand.u32 2147483647, %v12071_v11  ;;  %v2290_v32 = vadd.f32 1.0, %v12091_v14  ;;  %v8195_v7 = vmul.f32 %v12058_v21, %v2249_v37  ;;  %v2278_v39 = vand.u32 2147483647, %v12076_v2  ;;  %v12093_v10 = vld [vmem:[#allocation242_spill] sm:$0xff]  ;;  %v3422_v18 = vpop.eup %3421 }
 0x291   : >> { %12090 = vst [vmem:[#allocation394_spill] sm:$0xff] %v8189_v34  ;;  %v2284_v33 = vmul.f32 -0.5, %v12080_v29  ;;  %v2299_v6 = vadd.f32 1.0, %v12093_v10  ;;  %v8204_v56 = vmul.f32 0.6931472, %v3418_v61  ;;  %v2293_v62 = vmul.f32 -0.5, %v12091_v14  ;;  %v3424_v49 = vpop.eup %3423 }
 0x292   : >> { %12092 = vst [vmem:[#allocation240_spill] sm:$0xff] %v8195_v7  ;;  %v2308_v58 = vadd.f32 1.0, %v12095_v53  ;;  %v8213_v37 = vmul.f32 %v12063_v1, %v2258_v24  ;;  %vm8215_vm0 = vcmp.lt.f32.partialorder %v2260_v41, 0.0004427343  ;;  %v12097_v54 = vmov 0 }
 0x293   : >> { %12094 = vst [vmem:[#allocation242_spill] sm:$0xff] %v8204_v56  ;;  %v12098_v54 = vsel %vm8215_vm0, 4294967295, %v12097_v54  ;;  %v2276_v57 = vadd.f32 1.0, %v2275_v30  ;;  %v8220_v61 = vmul.f32 %v12071_v11, %v2267_v46  ;;  %vm8222_vm10 = vcmp.lt.f32.partialorder %v2269_v38, 0.0004427343  ;;  %v12112_v11 = vld [vmem:[#allocation247_spill] sm:$0xff] }
 0x294   : >> { %12096 = vst [vmem:[#allocation243_spill] sm:$0xff] %v8213_v37  ;;  %12099 = vst [vmem:[#allocation395_spill] sm:$0xff] %v12098_v54  ;;  %v12101_v12 = vmov 0  ;;  %v2287_v44 = vand.u32 2147483647, %v12080_v29  ;;  %3431 = vlog2.f32 %v2290_v32  ;;  %v2302_v21 = vmul.f32 -0.5, %v12093_v10 }
 0x295   : >> { %12100 = vst [vmem:[#allocation396_spill] sm:$0xff] %v8220_v61  ;;  %v12102_v12 = vsel %vm8222_vm10, 4294967295, %v12101_v12  ;;  %v8228_v1 = vmul.f32 0.6931472, %v3420_v9  ;;  %v8230_v41 = vmul.f32 0.6931472, %v3422_v18  ;;  %3433 = vlog2.f32 %v2299_v6 }
 0x296   : >> { %12103 = vst [vmem:[#allocation397_spill] sm:$0xff] %v12102_v12  ;;  %vm8232_vm1 = vcmp.lt.f32.partialorder %v2278_v39, 0.0004427343  ;;  %v12106_v24 = vmov 0  ;;  %v2285_v30 = vadd.f32 1.0, %v2284_v33  ;;  %v2294_v46 = vadd.f32 1.0, %v2293_v62  ;;  %v3426_v33 = vpop.eup %3425 }
 0x297   : >> { %12104 = vst [vmem:[#allocation398_spill] sm:$0xff] %v8228_v1  ;;  %12105 = vst [vmem:[#allocation399_spill] sm:$0xff] %v8230_v41  ;;  %v12107_v24 = vsel %vm8232_vm1, 4294967295, %v12106_v24  ;;  %v2296_v32 = vand.u32 2147483647, %v12091_v14  ;;  %3435 = vlog2.f32 %v2308_v58  ;;  %v8244_v9 = vmul.f32 %v12076_v2, %v2276_v57  ;;  %v12111_v18 = vld [vmem:[#allocation245_spill] sm:$0xff]  ;;  %v3428_v56 = vpop.eup %3427 }
 0x298   : >> { %12108 = vst [vmem:[#allocation400_spill] sm:$0xff] %v12107_v24  ;;  %v8241_v38 = vmul.f32 0.6931472, %v3424_v49  ;;  %v2311_v39 = vmul.f32 -0.5, %v12095_v53  ;;  %v2317_v34 = vadd.f32 1.0, %v12111_v18  ;;  %v2303_v6 = vadd.f32 1.0, %v2302_v21 }
 0x299   : >> { %12110 = vst [vmem:[#allocation402_spill] sm:$0xff] %v8244_v9  ;;  %v2305_v51 = vand.u32 2147483647, %v12093_v10  ;;  %v2320_v55 = vmul.f32 -0.5, %v12111_v18  ;;  %v2326_v62 = vadd.f32 1.0, %v12112_v11  ;;  %v8260_v2 = vmul.f32 %v12080_v29, %v2285_v30  ;;  %v3430_v21 = vpop.eup %3429  ;;  %v12121_v1 = vld [vmem:[#allocation249_spill] sm:$0xff] }
 0x29a   : >> { %12109 = vst [vmem:[#allocation401_spill] sm:$0xff] %v8241_v38  ;;  %vm8262_vm13 = vcmp.lt.f32.partialorder %v2287_v44, 0.0004427343  ;;  %v12114_v49 = vmov 0  ;;  %v8267_v20 = vmul.f32 %v12091_v14, %v2294_v46  ;;  %vm8269_vm6 = vcmp.lt.f32.partialorder %v2296_v32, 0.0004427343 }
 0x29b   : >> { %12113 = vst [vmem:[#allocation245_spill] sm:$0xff] %v8260_v2  ;;  %v12115_v49 = vsel %vm8262_vm13, 4294967295, %v12114_v49  ;;  %v12118_v47 = vmov 0  ;;  %v2314_v58 = vand.u32 2147483647, %v12095_v53  ;;  %v2335_v48 = vadd.f32 1.0, %v12121_v1 }
 0x29c   : >> { %12116 = vst [vmem:[#allocation247_spill] sm:$0xff] %v12115_v49  ;;  %12117 = vst [vmem:[#allocation403_spill] sm:$0xff] %v8267_v20  ;;  %v12119_v47 = vsel %vm8269_vm6, 4294967295, %v12118_v47  ;;  %v8279_v29 = vmul.f32 0.6931472, %v3426_v33  ;;  %v2312_v30 = vadd.f32 1.0, %v2311_v39  ;;  %3437 = vlog2.f32 %v2317_v34 }
 0x29d   : >> { %12120 = vst [vmem:[#allocation404_spill] sm:$0xff] %v12119_v47  ;;  %v8281_v57 = vmul.f32 0.6931472, %v3428_v56  ;;  %v8284_v14 = vmul.f32 %v12093_v10, %v2303_v6  ;;  %vm8286_vm8 = vcmp.lt.f32.partialorder %v2305_v51, 0.0004427343  ;;  %v12125_v46 = vmov 0 }
 0x29e   : >> { %12122 = vst [vmem:[#allocation249_spill] sm:$0xff] %v8279_v29  ;;  %v12126_v46 = vsel %vm8286_vm8, 4294967295, %v12125_v46  ;;  %v2321_v32 = vadd.f32 1.0, %v2320_v55  ;;  %3439 = vlog2.f32 %v2326_v62  ;;  %v8290_v41 = vmul.f32 0.6931472, %v3430_v21  ;;  %v12129_v44 = vld [vmem:[#allocation251_spill] sm:$0xff]  ;;  %v3432_v34 = vpop.eup %3431 }
 0x29f   : >> { %12123 = vst [vmem:[#allocation405_spill] sm:$0xff] %v8281_v57  ;;  %12124 = vst [vmem:[#allocation406_spill] sm:$0xff] %v8284_v14  ;;  %v2323_v54 = vand.u32 2147483647, %v12111_v18  ;;  %v2329_v33 = vmul.f32 -0.5, %v12112_v11  ;;  %v2344_v39 = vadd.f32 1.0, %v12129_v44  ;;  %3441 = vlog2.f32 %v2335_v48  ;;  %v3434_v55 = vpop.eup %3433 }
 0x2a0   : >> { %12127 = vst [vmem:[#allocation407_spill] sm:$0xff] %v12126_v46  ;;  %12128 = vst [vmem:[#allocation408_spill] sm:$0xff] %v8290_v41  ;;  %vm8295_vm0 = vcmp.lt.f32.partialorder %v2314_v58, 0.0004427343  ;;  %v12130_v56 = vmov 0  ;;  %v2338_v51 = vmul.f32 -0.5, %v12121_v1  ;;  %v8306_v21 = vmul.f32 %v12095_v53, %v2312_v30 }
 0x2a1   : >> { %v12131_v56 = vsel %vm8295_vm0, 4294967295, %v12130_v56  ;;  %v12133_v10 = vld [vmem:[#allocation254_spill] sm:$0xff]  ;;  %v2347_v38 = vmul.f32 -0.5, %v12129_v44  ;;  %v12135_v58 = vld [vmem:[#allocation121_spill] sm:$0xff]  ;;  %v3436_v7 = vpop.eup %3435  ;;  %v8315_v36 = vmul.f32 %v12111_v18, %v2321_v32  ;;  %v2332_v42 = vand.u32 2147483647, %v12112_v11 }
 0x2a2   : >> { %12132 = vst [vmem:[#allocation251_spill] sm:$0xff] %v12131_v56  ;;  %v2353_v6 = vadd.f32 1.0, %v12133_v10  ;;  %12134 = vst [vmem:[#allocation254_spill] sm:$0xff] %v8306_v21  ;;  %v2362_v37 = vadd.f32 1.0, %v12135_v58  ;;  %v2356_v62 = vmul.f32 -0.5, %v12133_v10  ;;  %v12138_v29 = vmov 0 }
 0x2a3   : >> { %12136 = vst [vmem:[#allocation121_spill] sm:$0xff] %v8315_v36  ;;  %v8323_v30 = vmul.f32 0.6931472, %v3432_v34  ;;  %vm8325_vm10 = vcmp.lt.f32.partialorder %v2323_v54, 0.0004427343  ;;  %v2330_v24 = vadd.f32 1.0, %v2329_v33  ;;  %3443 = vlog2.f32 %v2344_v39 }
 0x2a4   : >> { %v12139_v29 = vsel %vm8325_vm10, 4294967295, %v12138_v29  ;;  %v2339_v48 = vadd.f32 1.0, %v2338_v51  ;;  %v2341_v18 = vand.u32 2147483647, %v12121_v1  ;;  %v2350_v32 = vand.u32 2147483647, %v12129_v44 }
 0x2a5   : >> { %12137 = vst [vmem:[#allocation409_spill] sm:$0xff] %v8323_v30  ;;  %12140 = vst [vmem:[#allocation410_spill] sm:$0xff] %v12139_v29  ;;  %3445 = vlog2.f32 %v2353_v6  ;;  %v8331_v57 = vmul.f32 0.6931472, %v3434_v55  ;;  %v8333_v9 = vmul.f32 0.6931472, %v3436_v7  ;;  %v8346_v7 = vmul.f32 %v12112_v11, %v2330_v24 }
 0x2a6   : >> { %v2348_v49 = vadd.f32 1.0, %v2347_v38  ;;  %3447 = vlog2.f32 %v2362_v37  ;;  %vm8335_vm13 = vcmp.lt.f32.partialorder %v2332_v42, 0.0004427343  ;;  %v12143_v34 = vmov 0  ;;  %v12146_v39 = vld [vmem:[#allocation257_spill] sm:$0xff]  ;;  %v3438_v53 = vpop.eup %3437  ;;  %v12166_v56 = vld [vmem:[#allocation148_spill] sm:$0xff] }
 0x2a7   : >> { %12141 = vst [vmem:[#allocation411_spill] sm:$0xff] %v8331_v57  ;;  %12142 = vst [vmem:[#allocation412_spill] sm:$0xff] %v8333_v9  ;;  %v12144_v34 = vsel %vm8335_vm13, 4294967295, %v12143_v34  ;;  %v2357_v54 = vadd.f32 1.0, %v2356_v62  ;;  %v2359_v33 = vand.u32 2147483647, %v12133_v10  ;;  %v8351_v62 = vmul.f32 %v12121_v1, %v2339_v48 }
 0x2a8   : >> { %12145 = vst [vmem:[#allocation413_spill] sm:$0xff] %v12144_v34  ;;  %v2371_v51 = vadd.f32 1.0, %v12146_v39  ;;  %12147 = vst [vmem:[#allocation257_spill] sm:$0xff] %v8346_v7  ;;  %v2365_v37 = vmul.f32 -0.5, %v12135_v58  ;;  %v12148_v42 = vld [vmem:[#allocation129_spill] sm:$0xff]  ;;  %v3440_v55 = vpop.eup %3439  ;;  %v12150_v41 = vmov 0  ;;  %v8368_v1 = vmul.f32 %v12129_v44, %v2348_v49 }
 0x2a9   : >> { %v2380_v38 = vadd.f32 1.0, %v12148_v42  ;;  %12149 = vst [vmem:[#allocation129_spill] sm:$0xff] %v8351_v62  ;;  %vm8353_vm1 = vcmp.lt.f32.partialorder %v2341_v18, 0.0004427343  ;;  %v2374_v2 = vmul.f32 -0.5, %v12146_v39  ;;  %v12153_v61 = vld [vmem:[#allocation133_spill] sm:$0xff]  ;;  %v3442_v30 = vpop.eup %3441  ;;  %v8378_v46 = vmul.f32 %v12133_v10, %v2357_v54 }
 0x2aa   : >> { %v12151_v41 = vsel %vm8353_vm1, 4294967295, %v12150_v41  ;;  %v2389_v47 = vadd.f32 1.0, %v12153_v61  ;;  %12154 = vst [vmem:[#allocation133_spill] sm:$0xff] %v8368_v1  ;;  %vm8370_vm6 = vcmp.lt.f32.partialorder %v2350_v32, 0.0004427343  ;;  %v12155_v48 = vmov 0 }
 0x2ab   : >> { %12152 = vst [vmem:[#allocation414_spill] sm:$0xff] %v12151_v41  ;;  %v12156_v48 = vsel %vm8370_vm6, 4294967295, %v12155_v48  ;;  %v12158_v18 = vld [vmem:[#allocation263_spill] sm:$0xff]  ;;  %v8375_v20 = vmul.f32 0.6931472, %v3438_v53  ;;  %12160 = vst [vmem:[#allocation416_spill] sm:$0xff] %v8378_v46  ;;  %3449 = vlog2.f32 %v2371_v51 }
 0x2ac   : >> { %12157 = vst [vmem:[#allocation415_spill] sm:$0xff] %v12156_v48  ;;  %v2398_v6 = vadd.f32 1.0, %v12158_v18  ;;  %vm8380_vm8 = vcmp.lt.f32.partialorder %v2359_v33, 0.0004427343  ;;  %v12161_v24 = vmov 0  ;;  %v2366_v44 = vadd.f32 1.0, %v2365_v37 }
 0x2ad   : >> { %12159 = vst [vmem:[#allocation263_spill] sm:$0xff] %v8375_v20  ;;  %v12162_v24 = vsel %vm8380_vm8, 4294967295, %v12161_v24  ;;  %v2368_v11 = vand.u32 2147483647, %v12135_v58  ;;  %v8385_v49 = vmul.f32 0.6931472, %v3440_v55  ;;  %3451 = vlog2.f32 %v2380_v38  ;;  %v3444_v10 = vpop.eup %3443 }
 0x2ae   : >> { %12163 = vst [vmem:[#allocation417_spill] sm:$0xff] %v12162_v24  ;;  %v2383_v32 = vmul.f32 -0.5, %v12148_v42  ;;  %v2375_v9 = vadd.f32 1.0, %v2374_v2  ;;  %v2377_v53 = vand.u32 2147483647, %v12146_v39  ;;  %3453 = vlog2.f32 %v2389_v47  ;;  %v12170_v38 = vld [vmem:[#allocation265_spill] sm:$0xff] }
 0x2af   : >> { %12164 = vst [vmem:[#allocation418_spill] sm:$0xff] %v8385_v49  ;;  %v2386_v21 = vand.u32 2147483647, %v12148_v42  ;;  %v8390_v54 = vmul.f32 0.6931472, %v3442_v30  ;;  %v2392_v33 = vmul.f32 -0.5, %v12153_v61  ;;  %3455 = vlog2.f32 %v2398_v6  ;;  %v3446_v55 = vpop.eup %3445 }
 0x2b0   : >> { %v2407_v51 = vadd.f32 1.0, %v12166_v56  ;;  %vm8398_vm0 = vcmp.lt.f32.partialorder %v2368_v11, 0.0004427343  ;;  %v12167_v2 = vmov 0  ;;  %v2401_v47 = vmul.f32 -0.5, %v12158_v18  ;;  %v3448_v57 = vpop.eup %3447 }
 0x2b1   : >> { %12165 = vst [vmem:[#allocation419_spill] sm:$0xff] %v8390_v54  ;;  %v12168_v2 = vsel %vm8398_vm0, 4294967295, %v12167_v2  ;;  %v2416_v30 = vadd.f32 1.0, %v12170_v38  ;;  %v8409_v14 = vmul.f32 %v12135_v58, %v2366_v44  ;;  %v2384_v12 = vadd.f32 1.0, %v2383_v32 }
 0x2b2   : >> { %12169 = vst [vmem:[#allocation148_spill] sm:$0xff] %v12168_v2  ;;  %v2410_v37 = vmul.f32 -0.5, %v12166_v56  ;;  %v8412_v11 = vmul.f32 0.6931472, %v3444_v10  ;;  %v8415_v20 = vmul.f32 %v12146_v39, %v2375_v9  ;;  %vm8417_vm10 = vcmp.lt.f32.partialorder %v2377_v53, 0.0004427343 }
 0x2b3   : >> { %12171 = vst [vmem:[#allocation265_spill] sm:$0xff] %v8409_v14  ;;  %v12174_v36 = vmov 0  ;;  %v2395_v29 = vand.u32 2147483647, %v12153_v61  ;;  %v8426_v44 = vmul.f32 0.6931472, %v3446_v55  ;;  %3457 = vlog2.f32 %v2407_v51 }
 0x2b4   : >> { %12172 = vst [vmem:[#allocation420_spill] sm:$0xff] %v8412_v11  ;;  %12173 = vst [vmem:[#allocation421_spill] sm:$0xff] %v8415_v20  ;;  %v12175_v36 = vsel %vm8417_vm10, 4294967295, %v12174_v36  ;;  %vm8428_vm13 = vcmp.lt.f32.partialorder %v2386_v21, 0.0004427343  ;;  %v12178_v32 = vmov 0  ;;  %3459 = vlog2.f32 %v2416_v30 }
 0x2b5   : >> { %12176 = vst [vmem:[#allocation422_spill] sm:$0xff] %v12175_v36  ;;  %12177 = vst [vmem:[#allocation423_spill] sm:$0xff] %v8426_v44  ;;  %v12179_v32 = vsel %vm8428_vm13, 4294967295, %v12178_v32  ;;  %v2393_v10 = vadd.f32 1.0, %v2392_v33  ;;  %v8432_v9 = vmul.f32 0.6931472, %v3448_v57  ;;  %v8436_v6 = vmul.f32 %v12148_v42, %v2384_v12  ;;  %v3450_v21 = vpop.eup %3449 }
 0x2b6   : >> { %12180 = vst [vmem:[#allocation424_spill] sm:$0xff] %v12179_v32  ;;  %v2402_v39 = vadd.f32 1.0, %v2401_v47  ;;  %v2404_v53 = vand.u32 2147483647, %v12158_v18  ;;  %v2411_v49 = vadd.f32 1.0, %v2410_v37  ;;  %v12183_v55 = vld [vmem:[#allocation150_spill] sm:$0xff] }
 0x2b7   : >> { %12181 = vst [vmem:[#allocation425_spill] sm:$0xff] %v8432_v9  ;;  %12182 = vst [vmem:[#allocation426_spill] sm:$0xff] %v8436_v6  ;;  %v2413_v58 = vand.u32 2147483647, %v12166_v56  ;;  %v2425_v54 = vadd.f32 1.0, %v12183_v55  ;;  %v12184_v57 = vmov 0  ;;  %v3452_v42 = vpop.eup %3451  ;;  %v8455_v30 = vmul.f32 %v12153_v61, %v2393_v10 }
 0x2b8   : >> { %vm8444_vm1 = vcmp.lt.f32.partialorder %v2395_v29, 0.0004427343  ;;  %v2419_v51 = vmul.f32 -0.5, %v12170_v38  ;;  %v12187_v47 = vld [vmem:[#allocation153_spill] sm:$0xff]  ;;  %v2428_v48 = vmul.f32 -0.5, %v12183_v55  ;;  %v3454_v33 = vpop.eup %3453  ;;  %v8464_v1 = vmul.f32 %v12158_v18, %v2402_v39  ;;  %v12193_v37 = vld [vmem:[#allocation267_spill] sm:$0xff] }
 0x2b9   : >> { %v12185_v57 = vsel %vm8444_vm1, 4294967295, %v12184_v57  ;;  %v2434_v12 = vadd.f32 1.0, %v12187_v47  ;;  %12188 = vst [vmem:[#allocation153_spill] sm:$0xff] %v8455_v30  ;;  %v2437_v29 = vmul.f32 -0.5, %v12187_v47  ;;  %vm8466_vm6 = vcmp.lt.f32.partialorder %v2404_v53, 0.0004427343  ;;  %v3456_v10 = vpop.eup %3455 }
 0x2ba   : >> { %12186 = vst [vmem:[#allocation150_spill] sm:$0xff] %v12185_v57  ;;  %12189 = vst [vmem:[#allocation427_spill] sm:$0xff] %v8464_v1  ;;  %v12190_v62 = vmov 0  ;;  %v2443_v61 = vadd.f32 1.0, %v12193_v37  ;;  %v8471_v44 = vmul.f32 0.6931472, %v3450_v21  ;;  %v8474_v46 = vmul.f32 %v12166_v56, %v2411_v49 }
 0x2bb   : >> { %v12191_v62 = vsel %vm8466_vm6, 4294967295, %v12190_v62  ;;  %vm8476_vm8 = vcmp.lt.f32.partialorder %v2413_v58, 0.0004427343  ;;  %v12196_v24 = vmov 0  ;;  %v2422_v11 = vand.u32 2147483647, %v12170_v38 }
 0x2bc   : >> { %12192 = vst [vmem:[#allocation428_spill] sm:$0xff] %v12191_v62  ;;  %12194 = vst [vmem:[#allocation267_spill] sm:$0xff] %v8471_v44  ;;  %v12197_v24 = vsel %vm8476_vm8, 4294967295, %v12196_v24  ;;  %3461 = vlog2.f32 %v2425_v54  ;;  %v8481_v18 = vmul.f32 0.6931472, %v3452_v42  ;;  %v2420_v39 = vadd.f32 1.0, %v2419_v51 }
 0x2bd   : >> { %12195 = vst [vmem:[#allocation429_spill] sm:$0xff] %v8474_v46  ;;  %12198 = vst [vmem:[#allocation430_spill] sm:$0xff] %v12197_v24  ;;  %3463 = vlog2.f32 %v2434_v12  ;;  %v2446_v53 = vmul.f32 -0.5, %v12193_v37  ;;  %v8484_v9 = vmul.f32 0.6931472, %v3454_v33  ;;  %v2429_v21 = vadd.f32 1.0, %v2428_v48  ;;  %v3458_v54 = vpop.eup %3457 }
 0x2be   : >> { %12199 = vst [vmem:[#allocation431_spill] sm:$0xff] %v8481_v18  ;;  %v2431_v14 = vand.u32 2147483647, %v12183_v55  ;;  %v2438_v56 = vadd.f32 1.0, %v2437_v29  ;;  %v8487_v49 = vmul.f32 0.6931472, %v3456_v10  ;;  %3465 = vlog2.f32 %v2443_v61  ;;  %v3460_v29 = vpop.eup %3459 }
 0x2bf   : >> { %12200 = vst [vmem:[#allocation432_spill] sm:$0xff] %v8484_v9  ;;  %v2440_v58 = vand.u32 2147483647, %v12187_v47  ;;  %v12202_v2 = vld [vmem:[#allocation156_spill] sm:$0xff]  ;;  %vm8495_vm0 = vcmp.lt.f32.partialorder %v2422_v11, 0.0004427343  ;;  %v8506_v10 = vmul.f32 %v12170_v38, %v2420_v39  ;;  %v8514_v44 = vmul.f32 %v12183_v55, %v2429_v21 }
 0x2c0   : >> { %12201 = vst [vmem:[#allocation433_spill] sm:$0xff] %v8487_v49  ;;  %v2452_v41 = vadd.f32 1.0, %v12202_v2  ;;  %v12203_v33 = vmov 0  ;;  %v2455_v48 = vmul.f32 -0.5, %v12202_v2  ;;  %v12206_v12 = vld [vmem:[#allocation270_spill] sm:$0xff]  ;;  %v2447_v7 = vadd.f32 1.0, %v2446_v53 }
 0x2c1   : >> { %v12204_v33 = vsel %vm8495_vm0, 4294967295, %v12203_v33  ;;  %v2461_v42 = vadd.f32 1.0, %v12206_v12  ;;  %12207 = vst [vmem:[#allocation270_spill] sm:$0xff] %v8506_v10  ;;  %v2449_v51 = vand.u32 2147483647, %v12193_v37  ;;  %12208 = vst [vmem:[#allocation434_spill] sm:$0xff] %v8514_v44  ;;  %v8521_v61 = vmul.f32 %v12187_v47, %v2438_v56 }
 0x2c2   : >> { %12205 = vst [vmem:[#allocation156_spill] sm:$0xff] %v12204_v33  ;;  %vm8516_vm10 = vcmp.lt.f32.partialorder %v2431_v14, 0.0004427343  ;;  %v12209_v20 = vmov 0  ;;  %v2464_v38 = vmul.f32 -0.5, %v12206_v12  ;;  %v12214_v11 = vmov 0 }
 0x2c3   : >> { %v12210_v20 = vsel %vm8516_vm10, 4294967295, %v12209_v20  ;;  %12212 = vst [vmem:[#allocation436_spill] sm:$0xff] %v8521_v61  ;;  %v8528_v53 = vmul.f32 0.6931472, %v3458_v54  ;;  %vm8530_vm1 = vcmp.lt.f32.partialorder %v2440_v58, 0.0004427343  ;;  %3467 = vlog2.f32 %v2452_v41 }
 0x2c4   : >> { %12211 = vst [vmem:[#allocation435_spill] sm:$0xff] %v12210_v20  ;;  %v12215_v11 = vsel %vm8530_vm1, 4294967295, %v12214_v11  ;;  %v12217_v14 = vld [vmem:[#allocation157_spill] sm:$0xff]  ;;  %v8535_v21 = vmul.f32 0.6931472, %v3460_v29  ;;  %v2456_v47 = vadd.f32 1.0, %v2455_v48  ;;  %3469 = vlog2.f32 %v2461_v42 }
 0x2c5   : >> { %12213 = vst [vmem:[#allocation437_spill] sm:$0xff] %v8528_v53  ;;  %12216 = vst [vmem:[#allocation438_spill] sm:$0xff] %v12215_v11  ;;  %v2470_v55 = vadd.f32 1.0, %v12217_v14  ;;  %v12219_v56 = vld [vmem:[#allocation272_spill] sm:$0xff]  ;;  %v8539_v30 = vmul.f32 %v12193_v37, %v2447_v7  ;;  %vm8541_vm13 = vcmp.lt.f32.partialorder %v2449_v51, 0.0004427343 }
 0x2c6   : >> { %12218 = vst [vmem:[#allocation157_spill] sm:$0xff] %v8535_v21  ;;  %v2479_v9 = vadd.f32 1.0, %v12219_v56  ;;  %v12221_v39 = vmov 0  ;;  %v2458_v58 = vand.u32 2147483647, %v12202_v2  ;;  %v12224_v54 = vld [vmem:[#allocation159_spill] sm:$0xff]  ;;  %v3462_v41 = vpop.eup %3461  ;;  %v8561_v6 = vmul.f32 %v12202_v2, %v2456_v47 }
 0x2c7   : >> { %12220 = vst [vmem:[#allocation272_spill] sm:$0xff] %v8539_v30  ;;  %v12222_v39 = vsel %vm8541_vm13, 4294967295, %v12221_v39  ;;  %v2488_v49 = vadd.f32 1.0, %v12224_v54  ;;  %v2465_v1 = vadd.f32 1.0, %v2464_v38  ;;  %v2467_v29 = vand.u32 2147483647, %v12206_v12  ;;  %v3464_v57 = vpop.eup %3463 }
 0x2c8   : >> { %12223 = vst [vmem:[#allocation439_spill] sm:$0xff] %v12222_v39  ;;  %v2473_v48 = vmul.f32 -0.5, %v12217_v14  ;;  %v12225_v42 = vld [vmem:[#allocation162_spill] sm:$0xff]  ;;  %3471 = vlog2.f32 %v2470_v55  ;;  %v2482_v37 = vmul.f32 -0.5, %v12219_v56  ;;  %v12226_v51 = vld [vmem:[#allocation275_spill] sm:$0xff]  ;;  %v2491_v32 = vmul.f32 -0.5, %v12224_v54  ;;  %v3466_v36 = vpop.eup %3465 }
 0x2c9   : >> { %v2497_v62 = vadd.f32 1.0, %v12225_v42  ;;  %v2506_v18 = vadd.f32 1.0, %v12226_v51  ;;  %3473 = vlog2.f32 %v2479_v9  ;;  %v8564_v34 = vmul.f32 0.6931472, %v3462_v41  ;;  %v12231_v53 = vld [vmem:[#allocation165_spill] sm:$0xff]  ;;  %v12237_v38 = vld [vmem:[#allocation166_spill] sm:$0xff] }
 0x2ca   : >> { %vm8566_vm8 = vcmp.lt.f32.partialorder %v2458_v58, 0.0004427343  ;;  %v12228_v55 = vmov 0  ;;  %v2476_v7 = vand.u32 2147483647, %v12217_v14  ;;  %3475 = vlog2.f32 %v2488_v49 }
 0x2cb   : >> { %12227 = vst [vmem:[#allocation159_spill] sm:$0xff] %v8564_v34  ;;  %v12229_v55 = vsel %vm8566_vm8, 4294967295, %v12228_v55  ;;  %v2515_v46 = vadd.f32 1.0, %v12231_v53  ;;  %v8572_v33 = vmul.f32 0.6931472, %v3464_v57  ;;  %v8575_v2 = vmul.f32 %v12206_v12, %v2465_v1 }
 0x2cc   : >> { %12230 = vst [vmem:[#allocation162_spill] sm:$0xff] %v12229_v55  ;;  %vm8577_vm0 = vcmp.lt.f32.partialorder %v2467_v29, 0.0004427343  ;;  %v12234_v9 = vmov 0  ;;  %v2474_v47 = vadd.f32 1.0, %v2473_v48  ;;  %3477 = vlog2.f32 %v2497_v62  ;;  %v12239_v29 = vld [vmem:[#allocation277_spill] sm:$0xff] }
 0x2cd   : >> { %12232 = vst [vmem:[#allocation275_spill] sm:$0xff] %v8572_v33  ;;  %12233 = vst [vmem:[#allocation165_spill] sm:$0xff] %v8575_v2  ;;  %v12235_v9 = vsel %vm8577_vm0, 4294967295, %v12234_v9  ;;  %v2483_v58 = vadd.f32 1.0, %v2482_v37  ;;  %v2485_v41 = vand.u32 2147483647, %v12219_v56  ;;  %3479 = vlog2.f32 %v2506_v18  ;;  %v3468_v1 = vpop.eup %3467 }
 0x2ce   : >> { %12236 = vst [vmem:[#allocation440_spill] sm:$0xff] %v12235_v9  ;;  %v2524_v21 = vadd.f32 1.0, %v12237_v38  ;;  %v8583_v49 = vmul.f32 0.6931472, %v3466_v36  ;;  %v2492_v10 = vadd.f32 1.0, %v2491_v32  ;;  %v2500_v57 = vmul.f32 -0.5, %v12225_v42  ;;  %v3470_v18 = vpop.eup %3469 }
 0x2cf   : >> { %3481 = vlog2.f32 %v2515_v46  ;;  %v2494_v62 = vand.u32 2147483647, %v12224_v54  ;;  %v2533_v48 = vadd.f32 1.0, %v12239_v29  ;;  %v8597_v32 = vmul.f32 %v12217_v14, %v2474_v47  ;;  %v12245_v36 = vld [vmem:[#allocation168_spill] sm:$0xff] }
 0x2d0   : >> { %12238 = vst [vmem:[#allocation166_spill] sm:$0xff] %v8583_v49  ;;  %3483 = vlog2.f32 %v2524_v21  ;;  %vm8599_vm6 = vcmp.lt.f32.partialorder %v2476_v7, 0.0004427343  ;;  %v12241_v46 = vmov 0  ;;  %v2509_v37 = vmul.f32 -0.5, %v12226_v51 }
 0x2d1   : >> { %12240 = vst [vmem:[#allocation277_spill] sm:$0xff] %v8597_v32  ;;  %v12242_v46 = vsel %vm8599_vm6, 4294967295, %v12241_v46  ;;  %v8605_v12 = vmul.f32 %v12219_v56, %v2483_v58  ;;  %vm8607_vm10 = vcmp.lt.f32.partialorder %v2485_v41, 0.0004427343  ;;  %v12243_v21 = vmov 0 }
 0x2d2   : >> { %v12244_v21 = vsel %vm8607_vm10, 4294967295, %v12243_v21  ;;  %v2503_v34 = vand.u32 2147483647, %v12225_v42  ;;  %3485 = vlog2.f32 %v2533_v48  ;;  %v2542_v33 = vadd.f32 1.0, %v12245_v36  ;;  %v3472_v58 = vpop.eup %3471 }
 0x2d3   : >> { %v8617_v7 = vmul.f32 0.6931472, %v3468_v1  ;;  %v8620_v47 = vmul.f32 %v12224_v54, %v2492_v10  ;;  %v2501_v56 = vadd.f32 1.0, %v2500_v57  ;;  %v8622_v41 = vmul.f32 0.6931472, %v3470_v18  ;;  %v3474_v39 = vpop.eup %3473  ;;  %v12249_v54 = vld [vmem:[#allocation171_spill] sm:$0xff] }
 0x2d4   : >> { %vm8624_vm1 = vcmp.lt.f32.partialorder %v2494_v62, 0.0004427343  ;;  %v12247_v61 = vmov 0  ;;  %v2512_v48 = vand.u32 2147483647, %v12226_v51  ;;  %v2518_v11 = vmul.f32 -0.5, %v12231_v53  ;;  %v3476_v49 = vpop.eup %3475 }
 0x2d5   : >> { %12246 = vst [vmem:[#allocation168_spill] sm:$0xff] %v8622_v41  ;;  %v12248_v61 = vsel %vm8624_vm1, 4294967295, %v12247_v61  ;;  %3487 = vlog2.f32 %v2542_v33  ;;  %v2510_v14 = vadd.f32 1.0, %v2509_v37  ;;  %v2521_v1 = vand.u32 2147483647, %v12231_v53 }
 0x2d6   : >> { %v2527_v10 = vmul.f32 -0.5, %v12237_v38  ;;  %v2551_v57 = vadd.f32 1.0, %v12249_v54  ;;  %vm8633_vm13 = vcmp.lt.f32.partialorder %v2503_v34, 0.0004427343  ;;  %v12250_v18 = vmov 0  ;;  %v3478_v33 = vpop.eup %3477 }
 0x2d7   : >> { %v12251_v18 = vsel %vm8633_vm13, 4294967295, %v12250_v18  ;;  %v2530_v62 = vand.u32 2147483647, %v12237_v38  ;;  %v2536_v30 = vmul.f32 -0.5, %v12239_v29  ;;  %v2545_v44 = vmul.f32 -0.5, %v12245_v36  ;;  %v3480_v34 = vpop.eup %3479 }
 0x2d8   : >> { %v8644_v20 = vmul.f32 0.6931472, %v3472_v58  ;;  %v8647_v24 = vmul.f32 %v12225_v42, %v2501_v56  ;;  %3489 = vlog2.f32 %v2551_v57  ;;  %vm8653_vm3 = vcmp.lt.f32.partialorder %v2512_v48, 0.0004427343  ;;  %v12884_v56 = vld [vmem:[#allocation57_spill] sm:$0xff]  ;;  %v12887_v48 = vld [vmem:[#allocation132_spill] sm:$0xff] }
 0x2d9   : >> { %v12253_v3 = vmov 0  ;;  %v2519_v16 = vadd.f32 1.0, %v2518_v11  ;;  %v2554_v55 = vmul.f32 -0.5, %v12249_v54  ;;  %v3482_v37 = vpop.eup %3481  ;;  %v8658_v58 = vmul.f32 0.6931472, %v3474_v39  ;;  %v12284_v39 = vld [vmem:[#allocation291_spill] sm:$0xff] }
 0x2da   : >> { %12252 = vst [vmem:[#allocation171_spill] sm:$0xff] %v8644_v20  ;;  %v12254_v3 = vsel %vm8653_vm3, 4294967295, %v12253_v3  ;;  %v8661_v42 = vmul.f32 %v12226_v51, %v2510_v14  ;;  %vm8663_vm8 = vcmp.lt.f32.partialorder %v2521_v1, 0.0004427343  ;;  %v2528_v57 = vadd.f32 1.0, %v2527_v10  ;;  %v3484_v9 = vpop.eup %3483 }
 0x2db   : >> { %vm8667_vm0 = vcmp.lt.f32.partialorder %v2530_v62, 0.0004427343  ;;  %v2537_v52 = vadd.f32 1.0, %v2536_v30  ;;  %v2539_v11 = vand.u32 2147483647, %v12239_v29  ;;  %v2546_v41 = vadd.f32 1.0, %v2545_v44 }
 0x2dc   : >> { %v8676_v51 = vmul.f32 0.6931472, %v3476_v49  ;;  %v8678_v14 = vmul.f32 0.6931472, %v3478_v33  ;;  %v2548_v1 = vand.u32 2147483647, %v12245_v36  ;;  %v3486_v10 = vpop.eup %3485  ;;  %v8684_v2 = vmul.f32 %v12231_v53, %v2519_v16 }
 0x2dd   : >> { %v8681_v62 = vmul.f32 0.6931472, %v3480_v34  ;;  %v2555_v30 = vadd.f32 1.0, %v2554_v55  ;;  %v2557_v44 = vand.u32 2147483647, %v12249_v54  ;;  %v8696_v20 = vmul.f32 %v12237_v38, %v2528_v57  ;;  %v12268_v57 = vld [vmem:[#allocation137_spill] sm:$0xff] }
 0x2de   : >> { %v8691_v49 = vmul.f32 0.6931472, %v3482_v37  ;;  %v8693_v33 = vmul.f32 0.6931472, %v3484_v9  ;;  %v8698_v32 = vmul.f32 0.6931472, %v3486_v10  ;;  %v8701_v16 = vmul.f32 %v12239_v29, %v2537_v52 }
 0x2df   : >> { %v3488_v34 = vpop.eup %3487  ;;  %vm8703_vm6 = vcmp.lt.f32.partialorder %v2539_v11, 0.0004427343  ;;  %v8708_v55 = vmul.f32 %v12245_v36, %v2546_v41  ;;  %vm8720_vm10 = vcmp.lt.f32.partialorder %v2548_v1, 0.0004427343  ;;  %v12263_v52 = vmov 0  ;;  %v12270_v11 = vld [vmem:[#allocation288_spill] sm:$0xff] }
 0x2e0   : >> { %v8718_v37 = vmul.f32 0.6931472, %v3488_v34  ;;  %v12264_v52 = vsel %vm8720_vm10, 4294967295, %v12263_v52  ;;  %v8729_v36 = vmul.f32 %v12249_v54, %v2555_v30  ;;  %vm8731_vm1 = vcmp.lt.f32.partialorder %v2557_v44, 0.0004427343  ;;  %v12273_v30 = vld [vmem:[#allocation62_spill] sm:$0xff] }
 0x2e1   : >> { %12261 = vst [vmem:[#allocation441_spill] sm:$0xff] %v8708_v55  ;;  %12265 = vst [vmem:[#allocation443_spill] sm:$0xff] %v12264_v52  ;;  %vm12269_vm13 = vnez %v11705_v50  ;;  %v12274_v44 = vld [vmem:[#allocation172_spill] sm:$0xff]  ;;  %v12276_v50 = vld [vmem:[#allocation222_spill] sm:$0xff] }
 0x2e2   : >> { %12262 = vst [vmem:[#allocation442_spill] sm:$0xff] %v8718_v37  ;;  %v12271_v1 = vsel %vm12269_vm13, %v6798_v23, %v12270_v11  ;;  %v3490_v34 = vpop.eup %3489  ;;  %vm12275_vm3 = vnez %v12274_v44  ;;  %v12277_v38 = vld [vmem:[#allocation289_spill] sm:$0xff]  ;;  %v12289_v44 = vld [vmem:[#allocation266_spill] sm:$0xff]  ;;  %v12299_v52 = vld [vmem:[#allocation76_spill] sm:$0xff] }
 0x2e3   : >> { %v8741_v10 = vadd.f32 %v12271_v1, %v12268_v57  ;;  %v12278_v9 = vsel %vm12275_vm3, %v12276_v50, %v12277_v38  ;;  %v12280_v57 = vld [vmem:[#allocation138_spill] sm:$0xff]  ;;  %v12281_v11 = vld [vmem:[#allocation173_spill] sm:$0xff]  ;;  %vm12288_vm3 = vnez %v11739_v17  ;;  %v12290_v50 = vld [vmem:[#allocation300_spill] sm:$0xff] }
 0x2e4   : >> { %v8757_v23 = vadd.f32 %v12278_v9, %v12273_v30  ;;  %vm12282_vm13 = vnez %v12281_v11  ;;  %v12283_v1 = vld [vmem:[#allocation225_spill] sm:$0xff]  ;;  %v8775_v9 = vmul.f32 0.6931472, %v3490_v34  ;;  %v12287_v30 = vld [vmem:[#allocation71_spill] sm:$0xff]  ;;  %v12297_v54 = vld [vmem:[#allocation182_spill] sm:$0xff] }
 0x2e5   : >> { %12272 = vst [vmem:[#allocation137_spill] sm:$0xff] %v8741_v10  ;;  %v12285_v10 = vsel %vm12282_vm13, %v12283_v1, %v12284_v39  ;;  %v12291_v39 = vsel %vm12288_vm3, %v12289_v44, %v12290_v50  ;;  %v12294_v11 = vld [vmem:[#allocation179_spill] sm:$0xff]  ;;  %v12296_v1 = vld [vmem:[#allocation268_spill] sm:$0xff]  ;;  %v12300_v34 = vld [vmem:[#allocation269_spill] sm:$0xff] }
 0x2e6   : >> { %12279 = vst [vmem:[#allocation288_spill] sm:$0xff] %v8757_v23  ;;  %v8765_v29 = vadd.f32 %v12285_v10, %v12280_v57  ;;  %v8783_v10 = vadd.f32 %v12291_v39, %v12287_v30  ;;  %v12293_v57 = vld [vmem:[#allocation11_spill] sm:$0xff]  ;;  %vm12295_vm13 = vnez %v12294_v11  ;;  %v12301_v38 = vld [vmem:[#allocation308_spill] sm:$0xff]  ;;  %v12303_v55 = vld [vmem:[#allocation77_spill] sm:$0xff] }
 0x2e7   : >> { %v12302_v37 = vsel %vm7304_vm7, %v12300_v34, %v12301_v38  ;;  %v12304_v44 = vld [vmem:[#allocation295_spill] sm:$0xff]  ;;  %v12307_v50 = vld [vmem:[#allocation309_spill] sm:$0xff]  ;;  %v12319_v34 = vld [vmem:[#allocation14_spill] sm:$0xff] }
 0x2e8   : >> { %12286 = vst [vmem:[#allocation62_spill] sm:$0xff] %v8765_v29  ;;  %12292 = vst [vmem:[#allocation172_spill] sm:$0xff] %v8783_v10  ;;  %v12298_v29 = vsel %vm12295_vm13, %v12296_v1, %v12297_v54  ;;  %v8799_v17 = vadd.f32 %v12302_v37, %v12299_v52  ;;  %vm12305_vm3 = vnez %v12304_v44  ;;  %v12306_v30 = vld [vmem:[#allocation271_spill] sm:$0xff]  ;;  %v12309_v10 = vld [vmem:[#allocation144_spill] sm:$0xff] }
 0x2e9   : >> { %v8791_v23 = vadd.f32 %v12298_v29, %v12293_v57  ;;  %v12308_v39 = vsel %vm12305_vm3, %v12306_v30, %v12307_v50  ;;  %v12310_v54 = vld [vmem:[#allocation296_spill] sm:$0xff]  ;;  %v12313_v52 = vld [vmem:[#allocation78_spill] sm:$0xff]  ;;  %v12314_v38 = vld [vmem:[#allocation297_spill] sm:$0xff] }
 0x2ea   : >> { %v8807_v11 = vadd.f32 %v12308_v39, %v12303_v55  ;;  %vm12311_vm13 = vnez %v12310_v54  ;;  %vm12315_vm7 = vnez %v12314_v38  ;;  %v12316_v57 = vld [vmem:[#allocation310_spill] sm:$0xff]  ;;  %v12322_v30 = vld [vmem:[#allocation276_spill] sm:$0xff]  ;;  %v12325_v50 = vld [vmem:[#allocation79_spill] sm:$0xff] }
 0x2eb   : >> { %v12312_v29 = vsel %vm12311_vm13, %v11819_v19, %v7399_v26  ;;  %v12317_v55 = vsel %vm12315_vm7, %v11820_v15, %v12316_v57  ;;  %v12320_v44 = vld [vmem:[#allocation298_spill] sm:$0xff]  ;;  %v12323_v19 = vld [vmem:[#allocation311_spill] sm:$0xff]  ;;  %v12326_v39 = vld [vmem:[#allocation301_spill] sm:$0xff] }
 0x2ec   : >> { %v8815_v5 = vadd.f32 %v12312_v29, %v12309_v10  ;;  %v8827_v1 = vadd.f32 %v12317_v55, %v12313_v52  ;;  %vm12321_vm3 = vnez %v12320_v44  ;;  %vm12327_vm13 = vnez %v12326_v39  ;;  %v12328_v54 = vld [vmem:[#allocation313_spill] sm:$0xff]  ;;  %v12330_v37 = vld [vmem:[#allocation15_spill] sm:$0xff]  ;;  %v12334_v57 = vld [vmem:[#allocation184_spill] sm:$0xff] }
 0x2ed   : >> { %v12324_v26 = vsel %vm12321_vm3, %v12322_v30, %v12323_v19  ;;  %v12329_v29 = vsel %vm12327_vm13, %v11828_v27, %v12328_v54  ;;  %v12331_v15 = vld [vmem:[#allocation303_spill] sm:$0xff]  ;;  %v12342_v39 = vld [vmem:[#allocation273_spill] sm:$0xff]  ;;  %v12351_v30 = vld [vmem:[#allocation84_spill] sm:$0xff] }
 0x2ee   : >> { %12318 = vst [vmem:[#allocation222_spill] sm:$0xff] %v8827_v1  ;;  %v8835_v10 = vadd.f32 %v12324_v26, %v12319_v34  ;;  %v8843_v38 = vadd.f32 %v12329_v29, %v12325_v50  ;;  %vm12332_vm7 = vnez %v12331_v15  ;;  %v12333_v52 = vld [vmem:[#allocation279_spill] sm:$0xff]  ;;  %v12336_v1 = vld [vmem:[#allocation81_spill] sm:$0xff]  ;;  %v12338_v34 = vsel %vm7376_vm14, %v11852_v40, %v7477_v0  ;;  %v12339_v26 = vld [vmem:[#allocation16_spill] sm:$0xff] }
 0x2ef   : >> { %v12335_v55 = vsel %vm12332_vm7, %v12333_v52, %v12334_v57  ;;  %v8859_v19 = vadd.f32 %v12338_v34, %v12336_v1  ;;  %v12341_v50 = vld [vmem:[#allocation281_spill] sm:$0xff]  ;;  %v12344_v15 = vld [vmem:[#allocation82_spill] sm:$0xff]  ;;  %vm12347_vm14 = vnez %v11799_v60  ;;  %v12348_v0 = vld [vmem:[#allocation284_spill] sm:$0xff] }
 0x2f0   : >> { %v8851_v44 = vadd.f32 %v12335_v55, %v12330_v37  ;;  %v12343_v54 = vsel %vm7382_vm15, %v12341_v50, %v12342_v39  ;;  %v12345_v37 = vsel %vm7405_vm4, %v11857_v59, %v7503_v25  ;;  %v12346_v57 = vld [vmem:[#allocation17_spill] sm:$0xff]  ;;  %v12349_v40 = vld [vmem:[#allocation188_spill] sm:$0xff]  ;;  %v12352_v34 = vld [vmem:[#allocation315_spill] sm:$0xff] }
 0x2f1   : >> { %v8867_v29 = vadd.f32 %v12343_v54, %v12339_v26  ;;  %v8875_v52 = vadd.f32 %v12345_v37, %v12344_v15  ;;  %v12350_v1 = vsel %vm12347_vm14, %v12348_v0, %v12349_v40  ;;  %v12353_v26 = vsel %vm7423_vm5, %v11859_v63, %v12352_v34  ;;  %v12354_v27 = vld [vmem:[#allocation18_spill] sm:$0xff]  ;;  %v12355_v25 = vld [vmem:[#allocation316_spill] sm:$0xff]  ;;  %v12357_v50 = vld [vmem:[#allocation85_spill] sm:$0xff] }
 0x2f2   : >> { %v8883_v55 = vadd.f32 %v12350_v1, %v12346_v57  ;;  %v8891_v28 = vadd.f32 %v12353_v26, %v12351_v30  ;;  %v12356_v59 = vsel %vm7429_vm2, %v7234_v13, %v12355_v25  ;;  %v12358_v39 = vld [vmem:[#allocation312_spill] sm:$0xff]  ;;  %v12360_v54 = vld [vmem:[#allocation317_spill] sm:$0xff]  ;;  %v12362_v37 = vld [vmem:[#allocation19_spill] sm:$0xff]  ;;  %vm12363_vm5 = vnez %v11814_v4 }
 0x2f3   : >> { %v8899_v60 = vadd.f32 %v12356_v59, %v12354_v27  ;;  %vm12359_vm4 = vnez %v12358_v39  ;;  %v12364_v63 = vld [vmem:[#allocation280_spill] sm:$0xff]  ;;  %v12366_v0 = vld [vmem:[#allocation86_spill] sm:$0xff]  ;;  %v12367_v13 = vld [vmem:[#allocation189_spill] sm:$0xff] }
 0x2f4   : >> { %v12361_v15 = vsel %vm12359_vm4, %v7243_v45, %v12360_v54  ;;  %v12365_v57 = vsel %vm12363_vm5, %v7270_v43, %v12364_v63  ;;  %v12368_v40 = vsel %vm7483_vm9, %v7316_v22, %v12367_v13  ;;  %v12370_v30 = vld [vmem:[#allocation20_spill] sm:$0xff]  ;;  %v12372_v34 = vld [vmem:[#allocation299_spill] sm:$0xff]  ;;  %v12378_v59 = vld [vmem:[#allocation302_spill] sm:$0xff] }
 0x2f5   : >> { %v8907_v31 = vadd.f32 %v12361_v15, %v12357_v50  ;;  %v8915_v35 = vadd.f32 %v12365_v57, %v12362_v37  ;;  %v8923_v1 = vadd.f32 %v12368_v40, %v12366_v0  ;;  %v12373_v26 = vld [vmem:[#allocation191_spill] sm:$0xff]  ;;  %v12379_v50 = vld [vmem:[#allocation321_spill] sm:$0xff]  ;;  %v12383_v22 = vld [vmem:[#allocation314_spill] sm:$0xff] }
 0x2f6   : >> { %v12374_v27 = vsel %vm7494_vm11, %v12372_v34, %v12373_v26  ;;  %v12376_v25 = vld [vmem:[#allocation87_spill] sm:$0xff]  ;;  %v12380_v39 = vsel %vm7509_vm12, %v12378_v59, %v12379_v50  ;;  %v12382_v54 = vld [vmem:[#allocation21_spill] sm:$0xff]  ;;  %vm12384_vm2 = vnez %v12383_v22  ;;  %v12385_v15 = vld [vmem:[#allocation304_spill] sm:$0xff] }
 0x2f7   : >> { %12369 = vst [vmem:[#allocation289_spill] sm:$0xff] %v8923_v1  ;;  %v8931_v4 = vadd.f32 %v12374_v27, %v12370_v30  ;;  %v8939_v8 = vadd.f32 %v12380_v39, %v12376_v25  ;;  %v12386_v37 = vld [vmem:[#allocation322_spill] sm:$0xff]  ;;  %v12389_v0 = vld [vmem:[#allocation88_spill] sm:$0xff]  ;;  %v12392_v40 = vld [vmem:[#allocation307_spill] sm:$0xff] }
 0x2f8   : >> { %v12387_v63 = vsel %vm12384_vm2, %v12385_v15, %v12386_v37  ;;  %v12390_v13 = vld [vmem:[#allocation318_spill] sm:$0xff]  ;;  %v12393_v30 = vld [vmem:[#allocation324_spill] sm:$0xff]  ;;  %v12397_v27 = vld [vmem:[#allocation319_spill] sm:$0xff] }
 0x2f9   : >> { %12375 = vst [vmem:[#allocation138_spill] sm:$0xff] %v8931_v4  ;;  %12381 = vst [vmem:[#allocation173_spill] sm:$0xff] %v8939_v8  ;;  %v8947_v57 = vadd.f32 %v12387_v63, %v12382_v54  ;;  %vm12391_vm9 = vnez %v12390_v13  ;;  %v12396_v26 = vld [vmem:[#allocation22_spill] sm:$0xff]  ;;  %vm12398_vm11 = vnez %v12397_v27  ;;  %v12400_v43 = vld [vmem:[#allocation325_spill] sm:$0xff] }
 0x2fa   : >> { %v12394_v45 = vsel %vm12391_vm9, %v12392_v40, %v12393_v30  ;;  %v12399_v25 = vld [vmem:[#allocation186_spill] sm:$0xff]  ;;  %v12403_v39 = vld [vmem:[#allocation89_spill] sm:$0xff]  ;;  %v12406_v54 = vld [vmem:[#allocation320_spill] sm:$0xff] }
 0x2fb   : >> { %12388 = vst [vmem:[#allocation225_spill] sm:$0xff] %v8947_v57  ;;  %v8955_v34 = vadd.f32 %v12394_v45, %v12389_v0  ;;  %v12401_v59 = vsel %vm12398_vm11, %v12399_v25, %v12400_v43  ;;  %v12404_v22 = vld [vmem:[#allocation282_spill] sm:$0xff]  ;;  %v12407_v15 = vld [vmem:[#allocation199_spill] sm:$0xff]  ;;  %v12413_v0 = vld [vmem:[#allocation285_spill] sm:$0xff] }
 0x2fc   : >> { %v8963_v50 = vadd.f32 %v12401_v59, %v12396_v26  ;;  %vm12405_vm12 = vnez %v12404_v22  ;;  %v12410_v13 = vld [vmem:[#allocation23_spill] sm:$0xff]  ;;  %v12414_v30 = vld [vmem:[#allocation328_spill] sm:$0xff]  ;;  %v12418_v25 = vld [vmem:[#allocation193_spill] sm:$0xff] }
 0x2fd   : >> { %12395 = vst [vmem:[#allocation291_spill] sm:$0xff] %v8955_v34  ;;  %v12408_v37 = vsel %vm12405_vm12, %v12406_v54, %v12407_v15  ;;  %v12411_v40 = vld [vmem:[#allocation323_spill] sm:$0xff]  ;;  %vm12419_vm3 = vnez %v12418_v25  ;;  %v12420_v26 = vld [vmem:[#allocation197_spill] sm:$0xff]  ;;  %v12631_v57 = vld [vmem:[#allocation110_spill] sm:$0xff] }
 0x2fe   : >> { %12402 = vst [vmem:[#allocation71_spill] sm:$0xff] %v8963_v50  ;;  %v8971_v63 = vadd.f32 %v12408_v37, %v12403_v39  ;;  %vm12412_vm15 = vnez %v12411_v40  ;;  %v12417_v34 = vld [vmem:[#allocation91_spill] sm:$0xff]  ;;  %v12421_v43 = vld [vmem:[#allocation329_spill] sm:$0xff]  ;;  %v12424_v50 = vld [vmem:[#allocation24_spill] sm:$0xff] }
 0x2ff   : >> { %v12415_v45 = vsel %vm12412_vm15, %v12413_v0, %v12414_v30  ;;  %v12422_v59 = vsel %vm12419_vm3, %v12420_v26, %v12421_v43  ;;  %v12425_v54 = vld [vmem:[#allocation327_spill] sm:$0xff]  ;;  %v12427_v39 = vld [vmem:[#allocation326_spill] sm:$0xff]  ;;  %v12435_v30 = vld [vmem:[#allocation332_spill] sm:$0xff] }
 0x300   : >> { %12409 = vst [vmem:[#allocation266_spill] sm:$0xff] %v8971_v63  ;;  %v8979_v27 = vadd.f32 %v12415_v45, %v12410_v13  ;;  %v8987_v22 = vadd.f32 %v12422_v59, %v12417_v34  ;;  %vm12426_vm13 = vnez %v12425_v54  ;;  %v12428_v15 = vld [vmem:[#allocation331_spill] sm:$0xff]  ;;  %v12431_v63 = vld [vmem:[#allocation92_spill] sm:$0xff]  ;;  %v12434_v13 = vld [vmem:[#allocation201_spill] sm:$0xff] }
 0x301   : >> { %v12429_v37 = vsel %vm12426_vm13, %v12427_v39, %v12428_v15  ;;  %v12432_v0 = vld [vmem:[#allocation203_spill] sm:$0xff]  ;;  %v12439_v26 = vld [vmem:[#allocation330_spill] sm:$0xff]  ;;  %v12441_v34 = vld [vmem:[#allocation61_spill] sm:$0xff] }
 0x302   : >> { %12416 = vst [vmem:[#allocation300_spill] sm:$0xff] %v8979_v27  ;;  %12423 = vst [vmem:[#allocation11_spill] sm:$0xff] %v8987_v22  ;;  %v8995_v40 = vadd.f32 %v12429_v37, %v12424_v50  ;;  %vm12433_vm7 = vnez %v12432_v0  ;;  %v12438_v27 = vld [vmem:[#allocation25_spill] sm:$0xff]  ;;  %vm12440_vm14 = vnez %v12439_v26  ;;  %v12442_v43 = vld [vmem:[#allocation336_spill] sm:$0xff] }
 0x303   : >> { %v12436_v45 = vsel %vm12433_vm7, %v12434_v13, %v12435_v30  ;;  %v12443_v59 = vsel %vm12440_vm14, %v12441_v34, %v12442_v43  ;;  %v12445_v22 = vld [vmem:[#allocation93_spill] sm:$0xff]  ;;  %v12448_v50 = vld [vmem:[#allocation207_spill] sm:$0xff]  ;;  %v12456_v30 = vld [vmem:[#allocation340_spill] sm:$0xff] }
 0x304   : >> { %12430 = vst [vmem:[#allocation179_spill] sm:$0xff] %v8995_v40  ;;  %v9003_v25 = vadd.f32 %v12436_v45, %v12431_v63  ;;  %v9011_v54 = vadd.f32 %v12443_v59, %v12438_v27  ;;  %v12446_v39 = vld [vmem:[#allocation209_spill] sm:$0xff]  ;;  %v12449_v15 = vld [vmem:[#allocation339_spill] sm:$0xff]  ;;  %v12452_v40 = vld [vmem:[#allocation26_spill] sm:$0xff] }
 0x305   : >> { %vm12447_vm4 = vnez %v12446_v39  ;;  %v12453_v13 = vld [vmem:[#allocation333_spill] sm:$0xff]  ;;  %v12455_v63 = vld [vmem:[#allocation211_spill] sm:$0xff]  ;;  %v12462_v27 = vld [vmem:[#allocation334_spill] sm:$0xff] }
 0x306   : >> { %12437 = vst [vmem:[#allocation268_spill] sm:$0xff] %v9003_v25  ;;  %12444 = vst [vmem:[#allocation182_spill] sm:$0xff] %v9011_v54  ;;  %v12450_v37 = vsel %vm12447_vm4, %v12448_v50, %v12449_v15  ;;  %vm12454_vm5 = vnez %v12453_v13  ;;  %v12459_v25 = vld [vmem:[#allocation94_spill] sm:$0xff]  ;;  %v12460_v34 = vld [vmem:[#allocation335_spill] sm:$0xff] }
 0x307   : >> { %v9019_v0 = vadd.f32 %v12450_v37, %v12445_v22  ;;  %v12457_v45 = vsel %vm12454_vm5, %v12455_v63, %v12456_v30  ;;  %vm12461_vm2 = vnez %v12460_v34  ;;  %v12463_v43 = vld [vmem:[#allocation151_spill] sm:$0xff]  ;;  %v12467_v50 = vld [vmem:[#allocation338_spill] sm:$0xff]  ;;  %v12469_v22 = vld [vmem:[#allocation337_spill] sm:$0xff] }
 0x308   : >> { %v9027_v26 = vadd.f32 %v12457_v45, %v12452_v40  ;;  %v12464_v59 = vsel %vm12461_vm2, %v12462_v27, %v12463_v43  ;;  %v12466_v54 = vld [vmem:[#allocation27_spill] sm:$0xff]  ;;  %vm12468_vm9 = vnez %v12467_v50  ;;  %v12474_v63 = vld [vmem:[#allocation213_spill] sm:$0xff]  ;;  %v12477_v30 = vld [vmem:[#allocation346_spill] sm:$0xff] }
 0x309   : >> { %12451 = vst [vmem:[#allocation76_spill] sm:$0xff] %v9019_v0  ;;  %v9035_v39 = vadd.f32 %v12464_v59, %v12459_v25  ;;  %v12470_v15 = vld [vmem:[#allocation343_spill] sm:$0xff]  ;;  %v12473_v0 = vld [vmem:[#allocation96_spill] sm:$0xff]  ;;  %vm12475_vm11 = vnez %v12474_v63  ;;  %v12481_v27 = vld [vmem:[#allocation341_spill] sm:$0xff] }
 0x30a   : >> { %12458 = vst [vmem:[#allocation269_spill] sm:$0xff] %v9027_v26  ;;  %v12471_v37 = vsel %vm12468_vm9, %v12469_v22, %v12470_v15  ;;  %v12476_v40 = vld [vmem:[#allocation215_spill] sm:$0xff]  ;;  %v12480_v26 = vld [vmem:[#allocation28_spill] sm:$0xff]  ;;  %vm12482_vm12 = vnez %v12481_v27  ;;  %v12488_v22 = vld [vmem:[#allocation342_spill] sm:$0xff] }
 0x30b   : >> { %12465 = vst [vmem:[#allocation308_spill] sm:$0xff] %v9035_v39  ;;  %v9043_v13 = vadd.f32 %v12471_v37, %v12466_v54  ;;  %v12478_v45 = vsel %vm12475_vm11, %v12476_v40, %v12477_v30  ;;  %v12483_v25 = vld [vmem:[#allocation147_spill] sm:$0xff]  ;;  %v12484_v43 = vld [vmem:[#allocation160_spill] sm:$0xff]  ;;  %v12487_v39 = vld [vmem:[#allocation97_spill] sm:$0xff]  ;;  %vm12489_vm15 = vnez %v12488_v22 }
 0x30c   : >> { %v9051_v34 = vadd.f32 %v12478_v45, %v12473_v0  ;;  %v12485_v59 = vsel %vm12482_vm12, %v12483_v25, %v12484_v43  ;;  %v12490_v54 = vld [vmem:[#allocation344_spill] sm:$0xff]  ;;  %v12495_v40 = vld [vmem:[#allocation345_spill] sm:$0xff]  ;;  %v12497_v0 = vld [vmem:[#allocation154_spill] sm:$0xff] }
 0x30d   : >> { %12472 = vst [vmem:[#allocation77_spill] sm:$0xff] %v9043_v13  ;;  %v9059_v50 = vadd.f32 %v12485_v59, %v12480_v26  ;;  %v12491_v15 = vld [vmem:[#allocation348_spill] sm:$0xff]  ;;  %v12494_v13 = vld [vmem:[#allocation29_spill] sm:$0xff]  ;;  %vm12496_vm3 = vnez %v12495_v40  ;;  %v12498_v30 = vld [vmem:[#allocation351_spill] sm:$0xff] }
 0x30e   : >> { %12479 = vst [vmem:[#allocation295_spill] sm:$0xff] %v9051_v34  ;;  %v12492_v37 = vsel %vm12489_vm15, %v12490_v54, %v12491_v15  ;;  %v12499_v45 = vsel %vm12496_vm3, %v12497_v0, %v12498_v30  ;;  %v12501_v34 = vld [vmem:[#allocation99_spill] sm:$0xff]  ;;  %v12505_v43 = vld [vmem:[#allocation353_spill] sm:$0xff]  ;;  %v12509_v54 = vld [vmem:[#allocation350_spill] sm:$0xff] }
 0x30f   : >> { %12486 = vst [vmem:[#allocation271_spill] sm:$0xff] %v9059_v50  ;;  %v9067_v63 = vadd.f32 %v12492_v37, %v12487_v39  ;;  %v9075_v27 = vadd.f32 %v12499_v45, %v12494_v13  ;;  %v12502_v25 = vld [vmem:[#allocation347_spill] sm:$0xff]  ;;  %v12508_v50 = vld [vmem:[#allocation30_spill] sm:$0xff]  ;;  %vm12510_vm7 = vnez %v12509_v54  ;;  %v12511_v39 = vld [vmem:[#allocation349_spill] sm:$0xff] }
 0x310   : >> { %vm12503_vm13 = vnez %v12502_v25  ;;  %v12504_v26 = vld [vmem:[#allocation163_spill] sm:$0xff]  ;;  %v12512_v15 = vld [vmem:[#allocation356_spill] sm:$0xff]  ;;  %v12516_v0 = vld [vmem:[#allocation169_spill] sm:$0xff] }
 0x311   : >> { %12493 = vst [vmem:[#allocation309_spill] sm:$0xff] %v9067_v63  ;;  %12500 = vst [vmem:[#allocation144_spill] sm:$0xff] %v9075_v27  ;;  %v12506_v59 = vsel %vm12503_vm13, %v12504_v26, %v12505_v43  ;;  %v12513_v37 = vsel %vm12510_vm7, %v12511_v39, %v12512_v15  ;;  %v12515_v63 = vld [vmem:[#allocation100_spill] sm:$0xff]  ;;  %vm12517_vm14 = vnez %v12516_v0  ;;  %v12518_v13 = vld [vmem:[#allocation194_spill] sm:$0xff] }
 0x312   : >> { %v9083_v22 = vadd.f32 %v12506_v59, %v12501_v34  ;;  %v9091_v40 = vadd.f32 %v12513_v37, %v12508_v50  ;;  %v12519_v30 = vld [vmem:[#allocation358_spill] sm:$0xff]  ;;  %v12522_v27 = vld [vmem:[#allocation31_spill] sm:$0xff]  ;;  %v12523_v26 = vld [vmem:[#allocation352_spill] sm:$0xff] }
 0x313   : >> { %v12520_v45 = vsel %vm12517_vm14, %v12518_v13, %v12519_v30  ;;  %vm12524_vm4 = vnez %v12523_v26  ;;  %v12525_v34 = vld [vmem:[#allocation354_spill] sm:$0xff]  ;;  %v12526_v43 = vld [vmem:[#allocation195_spill] sm:$0xff]  ;;  %v12530_v39 = vld [vmem:[#allocation357_spill] sm:$0xff] }
 0x314   : >> { %12507 = vst [vmem:[#allocation296_spill] sm:$0xff] %v9083_v22  ;;  %12514 = vst [vmem:[#allocation78_spill] sm:$0xff] %v9091_v40  ;;  %v9099_v25 = vadd.f32 %v12520_v45, %v12515_v63  ;;  %v12527_v59 = vsel %vm12524_vm4, %v12525_v34, %v12526_v43  ;;  %v12529_v22 = vld [vmem:[#allocation101_spill] sm:$0xff]  ;;  %vm12531_vm5 = vnez %v12530_v39  ;;  %v12532_v50 = vld [vmem:[#allocation355_spill] sm:$0xff] }
 0x315   : >> { %v9107_v54 = vadd.f32 %v12527_v59, %v12522_v27  ;;  %v12533_v15 = vld [vmem:[#allocation362_spill] sm:$0xff]  ;;  %v12536_v40 = vld [vmem:[#allocation32_spill] sm:$0xff]  ;;  %v12537_v13 = vld [vmem:[#allocation359_spill] sm:$0xff] }
 0x316   : >> { %12521 = vst [vmem:[#allocation297_spill] sm:$0xff] %v9099_v25  ;;  %v12534_v37 = vsel %vm12531_vm5, %v12532_v50, %v12533_v15  ;;  %vm12538_vm2 = vnez %v12537_v13  ;;  %v12539_v63 = vld [vmem:[#allocation196_spill] sm:$0xff]  ;;  %v12540_v30 = vld [vmem:[#allocation363_spill] sm:$0xff]  ;;  %v12543_v25 = vld [vmem:[#allocation102_spill] sm:$0xff] }
 0x317   : >> { %12528 = vst [vmem:[#allocation310_spill] sm:$0xff] %v9107_v54  ;;  %v9115_v0 = vadd.f32 %v12534_v37, %v12529_v22  ;;  %v12541_v45 = vsel %vm12538_vm2, %v12539_v63, %v12540_v30  ;;  %v12544_v34 = vld [vmem:[#allocation360_spill] sm:$0xff]  ;;  %v12546_v27 = vld [vmem:[#allocation198_spill] sm:$0xff]  ;;  %v12550_v54 = vld [vmem:[#allocation33_spill] sm:$0xff] }
 0x318   : >> { %v9123_v26 = vadd.f32 %v12541_v45, %v12536_v40  ;;  %vm12545_vm9 = vnez %v12544_v34  ;;  %v12547_v43 = vld [vmem:[#allocation364_spill] sm:$0xff]  ;;  %v12551_v50 = vld [vmem:[#allocation361_spill] sm:$0xff]  ;;  %v12554_v15 = vld [vmem:[#allocation366_spill] sm:$0xff] }
 0x319   : >> { %12535 = vst [vmem:[#allocation14_spill] sm:$0xff] %v9115_v0  ;;  %v12548_v59 = vsel %vm12545_vm9, %v12546_v27, %v12547_v43  ;;  %vm12552_vm11 = vnez %v12551_v50  ;;  %v12553_v22 = vld [vmem:[#allocation200_spill] sm:$0xff]  ;;  %v12557_v0 = vld [vmem:[#allocation103_spill] sm:$0xff]  ;;  %v12558_v63 = vld [vmem:[#allocation365_spill] sm:$0xff] }
 0x31a   : >> { %12542 = vst [vmem:[#allocation298_spill] sm:$0xff] %v9123_v26  ;;  %v9131_v39 = vadd.f32 %v12548_v59, %v12543_v25  ;;  %v12555_v37 = vsel %vm12552_vm11, %v12553_v22, %v12554_v15  ;;  %vm12559_vm12 = vnez %v12558_v63  ;;  %v12560_v40 = vld [vmem:[#allocation218_spill] sm:$0xff]  ;;  %v12561_v30 = vld [vmem:[#allocation369_spill] sm:$0xff]  ;;  %v12565_v27 = vld [vmem:[#allocation219_spill] sm:$0xff] }
 0x31b   : >> { %v9139_v13 = vadd.f32 %v12555_v37, %v12550_v54  ;;  %v12562_v45 = vsel %vm12559_vm12, %v12560_v40, %v12561_v30  ;;  %v12564_v26 = vld [vmem:[#allocation34_spill] sm:$0xff]  ;;  %vm12566_vm15 = vnez %v12565_v27  ;;  %v12567_v25 = vld [vmem:[#allocation220_spill] sm:$0xff]  ;;  %v12568_v43 = vld [vmem:[#allocation223_spill] sm:$0xff] }
 0x31c   : >> { %12549 = vst [vmem:[#allocation276_spill] sm:$0xff] %v9131_v39  ;;  %v9147_v34 = vadd.f32 %v12562_v45, %v12557_v0  ;;  %v12569_v59 = vsel %vm12566_vm15, %v12567_v25, %v12568_v43  ;;  %v12571_v39 = vld [vmem:[#allocation105_spill] sm:$0xff]  ;;  %v12572_v22 = vld [vmem:[#allocation368_spill] sm:$0xff]  ;;  %v12574_v54 = vld [vmem:[#allocation367_spill] sm:$0xff] }
 0x31d   : >> { %12556 = vst [vmem:[#allocation311_spill] sm:$0xff] %v9139_v13  ;;  %v9155_v50 = vadd.f32 %v12569_v59, %v12564_v26  ;;  %vm12573_vm3 = vnez %v12572_v22  ;;  %v12575_v15 = vld [vmem:[#allocation374_spill] sm:$0xff]  ;;  %v12578_v13 = vld [vmem:[#allocation35_spill] sm:$0xff]  ;;  %v12586_v25 = vld [vmem:[#allocation221_spill] sm:$0xff] }
 0x31e   : >> { %12563 = vst [vmem:[#allocation79_spill] sm:$0xff] %v9147_v34  ;;  %v12576_v37 = vsel %vm12573_vm3, %v12574_v54, %v12575_v15  ;;  %v12579_v40 = vld [vmem:[#allocation370_spill] sm:$0xff]  ;;  %v12581_v0 = vld [vmem:[#allocation371_spill] sm:$0xff]  ;;  %vm12587_vm7 = vnez %v12586_v25  ;;  %v12588_v26 = vld [vmem:[#allocation372_spill] sm:$0xff] }
 0x31f   : >> { %12570 = vst [vmem:[#allocation301_spill] sm:$0xff] %v9155_v50  ;;  %v9163_v63 = vadd.f32 %v12576_v37, %v12571_v39  ;;  %vm12580_vm13 = vnez %v12579_v40  ;;  %v12582_v30 = vld [vmem:[#allocation375_spill] sm:$0xff]  ;;  %v12585_v34 = vld [vmem:[#allocation106_spill] sm:$0xff]  ;;  %v12589_v43 = vld [vmem:[#allocation377_spill] sm:$0xff] }
 0x320   : >> { %v12583_v45 = vsel %vm12580_vm13, %v12581_v0, %v12582_v30  ;;  %v12590_v59 = vsel %vm12587_vm7, %v12588_v26, %v12589_v43  ;;  %v12592_v50 = vld [vmem:[#allocation36_spill] sm:$0xff]  ;;  %v12593_v54 = vld [vmem:[#allocation373_spill] sm:$0xff]  ;;  %v12691_v8 = vld [vmem:[#allocation114_spill] sm:$0xff] }
 0x321   : >> { %12577 = vst [vmem:[#allocation313_spill] sm:$0xff] %v9163_v63  ;;  %v9171_v27 = vadd.f32 %v12583_v45, %v12578_v13  ;;  %v9179_v22 = vadd.f32 %v12590_v59, %v12585_v34  ;;  %vm12594_vm14 = vnez %v12593_v54  ;;  %v12595_v39 = vld [vmem:[#allocation224_spill] sm:$0xff]  ;;  %v12599_v63 = vld [vmem:[#allocation107_spill] sm:$0xff]  ;;  %v12602_v13 = vld [vmem:[#allocation226_spill] sm:$0xff] }
 0x322   : >> { %v12596_v15 = vld [vmem:[#allocation380_spill] sm:$0xff]  ;;  %v12603_v30 = vld [vmem:[#allocation229_spill] sm:$0xff]  ;;  %v12611_v59 = vld [vmem:[#allocation378_spill] sm:$0xff] }
 0x323   : >> { %12584 = vst [vmem:[#allocation15_spill] sm:$0xff] %v9171_v27  ;;  %12591 = vst [vmem:[#allocation303_spill] sm:$0xff] %v9179_v22  ;;  %v12597_v37 = vsel %vm12594_vm14, %v12595_v39, %v12596_v15  ;;  %v12600_v0 = vld [vmem:[#allocation376_spill] sm:$0xff]  ;;  %v12606_v27 = vld [vmem:[#allocation202_spill] sm:$0xff]  ;;  %vm12612_vm2 = vnez %v12611_v59 }
 0x324   : >> { %v9187_v40 = vadd.f32 %v12597_v37, %v12592_v50  ;;  %vm12601_vm4 = vnez %v12600_v0  ;;  %v12607_v26 = vand.u32 2147483647, %v12606_v27  ;;  %v12610_v43 = vld [vmem:[#allocation37_spill] sm:$0xff]  ;;  %v12613_v54 = vld [vmem:[#allocation228_spill] sm:$0xff]  ;;  %v12614_v50 = vld [vmem:[#allocation382_spill] sm:$0xff] }
 0x325   : >> { %v12604_v45 = vsel %vm12601_vm4, %v12602_v13, %v12603_v30  ;;  %v12615_v39 = vsel %vm12612_vm2, %v12613_v54, %v12614_v50  ;;  %v12617_v37 = vld [vmem:[#allocation109_spill] sm:$0xff]  ;;  %v12620_v13 = vld [vmem:[#allocation379_spill] sm:$0xff]  ;;  %v12624_v27 = vld [vmem:[#allocation38_spill] sm:$0xff] }
 0x326   : >> { %12598 = vst [vmem:[#allocation279_spill] sm:$0xff] %v9187_v40  ;;  %v9195_v25 = vadd.f32 %v12604_v45, %v12599_v63  ;;  %vm9199_vm5 = vcmp.lt.f32.partialorder %v12607_v26, 0.0004427343  ;;  %v9209_v15 = vadd.f32 %v12615_v39, %v12610_v43  ;;  %v12618_v0 = vld [vmem:[#allocation381_spill] sm:$0xff]  ;;  %v12621_v63 = vld [vmem:[#allocation386_spill] sm:$0xff]  ;;  %v12625_v26 = vld [vmem:[#allocation383_spill] sm:$0xff] }
 0x327   : >> { %vm12619_vm9 = vnez %v12618_v0  ;;  %vm12626_vm11 = vnez %v12625_v26  ;;  %v12628_v40 = vld [vmem:[#allocation387_spill] sm:$0xff]  ;;  %v12632_v54 = vld [vmem:[#allocation232_spill] sm:$0xff]  ;;  %v12751_v4 = vld [vmem:[#allocation118_spill] sm:$0xff] }
 0x328   : >> { %12605 = vst [vmem:[#allocation184_spill] sm:$0xff] %v9195_v25  ;;  %12616 = vst [vmem:[#allocation81_spill] sm:$0xff] %v9209_v15  ;;  %v12622_v30 = vsel %vm12619_vm9, %v12620_v13, %v12621_v63  ;;  %v12627_v25 = vld [vmem:[#allocation231_spill] sm:$0xff]  ;;  %vm12633_vm12 = vnez %v12632_v54  ;;  %v12634_v43 = vld [vmem:[#allocation384_spill] sm:$0xff] }
 0x329   : >> { %v9217_v45 = vadd.f32 %v12622_v30, %v12617_v37  ;;  %v12629_v22 = vsel %vm12626_vm11, %v12627_v25, %v12628_v40  ;;  %v12635_v50 = vld [vmem:[#allocation388_spill] sm:$0xff]  ;;  %v12638_v15 = vld [vmem:[#allocation39_spill] sm:$0xff]  ;;  %v12639_v13 = vld [vmem:[#allocation385_spill] sm:$0xff] }
 0x32a   : >> { %v9225_v59 = vadd.f32 %v12629_v22, %v12624_v27  ;;  %v12636_v39 = vsel %vm12633_vm12, %v12634_v43, %v12635_v50  ;;  %vm12640_vm15 = vnez %v12639_v13  ;;  %v12641_v37 = vld [vmem:[#allocation234_spill] sm:$0xff]  ;;  %v12642_v63 = vld [vmem:[#allocation391_spill] sm:$0xff]  ;;  %v12646_v40 = vld [vmem:[#allocation389_spill] sm:$0xff] }
 0x32b   : >> { %12623 = vst [vmem:[#allocation305_spill] sm:$0xff] %v9217_v45  ;;  %v9233_v0 = vadd.f32 %v12636_v39, %v12631_v57  ;;  %v12643_v30 = vsel %vm12640_vm15, %v12641_v37, %v12642_v63  ;;  %v12645_v45 = vld [vmem:[#allocation111_spill] sm:$0xff]  ;;  %vm12647_vm3 = vnez %v12646_v40  ;;  %v12648_v22 = vld [vmem:[#allocation236_spill] sm:$0xff]  ;;  %v12649_v25 = vld [vmem:[#allocation394_spill] sm:$0xff] }
 0x32c   : >> { %12630 = vst [vmem:[#allocation16_spill] sm:$0xff] %v9225_v59  ;;  %v9241_v26 = vadd.f32 %v12643_v30, %v12638_v15  ;;  %v12650_v27 = vsel %vm12647_vm3, %v12648_v22, %v12649_v25  ;;  %v12652_v59 = vld [vmem:[#allocation40_spill] sm:$0xff]  ;;  %v12653_v43 = vld [vmem:[#allocation237_spill] sm:$0xff]  ;;  %v12655_v57 = vld [vmem:[#allocation239_spill] sm:$0xff] }
 0x32d   : >> { %12637 = vst [vmem:[#allocation306_spill] sm:$0xff] %v9233_v0  ;;  %v9249_v54 = vadd.f32 %v12650_v27, %v12645_v45  ;;  %vm12654_vm13 = vnez %v12653_v43  ;;  %v12656_v50 = vld [vmem:[#allocation242_spill] sm:$0xff]  ;;  %v12659_v0 = vld [vmem:[#allocation112_spill] sm:$0xff]  ;;  %v12670_v25 = vld [vmem:[#allocation41_spill] sm:$0xff] }
 0x32e   : >> { %12644 = vst [vmem:[#allocation281_spill] sm:$0xff] %v9241_v26  ;;  %v12657_v39 = vsel %vm12654_vm13, %v12655_v57, %v12656_v50  ;;  %v12660_v37 = vld [vmem:[#allocation392_spill] sm:$0xff]  ;;  %v12662_v15 = vld [vmem:[#allocation390_spill] sm:$0xff]  ;;  %v12671_v27 = vld [vmem:[#allocation393_spill] sm:$0xff] }
 0x32f   : >> { %12651 = vst [vmem:[#allocation273_spill] sm:$0xff] %v9249_v54  ;;  %v9257_v13 = vadd.f32 %v12657_v39, %v12652_v59  ;;  %vm12661_vm7 = vnez %v12660_v37  ;;  %v12663_v63 = vld [vmem:[#allocation398_spill] sm:$0xff]  ;;  %v12666_v26 = vld [vmem:[#allocation204_spill] sm:$0xff]  ;;  %vm12672_vm4 = vnez %v12671_v27  ;;  %v12674_v59 = vld [vmem:[#allocation399_spill] sm:$0xff] }
 0x330   : >> { %v12664_v30 = vsel %vm12661_vm7, %v12662_v15, %v12663_v63  ;;  %v12667_v22 = vand.u32 2147483647, %v12666_v26  ;;  %v12673_v43 = vld [vmem:[#allocation240_spill] sm:$0xff]  ;;  %v12677_v39 = vld [vmem:[#allocation113_spill] sm:$0xff]  ;;  %v12678_v37 = vld [vmem:[#allocation395_spill] sm:$0xff] }
 0x331   : >> { %12658 = vst [vmem:[#allocation82_spill] sm:$0xff] %v9257_v13  ;;  %v9265_v40 = vadd.f32 %v12664_v30, %v12659_v0  ;;  %v12675_v57 = vsel %vm12672_vm4, %v12673_v43, %v12674_v59  ;;  %vm12679_vm2 = vnez %v12678_v37  ;;  %v12680_v15 = vld [vmem:[#allocation243_spill] sm:$0xff]  ;;  %v12681_v0 = vld [vmem:[#allocation401_spill] sm:$0xff]  ;;  %v12684_v26 = vld [vmem:[#allocation42_spill] sm:$0xff] }
 0x332   : >> { %vm9269_vm14 = vcmp.lt.f32.partialorder %v12667_v22, 0.0004427343  ;;  %v9279_v50 = vadd.f32 %v12675_v57, %v12670_v25  ;;  %v12682_v63 = vsel %vm12679_vm2, %v12680_v15, %v12681_v0  ;;  %v12685_v22 = vld [vmem:[#allocation397_spill] sm:$0xff]  ;;  %v12692_v43 = vld [vmem:[#allocation400_spill] sm:$0xff]  ;;  %v12694_v25 = vld [vmem:[#allocation402_spill] sm:$0xff] }
 0x333   : >> { %12665 = vst [vmem:[#allocation17_spill] sm:$0xff] %v9265_v40  ;;  %v9287_v30 = vadd.f32 %v12682_v63, %v12677_v39  ;;  %vm12686_vm9 = vnez %v12685_v22  ;;  %v12687_v40 = vld [vmem:[#allocation396_spill] sm:$0xff]  ;;  %v12688_v13 = vld [vmem:[#allocation249_spill] sm:$0xff]  ;;  %vm12693_vm11 = vnez %v12692_v43  ;;  %v12699_v15 = vld [vmem:[#allocation247_spill] sm:$0xff] }
 0x334   : >> { %12676 = vst [vmem:[#allocation284_spill] sm:$0xff] %v9279_v50  ;;  %v12689_v54 = vsel %vm12686_vm9, %v12687_v40, %v12688_v13  ;;  %v12695_v59 = vld [vmem:[#allocation405_spill] sm:$0xff]  ;;  %v12698_v50 = vld [vmem:[#allocation43_spill] sm:$0xff]  ;;  %vm12700_vm12 = vnez %v12699_v15  ;;  %v12702_v0 = vld [vmem:[#allocation408_spill] sm:$0xff] }
 0x335   : >> { %12683 = vst [vmem:[#allocation188_spill] sm:$0xff] %v9287_v30  ;;  %v9295_v27 = vadd.f32 %v12689_v54, %v12684_v26  ;;  %v12696_v57 = vsel %vm12693_vm11, %v12694_v25, %v12695_v59  ;;  %v12701_v39 = vld [vmem:[#allocation245_spill] sm:$0xff]  ;;  %v12705_v30 = vld [vmem:[#allocation115_spill] sm:$0xff]  ;;  %v12706_v13 = vld [vmem:[#allocation404_spill] sm:$0xff] }
 0x336   : >> { %v9303_v37 = vadd.f32 %v12696_v57, %v12691_v8  ;;  %v12703_v63 = vsel %vm12700_vm12, %v12701_v39, %v12702_v0  ;;  %vm12707_vm15 = vnez %v12706_v13  ;;  %v12708_v54 = vld [vmem:[#allocation403_spill] sm:$0xff]  ;;  %v12709_v40 = vld [vmem:[#allocation409_spill] sm:$0xff]  ;;  %v12715_v8 = vld [vmem:[#allocation406_spill] sm:$0xff] }
 0x337   : >> { %12690 = vst [vmem:[#allocation84_spill] sm:$0xff] %v9295_v27  ;;  %v9311_v22 = vadd.f32 %v12703_v63, %v12698_v50  ;;  %v12710_v26 = vsel %vm12707_vm15, %v12708_v54, %v12709_v40  ;;  %v12712_v27 = vld [vmem:[#allocation44_spill] sm:$0xff]  ;;  %v12713_v25 = vld [vmem:[#allocation407_spill] sm:$0xff]  ;;  %v12722_v50 = vld [vmem:[#allocation254_spill] sm:$0xff] }
 0x338   : >> { %12697 = vst [vmem:[#allocation315_spill] sm:$0xff] %v9303_v37  ;;  %v9319_v43 = vadd.f32 %v12710_v26, %v12705_v30  ;;  %vm12714_vm3 = vnez %v12713_v25  ;;  %v12716_v59 = vld [vmem:[#allocation411_spill] sm:$0xff]  ;;  %v12719_v37 = vld [vmem:[#allocation116_spill] sm:$0xff]  ;;  %v12730_v40 = vld [vmem:[#allocation45_spill] sm:$0xff] }
 0x339   : >> { %12704 = vst [vmem:[#allocation18_spill] sm:$0xff] %v9311_v22  ;;  %v12717_v57 = vsel %vm12714_vm3, %v12715_v8, %v12716_v59  ;;  %v12720_v39 = vld [vmem:[#allocation251_spill] sm:$0xff]  ;;  %v12723_v0 = vld [vmem:[#allocation412_spill] sm:$0xff]  ;;  %v12726_v22 = vld [vmem:[#allocation206_spill] sm:$0xff] }
 0x33a   : >> { %12711 = vst [vmem:[#allocation316_spill] sm:$0xff] %v9319_v43  ;;  %v9327_v15 = vadd.f32 %v12717_v57, %v12712_v27  ;;  %vm12721_vm13 = vnez %v12720_v39  ;;  %v12727_v54 = vand.u32 2147483647, %v12726_v22  ;;  %v12731_v26 = vld [vmem:[#allocation410_spill] sm:$0xff]  ;;  %v12733_v25 = vld [vmem:[#allocation121_spill] sm:$0xff]  ;;  %v12734_v27 = vld [vmem:[#allocation263_spill] sm:$0xff] }
 0x33b   : >> { %v12724_v63 = vsel %vm12721_vm13, %v12722_v50, %v12723_v0  ;;  %vm12732_vm4 = vnez %v12731_v26  ;;  %v12737_v57 = vld [vmem:[#allocation117_spill] sm:$0xff]  ;;  %v12744_v22 = vld [vmem:[#allocation46_spill] sm:$0xff]  ;;  %v12811_v1 = vld [vmem:[#allocation123_spill] sm:$0xff] }
 0x33c   : >> { %12718 = vst [vmem:[#allocation85_spill] sm:$0xff] %v9327_v15  ;;  %v9335_v13 = vadd.f32 %v12724_v63, %v12719_v37  ;;  %vm9339_vm7 = vcmp.lt.f32.partialorder %v12727_v54, 0.0004427343  ;;  %v12735_v8 = vsel %vm12732_vm4, %v12733_v25, %v12734_v27  ;;  %v12738_v39 = vld [vmem:[#allocation413_spill] sm:$0xff]  ;;  %v12741_v37 = vld [vmem:[#allocation418_spill] sm:$0xff]  ;;  %v12748_v15 = vld [vmem:[#allocation419_spill] sm:$0xff] }
 0x33d   : >> { %v9349_v59 = vadd.f32 %v12735_v8, %v12730_v40  ;;  %vm12739_vm2 = vnez %v12738_v39  ;;  %v12740_v50 = vld [vmem:[#allocation257_spill] sm:$0xff]  ;;  %v12745_v54 = vld [vmem:[#allocation414_spill] sm:$0xff]  ;;  %v12752_v25 = vld [vmem:[#allocation415_spill] sm:$0xff] }
 0x33e   : >> { %12725 = vst [vmem:[#allocation312_spill] sm:$0xff] %v9335_v13  ;;  %v12742_v0 = vsel %vm12739_vm2, %v12740_v50, %v12741_v37  ;;  %vm12746_vm9 = vnez %v12745_v54  ;;  %v12747_v13 = vld [vmem:[#allocation129_spill] sm:$0xff]  ;;  %vm12753_vm11 = vnez %v12752_v25  ;;  %v12755_v27 = vld [vmem:[#allocation420_spill] sm:$0xff]  ;;  %v12762_v37 = vld [vmem:[#allocation423_spill] sm:$0xff] }
 0x33f   : >> { %12736 = vst [vmem:[#allocation317_spill] sm:$0xff] %v9349_v59  ;;  %v9357_v63 = vadd.f32 %v12742_v0, %v12737_v57  ;;  %v12749_v43 = vsel %vm12746_vm9, %v12747_v13, %v12748_v15  ;;  %v12754_v40 = vld [vmem:[#allocation133_spill] sm:$0xff]  ;;  %v12758_v59 = vld [vmem:[#allocation47_spill] sm:$0xff]  ;;  %v12761_v57 = vld [vmem:[#allocation416_spill] sm:$0xff] }
 0x340   : >> { %v9365_v26 = vadd.f32 %v12749_v43, %v12744_v22  ;;  %v12756_v8 = vsel %vm12753_vm11, %v12754_v40, %v12755_v27  ;;  %v12759_v50 = vld [vmem:[#allocation417_spill] sm:$0xff]  ;;  %v12766_v15 = vld [vmem:[#allocation148_spill] sm:$0xff]  ;;  %v12773_v40 = vld [vmem:[#allocation422_spill] sm:$0xff] }
 0x341   : >> { %12743 = vst [vmem:[#allocation19_spill] sm:$0xff] %v9357_v63  ;;  %v9373_v39 = vadd.f32 %v12756_v8, %v12751_v4  ;;  %vm12760_vm12 = vnez %v12759_v50  ;;  %v12765_v63 = vld [vmem:[#allocation119_spill] sm:$0xff]  ;;  %vm12767_vm15 = vnez %v12766_v15  ;;  %v12768_v43 = vld [vmem:[#allocation265_spill] sm:$0xff]  ;;  %vm12774_vm3 = vnez %v12773_v40  ;;  %v12903_v41 = vld [vmem:[#allocation214_spill] sm:$0xff] }
 0x342   : >> { %12750 = vst [vmem:[#allocation280_spill] sm:$0xff] %v9365_v26  ;;  %v12763_v0 = vsel %vm12760_vm12, %v12761_v57, %v12762_v37  ;;  %v12769_v13 = vld [vmem:[#allocation425_spill] sm:$0xff]  ;;  %v12772_v26 = vld [vmem:[#allocation48_spill] sm:$0xff]  ;;  %v12776_v27 = vld [vmem:[#allocation267_spill] sm:$0xff] }
 0x343   : >> { %12757 = vst [vmem:[#allocation86_spill] sm:$0xff] %v9373_v39  ;;  %v9381_v54 = vadd.f32 %v12763_v0, %v12758_v59  ;;  %v12770_v22 = vsel %vm12767_vm15, %v12768_v43, %v12769_v13  ;;  %v12775_v4 = vld [vmem:[#allocation421_spill] sm:$0xff]  ;;  %v12779_v39 = vld [vmem:[#allocation120_spill] sm:$0xff]  ;;  %v12782_v59 = vld [vmem:[#allocation426_spill] sm:$0xff] }
 0x344   : >> { %v9389_v25 = vadd.f32 %v12770_v22, %v12765_v63  ;;  %v12777_v8 = vsel %vm12774_vm3, %v12775_v4, %v12776_v27  ;;  %v12780_v57 = vld [vmem:[#allocation424_spill] sm:$0xff]  ;;  %v12783_v37 = vld [vmem:[#allocation431_spill] sm:$0xff]  ;;  %v12790_v13 = vld [vmem:[#allocation49_spill] sm:$0xff] }
 0x345   : >> { %12764 = vst [vmem:[#allocation189_spill] sm:$0xff] %v9381_v54  ;;  %v9397_v50 = vadd.f32 %v12777_v8, %v12772_v26  ;;  %vm12781_vm13 = vnez %v12780_v57  ;;  %v12786_v54 = vld [vmem:[#allocation208_spill] sm:$0xff]  ;;  %v12791_v22 = vld [vmem:[#allocation150_spill] sm:$0xff]  ;;  %v12793_v40 = vld [vmem:[#allocation153_spill] sm:$0xff] }
 0x346   : >> { %12771 = vst [vmem:[#allocation20_spill] sm:$0xff] %v9389_v25  ;;  %v12784_v0 = vsel %vm12781_vm13, %v12782_v59, %v12783_v37  ;;  %v12787_v43 = vand.u32 2147483647, %v12786_v54  ;;  %vm12792_vm2 = vnez %v12791_v22  ;;  %v12794_v26 = vld [vmem:[#allocation432_spill] sm:$0xff]  ;;  %v12797_v8 = vld [vmem:[#allocation122_spill] sm:$0xff]  ;;  %v12800_v59 = vld [vmem:[#allocation427_spill] sm:$0xff] }
 0x347   : >> { %12778 = vst [vmem:[#allocation274_spill] sm:$0xff] %v9397_v50  ;;  %v9405_v15 = vadd.f32 %v12784_v0, %v12779_v39  ;;  %v12795_v4 = vsel %vm12792_vm2, %v12793_v40, %v12794_v26  ;;  %v12798_v57 = vld [vmem:[#allocation428_spill] sm:$0xff]  ;;  %v12801_v39 = vld [vmem:[#allocation433_spill] sm:$0xff]  ;;  %v12804_v54 = vld [vmem:[#allocation50_spill] sm:$0xff] }
 0x348   : >> { %vm9409_vm4 = vcmp.lt.f32.partialorder %v12787_v43, 0.0004427343  ;;  %v9419_v27 = vadd.f32 %v12795_v4, %v12790_v13  ;;  %vm12799_vm9 = vnez %v12798_v57  ;;  %v12805_v43 = vld [vmem:[#allocation430_spill] sm:$0xff]  ;;  %v12808_v50 = vld [vmem:[#allocation437_spill] sm:$0xff]  ;;  %v12812_v40 = vld [vmem:[#allocation156_spill] sm:$0xff] }
 0x349   : >> { %12785 = vst [vmem:[#allocation299_spill] sm:$0xff] %v9405_v15  ;;  %v12802_v37 = vsel %vm12799_vm9, %v12800_v59, %v12801_v39  ;;  %vm12806_vm11 = vnez %v12805_v43  ;;  %v12807_v15 = vld [vmem:[#allocation429_spill] sm:$0xff]  ;;  %vm12813_vm12 = vnez %v12812_v40  ;;  %v12814_v13 = vld [vmem:[#allocation270_spill] sm:$0xff]  ;;  %v12819_v59 = vld [vmem:[#allocation435_spill] sm:$0xff] }
 0x34a   : >> { %12796 = vst [vmem:[#allocation191_spill] sm:$0xff] %v9419_v27  ;;  %v9427_v0 = vadd.f32 %v12802_v37, %v12797_v8  ;;  %v12809_v25 = vsel %vm12806_vm11, %v12807_v15, %v12808_v50  ;;  %v12815_v26 = vld [vmem:[#allocation157_spill] sm:$0xff]  ;;  %v12818_v27 = vld [vmem:[#allocation51_spill] sm:$0xff]  ;;  %vm12820_vm15 = vnez %v12819_v59  ;;  %v12821_v8 = vld [vmem:[#allocation434_spill] sm:$0xff] }
 0x34b   : >> { %v9435_v22 = vadd.f32 %v12809_v25, %v12804_v54  ;;  %v12816_v4 = vsel %vm12813_vm12, %v12814_v13, %v12815_v26  ;;  %v12822_v39 = vld [vmem:[#allocation159_spill] sm:$0xff]  ;;  %v12825_v50 = vld [vmem:[#allocation438_spill] sm:$0xff]  ;;  %v12827_v25 = vld [vmem:[#allocation436_spill] sm:$0xff]  ;;  %vm12853_vm12 = vnez %v12242_v46 }
 0x34c   : >> { %12803 = vst [vmem:[#allocation87_spill] sm:$0xff] %v9427_v0  ;;  %v9443_v57 = vadd.f32 %v12816_v4, %v12811_v1  ;;  %v12823_v37 = vsel %vm12820_vm15, %v12821_v8, %v12822_v39  ;;  %v12824_v0 = vld [vmem:[#allocation124_spill] sm:$0xff]  ;;  %vm12826_vm3 = vnez %v12825_v50  ;;  %v12828_v15 = vld [vmem:[#allocation275_spill] sm:$0xff]  ;;  %v12834_v26 = vld [vmem:[#allocation166_spill] sm:$0xff]  ;;  %vm12859_vm15 = vnez %v12244_v21 }
 0x34d   : >> { %12810 = vst [vmem:[#allocation278_spill] sm:$0xff] %v9435_v22  ;;  %v9451_v43 = vadd.f32 %v12823_v37, %v12818_v27  ;;  %v12829_v54 = vsel %vm12826_vm3, %v12827_v25, %v12828_v15  ;;  %v12830_v22 = vld [vmem:[#allocation52_spill] sm:$0xff]  ;;  %v12831_v13 = vld [vmem:[#allocation439_spill] sm:$0xff]  ;;  %v12837_v8 = vld [vmem:[#allocation162_spill] sm:$0xff]  ;;  %vm12863_vm3 = vnez %v12248_v61 }
 0x34e   : >> { %12817 = vst [vmem:[#allocation302_spill] sm:$0xff] %v9443_v57  ;;  %v9459_v40 = vadd.f32 %v12829_v54, %v12824_v0  ;;  %vm12832_vm13 = vnez %v12831_v13  ;;  %v12833_v1 = vld [vmem:[#allocation272_spill] sm:$0xff]  ;;  %v12836_v57 = vld [vmem:[#allocation126_spill] sm:$0xff]  ;;  %vm12838_vm2 = vnez %v12837_v8  ;;  %v12845_v25 = vld [vmem:[#allocation53_spill] sm:$0xff] }
 0x34f   : >> { %v12835_v4 = vsel %vm12832_vm13, %v12833_v1, %v12834_v26  ;;  %v12839_v27 = vsel %vm12838_vm2, %v8561_v6, %v8617_v7  ;;  %v12841_v37 = vld [vmem:[#allocation210_spill] sm:$0xff]  ;;  %v12846_v15 = vld [vmem:[#allocation440_spill] sm:$0xff]  ;;  %v12848_v54 = vld [vmem:[#allocation165_spill] sm:$0xff]  ;;  %vm12867_vm13 = vnez %v12251_v18  ;;  %vm12871_vm2 = vnez %v12254_v3 }
 0x350   : >> { %v9467_v59 = vadd.f32 %v12835_v4, %v12830_v22  ;;  %v9475_v39 = vadd.f32 %v12839_v27, %v12836_v57  ;;  %v12842_v50 = vand.u32 2147483647, %v12841_v37  ;;  %vm12847_vm11 = vnez %v12846_v15  ;;  %v12849_v22 = vld [vmem:[#allocation168_spill] sm:$0xff]  ;;  %v12852_v26 = vld [vmem:[#allocation127_spill] sm:$0xff]  ;;  %v12854_v6 = vld [vmem:[#allocation277_spill] sm:$0xff] }
 0x351   : >> { %v12850_v13 = vsel %vm12847_vm11, %v12848_v54, %v12849_v22  ;;  %v12855_v7 = vld [vmem:[#allocation171_spill] sm:$0xff]  ;;  %v12858_v8 = vld [vmem:[#allocation54_spill] sm:$0xff]  ;;  %v12860_v27 = vsel %vm12859_vm15, %v8605_v12, %v8658_v58  ;;  %v12868_v54 = vsel %vm12867_vm13, %v8647_v24, %v8678_v14  ;;  %v12872_v12 = vsel %vm12871_vm2, %v8661_v42, %v8681_v62  ;;  %v12874_v58 = vld [vmem:[#allocation56_spill] sm:$0xff] }
 0x352   : >> { %12840 = vst [vmem:[#allocation321_spill] sm:$0xff] %v9475_v39  ;;  %vm9479_vm9 = vcmp.lt.f32.partialorder %v12842_v50, 0.0004427343  ;;  %v9489_v1 = vadd.f32 %v12850_v13, %v12845_v25  ;;  %v12856_v57 = vsel %vm12853_vm12, %v12854_v6, %v12855_v7  ;;  %v9505_v37 = vadd.f32 %v12860_v27, %v12858_v8  ;;  %v12862_v50 = vld [vmem:[#allocation128_spill] sm:$0xff]  ;;  %v12866_v15 = vld [vmem:[#allocation55_spill] sm:$0xff]  ;;  %v12870_v22 = vld [vmem:[#allocation130_spill] sm:$0xff] }
 0x353   : >> { %v9497_v4 = vadd.f32 %v12856_v57, %v12852_v26  ;;  %v12864_v25 = vsel %vm12863_vm3, %v8620_v47, %v8676_v51  ;;  %v9521_v21 = vadd.f32 %v12868_v54, %v12866_v15  ;;  %v9529_v61 = vadd.f32 %v12872_v12, %v12870_v22  ;;  %v12877_v51 = vld [vmem:[#allocation131_spill] sm:$0xff]  ;;  %v12880_v14 = vld [vmem:[#allocation212_spill] sm:$0xff]  ;;  %v12893_v7 = vld [vmem:[#allocation58_spill] sm:$0xff] }
 0x354   : >> { %12851 = vst [vmem:[#allocation21_spill] sm:$0xff] %v9489_v1  ;;  %12861 = vst [vmem:[#allocation304_spill] sm:$0xff] %v9505_v37  ;;  %v9513_v46 = vadd.f32 %v12864_v25, %v12862_v50  ;;  %v12875_v47 = vsel %vm8663_vm8, %v8684_v2, %v8691_v49  ;;  %v12878_v24 = vsel %vm8667_vm0, %v8696_v20, %v8693_v33  ;;  %v12881_v42 = vand.u32 2147483647, %v12880_v14  ;;  %v12889_v20 = vld [vmem:[#allocation441_spill] sm:$0xff]  ;;  %v12890_v33 = vld [vmem:[#allocation442_spill] sm:$0xff] }
 0x355   : >> { %12857 = vst [vmem:[#allocation314_spill] sm:$0xff] %v9497_v4  ;;  %12869 = vst [vmem:[#allocation88_spill] sm:$0xff] %v9521_v21  ;;  %v9537_v18 = vadd.f32 %v12875_v47, %v12874_v58  ;;  %v9545_v3 = vadd.f32 %v12878_v24, %v12877_v51  ;;  %v12885_v2 = vsel %vm8703_vm6, %v8701_v16, %v8698_v32  ;;  %v12896_v8 = vld [vmem:[#allocation205_spill] sm:$0xff]  ;;  %v12899_v50 = vld [vmem:[#allocation230_spill] sm:$0xff]  ;;  %v12904_v51 = vand.u32 2147483647, %v12903_v41 }
 0x356   : >> { %12865 = vst [vmem:[#allocation322_spill] sm:$0xff] %v9513_v46  ;;  %12873 = vst [vmem:[#allocation318_spill] sm:$0xff] %v9529_v61  ;;  %vm9549_vm11 = vcmp.lt.f32.partialorder %v12881_v42, 0.0004427343  ;;  %v9559_v49 = vadd.f32 %v12885_v2, %v12884_v56  ;;  %v12891_v26 = vsel %vm8720_vm10, %v12889_v20, %v12890_v33  ;;  %v12894_v57 = vsel %vm8731_vm1, %v8729_v36, %v8775_v9  ;;  %v12897_v32 = vld [vmem:[#allocation137_spill] sm:$0xff]  ;;  %v12900_v15 = vld [vmem:[#allocation286_spill] sm:$0xff] }
 0x357   : >> { %12876 = vst [vmem:[#allocation307_spill] sm:$0xff] %v9537_v18  ;;  %12879 = vst [vmem:[#allocation324_spill] sm:$0xff] %v9545_v3  ;;  %v9567_v6 = vadd.f32 %v12891_v26, %v12887_v48  ;;  %v9575_v53 = vadd.f32 %v12894_v57, %v12893_v7  ;;  %v2688_v16 = vadd.f32 %v12897_v32, %v12896_v8  ;;  %v12898_v27 = vld [vmem:[#allocation181_spill] sm:$0xff]  ;;  %v1473_v54 = vmul.f32 0.6931472, %v12900_v15  ;;  %v12907_v9 = vld [vmem:[#allocation248_spill] sm:$0xff] }
 0x358   : >> { %12886 = vst [vmem:[#allocation22_spill] sm:$0xff] %v9559_v49  ;;  %v1461_v25 = vsel %vm9199_vm5, %v12899_v50, %v12898_v27  ;;  %v12901_v22 = vld [vmem:[#allocation141_spill] sm:$0xff]  ;;  %vm9588_vm6 = vcmp.lt.f32.partialorder %v12904_v51, 0.0004427343  ;;  %3491 = vlog2.f32 %v12907_v9  ;;  %v12908_v14 = vld [vmem:[#allocation63_spill] sm:$0xff]  ;;  %v12912_v56 = vld [vmem:[#allocation292_spill] sm:$0xff] }
 0x359   : >> { %12892 = vst [vmem:[#allocation319_spill] sm:$0xff] %v9567_v6  ;;  %12895 = vst [vmem:[#allocation186_spill] sm:$0xff] %v9575_v53  ;;  %v12902_v58 = vld [vmem:[#allocation69_spill] sm:$0xff]  ;;  %v12909_v42 = vld [vmem:[#allocation283_spill] sm:$0xff] }
 0x35a   : >> { %v1579_v47 = vadd.f32 1.0, %v12902_v58  ;;  %v1582_v24 = vmul.f32 -0.5, %v12902_v58  ;;  %vm12910_vm1 = vnez %v12909_v42  ;;  %v12911_v34 = vld [vmem:[#allocation227_spill] sm:$0xff]  ;;  %v12914_v13 = vld [vmem:[#allocation288_spill] sm:$0xff]  ;;  %v12915_v33 = vld [vmem:[#allocation294_spill] sm:$0xff] }
 0x35b   : >> { %v12913_v2 = vsel %vm12910_vm1, %v12911_v34, %v12912_v56  ;;  %v2689_v20 = vadd.f32 %v2688_v16, %v12914_v13  ;;  %v12916_v26 = vld [vmem:[#allocation233_spill] sm:$0xff]  ;;  %v12917_v57 = vld [vmem:[#allocation287_spill] sm:$0xff]  ;;  %v12918_v32 = vld [vmem:[#allocation262_spill] sm:$0xff] }
 0x35c   : >> { %v2564_v48 = vadd.f32 %v12913_v2, %v12908_v14  ;;  %v1470_v7 = vsel %vm9269_vm14, %v12916_v26, %v12915_v33  ;;  %v1482_v8 = vmul.f32 0.6931472, %v12917_v57  ;;  %v12919_v27 = vld [vmem:[#allocation67_spill] sm:$0xff]  ;;  %v12920_v15 = vld [vmem:[#allocation264_spill] sm:$0xff]  ;;  %v12925_v16 = vld [vmem:[#allocation253_spill] sm:$0xff] }
 0x35d   : >> { %v9608_v50 = vmul.f32 %v12919_v27, %v12918_v32  ;;  %v1574_v41 = vadd.f32 1.0, %v12920_v15  ;;  %v12921_v51 = vld [vmem:[#allocation216_spill] sm:$0xff]  ;;  %3493 = vlog2.f32 %v12925_v16  ;;  %v12926_v45 = vld [vmem:[#allocation139_spill] sm:$0xff]  ;;  %v12927_v56 = vld [vmem:[#allocation62_spill] sm:$0xff]  ;;  %v12964_v37 = vand.u32 2147483647, %v12919_v27 }
 0x35e   : >> { %v12922_v9 = vand.u32 2147483647, %v12921_v51  ;;  %v2565_v34 = vadd.f32 %v1461_v25, %v12926_v45  ;;  %v2690_v2 = vadd.f32 %v2689_v20, %v12927_v56  ;;  %v12928_v13 = vld [vmem:[#allocation235_spill] sm:$0xff]  ;;  %v12930_v32 = vld [vmem:[#allocation142_spill] sm:$0xff]  ;;  %v12935_v14 = vld [vmem:[#allocation256_spill] sm:$0xff]  ;;  %v1583_v25 = vadd.f32 1.0, %v1582_v24 }
 0x35f   : >> { %v1479_v33 = vsel %vm9339_vm7, %v12928_v13, %v1473_v54  ;;  %v12929_v26 = vld [vmem:[#allocation175_spill] sm:$0xff]  ;;  %v1588_v15 = vadd.f32 1.0, %v12930_v32  ;;  %v1591_v51 = vmul.f32 -0.5, %v12930_v32  ;;  %3495 = vlog2.f32 %v12935_v14  ;;  %v12936_v20 = vld [vmem:[#allocation64_spill] sm:$0xff]  ;;  %v12937_v30 = vld [vmem:[#allocation238_spill] sm:$0xff] }
 0x360   : >> { %vm9613_vm8 = vcmp.lt.f32.partialorder %v12922_v9, 0.0004427343  ;;  %v1491_v57 = vmul.f32 0.6931472, %v12929_v26  ;;  %v12931_v9 = vld [vmem:[#allocation217_spill] sm:$0xff]  ;;  %v2566_v45 = vadd.f32 %v1470_v7, %v12936_v20  ;;  %v2691_v56 = vadd.f32 %v2690_v2, %v2564_v48  ;;  %v12938_v13 = vld [vmem:[#allocation290_spill] sm:$0xff] }
 0x361   : >> { %v12932_v12 = vand.u32 2147483647, %v12931_v9  ;;  %v1488_v54 = vsel %vm9409_vm4, %v12937_v30, %v1482_v8  ;;  %v1500_v26 = vmul.f32 0.6931472, %v12938_v13  ;;  %v9640_v53 = vmul.f32 %v12901_v22, %v1574_v41  ;;  %v12939_v9 = vld [vmem:[#allocation65_spill] sm:$0xff]  ;;  %v12943_v24 = vld [vmem:[#allocation259_spill] sm:$0xff] }
 0x362   : >> { %v12940_v6 = vand.u32 2147483647, %v12939_v9  ;;  %3497 = vlog2.f32 %v12943_v24  ;;  %v12944_v48 = vld [vmem:[#allocation70_spill] sm:$0xff]  ;;  %v12945_v14 = vld [vmem:[#allocation68_spill] sm:$0xff]  ;;  %v2692_v8 = vadd.f32 %v2691_v56, %v2565_v34  ;;  %v12946_v2 = vld [vmem:[#allocation241_spill] sm:$0xff]  ;;  %v1592_v13 = vadd.f32 1.0, %v1591_v51  ;;  %v3492_v61 = vpop.eup %3491 }
 0x363   : >> { %vm9629_vm10 = vcmp.lt.f32.partialorder %v12932_v12, 0.0004427343  ;;  %v1594_v12 = vand.u32 2147483647, %v12930_v32  ;;  %v1600_v7 = vmul.f32 -0.5, %v12944_v48  ;;  %v2567_v63 = vadd.f32 %v1479_v33, %v12945_v14  ;;  %v12947_v20 = vld [vmem:[#allocation177_spill] sm:$0xff] }
 0x364   : >> { %vm9645_vm0 = vcmp.lt.f32.partialorder %v12940_v6, 0.0004427343  ;;  %v1497_v41 = vsel %vm9479_vm9, %v12946_v2, %v1491_v57  ;;  %v1509_v30 = vmul.f32 0.6931472, %v12947_v20  ;;  %v1597_v9 = vadd.f32 1.0, %v12944_v48  ;;  %v12948_v6 = vld [vmem:[#allocation66_spill] sm:$0xff] }
 0x365   : >> { %v12949_v3 = vand.u32 2147483647, %v12948_v6  ;;  %v12952_v24 = vld [vmem:[#allocation260_spill] sm:$0xff]  ;;  %v9665_v33 = vmul.f32 %v12902_v58, %v1583_v25  ;;  %v2693_v0 = vadd.f32 %v2692_v8, %v2566_v45  ;;  %v12955_v14 = vld [vmem:[#allocation178_spill] sm:$0xff]  ;;  %v1603_v20 = vand.u32 2147483647, %v12944_v48 }
 0x366   : >> { %3499 = vlog2.f32 %v12952_v24  ;;  %v12953_v34 = vld [vmem:[#allocation12_spill] sm:$0xff]  ;;  %v1518_v2 = vmul.f32 0.6931472, %v12955_v14  ;;  %v1601_v25 = vadd.f32 1.0, %v1600_v7  ;;  %v12961_v45 = vld [vmem:[#allocation145_spill] sm:$0xff]  ;;  %v12962_v62 = vld [vmem:[#allocation246_spill] sm:$0xff]  ;;  %v9686_v14 = vmul.f32 %v12930_v32, %v1592_v13 }
 0x367   : >> { %vm9659_vm5 = vcmp.lt.f32.partialorder %v12949_v3, 0.0004427343  ;;  %v2568_v56 = vadd.f32 %v1488_v54, %v12953_v34  ;;  %v12954_v57 = vld [vmem:[#allocation244_spill] sm:$0xff]  ;;  %3501 = vlog2.f32 %v1579_v47  ;;  %v2569_v54 = vadd.f32 %v1497_v41, %v12961_v45  ;;  %v12963_v34 = vld [vmem:[#allocation293_spill] sm:$0xff]  ;;  %v12980_v16 = vld [vmem:[#allocation255_spill] sm:$0xff] }
 0x368   : >> { %v1506_v51 = vsel %vm9549_vm11, %v12954_v57, %v1500_v26  ;;  %v12956_v3 = vld [vmem:[#allocation72_spill] sm:$0xff]  ;;  %v2694_v8 = vadd.f32 %v2693_v0, %v2567_v63  ;;  %v1515_v26 = vsel %vm9588_vm6, %v12962_v62, %v1509_v30  ;;  %v1527_v57 = vmul.f32 0.6931472, %v12963_v34  ;;  %v12967_v63 = vld [vmem:[#allocation125_spill] sm:$0xff]  ;;  %v12968_v30 = vld [vmem:[#allocation250_spill] sm:$0xff] }
 0x369   : >> { %v1609_v6 = vmul.f32 -0.5, %v12956_v3  ;;  %v12957_v21 = vld [vmem:[#allocation140_spill] sm:$0xff]  ;;  %vm9691_vm7 = vcmp.lt.f32.partialorder %v12964_v37, 0.0004427343  ;;  %3503 = vlog2.f32 %v1588_v15  ;;  %v1612_v7 = vand.u32 2147483647, %v12956_v3 }
 0x36a   : >> { %v12958_v46 = vand.u32 2147483647, %v12957_v21  ;;  %v1606_v21 = vadd.f32 1.0, %v12956_v3  ;;  %v2570_v36 = vadd.f32 %v1506_v51, %v12967_v63  ;;  %v2695_v41 = vadd.f32 %v2694_v8, %v2568_v56  ;;  %v12969_v45 = vld [vmem:[#allocation73_spill] sm:$0xff]  ;;  %v12973_v56 = vld [vmem:[#allocation146_spill] sm:$0xff]  ;;  %v12974_v42 = vld [vmem:[#allocation252_spill] sm:$0xff] }
 0x36b   : >> { %v1524_v32 = vsel %vm9613_vm8, %v12968_v30, %v1518_v2  ;;  %v1536_v13 = vmul.f32 0.6931472, %v3492_v61  ;;  %v1610_v0 = vadd.f32 1.0, %v1609_v6  ;;  %v1615_v62 = vadd.f32 1.0, %v12969_v45  ;;  %v12989_v4 = vld [vmem:[#allocation155_spill] sm:$0xff] }
 0x36c   : >> { %vm9676_vm14 = vcmp.lt.f32.partialorder %v12958_v46, 0.0004427343  ;;  %v3494_v46 = vpop.eup %3493  ;;  %v12970_v37 = vand.u32 2147483647, %v12901_v22  ;;  %3505 = vlog2.f32 %v1597_v9  ;;  %v9708_v15 = vmul.f32 %v12944_v48, %v1601_v25  ;;  %v12978_v48 = vld [vmem:[#allocation74_spill] sm:$0xff] }
 0x36d   : >> { %v3496_v34 = vpop.eup %3495  ;;  %v2571_v51 = vadd.f32 %v1515_v26, %v12973_v56  ;;  %v2696_v8 = vadd.f32 %v2695_v41, %v2569_v54  ;;  %v1533_v61 = vsel %vm9629_vm10, %v12974_v42, %v1527_v57  ;;  %v1545_v2 = vmul.f32 0.6931472, %v3494_v46  ;;  %v12979_v54 = vld [vmem:[#allocation149_spill] sm:$0xff] }
 0x36e   : >> { %vm9703_vm4 = vcmp.lt.f32.partialorder %v12970_v37, 0.0004427343  ;;  %v1618_v6 = vmul.f32 -0.5, %v12969_v45  ;;  %v1621_v22 = vand.u32 2147483647, %v12969_v45  ;;  %v3498_v63 = vpop.eup %3497  ;;  %3507 = vlog2.f32 %v1606_v21  ;;  %v12983_v21 = vld [vmem:[#allocation80_spill] sm:$0xff] }
 0x36f   : >> { %v12975_v30 = vand.u32 2147483647, %v12902_v58  ;;  %v1624_v25 = vadd.f32 1.0, %v12978_v48  ;;  %v2572_v26 = vadd.f32 %v1524_v32, %v12979_v54  ;;  %v2697_v41 = vadd.f32 %v2696_v8, %v2570_v36  ;;  %v12984_v32 = vld [vmem:[#allocation152_spill] sm:$0xff]  ;;  %v12985_v54 = vld [vmem:[#allocation258_spill] sm:$0xff] }
 0x370   : >> { %v1542_v57 = vsel %vm9645_vm0, %v12980_v16, %v1536_v13  ;;  %v1554_v46 = vmul.f32 0.6931472, %v3496_v34  ;;  %v9728_v37 = vmul.f32 %v12956_v3, %v1610_v0  ;;  %v1627_v58 = vmul.f32 -0.5, %v12978_v48  ;;  %v3500_v56 = vpop.eup %3499 }
 0x371   : >> { %vm9718_vm9 = vcmp.lt.f32.partialorder %v12975_v30, 0.0004427343  ;;  %vm9731_vm12 = vcmp.lt.f32.partialorder %v1594_v12, 0.0004427343  ;;  %3509 = vlog2.f32 %v1615_v62  ;;  %v1633_v30 = vadd.f32 1.0, %v12983_v21  ;;  %v3502_v34 = vpop.eup %3501  ;;  %v12988_v62 = vld [vmem:[#allocation143_spill] sm:$0xff] }
 0x372   : >> { %v2573_v36 = vadd.f32 %v1533_v61, %v12984_v32  ;;  %v2698_v8 = vadd.f32 %v2697_v41, %v2571_v51  ;;  %v1551_v49 = vsel %vm9659_vm5, %v12985_v54, %v1545_v2  ;;  %v1563_v13 = vmul.f32 0.6931472, %v3498_v63  ;;  %v12990_v51 = vld [vmem:[#allocation261_spill] sm:$0xff]  ;;  %v12994_v54 = vld [vmem:[#allocation158_spill] sm:$0xff] }
 0x373   : >> { %v1619_v3 = vadd.f32 1.0, %v1618_v6  ;;  %v1630_v0 = vand.u32 2147483647, %v12978_v48  ;;  %vm9741_vm15 = vcmp.lt.f32.partialorder %v1603_v20, 0.0004427343  ;;  %3511 = vlog2.f32 %v1624_v25  ;;  %v3504_v41 = vpop.eup %3503  ;;  %v12993_v25 = vld [vmem:[#allocation83_spill] sm:$0xff] }
 0x374   : >> { %v1642_v16 = vadd.f32 1.0, %v12988_v62  ;;  %v2574_v1 = vadd.f32 %v1542_v57, %v12989_v4  ;;  %v2699_v61 = vadd.f32 %v2698_v8, %v2572_v26  ;;  %v1560_v18 = vsel %vm9676_vm14, %v12990_v51, %v1554_v46  ;;  %v12998_v8 = vld [vmem:[#allocation161_spill] sm:$0xff] }
 0x375   : >> { %v1572_v2 = vmul.f32 0.6931472, %v3500_v56  ;;  %v1628_v63 = vadd.f32 1.0, %v1627_v58  ;;  %v1636_v6 = vmul.f32 -0.5, %v12983_v21  ;;  %vm9751_vm3 = vcmp.lt.f32.partialorder %v1612_v7, 0.0004427343 }
 0x376   : >> { %3513 = vlog2.f32 %v1633_v30  ;;  %v1651_v32 = vadd.f32 1.0, %v12993_v25  ;;  %v2575_v39 = vadd.f32 %v1551_v49, %v12994_v54  ;;  %v2700_v4 = vadd.f32 %v2699_v61, %v2573_v36  ;;  %v3506_v7 = vpop.eup %3505  ;;  %v12997_v56 = vld [vmem:[#allocation90_spill] sm:$0xff]  ;;  %v13002_v61 = vld [vmem:[#allocation164_spill] sm:$0xff] }
 0x377   : >> { %v1569_v24 = vsel %vm9691_vm7, %v9608_v50, %v1563_v13  ;;  %v1581_v26 = vmul.f32 0.6931472, %v3502_v34  ;;  %v9761_v57 = vmul.f32 %v12969_v45, %v1619_v3  ;;  %v1639_v46 = vand.u32 2147483647, %v12983_v21  ;;  %v13001_v34 = vld [vmem:[#allocation13_spill] sm:$0xff] }
 0x378   : >> { %vm9764_vm13 = vcmp.lt.f32.partialorder %v1621_v22, 0.0004427343  ;;  %3515 = vlog2.f32 %v1642_v16  ;;  %v1660_v30 = vadd.f32 1.0, %v12997_v56  ;;  %v2576_v36 = vadd.f32 %v1560_v18, %v12998_v8  ;;  %v3508_v3 = vpop.eup %3507 }
 0x379   : >> { %v2701_v49 = vadd.f32 %v2700_v4, %v2574_v1  ;;  %v1578_v50 = vsel %vm9703_vm4, %v9640_v53, %v1572_v2  ;;  %v1590_v47 = vmul.f32 0.6931472, %v3504_v41  ;;  %v9774_v45 = vmul.f32 %v12978_v48, %v1628_v63  ;;  %v13005_v63 = vld [vmem:[#allocation98_spill] sm:$0xff]  ;;  %v13006_v41 = vld [vmem:[#allocation167_spill] sm:$0xff] }
 0x37a   : >> { %v1637_v13 = vadd.f32 1.0, %v1636_v6  ;;  %vm9776_vm2 = vcmp.lt.f32.partialorder %v1630_v0, 0.0004427343  ;;  %3517 = vlog2.f32 %v1651_v32  ;;  %v1669_v16 = vadd.f32 1.0, %v13001_v34 }
 0x37b   : >> { %v2577_v51 = vadd.f32 %v1569_v24, %v13002_v61  ;;  %v2702_v1 = vadd.f32 %v2701_v49, %v2575_v39  ;;  %v1587_v53 = vsel %vm9718_vm9, %v9665_v33, %v1581_v26  ;;  %v1599_v27 = vmul.f32 0.6931472, %v3506_v7  ;;  %v3510_v2 = vpop.eup %3509  ;;  %v13007_v26 = vld [vmem:[#allocation104_spill] sm:$0xff]  ;;  %v13008_v7 = vld [vmem:[#allocation170_spill] sm:$0xff] }
 0x37c   : >> { %v1645_v48 = vmul.f32 -0.5, %v12988_v62  ;;  %v1648_v18 = vand.u32 2147483647, %v12988_v62  ;;  %vm9787_vm11 = vcmp.lt.f32.partialorder %v1639_v46, 0.0004427343  ;;  %3519 = vlog2.f32 %v1660_v30 }
 0x37d   : >> { %v1678_v6 = vadd.f32 1.0, %v13005_v63  ;;  %v2578_v32 = vadd.f32 %v1578_v50, %v13006_v41  ;;  %v2703_v39 = vadd.f32 %v2702_v1, %v2576_v36  ;;  %v1596_v33 = vsel %vm9731_vm12, %v9686_v14, %v1590_v47  ;;  %v3512_v24 = vpop.eup %3511 }
 0x37e   : >> { %v1608_v9 = vmul.f32 0.6931472, %v3508_v3  ;;  %v1638_v54 = vmul.f32 %v12983_v21, %v1637_v13  ;;  %v1654_v4 = vmul.f32 -0.5, %v12993_v25  ;;  %3521 = vlog2.f32 %v1669_v16  ;;  %v13009_v21 = vld [vmem:[#allocation108_spill] sm:$0xff]  ;;  %v13010_v13 = vld [vmem:[#allocation174_spill] sm:$0xff] }
 0x37f   : >> { %v1687_v46 = vadd.f32 1.0, %v13007_v26  ;;  %v2579_v30 = vadd.f32 %v1587_v53, %v13008_v7  ;;  %v2704_v8 = vadd.f32 %v2703_v39, %v2577_v51  ;;  %v1605_v36 = vsel %vm9741_vm15, %v9708_v15, %v1599_v27  ;;  %v13013_v27 = vld [vmem:[#allocation176_spill] sm:$0xff] }
 0x380   : >> { %v1617_v49 = vmul.f32 0.6931472, %v3510_v2  ;;  %v1646_v50 = vadd.f32 1.0, %v1645_v48  ;;  %v1663_v14 = vmul.f32 -0.5, %v12997_v56  ;;  %v3514_v42 = vpop.eup %3513  ;;  %3523 = vlog2.f32 %v1678_v6  ;;  %v13014_v39 = vld [vmem:[#allocation180_spill] sm:$0xff] }
 0x381   : >> { %v1696_v47 = vadd.f32 1.0, %v13009_v21  ;;  %v2580_v3 = vadd.f32 %v1596_v33, %v13010_v13  ;;  %v2705_v16 = vadd.f32 %v2704_v8, %v2578_v32  ;;  %v1614_v61 = vsel %vm9751_vm3, %v9728_v37, %v1608_v9  ;;  %v13018_v13 = vld [vmem:[#allocation185_spill] sm:$0xff] }
 0x382   : >> { %v1626_v51 = vmul.f32 0.6931472, %v3512_v24  ;;  %vm9809_vm6 = vcmp.lt.f32.partialorder %v1648_v18, 0.0004427343  ;;  %v1657_v15 = vand.u32 2147483647, %v12993_v25  ;;  %v3516_v12 = vpop.eup %3515  ;;  %3525 = vlog2.f32 %v1687_v46 }
 0x383   : >> { %v1655_v53 = vadd.f32 1.0, %v1654_v4  ;;  %v2581_v48 = vadd.f32 %v1605_v36, %v13013_v27  ;;  %v2706_v2 = vadd.f32 %v2705_v16, %v2579_v30  ;;  %v1623_v6 = vsel %vm9764_vm13, %v9761_v57, %v1617_v49  ;;  %v13017_v30 = vld [vmem:[#allocation183_spill] sm:$0xff] }
 0x384   : >> { %v1635_v41 = vmul.f32 0.6931472, %v3514_v42  ;;  %v1647_v37 = vmul.f32 %v12988_v62, %v1646_v50  ;;  %v1672_v20 = vmul.f32 -0.5, %v13001_v34  ;;  %v3518_v18 = vpop.eup %3517  ;;  %v1664_v32 = vadd.f32 1.0, %v1663_v14 }
 0x385   : >> { %3527 = vlog2.f32 %v1696_v47  ;;  %v2582_v33 = vadd.f32 %v1614_v61, %v13014_v39  ;;  %v2707_v9 = vadd.f32 %v2706_v2, %v2580_v3  ;;  %v1632_v4 = vsel %vm9776_vm2, %v9774_v45, %v1626_v51 }
 0x386   : >> { %v1644_v24 = vmul.f32 0.6931472, %v3516_v12  ;;  %vm9824_vm1 = vcmp.lt.f32.partialorder %v1657_v15, 0.0004427343  ;;  %v1681_v57 = vmul.f32 -0.5, %v13005_v63  ;;  %v3520_v62 = vpop.eup %3519  ;;  %v1656_v58 = vmul.f32 %v12993_v25, %v1655_v53  ;;  %v13021_v12 = vld [vmem:[#allocation187_spill] sm:$0xff] }
 0x387   : >> { %v1666_v7 = vand.u32 2147483647, %v12997_v56  ;;  %v2583_v8 = vadd.f32 %v1623_v6, %v13017_v30  ;;  %v2708_v36 = vadd.f32 %v2707_v9, %v2581_v48  ;;  %v1641_v49 = vsel %vm9787_vm11, %v1638_v54, %v1635_v41 }
 0x388   : >> { %v1653_v22 = vmul.f32 0.6931472, %v3518_v18  ;;  %v1673_v45 = vadd.f32 1.0, %v1672_v20  ;;  %v1690_v50 = vmul.f32 -0.5, %v13007_v26  ;;  %v3522_v14 = vpop.eup %3521  ;;  %v1665_v42 = vmul.f32 %v12997_v56, %v1664_v32  ;;  %v13024_v32 = vld [vmem:[#allocation190_spill] sm:$0xff] }
 0x389   : >> { %v1675_v47 = vand.u32 2147483647, %v13001_v34  ;;  %v2584_v3 = vadd.f32 %v1632_v4, %v13018_v13  ;;  %v2709_v25 = vadd.f32 %v2708_v36, %v2582_v33  ;;  %v1650_v16 = vsel %vm9809_vm6, %v1647_v37, %v1644_v24  ;;  %v416_v37 = vld [vmem:[%s4260_s12 + $0x100] sm:$0xff] }
 0x38a   : >> { %v1662_v61 = vmul.f32 0.6931472, %v3520_v62  ;;  %v1682_v51 = vadd.f32 1.0, %v1681_v57  ;;  %v1699_v0 = vmul.f32 -0.5, %v13009_v21  ;;  %v3524_v54 = vpop.eup %3523  ;;  %vm9841_vm8 = vcmp.lt.f32.partialorder %v1666_v7, 0.0004427343 }
 0x38b   : >> { %v1684_v56 = vand.u32 2147483647, %v13005_v63  ;;  %v2585_v53 = vadd.f32 %v1641_v49, %v13021_v12  ;;  %v2710_v27 = vadd.f32 %v2709_v25, %v2583_v8  ;;  %v1659_v48 = vsel %vm9824_vm1, %v1656_v58, %v1653_v22  ;;  %v13027_v58 = vld [vmem:[#allocation192_spill] sm:$0xff]  ;;  %v3624_v8 = vld [vmem:[%s3976_s20 + $0x100] sm:$0xff] }
 0x38c   : >> { %v1671_v2 = vmul.f32 0.6931472, %v3522_v14  ;;  %v1674_v1 = vmul.f32 %v13001_v34, %v1673_v45  ;;  %v1691_v6 = vadd.f32 1.0, %v1690_v50  ;;  %v3526_v41 = vpop.eup %3525  ;;  %vm9851_vm10 = vcmp.lt.f32.partialorder %v1675_v47, 0.0004427343  ;;  %v13029_v50 = vld [vmem:[#allocation135_spill] sm:$0xff] }
 0x38d   : >> { %v1693_v18 = vand.u32 2147483647, %v13007_v26  ;;  %v2586_v39 = vadd.f32 %v1650_v16, %v13024_v32  ;;  %v2711_v33 = vadd.f32 %v2710_v27, %v2584_v3  ;;  %v1668_v9 = vsel %vm9841_vm8, %v1665_v42, %v1662_v61  ;;  %v13031_v47 = vld [vmem:[#allocation134_spill] sm:$0xff]  ;;  %v13036_v27 = vld [vmem:[#allocation136_spill] sm:$0xff] }
 0x38e   : >> { %v1680_v4 = vmul.f32 0.6931472, %v3524_v54  ;;  %v1683_v24 = vmul.f32 %v13005_v63, %v1682_v51  ;;  %v1700_v34 = vadd.f32 1.0, %v1699_v0  ;;  %vm9860_vm0 = vcmp.lt.f32.partialorder %v1684_v56, 0.0004427343  ;;  %v13028_v63 = vld [vmem:[#allocation75_spill] sm:$0xff] }
 0x38f   : >> { %v3528_v46 = vpop.eup %3527  ;;  %v1702_v62 = vand.u32 2147483647, %v13009_v21  ;;  %v2587_v7 = vadd.f32 %v1659_v48, %v13027_v58  ;;  %v2712_v30 = vadd.f32 %v2711_v33, %v2585_v53  ;;  %v672_v36 = vmul.f32 %v3624_v8, %v416_v37  ;;  %v13032_v51 = vld [vmem:[#allocation95_spill] sm:$0xff]  ;;  %v13033_v0 = vld [vmem:[#allocation60_spill] sm:$0xff]  ;;  %v13039_v57 = vld [vmem:[#allocation222_spill] sm:$0xff] }
 0x390   : >> { %v1677_v49 = vsel %vm9851_vm10, %v1674_v1, %v1671_v2  ;;  %v1689_v22 = vmul.f32 0.6931472, %v3526_v41  ;;  %v1692_v45 = vmul.f32 %v13007_v26, %v1691_v6  ;;  %v13030_v14 = vmax.f32 %v13029_v50, 0.0  ;;  %v13035_v26 = vld [vmem:[#allocation59_spill] sm:$0xff]  ;;  %v13038_v33 = vld [vmem:[#allocation172_spill] sm:$0xff]  ;;  %v13043_v50 = vld [vmem:[#allocation225_spill] sm:$0xff] }
 0x391   : >> { %vm1694_vm5 = vcmp.lt.f32.partialorder %v1693_v18, 0.0004427343  ;;  %v2588_v13 = vadd.f32 %v1668_v9, %v13031_v47  ;;  %v2713_v3 = vadd.f32 %v2712_v30, %v2586_v39  ;;  %v1686_v25 = vsel %vm9860_vm0, %v1683_v24, %v1680_v4  ;;  %v13046_v47 = vld [vmem:[#allocation266_spill] sm:$0xff] }
 0x392   : >> { %v798_v42 = vsub.f32 %v13030_v14, %v13028_v63  ;;  %v1698_v16 = vmul.f32 0.6931472, %v3528_v46  ;;  %v1701_v61 = vmul.f32 %v13009_v21, %v1700_v34  ;;  %v13034_v54 = vmax.f32 %v13033_v0, 0.0  ;;  %v13042_v63 = vld [vmem:[#allocation173_spill] sm:$0xff]  ;;  %v13044_v14 = vld [vmem:[#allocation291_spill] sm:$0xff] }
 0x393   : >> { %vm1703_vm14 = vcmp.lt.f32.partialorder %v1702_v62, 0.0004427343  ;;  %v2589_v56 = vadd.f32 %v1677_v49, %v13035_v26  ;;  %v2714_v12 = vadd.f32 %v2713_v3, %v2587_v7  ;;  %v1695_v53 = vsel %vm1694_vm5, %v1692_v45, %v1689_v22  ;;  %v13040_v22 = vld [vmem:[#allocation289_spill] sm:$0xff]  ;;  %v13041_v45 = vld [vmem:[#allocation138_spill] sm:$0xff]  ;;  %v13048_v3 = vld [vmem:[#allocation11_spill] sm:$0xff] }
 0x394   : >> { %v799_v15 = vsub.f32 %v13034_v54, %v13032_v51  ;;  %v13037_v48 = vmax.f32 %v13036_v27, 0.0  ;;  %v2590_v1 = vadd.f32 %v1686_v25, %v798_v42  ;;  %v1704_v41 = vsel %vm1703_vm14, %v1701_v61, %v1698_v16  ;;  %v13045_v42 = vld [vmem:[#allocation71_spill] sm:$0xff]  ;;  %v13050_v16 = vld [vmem:[#allocation268_spill] sm:$0xff]  ;;  %v13051_v51 = vld [vmem:[#allocation182_spill] sm:$0xff] }
 0x395   : >> { %v2715_v6 = vadd.f32 %v2714_v12, %v2588_v13  ;;  %v13047_v13 = vld [vmem:[#allocation300_spill] sm:$0xff]  ;;  %v13049_v25 = vld [vmem:[#allocation179_spill] sm:$0xff]  ;;  %v13053_v26 = vld [vmem:[#allocation269_spill] sm:$0xff] }
 0x396   : >> { %v800_v2 = vsub.f32 %v13037_v48, %v672_v36  ;;  %v2591_v37 = vadd.f32 %v1695_v53, %v799_v15  ;;  %v13052_v54 = vld [vmem:[#allocation76_spill] sm:$0xff]  ;;  %v13055_v27 = vld [vmem:[#allocation77_spill] sm:$0xff] }
 0x397   : >> { %v2716_v20 = vadd.f32 %v2715_v6, %v2589_v56  ;;  %v13054_v12 = vld [vmem:[#allocation308_spill] sm:$0xff]  ;;  %v13057_v6 = vld [vmem:[#allocation271_spill] sm:$0xff] }
 0x398   : >> { %v2592_v18 = vadd.f32 %v1704_v41, %v800_v2  ;;  %v13056_v2 = vld [vmem:[#allocation295_spill] sm:$0xff] }
 0x399   : >> { %v2717_v32 = vadd.f32 %v2716_v20, %v2590_v1 }
 0x39b   : >> { %v2718_v21 = vadd.f32 %v2717_v32, %v2591_v37  ;;  %v13058_v37 = vld [vmem:[#allocation309_spill] sm:$0xff] }
 0x39d   : >> { %v2719_v39 = vadd.f32 %v2718_v21, %v2592_v18  ;;  %v13059_v18 = vld [vmem:[#allocation144_spill] sm:$0xff] }
 0x39e   : >> { %v13060_v21 = vld [vmem:[#allocation296_spill] sm:$0xff] }
 0x39f   : >> { %v2720_v9 = vadd.f32 %v2719_v39, %v13038_v33  ;;  %v13061_v33 = vld [vmem:[#allocation78_spill] sm:$0xff] }
 0x3a1   : >> { %v2721_v4 = vadd.f32 %v2720_v9, %v8791_v23 }
 0x3a3   : >> { %v2722_v24 = vadd.f32 %v2721_v4, %v8799_v17  ;;  %v13062_v4 = vld [vmem:[#allocation297_spill] sm:$0xff] }
 0x3a5   : >> { %v2723_v34 = vadd.f32 %v2722_v24, %v8807_v11 }
 0x3a7   : >> { %v2724_v46 = vadd.f32 %v2723_v34, %v8815_v5  ;;  %v13063_v34 = vld [vmem:[#allocation310_spill] sm:$0xff] }
 0x3a9   : >> { %v2725_v62 = vadd.f32 %v2724_v46, %v13039_v57  ;;  %v13064_v57 = vld [vmem:[#allocation14_spill] sm:$0xff] }
 0x3ab   : >> { %v2726_v58 = vadd.f32 %v2725_v62, %v8835_v10 }
 0x3ad   : >> { %v2727_v7 = vadd.f32 %v2726_v58, %v8843_v38  ;;  %v13065_v58 = vld [vmem:[#allocation298_spill] sm:$0xff] }
 0x3af   : >> { %v2728_v30 = vadd.f32 %v2727_v7, %v8851_v44 }
 0x3b1   : >> { %v2729_v8 = vadd.f32 %v2728_v30, %v8859_v19  ;;  %v13066_v30 = vld [vmem:[#allocation276_spill] sm:$0xff] }
 0x3b3   : >> { %v2730_v36 = vadd.f32 %v2729_v8, %v8867_v29 }
 0x3b5   : >> { %v2731_v23 = vadd.f32 %v2730_v36, %v8875_v52  ;;  %v13067_v36 = vld [vmem:[#allocation311_spill] sm:$0xff] }
 0x3b7   : >> { %v2732_v17 = vadd.f32 %v2731_v23, %v8883_v55 }
 0x3b9   : >> { %v2733_v11 = vadd.f32 %v2732_v17, %v8891_v28  ;;  %v13068_v17 = vld [vmem:[#allocation79_spill] sm:$0xff] }
 0x3bb   : >> { %v2734_v5 = vadd.f32 %v2733_v11, %v8899_v60 }
 0x3bd   : >> { %v2735_v49 = vadd.f32 %v2734_v5, %v8907_v31  ;;  %v13069_v5 = vld [vmem:[#allocation301_spill] sm:$0xff] }
 0x3bf   : >> { %v2736_v10 = vadd.f32 %v2735_v49, %v8915_v35 }
 0x3c1   : >> { %v2737_v38 = vadd.f32 %v2736_v10, %v13040_v22  ;;  %v13070_v10 = vld [vmem:[#allocation313_spill] sm:$0xff] }
 0x3c3   : >> { %v2738_v44 = vadd.f32 %v2737_v38, %v13041_v45  ;;  %v13071_v38 = vld [vmem:[#allocation15_spill] sm:$0xff] }
 0x3c5   : >> { %v2739_v19 = vadd.f32 %v2738_v44, %v13042_v63  ;;  %v13072_v44 = vld [vmem:[#allocation303_spill] sm:$0xff] }
 0x3c7   : >> { %v2740_v29 = vadd.f32 %v2739_v19, %v13043_v50  ;;  %v13073_v19 = vld [vmem:[#allocation279_spill] sm:$0xff] }
 0x3c9   : >> { %v2741_v52 = vadd.f32 %v2740_v29, %v13044_v14  ;;  %v13074_v29 = vld [vmem:[#allocation184_spill] sm:$0xff] }
 0x3cb   : >> { %v2742_v55 = vadd.f32 %v2741_v52, %v13045_v42  ;;  %v13075_v52 = vld [vmem:[#allocation81_spill] sm:$0xff] }
 0x3cd   : >> { %v2743_v28 = vadd.f32 %v2742_v55, %v13046_v47  ;;  %v13076_v55 = vld [vmem:[#allocation305_spill] sm:$0xff] }
 0x3cf   : >> { %v2744_v60 = vadd.f32 %v2743_v28, %v13047_v13  ;;  %v13077_v28 = vld [vmem:[#allocation16_spill] sm:$0xff] }
 0x3d1   : >> { %v2745_v31 = vadd.f32 %v2744_v60, %v13048_v3  ;;  %v13078_v60 = vld [vmem:[#allocation306_spill] sm:$0xff] }
 0x3d3   : >> { %v2746_v35 = vadd.f32 %v2745_v31, %v13049_v25  ;;  %v13079_v31 = vld [vmem:[#allocation281_spill] sm:$0xff] }
 0x3d5   : >> { %v2747_v61 = vadd.f32 %v2746_v35, %v13050_v16  ;;  %v13080_v35 = vld [vmem:[#allocation273_spill] sm:$0xff] }
 0x3d7   : >> { %v2748_v0 = vadd.f32 %v2747_v61, %v13051_v51  ;;  %v13081_v61 = vld [vmem:[#allocation82_spill] sm:$0xff] }
 0x3d9   : >> { %v2749_v15 = vadd.f32 %v2748_v0, %v13052_v54  ;;  %v13082_v0 = vld [vmem:[#allocation17_spill] sm:$0xff] }
 0x3db   : >> { %v2750_v56 = vadd.f32 %v2749_v15, %v13053_v26  ;;  %v13083_v15 = vld [vmem:[#allocation284_spill] sm:$0xff] }
 0x3dd   : >> { %v2751_v53 = vadd.f32 %v2750_v56, %v13054_v12  ;;  %v13084_v56 = vld [vmem:[#allocation188_spill] sm:$0xff] }
 0x3df   : >> { %v2752_v48 = vadd.f32 %v2751_v53, %v13055_v27  ;;  %v13085_v53 = vld [vmem:[#allocation84_spill] sm:$0xff] }
 0x3e1   : >> { %v2753_v1 = vadd.f32 %v2752_v48, %v13056_v2  ;;  %v13086_v48 = vld [vmem:[#allocation315_spill] sm:$0xff] }
 0x3e3   : >> { %v2754_v41 = vadd.f32 %v2753_v1, %v13057_v6  ;;  %v13087_v1 = vld [vmem:[#allocation18_spill] sm:$0xff] }
 0x3e5   : >> { %v2755_v20 = vadd.f32 %v2754_v41, %v13058_v37  ;;  %v13088_v41 = vld [vmem:[#allocation316_spill] sm:$0xff] }
 0x3e7   : >> { %v2756_v32 = vadd.f32 %v2755_v20, %v13059_v18  ;;  %v13089_v20 = vld [vmem:[#allocation85_spill] sm:$0xff] }
 0x3e9   : >> { %v2757_v39 = vadd.f32 %v2756_v32, %v13060_v21  ;;  %v13090_v32 = vld [vmem:[#allocation312_spill] sm:$0xff] }
 0x3eb   : >> { %v2758_v9 = vadd.f32 %v2757_v39, %v13061_v33  ;;  %v13091_v39 = vld [vmem:[#allocation317_spill] sm:$0xff] }
 0x3ed   : >> { %v2759_v24 = vadd.f32 %v2758_v9, %v13062_v4  ;;  %v13092_v9 = vld [vmem:[#allocation19_spill] sm:$0xff] }
 0x3ef   : >> { %v2760_v46 = vadd.f32 %v2759_v24, %v13063_v34  ;;  %v13093_v24 = vld [vmem:[#allocation280_spill] sm:$0xff] }
 0x3f1   : >> { %v2761_v62 = vadd.f32 %v2760_v46, %v13064_v57  ;;  %v13094_v46 = vld [vmem:[#allocation86_spill] sm:$0xff] }
 0x3f3   : >> { %v2762_v7 = vadd.f32 %v2761_v62, %v13065_v58  ;;  %v13095_v62 = vld [vmem:[#allocation189_spill] sm:$0xff] }
 0x3f5   : >> { %v2763_v8 = vadd.f32 %v2762_v7, %v13066_v30  ;;  %v13096_v7 = vld [vmem:[#allocation20_spill] sm:$0xff] }
 0x3f7   : >> { %v2764_v23 = vadd.f32 %v2763_v8, %v13067_v36  ;;  %v13097_v8 = vld [vmem:[#allocation274_spill] sm:$0xff] }
 0x3f9   : >> { %v2765_v11 = vadd.f32 %v2764_v23, %v13068_v17  ;;  %v13098_v23 = vld [vmem:[#allocation299_spill] sm:$0xff] }
 0x3fb   : >> { %v2766_v49 = vadd.f32 %v2765_v11, %v13069_v5  ;;  %v13099_v11 = vld [vmem:[#allocation191_spill] sm:$0xff] }
 0x3fd   : >> { %v2767_v22 = vadd.f32 %v2766_v49, %v13070_v10  ;;  %v13100_v49 = vld [vmem:[#allocation87_spill] sm:$0xff] }
 0x3ff   : >> { %v2768_v45 = vadd.f32 %v2767_v22, %v13071_v38  ;;  %v13101_v22 = vld [vmem:[#allocation278_spill] sm:$0xff] }
 0x401   : >> { %v2769_v63 = vadd.f32 %v2768_v45, %v13072_v44  ;;  %v13102_v45 = vld [vmem:[#allocation302_spill] sm:$0xff] }
 0x403   : >> { %v2770_v50 = vadd.f32 %v2769_v63, %v13073_v19 }
 0x405   : >> { %v2771_v14 = vadd.f32 %v2770_v50, %v13074_v29  ;;  %v13103_v29 = vld [vmem:[#allocation321_spill] sm:$0xff] }
 0x407   : >> { %v2772_v42 = vadd.f32 %v2771_v14, %v13075_v52  ;;  %v13104_v52 = vld [vmem:[#allocation21_spill] sm:$0xff] }
 0x409   : >> { %v2773_v47 = vadd.f32 %v2772_v42, %v13076_v55  ;;  %v13105_v55 = vld [vmem:[#allocation314_spill] sm:$0xff] }
 0x40b   : >> { %v2774_v13 = vadd.f32 %v2773_v47, %v13077_v28  ;;  %v13106_v28 = vld [vmem:[#allocation304_spill] sm:$0xff] }
 0x40d   : >> { %v2775_v3 = vadd.f32 %v2774_v13, %v13078_v60  ;;  %v13107_v60 = vld [vmem:[#allocation322_spill] sm:$0xff] }
 0x40f   : >> { %v2776_v25 = vadd.f32 %v2775_v3, %v13079_v31  ;;  %v13108_v31 = vld [vmem:[#allocation88_spill] sm:$0xff] }
 0x411   : >> { %v2777_v16 = vadd.f32 %v2776_v25, %v13080_v35  ;;  %v13109_v35 = vld [vmem:[#allocation318_spill] sm:$0xff] }
 0x413   : >> { %v2778_v51 = vadd.f32 %v2777_v16, %v13081_v61  ;;  %v13110_v61 = vld [vmem:[#allocation307_spill] sm:$0xff] }
 0x415   : >> { %v2779_v54 = vadd.f32 %v2778_v51, %v13082_v0  ;;  %v13111_v51 = vld [vmem:[#allocation324_spill] sm:$0xff]  ;;  %v13112_v0 = vld [vmem:[#allocation22_spill] sm:$0xff] }
 0x417   : >> { %v2780_v26 = vadd.f32 %v2779_v54, %v13083_v15  ;;  %v13113_v54 = vld [vmem:[#allocation319_spill] sm:$0xff] }
 0x419   : >> { %v2781_v12 = vadd.f32 %v2780_v26, %v13084_v56  ;;  %v253_v26 = vld [vmem:[#allocation7] sm:$0xff] }
 0x41a   : >> { %v13114_v56 = vld [vmem:[#allocation186_spill] sm:$0xff] }
 0x41b   : >> { %v2782_v27 = vadd.f32 %v2781_v12, %v13085_v53 }
 0x41d   : >> { %v2783_v2 = vadd.f32 %v2782_v27, %v13086_v48 }
 0x41f   : >> { %v2784_v6 = vadd.f32 %v2783_v2, %v13087_v1 }
 0x421   : >> { %v2785_v37 = vadd.f32 %v2784_v6, %v13088_v41 }
 0x423   : >> { %v2786_v18 = vadd.f32 %v2785_v37, %v13089_v20 }
 0x425   : >> { %v2787_v21 = vadd.f32 %v2786_v18, %v13090_v32 }
 0x427   : >> { %v2788_v33 = vadd.f32 %v2787_v21, %v13091_v39 }
 0x429   : >> { %v2789_v4 = vadd.f32 %v2788_v33, %v13092_v9 }
 0x42b   : >> { %v2790_v34 = vadd.f32 %v2789_v4, %v13093_v24 }
 0x42d   : >> { %v2791_v57 = vadd.f32 %v2790_v34, %v13094_v46 }
 0x42f   : >> { %v2792_v58 = vadd.f32 %v2791_v57, %v13095_v62 }
 0x431   : >> { %v2793_v30 = vadd.f32 %v2792_v58, %v13096_v7 }
 0x433   : >> { %v2794_v36 = vadd.f32 %v2793_v30, %v13097_v8 }
 0x435   : >> { %v2795_v17 = vadd.f32 %v2794_v36, %v13098_v23 }
 0x437   : >> { %v2796_v5 = vadd.f32 %v2795_v17, %v13099_v11 }
 0x439   : >> { %v2797_v10 = vadd.f32 %v2796_v5, %v13100_v49 }
 0x43b   : >> { %v2798_v38 = vadd.f32 %v2797_v10, %v13101_v22 }
 0x43d   : >> { %v2799_v44 = vadd.f32 %v2798_v38, %v13102_v45 }
 0x43f   : >> { %v2800_v63 = vadd.f32 %v2799_v44, %v9451_v43 }
 0x441   : >> { %v2801_v19 = vadd.f32 %v2800_v63, %v9459_v40 }
 0x443   : >> { %v2802_v50 = vadd.f32 %v2801_v19, %v9467_v59 }
 0x445   : >> { %v2803_v14 = vadd.f32 %v2802_v50, %v13103_v29 }
 0x447   : >> { %v2804_v42 = vadd.f32 %v2803_v14, %v13104_v52 }
 0x449   : >> { %v2805_v47 = vadd.f32 %v2804_v42, %v13105_v55 }
 0x44b   : >> { %v2806_v13 = vadd.f32 %v2805_v47, %v13106_v28 }
 0x44d   : >> { %v2807_v3 = vadd.f32 %v2806_v13, %v13107_v60 }
 0x44f   : >> { %v2808_v25 = vadd.f32 %v2807_v3, %v13108_v31 }
 0x451   : >> { %v2809_v16 = vadd.f32 %v2808_v25, %v13109_v35 }
 0x453   : >> { %v2810_v43 = vadd.f32 %v2809_v16, %v13110_v61 }
 0x455   : >> { %v2811_v40 = vadd.f32 %v2810_v43, %v13111_v51 }
 0x457   : >> { %v2812_v59 = vadd.f32 %v2811_v40, %v13112_v0 }
 0x459   : >> { %v2813_v15 = vadd.f32 %v2812_v59, %v13113_v54  ;;  %250 = sbr.rel (!%p248_p13) target bundleno = 91 (0x5b), region = 92 }
 0x45b   : >> { %v2814_v12 = vadd.f32 %v2813_v15, %v13114_v56 }
 0x45d   : >> { %v2815_v53 = vadd.f32 %v2814_v12, %v253_v26 }
 0x45f   : >> { %2816 = vst [vmem:[#allocation7] sm:$0xff] %v2815_v53 }
 0x460   : > { %3698 = shalt.err (!%p3695_p9)
}
 0x461   : > { %s3699_s15 = scalar_lea.hbm %s10029_s2, 128 }
 0x462   : > { %p3700_p12 = scmp.ne.s32.totalorder %s10029_s2, %s3699_s15  ;;  %p3705_p8 = scmp.lt.u32.totalorder %s3699_s15, %s10029_s2 }
 0x464   : > { %p3701_p0 = pnand %p3700_p12, %p9983_p6 }
 0x466   : > { %p3702_p2 = pneg %p3701_p0 }
 0x468   : > { %p3707_p11 = pnand %p3705_p8, %p3702_p2 }
 0x46a   : > { %3710 = shalt.err (!%p3707_p11)
}
 0x46b   : > { %2944 = dma.vmem_to_hbm [thread:$0]  (%p9983_p6), %s2827_s19, 128, %s10029_s2, [#allocation4]  }
 0x46c   : > { %3748 = dma.done.wait (%p9983_p6), [#allocation4], 128  }
 0x46d   : > { %3750 = vsyncadd (%p9983_p6), [#allocation4], 4294967168 }
 0x46e PF: > { %s19_s14 = sadd.s32 1, %s3773_s14   ;;  %s13116_s9 = smov %s3757_s10 }
 0x46f   : > { %p16_p13 = scmp.ge.s32.totalorder %s19_s14, 10   ;;  %s13117_s10 = smov %s3761_s11 }
 0x470   : > { %s13118_s11 = smov %s3856_s24  ;;  %s13119_s12 = smov %s3769_s13 }
 0x471   : > { %s13120_s13 = smov %s13122_s16  ;;  %18 = sbr.rel (!%p16_p13) target bundleno = 7 (0x7), region = 103 }
 0x478   :  { %2839 = vsyncpa [#allocation3], 1 }
 0x479   :  { %2841 = vsyncpa [#allocation3 + $0x1], 1 }
 0x47a   :  { %2842 = vsyncpa [#allocation6], 1 }
 0x47b   :  { %2844 = vsyncpa [#allocation6 + $0x1], 1 }
 0x47c   :  { %2845 = vsyncpa [#allocation4], 1 }
 0x47d   :  { %2847 = vsyncpa [#allocation4 + $0x1], 1 }

</bundles_post_ra>
